<compile_context>
chip_gen: v6e
topology: v6e:2x2x1
jax: 0.10.0
libtpu: 0.0.40
codegen_flags: <defaults>
</compile_context>

<pallas_src>
import jax
import jax.numpy as jnp
from jax.experimental import pallas as pl
from jax.experimental.pallas import tpu as pltpu


# ---------------------------------------------------------------------------
# Pallas kernel: one (image-block, Cout-tile) grid step.
# ---------------------------------------------------------------------------
def _repvgg_kernel(x_ref, w_ref, b_ref, o_ref, xpad_ref):
    # x_ref    : (nb, H, W, Cin)        bf16 unpadded input images
    # w_ref    : (9, Cin, tco)          bf16 reparameterized 3x3 weights (tap-major)
    # b_ref    : (1, tco)               f32 reparameterized bias
    # o_ref    : (nb, H*W, tco)         output tile (lane/sublane-dense)
    # xpad_ref : (nb, H+2, W+2, Cin)    bf16 VMEM scratch: zero-halo padded images
    nb, H, W, Cin = x_ref.shape
    tco = o_ref.shape[2]
    M = nb * H * W

    # The halo buffer depends only on the image block (grid axis 0), not on the
    # Cout tile (grid axis 1).
    # INVARIANT: the Cout axis MUST remain the innermost, sequential
    # ("arbitrary") grid axis.  If it is reordered or marked "parallel", steps
    # with program_id(1) > 0 would read an unbuilt / stale halo buffer.
    @pl.when(pl.program_id(1) == 0)
    def _build_halo():
        # Zero only the 4 halo strips; the interior is overwritten below.
        zrow = jnp.zeros((nb, 1, W + 2, Cin), xpad_ref.dtype)
        zcol = jnp.zeros((nb, H + 2, 1, Cin), xpad_ref.dtype)
        xpad_ref[:, 0:1, :, :] = zrow            # top halo row
        xpad_ref[:, H + 1:H + 2, :, :] = zrow    # bottom halo row
        xpad_ref[:, :, 0:1, :] = zcol            # left halo column
        xpad_ref[:, :, W + 1:W + 2, :] = zcol    # right halo column
        xpad_ref[:, 1:H + 1, 1:W + 1, :] = x_ref[...]

    # 3x3 conv = 9 shifted K=Cin MXU matmuls, accumulated in f32.
    acc = jnp.zeros((M, tco), jnp.float32)
    for tap in range(9):
        ky, kx = tap // 3, tap % 3
        patch = xpad_ref[:, ky:ky + H, kx:kx + W, :].reshape(M, Cin)
        acc = acc + jnp.dot(patch, w_ref[tap],
                            preferred_element_type=jnp.float32)

    # Bias + SiLU epilogue in f32 (v5e has no bf16 VPU/EUP).
    y = acc + b_ref[...]
    y = y * jax.nn.sigmoid(y)
    o_ref[...] = y.reshape(nb, H * W, tco).astype(o_ref.dtype)


# ---------------------------------------------------------------------------
# Wrapper
# ---------------------------------------------------------------------------
def repvgg_block(x, w_eff, b_eff, *, out_dtype=None):
    """x: (N, H, W, Cin) NHWC.  w_eff: (3, 3, Cin, Cout).  b_eff: (Cout,)."""
    N, H, W, Cin = x.shape
    Cout = w_eff.shape[-1]
    out_dtype = x.dtype if out_dtype is None else out_dtype

    # Cout tiling: 128 matches v5e's 128x128 MXU tiles and halves the resident
    # weight tile on v6e/v7x (v7x has only 64 MiB VMEM).  Non-multiple Cout
    # falls back to a single (lane-masked but correct) tile.
    tco = 128 if (Cout % 128 == 0) else Cout
    n_cout = Cout // tco

    # Multi-image blocking: amortize the weight-tile DMA over nb images and
    # fatten M = nb*H*W (MXU wants >=128/256 rows).  Keep the bf16 x block
    # within a modest budget so double-buffering still fits.
    x_img_bytes = H * W * Cin * 2  # bf16
    nb = 1
    for cand in range(1, N + 1):
        if N % cand == 0 and cand * x_img_bytes <= (4 << 20) and cand * H * W <= 4096:
            nb = cand

    # bf16 MXU inputs (cast AFTER re-parameterization); bias stays f32.
    x_bf = x.astype(jnp.bfloat16)
    w_taps = jnp.asarray(w_eff, jnp.float32).reshape(9, Cin, Cout).astype(jnp.bfloat16)
    b_2d = jnp.asarray(b_eff, jnp.float32).reshape(1, Cout)

    # VMEM budget: double-buffered blocks + halo scratch + f32 accumulator /
    # epilogue temporaries, with headroom, clamped below physical VMEM.
    out_itemsize = jnp.dtype(out_dtype).itemsize
    blk_bytes = (
        2 * (nb * H * W * Cin * 2)                 # x block (double-buffered)
        + 2 * (9 * Cin * tco * 2)                  # weight tile
        + 2 * (tco * 4)                            # bias tile
        + 2 * (nb * H * W * tco * out_itemsize)    # output tile
        + nb * (H + 2) * (W + 2) * Cin * 2         # halo scratch
        + 3 * (nb * H * W * tco * 4)               # f32 acc / epilogue temps
        + nb * H * W * Cin * 4                     # tap-slice temp
    )
    try:
        vmem_cap = pltpu.get_tpu_info().vmem_capacity_bytes
    except Exception:
        vmem_cap = 64 * 1024 * 1024                # conservative (v7x) fallback
    vmem_limit = min(max(int(blk_bytes * 1.5) + (8 << 20), 32 << 20),
                     int(vmem_cap * 0.875))

    grid_spec = pltpu.PrefetchScalarGridSpec(
        num_scalar_prefetch=0,
        grid=(N // nb, n_cout),                    # Cout innermost + "arbitrary":
        in_specs=[                                 # required by the halo-reuse guard.
            pl.BlockSpec((nb, H, W, Cin), lambda n, j: (n, 0, 0, 0)),
            pl.BlockSpec((9, Cin, tco), lambda n, j: (0, 0, j)),
            pl.BlockSpec((1, tco), lambda n, j: (0, j)),
        ],
        out_specs=pl.BlockSpec((nb, H * W, tco), lambda n, j: (n, 0, j)),
        scratch_shapes=[
            pltpu.VMEM((nb, H + 2, W + 2, Cin), jnp.bfloat16),
        ],
    )

    out_flat = pl.pallas_call(
        _repvgg_kernel,
        out_shape=jax.ShapeDtypeStruct((N, H * W, Cout), out_dtype),
        grid_spec=grid_spec,
        compiler_params=pltpu.CompilerParams(
            dimension_semantics=("parallel", "arbitrary"),
            vmem_limit_bytes=vmem_limit,
        ),
    )(x_bf, w_taps, b_2d)

    # Free, contiguous reshape back to NHWC.
    return out_flat.reshape(N, H, W, Cout)


# ---------------------------------------------------------------------------
# Plain-JAX parameter glue: eval-mode BN folding + RepVGG re-parameterization
# (mirrors RepVGGBlock.get_equivalent_kernel_bias).
# ---------------------------------------------------------------------------
def _fuse_conv_bn(w, gamma, beta, mean, var, eps=1e-5):
    """w: (KH, KW, Cin, Cout). Returns BN-folded (w_eff, b_eff)."""
    std = jnp.sqrt(var + eps)
    t = gamma / std                       # (Cout,)
    return w * t, beta - mean * t


def repvgg_equivalent_kernel_bias(w3_raw, bn3, w1_raw, bn1, bn_id=None, eps=1e-5):
    """Fold the three branches into a single 3x3 kernel + bias.

    w3_raw: (3, 3, Cin, Cout); w1_raw: (Cin, Cout);
    bn*: tuples (gamma, beta, running_mean, running_var);
    bn_id: identity-branch BN params or None (Cin != Cout or stride != 1).
    """
    Cin, Cout = w3_raw.shape[2], w3_raw.shape[3]
    w3_f, b3_f = _fuse_conv_bn(w3_raw, *bn3, eps=eps)
    w1_f, b1_f = _fuse_conv_bn(w1_raw.reshape(1, 1, Cin, Cout), *bn1, eps=eps)
    w_eff = w3_f + jnp.pad(w1_f, ((1, 1), (1, 1), (0, 0), (0, 0)))
    b_eff = b3_f + b1_f
    if bn_id is not None:
        gid, betaid, meanid, varid = bn_id
        t_id = gid / jnp.sqrt(varid + eps)                      # (Cin,), Cin == Cout
        id_k = jnp.zeros((3, 3, Cin, Cout), w3_raw.dtype).at[1, 1].set(jnp.diag(t_id))
        w_eff = w_eff + id_k
        b_eff = b_eff + (betaid - meanid * t_id)
    return w_eff, b_eff


# ---------------------------------------------------------------------------
# Pure-JAX reference: the training-architecture three-branch forward (eval BN),
# i.e. SiLU( conv3x3BN(x) + conv1x1BN(x) + idBN(x) ).
# ---------------------------------------------------------------------------
def _reference(x, w3_f, b3_f, w1_f, b1_f, id_scale, id_bias):
    dn = jax.lax.conv_dimension_numbers(x.shape, w3_f.shape, ("NHWC", "HWIO", "NHWC"))
    y3 = jax.lax.conv_general_dilated(x, w3_f, (1, 1), ((1, 1), (1, 1)),
                                      dimension_numbers=dn,
                                      precision=jax.lax.Precision.HIGHEST) + b3_f
    y1 = jax.lax.conv_general_dilated(x, w1_f, (1, 1), ((0, 0), (0, 0)),
                                      dimension_numbers=dn,
                                      precision=jax.lax.Precision.HIGHEST) + b1_f
    yid = x * id_scale + id_bias
    y = y3 + y1 + yid
    return y * jax.nn.sigmoid(y)


if __name__ == "__main__":
    # in_channels == out_channels, stride 1 -> identity branch present.
    N, C, H, W = 2, 4, 16, 16
    Cin = Cout = C

    key = jax.random.PRNGKey(0)
    ks = jax.random.split(key, 12)

    x = jax.random.normal(ks[0], (N, H, W, Cin), jnp.float32)

    # rbr_dense: conv3x3 (no bias) + BN
    w3_raw = jax.random.normal(ks[1], (3, 3, Cin, Cout), jnp.float32) * 0.1
    g3 = jax.random.uniform(ks[2], (Cout,), jnp.float32, 0.5, 1.5)
    beta3 = jax.random.normal(ks[3], (Cout,), jnp.float32) * 0.1
    mean3 = jax.random.normal(ks[4], (Cout,), jnp.float32) * 0.1
    var3 = jax.random.uniform(ks[5], (Cout,), jnp.float32, 0.5, 1.5)

    # rbr_1x1: conv1x1 (no bias) + BN
    w1_raw = jax.random.normal(ks[6], (Cin, Cout), jnp.float32) * 0.1
    g1 = jax.random.uniform(ks[7], (Cout,), jnp.float32, 0.5, 1.5)
    beta1 = jax.random.normal(ks[8], (Cout,), jnp.float32) * 0.1
    mean1 = jax.random.normal(ks[9], (Cout,), jnp.float32) * 0.1
    var1 = jax.random.uniform(ks[10], (Cout,), jnp.float32, 0.5, 1.5)

    # rbr_identity: BatchNorm2d(in_channels)
    kid = jax.random.split(ks[11], 4)
    gid = jax.random.uniform(kid[0], (Cin,), jnp.float32, 0.5, 1.5)
    betaid = jax.random.normal(kid[1], (Cin,), jnp.float32) * 0.1
    meanid = jax.random.normal(kid[2], (Cin,), jnp.float32) * 0.1
    varid = jax.random.uniform(kid[3], (Cin,), jnp.float32, 0.5, 1.5)

    # Pallas path: single re-parameterized 3x3 conv + bias (bf16 MXU, f32 epilogue).
    bn_id = (gid, betaid, meanid, varid) if (Cin == Cout) else None
    w_eff, b_eff = repvgg_equivalent_kernel_bias(
        w3_raw, (g3, beta3, mean3, var3), w1_raw, (g1, beta1, mean1, var1), bn_id)

    out = repvgg_block(x, w_eff, b_eff)
    out = jax.block_until_ready(out)
    assert out.shape == (N, H, W, Cout)

    # (1) Tight check: f32 conv on the exact bf16-quantized operands the kernel
    #     consumes -> validates the Pallas kernel numerics.
    xq = x.astype(jnp.bfloat16).astype(jnp.float32)
    wq = jnp.asarray(w_eff, jnp.float32).astype(jnp.bfloat16).astype(jnp.float32)
    dn = jax.lax.conv_dimension_numbers(xq.shape, wq.shape, ("NHWC", "HWIO", "NHWC"))
    y = jax.lax.conv_general_dilated(xq, wq, (1, 1), ((1, 1), (1, 1)),
                                     dimension_numbers=dn,
                                     precision=jax.lax.Precision.HIGHEST) + b_eff
    ref_tight = y * jax.nn.sigmoid(y)
    assert jnp.allclose(out, ref_tight, rtol=1e-3, atol=1e-3), "mismatch vs reparam reference"

    # (2) Loose check: original three-branch eval-mode forward in f32 (relaxed
    #     tolerance for the bf16 MXU inputs) -> validates module semantics.
    w3_f, b3_f = _fuse_conv_bn(w3_raw, g3, beta3, mean3, var3)
    w1_f, b1_f = _fuse_conv_bn(w1_raw.reshape(1, 1, Cin, Cout), g1, beta1, mean1, var1)
    id_scale = gid / jnp.sqrt(varid + 1e-5)
    id_bias = betaid - meanid * id_scale
    ref = _reference(x, w3_f, b3_f, w1_f, b1_f, id_scale, id_bias)
    assert jnp.allclose(out, ref, rtol=1e-1, atol=1e-1), "mismatch vs three-branch reference"

    print("KERNEL_OK")
</pallas_src>

<mosaic_0001>
module attributes {stable_mosaic.version = 11 : i64} {
  func.func @_repvgg_kernel(%arg0: i32, %arg1: i32, %arg2: memref<2x16x16x4xbf16, #tpu.memory_space<vmem>>, %arg3: memref<9x4x4xbf16, #tpu.memory_space<vmem>>, %arg4: memref<1x4xf32, #tpu.memory_space<vmem>>, %arg5: memref<2x256x4xf32, #tpu.memory_space<vmem>>, %arg6: memref<2x18x18x4xbf16, #tpu.memory_space<vmem>>) attributes {dimension_semantics = [#tpu.dimension_semantics<parallel>, #tpu.dimension_semantics<arbitrary>], iteration_bounds = array<i64: 1, 1>, scalar_prefetch = 0 : i64, scratch_operands = 1 : i64, tpu.core_type = #tpu.core_type<tc>, window_params = [{transform_indices = @transform_0, window_bounds = array<i64: 2, 16, 16, 4>}, {transform_indices = @transform_1, window_bounds = array<i64: 9, 4, 4>}, {transform_indices = @transform_2, window_bounds = array<i64: 1, 4>}, {transform_indices = @transform_3, window_bounds = array<i64: 2, 256, 4>}]} {
    %c0_i32 = arith.constant 0 : i32
    %0 = arith.cmpi eq, %arg1, %c0_i32 : i32
    %1 = arith.extui %0 : i1 to i32
    %c0_i32_0 = arith.constant 0 : i32
    %2 = arith.cmpi ne, %1, %c0_i32_0 : i32
    scf.if %2 {
      %cst_70 = arith.constant 0.000000e+00 : bf16
      %69 = vector.broadcast %cst_70 : bf16 to vector<2x1x18x4xbf16>
      %cst_71 = arith.constant 0.000000e+00 : bf16
      %70 = vector.broadcast %cst_71 : bf16 to vector<2x18x1x4xbf16>
      %c0_72 = arith.constant 0 : index
      %c0_73 = arith.constant 0 : index
      %c0_74 = arith.constant 0 : index
      %c0_75 = arith.constant 0 : index
      %71 = vector.load %arg6[%c0_72, %c0_73, %c0_74, %c0_75] : memref<2x18x18x4xbf16, #tpu.memory_space<vmem>>, vector<2x1x18x4xbf16>
      tpu.vector_store %arg6[%c0_72, %c0_73, %c0_74, %c0_75], %69 {strides = array<i32>} : memref<2x18x18x4xbf16, #tpu.memory_space<vmem>>, vector<2x1x18x4xbf16>,
      %c0_76 = arith.constant 0 : index
      %c17 = arith.constant 17 : index
      %c0_77 = arith.constant 0 : index
      %c0_78 = arith.constant 0 : index
      %72 = vector.load %arg6[%c0_76, %c17, %c0_77, %c0_78] : memref<2x18x18x4xbf16, #tpu.memory_space<vmem>>, vector<2x1x18x4xbf16>
      tpu.vector_store %arg6[%c0_76, %c17, %c0_77, %c0_78], %69 {strides = array<i32>} : memref<2x18x18x4xbf16, #tpu.memory_space<vmem>>, vector<2x1x18x4xbf16>,
      %c0_79 = arith.constant 0 : index
      %c0_80 = arith.constant 0 : index
      %c0_81 = arith.constant 0 : index
      %c0_82 = arith.constant 0 : index
      %73 = vector.load %arg6[%c0_79, %c0_80, %c0_81, %c0_82] : memref<2x18x18x4xbf16, #tpu.memory_space<vmem>>, vector<2x18x1x4xbf16>
      tpu.vector_store %arg6[%c0_79, %c0_80, %c0_81, %c0_82], %70 {strides = array<i32>} : memref<2x18x18x4xbf16, #tpu.memory_space<vmem>>, vector<2x18x1x4xbf16>,
      %c0_83 = arith.constant 0 : index
      %c0_84 = arith.constant 0 : index
      %c17_85 = arith.constant 17 : index
      %c0_86 = arith.constant 0 : index
      %74 = vector.load %arg6[%c0_83, %c0_84, %c17_85, %c0_86] : memref<2x18x18x4xbf16, #tpu.memory_space<vmem>>, vector<2x18x1x4xbf16>
      tpu.vector_store %arg6[%c0_83, %c0_84, %c17_85, %c0_86], %70 {strides = array<i32>} : memref<2x18x18x4xbf16, #tpu.memory_space<vmem>>, vector<2x18x1x4xbf16>,
      %c0_87 = arith.constant 0 : index
      %c0_88 = arith.constant 0 : index
      %c0_89 = arith.constant 0 : index
      %c0_90 = arith.constant 0 : index
      %75 = vector.load %arg2[%c0_87, %c0_88, %c0_89, %c0_90] : memref<2x16x16x4xbf16, #tpu.memory_space<vmem>>, vector<2x16x16x4xbf16>
      %c0_91 = arith.constant 0 : index
      %c1_92 = arith.constant 1 : index
      %c1_93 = arith.constant 1 : index
      %c0_94 = arith.constant 0 : index
      %76 = vector.load %arg6[%c0_91, %c1_92, %c1_93, %c0_94] : memref<2x18x18x4xbf16, #tpu.memory_space<vmem>>, vector<2x16x16x4xbf16>
      tpu.vector_store %arg6[%c0_91, %c1_92, %c1_93, %c0_94], %75 {strides = array<i32>} : memref<2x18x18x4xbf16, #tpu.memory_space<vmem>>, vector<2x16x16x4xbf16>,
    } else {
    }
    %cst = arith.constant 0.000000e+00 : f32
    %3 = vector.broadcast %cst : f32 to vector<512x4xf32>
    %c0 = arith.constant 0 : index
    %c0_1 = arith.constant 0 : index
    %c0_2 = arith.constant 0 : index
    %c0_3 = arith.constant 0 : index
    %4 = vector.load %arg6[%c0, %c0_1, %c0_2, %c0_3] : memref<2x18x18x4xbf16, #tpu.memory_space<vmem>>, vector<2x16x16x4xbf16>
    %5 = vector.shape_cast %4 : vector<2x16x16x4xbf16> to vector<512x4xbf16>
    %c0_4 = arith.constant 0 : index
    %c0_5 = arith.constant 0 : index
    %c0_6 = arith.constant 0 : index
    %6 = vector.load %arg3[%c0_4, %c0_5, %c0_6] : memref<9x4x4xbf16, #tpu.memory_space<vmem>>, vector<1x4x4xbf16>
    %7 = vector.shape_cast %6 : vector<1x4x4xbf16> to vector<4x4xbf16>
    %cst_7 = arith.constant dense<0.000000e+00> : vector<512x4xf32>
    %8 = tpu.matmul %5, %7, %cst_7 {dimension_numbers = #tpu.dot_dimension_numbers<[1], [0], [0], [1], [0, 0, 1, 1], [], []>} : vector<512x4xbf16>, vector<4x4xbf16>, vector<512x4xf32> -> vector<512x4xf32>
    %9 = arith.addf %3, %8 : vector<512x4xf32>
    %c0_8 = arith.constant 0 : index
    %c0_9 = arith.constant 0 : index
    %c1 = arith.constant 1 : index
    %c0_10 = arith.constant 0 : index
    %10 = vector.load %arg6[%c0_8, %c0_9, %c1, %c0_10] : memref<2x18x18x4xbf16, #tpu.memory_space<vmem>>, vector<2x16x16x4xbf16>
    %11 = vector.shape_cast %10 : vector<2x16x16x4xbf16> to vector<512x4xbf16>
    %c1_11 = arith.constant 1 : index
    %c0_12 = arith.constant 0 : index
    %c0_13 = arith.constant 0 : index
    %12 = vector.load %arg3[%c1_11, %c0_12, %c0_13] : memref<9x4x4xbf16, #tpu.memory_space<vmem>>, vector<1x4x4xbf16>
    %13 = vector.shape_cast %12 : vector<1x4x4xbf16> to vector<4x4xbf16>
    %cst_14 = arith.constant dense<0.000000e+00> : vector<512x4xf32>
    %14 = tpu.matmul %11, %13, %cst_14 {dimension_numbers = #tpu.dot_dimension_numbers<[1], [0], [0], [1], [0, 0, 1, 1], [], []>} : vector<512x4xbf16>, vector<4x4xbf16>, vector<512x4xf32> -> vector<512x4xf32>
    %15 = arith.addf %9, %14 : vector<512x4xf32>
    %c0_15 = arith.constant 0 : index
    %c0_16 = arith.constant 0 : index
    %c2 = arith.constant 2 : index
    %c0_17 = arith.constant 0 : index
    %16 = vector.load %arg6[%c0_15, %c0_16, %c2, %c0_17] : memref<2x18x18x4xbf16, #tpu.memory_space<vmem>>, vector<2x16x16x4xbf16>
    %17 = vector.shape_cast %16 : vector<2x16x16x4xbf16> to vector<512x4xbf16>
    %c2_18 = arith.constant 2 : index
    %c0_19 = arith.constant 0 : index
    %c0_20 = arith.constant 0 : index
    %18 = vector.load %arg3[%c2_18, %c0_19, %c0_20] : memref<9x4x4xbf16, #tpu.memory_space<vmem>>, vector<1x4x4xbf16>
    %19 = vector.shape_cast %18 : vector<1x4x4xbf16> to vector<4x4xbf16>
    %cst_21 = arith.constant dense<0.000000e+00> : vector<512x4xf32>
    %20 = tpu.matmul %17, %19, %cst_21 {dimension_numbers = #tpu.dot_dimension_numbers<[1], [0], [0], [1], [0, 0, 1, 1], [], []>} : vector<512x4xbf16>, vector<4x4xbf16>, vector<512x4xf32> -> vector<512x4xf32>
    %21 = arith.addf %15, %20 : vector<512x4xf32>
    %c0_22 = arith.constant 0 : index
    %c1_23 = arith.constant 1 : index
    %c0_24 = arith.constant 0 : index
    %c0_25 = arith.constant 0 : index
    %22 = vector.load %arg6[%c0_22, %c1_23, %c0_24, %c0_25] : memref<2x18x18x4xbf16, #tpu.memory_space<vmem>>, vector<2x16x16x4xbf16>
    %23 = vector.shape_cast %22 : vector<2x16x16x4xbf16> to vector<512x4xbf16>
    %c3 = arith.constant 3 : index
    %c0_26 = arith.constant 0 : index
    %c0_27 = arith.constant 0 : index
    %24 = vector.load %arg3[%c3, %c0_26, %c0_27] : memref<9x4x4xbf16, #tpu.memory_space<vmem>>, vector<1x4x4xbf16>
    %25 = vector.shape_cast %24 : vector<1x4x4xbf16> to vector<4x4xbf16>
    %cst_28 = arith.constant dense<0.000000e+00> : vector<512x4xf32>
    %26 = tpu.matmul %23, %25, %cst_28 {dimension_numbers = #tpu.dot_dimension_numbers<[1], [0], [0], [1], [0, 0, 1, 1], [], []>} : vector<512x4xbf16>, vector<4x4xbf16>, vector<512x4xf32> -> vector<512x4xf32>
    %27 = arith.addf %21, %26 : vector<512x4xf32>
    %c0_29 = arith.constant 0 : index
    %c1_30 = arith.constant 1 : index
    %c1_31 = arith.constant 1 : index
    %c0_32 = arith.constant 0 : index
    %28 = vector.load %arg6[%c0_29, %c1_30, %c1_31, %c0_32] : memref<2x18x18x4xbf16, #tpu.memory_space<vmem>>, vector<2x16x16x4xbf16>
    %29 = vector.shape_cast %28 : vector<2x16x16x4xbf16> to vector<512x4xbf16>
    %c4 = arith.constant 4 : index
    %c0_33 = arith.constant 0 : index
    %c0_34 = arith.constant 0 : index
    %30 = vector.load %arg3[%c4, %c0_33, %c0_34] : memref<9x4x4xbf16, #tpu.memory_space<vmem>>, vector<1x4x4xbf16>
    %31 = vector.shape_cast %30 : vector<1x4x4xbf16> to vector<4x4xbf16>
    %cst_35 = arith.constant dense<0.000000e+00> : vector<512x4xf32>
    %32 = tpu.matmul %29, %31, %cst_35 {dimension_numbers = #tpu.dot_dimension_numbers<[1], [0], [0], [1], [0, 0, 1, 1], [], []>} : vector<512x4xbf16>, vector<4x4xbf16>, vector<512x4xf32> -> vector<512x4xf32>
    %33 = arith.addf %27, %32 : vector<512x4xf32>
    %c0_36 = arith.constant 0 : index
    %c1_37 = arith.constant 1 : index
    %c2_38 = arith.constant 2 : index
    %c0_39 = arith.constant 0 : index
    %34 = vector.load %arg6[%c0_36, %c1_37, %c2_38, %c0_39] : memref<2x18x18x4xbf16, #tpu.memory_space<vmem>>, vector<2x16x16x4xbf16>
    %35 = vector.shape_cast %34 : vector<2x16x16x4xbf16> to vector<512x4xbf16>
    %c5 = arith.constant 5 : index
    %c0_40 = arith.constant 0 : index
    %c0_41 = arith.constant 0 : index
    %36 = vector.load %arg3[%c5, %c0_40, %c0_41] : memref<9x4x4xbf16, #tpu.memory_space<vmem>>, vector<1x4x4xbf16>
    %37 = vector.shape_cast %36 : vector<1x4x4xbf16> to vector<4x4xbf16>
    %cst_42 = arith.constant dense<0.000000e+00> : vector<512x4xf32>
    %38 = tpu.matmul %35, %37, %cst_42 {dimension_numbers = #tpu.dot_dimension_numbers<[1], [0], [0], [1], [0, 0, 1, 1], [], []>} : vector<512x4xbf16>, vector<4x4xbf16>, vector<512x4xf32> -> vector<512x4xf32>
    %39 = arith.addf %33, %38 : vector<512x4xf32>
    %c0_43 = arith.constant 0 : index
    %c2_44 = arith.constant 2 : index
    %c0_45 = arith.constant 0 : index
    %c0_46 = arith.constant 0 : index
    %40 = vector.load %arg6[%c0_43, %c2_44, %c0_45, %c0_46] : memref<2x18x18x4xbf16, #tpu.memory_space<vmem>>, vector<2x16x16x4xbf16>
    %41 = vector.shape_cast %40 : vector<2x16x16x4xbf16> to vector<512x4xbf16>
    %c6 = arith.constant 6 : index
    %c0_47 = arith.constant 0 : index
    %c0_48 = arith.constant 0 : index
    %42 = vector.load %arg3[%c6, %c0_47, %c0_48] : memref<9x4x4xbf16, #tpu.memory_space<vmem>>, vector<1x4x4xbf16>
    %43 = vector.shape_cast %42 : vector<1x4x4xbf16> to vector<4x4xbf16>
    %cst_49 = arith.constant dense<0.000000e+00> : vector<512x4xf32>
    %44 = tpu.matmul %41, %43, %cst_49 {dimension_numbers = #tpu.dot_dimension_numbers<[1], [0], [0], [1], [0, 0, 1, 1], [], []>} : vector<512x4xbf16>, vector<4x4xbf16>, vector<512x4xf32> -> vector<512x4xf32>
    %45 = arith.addf %39, %44 : vector<512x4xf32>
    %c0_50 = arith.constant 0 : index
    %c2_51 = arith.constant 2 : index
    %c1_52 = arith.constant 1 : index
    %c0_53 = arith.constant 0 : index
    %46 = vector.load %arg6[%c0_50, %c2_51, %c1_52, %c0_53] : memref<2x18x18x4xbf16, #tpu.memory_space<vmem>>, vector<2x16x16x4xbf16>
    %47 = vector.shape_cast %46 : vector<2x16x16x4xbf16> to vector<512x4xbf16>
    %c7 = arith.constant 7 : index
    %c0_54 = arith.constant 0 : index
    %c0_55 = arith.constant 0 : index
    %48 = vector.load %arg3[%c7, %c0_54, %c0_55] : memref<9x4x4xbf16, #tpu.memory_space<vmem>>, vector<1x4x4xbf16>
    %49 = vector.shape_cast %48 : vector<1x4x4xbf16> to vector<4x4xbf16>
    %cst_56 = arith.constant dense<0.000000e+00> : vector<512x4xf32>
    %50 = tpu.matmul %47, %49, %cst_56 {dimension_numbers = #tpu.dot_dimension_numbers<[1], [0], [0], [1], [0, 0, 1, 1], [], []>} : vector<512x4xbf16>, vector<4x4xbf16>, vector<512x4xf32> -> vector<512x4xf32>
    %51 = arith.addf %45, %50 : vector<512x4xf32>
    %c0_57 = arith.constant 0 : index
    %c2_58 = arith.constant 2 : index
    %c2_59 = arith.constant 2 : index
    %c0_60 = arith.constant 0 : index
    %52 = vector.load %arg6[%c0_57, %c2_58, %c2_59, %c0_60] : memref<2x18x18x4xbf16, #tpu.memory_space<vmem>>, vector<2x16x16x4xbf16>
    %53 = vector.shape_cast %52 : vector<2x16x16x4xbf16> to vector<512x4xbf16>
    %c8 = arith.constant 8 : index
    %c0_61 = arith.constant 0 : index
    %c0_62 = arith.constant 0 : index
    %54 = vector.load %arg3[%c8, %c0_61, %c0_62] : memref<9x4x4xbf16, #tpu.memory_space<vmem>>, vector<1x4x4xbf16>
    %55 = vector.shape_cast %54 : vector<1x4x4xbf16> to vector<4x4xbf16>
    %cst_63 = arith.constant dense<0.000000e+00> : vector<512x4xf32>
    %56 = tpu.matmul %53, %55, %cst_63 {dimension_numbers = #tpu.dot_dimension_numbers<[1], [0], [0], [1], [0, 0, 1, 1], [], []>} : vector<512x4xbf16>, vector<4x4xbf16>, vector<512x4xf32> -> vector<512x4xf32>
    %57 = arith.addf %51, %56 : vector<512x4xf32>
    %c0_64 = arith.constant 0 : index
    %c0_65 = arith.constant 0 : index
    %58 = vector.load %arg4[%c0_64, %c0_65] : memref<1x4xf32, #tpu.memory_space<vmem>>, vector<1x4xf32>
    %59 = vector.broadcast %58 : vector<1x4xf32> to vector<512x4xf32>
    %60 = arith.addf %57, %59 : vector<512x4xf32>
    %61 = arith.negf %60 : vector<512x4xf32>
    %62 = math.exp %61 : vector<512x4xf32>
    %cst_66 = arith.constant 1.000000e+00 : f32
    %63 = vector.broadcast %cst_66 : f32 to vector<512x4xf32>
    %64 = arith.addf %63, %62 : vector<512x4xf32>
    %65 = arith.divf %63, %64 : vector<512x4xf32>
    %66 = arith.mulf %60, %65 : vector<512x4xf32>
    %67 = vector.shape_cast %66 : vector<512x4xf32> to vector<2x256x4xf32>
    %c0_67 = arith.constant 0 : index
    %c0_68 = arith.constant 0 : index
    %c0_69 = arith.constant 0 : index
    %68 = vector.load %arg5[%c0_67, %c0_68, %c0_69] : memref<2x256x4xf32, #tpu.memory_space<vmem>>, vector<2x256x4xf32>
    tpu.vector_store %arg5[%c0_67, %c0_68, %c0_69], %67 {strides = array<i32>} : memref<2x256x4xf32, #tpu.memory_space<vmem>>, vector<2x256x4xf32>,
    return
  }
  func.func @transform_0(%arg0: i32, %arg1: i32) -> (i32, i32, i32, i32) {
    %c0_i32 = arith.constant 0 : i32
    %c0_i32_0 = arith.constant 0 : i32
    %c0_i32_1 = arith.constant 0 : i32
    %c0_i32_2 = arith.constant 0 : i32
    return %arg0, %c0_i32, %c0_i32_0, %c0_i32_1 : i32, i32, i32, i32
  }
  func.func @transform_1(%arg0: i32, %arg1: i32) -> (i32, i32, i32) {
    %c0_i32 = arith.constant 0 : i32
    %c0_i32_0 = arith.constant 0 : i32
    %c0_i32_1 = arith.constant 0 : i32
    return %c0_i32, %c0_i32_0, %arg1 : i32, i32, i32
  }
  func.func @transform_2(%arg0: i32, %arg1: i32) -> (i32, i32) {
    %c0_i32 = arith.constant 0 : i32
    %c0_i32_0 = arith.constant 0 : i32
    return %c0_i32, %arg1 : i32, i32
  }
  func.func @transform_3(%arg0: i32, %arg1: i32) -> (i32, i32, i32) {
    %c0_i32 = arith.constant 0 : i32
    %c0_i32_0 = arith.constant 0 : i32
    return %arg0, %c0_i32, %arg1 : i32, i32, i32
  }
}

</mosaic_0001>

<bundles_post_ra>
// kernel: tpu_custom_call.1
= control target key start
LH: loop header
LB: loop body
LE: loop exit
PB: predicated region body
PF: predicated region fallthrough
CT: control target
= control target key end

     0   :  { %vm2251_vm0 = vcmask 1041408   ;;  %vm19_vm1 = vcmask 27648   ;;  %vm22_vm2 = vcmask 24576   ;;  %v40_v0 = vld [vmem:[#allocation2 + $0xc] sm:$0x1]  ;;  %v12647_v2 = vmov 0   ;;  %s17987_s1 = inlined_call_operand.vmem [shape: bf16[9,4,4], index: 1, kind: input, shape index: {}]   ;;  %s17988_s0 = inlined_call_operand.vmem [shape: bf16[2,16,16,4], index: 0, kind: input, shape index: {}]   ;;  %s17989_s2 = inlined_call_operand.vmem [shape: f32[1,4], index: 2, kind: input, shape index: {}]   ;;  %s17990_s3 = inlined_call_operand.vmem [shape: f32[2,256,4], index: 3, kind: output, shape index: {}]  }
   0x1   :  { %v10542_v1 = vld [vmem:[%s17987_s1 + $0x2] sm:$0x3]  ;;  %20 = vst.msk [vmem:[#allocation2] sm:$0xf] %vm19_vm1, %v12647_v2  ;;  %21 = vst.msk [vmem:[#allocation2 + $0x4] sm:$0xf] %vm19_vm1, %v12647_v2 }
   0x2   :  { %23 = vst.msk [vmem:[#allocation2 + $0x8] sm:$0x1] %vm22_vm2, %v12647_v2  ;;  %vm35_vm3 = vsmask.f32 256  ;;  %vm145_vm4 = vsmask.f32 7938  ;;  %12181 = vmatprep.subr.msk.bf16.mxu1 %vm2251_vm0, %v10542_v1  ;;  %12180 = vmatprep.subr.msk.bf16.mxu0 %vm2251_vm0, %v10542_v1 }
   0x3   :  { %24 = vst.msk [vmem:[#allocation2 + $0xd8] sm:$0xf] %vm19_vm1, %v12647_v2  ;;  %25 = vst.msk [vmem:[#allocation2 + $0xdc] sm:$0xf] %vm19_vm1, %v12647_v2  ;;  %v2253_v3 = vsel %vm2251_vm0, %v10542_v1, 0  ;;  %v18083_v4 = vmov 0 }
   0x4   :  { %26 = vst.msk [vmem:[#allocation2 + $0xe0] sm:$0x1] %vm22_vm2, %v12647_v2  ;;  %30 = vst.msk [vmem:[#allocation2 + $0xd4] sm:$0x1] %vm22_vm2, %v12647_v2  ;;  %12179 = vmatpush3.bf16.msra.mxu1 %v2253_v3  ;;  %11585 = vmatpush3.bf16.msra.mxu0 %v2253_v3  ;;  %v18086_v5 = vmov 0  ;;  %v18089_v20 = vmov 0 }
   0x5   :  { %28 = vst.msk [vmem:[#allocation2 + $0xcc] sm:$0xf] %vm19_vm1, %v12647_v2  ;;  %29 = vst.msk [vmem:[#allocation2 + $0xd0] sm:$0xf] %vm19_vm1, %v12647_v2  ;;  %v12701_v6 = vld [vmem:[%s17987_s1] sm:$0x3] }
   0x6   :  { %31 = vst.msk [vmem:[#allocation2 + $0x1a4] sm:$0xf] %vm19_vm1, %v12647_v2  ;;  %32 = vst.msk [vmem:[#allocation2 + $0x1a8] sm:$0xf] %vm19_vm1, %v12647_v2  ;;  %v150_v8 = vld [vmem:[#allocation2 + $0x14] sm:$0x1]  ;;  %12182 = vmatprep.subr.msk.bf16.mxu1 %vm2251_vm0, %v12701_v6 }
   0x7   :  { %33 = vst.msk [vmem:[#allocation2 + $0x1ac] sm:$0x1] %vm22_vm2, %v12647_v2  ;;  %vm12688_vm5 = vmand %vm22_vm2, %vm35_vm3  ;;  %v255_v10 = vld [vmem:[%s17988_s0] sm:$0xf]  ;;  %v256_v11 = vld [vmem:[%s17988_s0 + $0x4] sm:$0xf] }
   0x8   :  { %v18084_v4 = vsel %vm12688_vm5, 4294967295, %v18083_v4  ;;  %vm12694_vm6 = vmand %vm22_vm2, %vm145_vm4  ;;  %v41_v7 = vsel %vm12688_vm5, 0, %v40_v0  ;;  %vm319_vm7 = vsmask.f32 4368  ;;  %v322_v12 = vshrl.u32 %v255_v10, 16 }
   0x9   :  { %18085 = vst [vmem:[#allocation3_spill] sm:$0xff] %v18084_v4  ;;  %v18087_v5 = vsel %vm12694_vm6, 4294967295, %v18086_v5  ;;  %42 = vst [vmem:[#allocation2 + $0xc] sm:$0x1] %v41_v7  ;;  %v151_v9 = vsel %vm12694_vm6, 0, %v150_v8  ;;  %v330_v13 = vshrl.u32 %v256_v11, 16 }
   0xa   :  { %18088 = vst [vmem:[#allocation4_spill] sm:$0xff] %v18087_v5  ;;  %152 = vst [vmem:[#allocation2 + $0x14] sm:$0x1] %v151_v9  ;;  %v325_v14 = vshll.u32 %v255_v10, 16  ;;  %v333_v15 = vshll.u32 %v256_v11, 16  ;;  %v324_v18 = vrot.slane %v322_v12, 7 }
   0xb   :  { %v94_v16 = vld [vmem:[#allocation2 + $0xe4] sm:$0x1]  ;;  %v204_v17 = vld [vmem:[#allocation2 + $0xec] sm:$0x1]  ;;  %v332_v19 = vrot.slane %v330_v13, 7  ;;  %vm12717_vm8 = vmand %vm19_vm1, %vm145_vm4  ;;  %v18092_v32 = vmov 0 }
   0xc   :  { %v18090_v20 = vsel %vm12717_vm8, 4294967295, %v18089_v20  ;;  %v95_v21 = vsel %vm12688_vm5, 0, %v94_v16  ;;  %v205_v22 = vsel %vm12694_vm6, 0, %v204_v17  ;;  %v37_v23 = vld [vmem:[#allocation2] sm:$0x1]  ;;  %vm12734_vm10 = vmor %vm35_vm3, %vm319_vm7  ;;  %v327_v36 = vor.u32 %v325_v14, %v324_v18 }
   0xd   :  { %18091 = vst [vmem:[#allocation5_spill] sm:$0xff] %v18090_v20  ;;  %v147_v24 = vld [vmem:[#allocation2 + $0x8] sm:$0x1]  ;;  %v1189_v25 = vld [vmem:[#allocation2 + $0x4] sm:$0xf]  ;;  %v38_v27 = vsel %vm12688_vm5, 0, %v37_v23  ;;  %v335_v38 = vor.u32 %v333_v15, %v332_v19 }
   0xe   :  { %vm1285_vm9 = vsmask.f32 3328  ;;  %96 = vst [vmem:[#allocation2 + $0xe4] sm:$0x1] %v95_v21  ;;  %206 = vst [vmem:[#allocation2 + $0xec] sm:$0x1] %v205_v22 }
   0xf   :  { %v287_v26 = vld [vmem:[%s17988_s0 + $0x80] sm:$0xf]  ;;  %v148_v28 = vsel %vm12694_vm6, 0, %v147_v24  ;;  %v1298_v29 = vshll.u32 %v1189_v25, 16  ;;  %v1302_v30 = vshrl.u32 %v1189_v25, 16  ;;  %v18093_v32 = vsel %vm12734_vm10, 4294967295, %v18092_v32 }
  0x10   :  { %v91_v31 = vld [vmem:[#allocation2 + $0xd8] sm:$0x1]  ;;  %18094 = vst [vmem:[#allocation6_spill] sm:$0xff] %v18093_v32  ;;  %39 = vst [vmem:[#allocation2] sm:$0x1] %v38_v27  ;;  %v328_v37 = vrot.slane %v324_v18, 4 }
  0x11   :  { %149 = vst [vmem:[#allocation2 + $0x8] sm:$0x1] %v148_v28  ;;  %v92_v33 = vsel %vm12688_vm5, 0, %v91_v31  ;;  %v201_v34 = vld [vmem:[#allocation2 + $0xe0] sm:$0x1]  ;;  %v12740_v39 = vrot.slane %v1298_v29, 5 }
  0x12   :  { %v1221_v35 = vld [vmem:[#allocation2 + $0xdc] sm:$0xf]  ;;  %v1304_v40 = vrot.slane %v1302_v30, 4  ;;  %93 = vst [vmem:[#allocation2 + $0xd8] sm:$0x1] %v92_v33  ;;  %v202_v41 = vsel %vm12694_vm6, 0, %v201_v34  ;;  %v336_v45 = vsel %vm12734_vm10, %v328_v37, %v335_v38 }
  0x13   :  { %v1682_v42 = vshll.u32 %v1221_v35, 16  ;;  %v964_v43 = vld [vmem:[#allocation2 + $0xc] sm:$0xf]  ;;  %203 = vst [vmem:[#allocation2 + $0xe0] sm:$0x1] %v202_v41  ;;  %v1686_v44 = vshrl.u32 %v1221_v35, 16 }
  0x14   :  { %v337_v46 = vrot.slane %v332_v19, 4  ;;  %v965_v47 = vsel %vm12717_vm8, %v327_v36, %v964_v43  ;;  %v968_v48 = vld [vmem:[#allocation2 + $0x14] sm:$0x1]  ;;  %v288_v49 = vld [vmem:[%s17988_s0 + $0x84] sm:$0xf]  ;;  %v1305_v50 = vor.u32 %v1304_v40, %v12740_v39  ;;  %v594_v52 = vshrl.u32 %v287_v26, 16 }
  0x15   :  { %v12752_v51 = vrot.slane %v1682_v42, 5  ;;  %966 = vst [vmem:[#allocation2 + $0xc] sm:$0xf] %v965_v47  ;;  %967 = vst.msk [vmem:[#allocation2 + $0x10] sm:$0xf] %vm19_vm1, %v336_v45  ;;  %v597_v53 = vshll.u32 %v287_v26, 16 }
  0x16   :  { %v10703_v54 = vld [vmem:[%s17987_s1 + $0x4] sm:$0x3]  ;;  %vm1286_vm11 = vsmask.f32 7440  ;;  %v1688_v55 = vrot.slane %v1686_v44, 4  ;;  %v969_v56 = vsel %vm12688_vm5, %v337_v46, %v968_v48  ;;  %v602_v57 = vshrl.u32 %v288_v49, 16 }
  0x17   :  { %12183 = vmatprep.subr.msk.bf16.mxu0 %vm2251_vm0, %v10703_v54  ;;  %v43_v58 = vld [vmem:[#allocation2 + $0x18] sm:$0x1]  ;;  %v12761_v59 = vrot.slane %v1305_v50, 4  ;;  %970 = vst [vmem:[#allocation2 + $0x14] sm:$0x1] %v969_v56  ;;  %v12763_v60 = vrot.slane %v594_v52, 7  ;;  %vm12789_vm13 = vmor %vm1285_vm9, %vm1286_vm11 }
  0x18   :  { %v605_v61 = vshll.u32 %v288_v49, 16  ;;  %v12767_v62 = vsel %vm2251_vm0, %v12701_v6, 0  ;;  %v1689_v63 = vor.u32 %v1688_v55, %v12752_v51  ;;  %v12770_v0 = vrot.slane %v602_v57, 7  ;;  %v153_v3 = vld [vmem:[#allocation2 + $0x20] sm:$0x1] }
  0x19   :  { %v12773_v1 = vsel %vm2251_vm0, %v10703_v54, 0  ;;  %v44_v2 = vsel %vm12688_vm5, 0, %v43_v58  ;;  %v1188_v7 = vld [vmem:[#allocation2] sm:$0xf]  ;;  %v12777_v8 = vld [vmem:[#allocation2 + $0x8] sm:$0x1]  ;;  %v12780_v9 = vor.u32 %v597_v53, %v12763_v60 }
  0x1a   :  { %v600_v6 = vrot.slane %v12763_v60, 4  ;;  %45 = vst [vmem:[#allocation2 + $0x18] sm:$0x1] %v44_v2  ;;  %v154_v10 = vsel %vm12694_vm6, 0, %v153_v3  ;;  %v1289_v11 = vshrl.u32 %v1188_v7, 16  ;;  %v1292_v12 = vshll.u32 %v1188_v7, 16 }
  0x1b   :  { %v1308_v13 = vshll.u32 %v12777_v8, 16  ;;  %vm2154_vm12 = vcmask 31744   ;;  %v3196_v14 = vrot.slane %v12777_v8, 5  ;;  %v1220_v15 = vld [vmem:[#allocation2 + $0xd8] sm:$0xf]  ;;  %v18095_v16 = vmov 0 }
  0x1c   :  { %155 = vst [vmem:[#allocation2 + $0x20] sm:$0x1] %v154_v10  ;;  %v18096_v16 = vsel %vm12789_vm13, 4294967295, %v18095_v16  ;;  %v12793_v17 = vld [vmem:[#allocation2 + $0xe0] sm:$0x1]  ;;  %v1673_v18 = vshrl.u32 %v1220_v15, 16  ;;  %v607_v22 = vor.u32 %v605_v61, %v12770_v0 }
  0x1d   :  { %18097 = vst [vmem:[#allocation7_spill] sm:$0xff] %v18096_v16  ;;  %v1676_v19 = vshll.u32 %v1220_v15, 16  ;;  %v1690_v21 = vrot.slane %v1689_v63, 4  ;;  %v1291_v23 = vrot.slane %v1289_v11, 4  ;;  %v1294_v24 = vrot.slane %v1292_v12, 5 }
  0x1e   :  { %v1310_v25 = vrot.slane %v1308_v13, 5  ;;  %v1692_v26 = vshll.u32 %v12793_v17, 16  ;;  %v1190_v27 = vld [vmem:[#allocation2 + $0xc] sm:$0xf]  ;;  %v1675_v28 = vrot.slane %v1673_v18, 4  ;;  %v609_v11 = vrot.slane %v12770_v0, 4 }
  0x1f   :  { %v1678_v29 = vrot.slane %v1676_v19, 5  ;;  %v12798_v31 = vld [vmem:[#allocation2 + $0x10] sm:$0xf]  ;;  %v1313_v33 = vshrl.u32 %v1190_v27, 16  ;;  %v1295_v34 = vor.u32 %v1294_v24, %v1291_v23  ;;  %v12803_v37 = vld [vmem:[#allocation2 + $0x14] sm:$0x1] }
  0x20   :  { %v1311_v35 = vsel %vm12789_vm13, %v12761_v59, %v1310_v25  ;;  %v1694_v36 = vrot.slane %v1692_v26, 5  ;;  %v1316_v38 = vshll.u32 %v1190_v27, 16  ;;  %v1322_v42 = vshll.u32 %v12798_v31, 16  ;;  %v1076_v53 = vld [vmem:[#allocation2 + $0xe4] sm:$0xf] }
  0x21   :  { %v1679_v40 = vor.u32 %v1678_v29, %v1675_v28  ;;  %v1315_v41 = vrot.slane %v1313_v33, 4  ;;  %v1326_v43 = vshrl.u32 %v12798_v31, 16  ;;  %v1296_v44 = vrot.slane %v1295_v34, 4  ;;  %v257_v58 = vld [vmem:[%s17988_s0 + $0x8] sm:$0xf] }
  0x22   :  { %v1695_v45 = vsel %vm12789_vm13, %v1690_v21, %v1694_v36  ;;  %v1318_v46 = vrot.slane %v1316_v38, 5  ;;  %v1332_v47 = vshll.u32 %v12803_v37, 16  ;;  %v1324_v49 = vrot.slane %v1322_v42, 5  ;;  %v258_v59 = vld [vmem:[%s17988_s0 + $0xc] sm:$0xf] }
  0x23   :  { %v1680_v48 = vrot.slane %v1679_v40, 4  ;;  %v1328_v50 = vrot.slane %v1326_v43, 4  ;;  %v3200_v52 = vrot.slane %v12798_v31, 5  ;;  %v1301_v54 = vsel %vm12789_vm13, %v1296_v44, %v12740_v39  ;;  %v1080_v2 = vld [vmem:[#allocation2 + $0xec] sm:$0x1] }
  0x24   :  { %v1319_v55 = vor.u32 %v1318_v46, %v1315_v41  ;;  %v1334_v56 = vrot.slane %v1332_v47, 5  ;;  %v10543_v60 = vcombine.low %v1301_v54, %v1311_v35  ;;  %v608_v39 = vsel %vm12734_vm10, %v600_v6, %v607_v22  ;;  %v97_v3 = vld [vmem:[#allocation2 + $0xf0] sm:$0x1]  ;;  %v207_v13 = vld [vmem:[#allocation2 + $0xf8] sm:$0x1] }
  0x25   :  { %v1685_v61 = vsel %vm12789_vm13, %v1680_v48, %v12752_v51  ;;  %v1329_v63 = vor.u32 %v1328_v50, %v1324_v49  ;;  %v1077_v12 = vsel %vm12717_vm8, %v12780_v9, %v1076_v53  ;;  %1079 = vst.msk [vmem:[#allocation2 + $0xe8] sm:$0xf] %vm19_vm1, %v608_v39  ;;  %v289_v51 = vld [vmem:[%s17988_s0 + $0x88] sm:$0xf]  ;;  %v339_v15 = vshrl.u32 %v257_v58, 16 }
  0x26   :  { %v10559_v7 = vcombine.low %v1685_v61, %v1695_v45  ;;  %v1320_v10 = vrot.slane %v1319_v55, 4  ;;  %11586 = vmatprep.mubr.msk.bf16.mxu0 %vm2154_vm12, %v10543_v60  ;;  %1078 = vst [vmem:[#allocation2 + $0xe4] sm:$0xf] %v1077_v12  ;;  %v342_v18 = vshll.u32 %v257_v58, 16  ;;  %v347_v19 = vshrl.u32 %v258_v59, 16 }
  0x27   :  { %v1330_v6 = vrot.slane %v1329_v63, 4  ;;  %v290_v0 = vld [vmem:[%s17988_s0 + $0x8c] sm:$0xf]  ;;  %v1081_v21 = vsel %vm12688_vm5, %v609_v11, %v1080_v2  ;;  %v350_v22 = vshll.u32 %v258_v59, 16  ;;  %v971_v23 = vld [vmem:[#allocation2 + $0x18] sm:$0xf] }
  0x28   :  { %11618 = vmatprep.mubr.msk.bf16.mxu1 %vm2154_vm12, %v10559_v7  ;;  %v1325_v9 = vsel %vm12789_vm13, %v1320_v10, %v1324_v49  ;;  %v975_v24 = vld [vmem:[#allocation2 + $0x20] sm:$0x1]  ;;  %v98_v25 = vsel %vm12688_vm5, 0, %v97_v3  ;;  %1082 = vst [vmem:[#allocation2 + $0xec] sm:$0x1] %v1081_v21  ;;  %v341_v27 = vrot.slane %v339_v15, 7 }
  0x29   :  { %v1335_v26 = vsel %vm12789_vm13, %v1330_v6, %v1334_v56  ;;  %v349_v28 = vrot.slane %v347_v19, 7  ;;  %99 = vst [vmem:[#allocation2 + $0xf0] sm:$0x1] %v98_v25  ;;  %v208_v29 = vsel %vm12694_vm6, 0, %v207_v13  ;;  %v46_v33 = vld [vmem:[#allocation2 + $0x24] sm:$0x1] }
  0x2a   :  { %v10544_v34 = vcombine.low %v1325_v9, %v1335_v26  ;;  %209 = vst [vmem:[#allocation2 + $0xf8] sm:$0x1] %v208_v29  ;;  %v611_v35 = vshrl.u32 %v289_v51, 16  ;;  %v614_v36 = vshll.u32 %v289_v51, 16  ;;  %v619_v38 = vshrl.u32 %v290_v0, 16 }
  0x2b   :  { %v156_v40 = vld [vmem:[#allocation2 + $0x2c] sm:$0x1]  ;;  %v344_v41 = vor.u32 %v342_v18, %v341_v27  ;;  %v345_v42 = vrot.slane %v341_v27, 4  ;;  %v352_v43 = vor.u32 %v350_v22, %v349_v28  ;;  %v354_v44 = vrot.slane %v349_v28, 4  ;;  %v259_v56 = vld [vmem:[%s17988_s0 + $0x10] sm:$0xf] }
  0x2c   :  { %11587 = vmatmul.mubr.msk.bf16.vlgmr.msra.gmra.mxu0 %vm2154_vm12, %v10544_v34  ;;  %v613_v45 = vrot.slane %v611_v35, 7  ;;  %v621_v46 = vrot.slane %v619_v38, 7  ;;  %v622_v47 = vshll.u32 %v290_v0, 16  ;;  %v47_v48 = vsel %vm12688_vm5, 0, %v46_v33  ;;  %v1223_v49 = vld [vmem:[#allocation2 + $0xe8] sm:$0xf] }
  0x2d   :  { %11717 = vmatpush3.bf16.msra.mxu0 %v12773_v1  ;;  %v353_v50 = vsel %vm12734_vm10, %v345_v42, %v352_v43  ;;  %v972_v53 = vsel %vm12717_vm8, %v344_v41, %v971_v23  ;;  %v976_v54 = vsel %vm12688_vm5, %v354_v44, %v975_v24  ;;  %48 = vst [vmem:[#allocation2 + $0x24] sm:$0x1] %v47_v48  ;;  %v157_v55 = vsel %vm12694_vm6, 0, %v156_v40  ;;  %v1222_v58 = vld [vmem:[#allocation2 + $0xe4] sm:$0xf] }
  0x2e   :  { %v1706_v59 = vshll.u32 %v1223_v49, 16  ;;  %v1710_v1 = vshrl.u32 %v1223_v49, 16  ;;  %973 = vst [vmem:[#allocation2 + $0x18] sm:$0xf] %v972_v53  ;;  %974 = vst.msk [vmem:[#allocation2 + $0x1c] sm:$0xf] %vm19_vm1, %v353_v50  ;;  %v616_v60 = vor.u32 %v614_v36, %v613_v45  ;;  %v624_v3 = vor.u32 %v622_v47, %v621_v46 }
  0x2f   :  { %977 = vst [vmem:[#allocation2 + $0x20] sm:$0x1] %v976_v54  ;;  %v617_v61 = vrot.slane %v613_v45, 4  ;;  %158 = vst [vmem:[#allocation2 + $0x2c] sm:$0x1] %v157_v55  ;;  %v1697_v39 = vshrl.u32 %v1222_v58, 16 }
  0x30   :  { %v260_v63 = vld [vmem:[%s17988_s0 + $0x14] sm:$0xf]  ;;  %v1700_v2 = vshll.u32 %v1222_v58, 16  ;;  %v626_v7 = vrot.slane %v621_v46, 4  ;;  %v100_v10 = vld [vmem:[#allocation2 + $0xfc] sm:$0x1] }
  0x31   :  { %v1270_v11 = vld [vmem:[#allocation2 + $0xec] sm:$0x1]  ;;  %v1708_v12 = vrot.slane %v1706_v59, 5  ;;  %v1712_v13 = vrot.slane %v1710_v1, 4  ;;  %v1083_v51 = vld [vmem:[#allocation2 + $0xf0] sm:$0xf]  ;;  %v625_v19 = vsel %vm12734_vm10, %v617_v61, %v624_v3 }
  0x32   :  { %v1699_v6 = vrot.slane %v1697_v39, 4  ;;  %v1702_v15 = vrot.slane %v1700_v2, 5  ;;  %v1716_v18 = vshll.u32 %v1270_v11, 16  ;;  %v1087_v0 = vld [vmem:[#allocation2 + $0xf8] sm:$0x1]  ;;  %v1084_v21 = vsel %vm12717_vm8, %v616_v60, %v1083_v51 }
  0x33   :  { %v1713_v9 = vor.u32 %v1712_v13, %v1708_v12  ;;  %1086 = vst.msk [vmem:[#allocation2 + $0xf4] sm:$0xf] %vm19_vm1, %v625_v19  ;;  %v1088_v22 = vsel %vm12688_vm5, %v626_v7, %v1087_v0  ;;  %v356_v23 = vshrl.u32 %v259_v56, 16  ;;  %1085 = vst [vmem:[#allocation2 + $0xf0] sm:$0xf] %v1084_v21  ;;  %v359_v26 = vshll.u32 %v259_v56, 16 }
  0x34   :  { %v1703_v24 = vor.u32 %v1702_v15, %v1699_v6  ;;  %v1718_v25 = vrot.slane %v1716_v18, 5  ;;  %1089 = vst [vmem:[#allocation2 + $0xf8] sm:$0x1] %v1088_v22  ;;  %v364_v27 = vshrl.u32 %v260_v63, 16  ;;  %v367_v33 = vshll.u32 %v260_v63, 16 }
  0x35   :  { %v1714_v28 = vrot.slane %v1713_v9, 4  ;;  %v358_v29 = vrot.slane %v356_v23, 7  ;;  %v101_v34 = vsel %vm12688_vm5, 0, %v100_v10  ;;  %v1192_v36 = vld [vmem:[#allocation2 + $0x18] sm:$0xf]  ;;  %vm3188_vm14 = vcmask 1042432  }
  0x36   :  { %v1704_v35 = vrot.slane %v1703_v24, 4  ;;  %v1193_v38 = vld [vmem:[#allocation2 + $0x1c] sm:$0xf]  ;;  %v12877_v40 = vrot.slane %v364_v27, 7  ;;  %102 = vst [vmem:[#allocation2 + $0xfc] sm:$0x1] %v101_v34 }
  0x37   :  { %v1719_v41 = vsel %vm12789_vm13, %v1714_v28, %v1718_v25  ;;  %v1255_v42 = vld [vmem:[#allocation2 + $0x20] sm:$0x1]  ;;  %v1337_v43 = vshrl.u32 %v1192_v36, 16  ;;  %v1340_v44 = vshll.u32 %v1192_v36, 16  ;;  %v1346_v45 = vshll.u32 %v1193_v38, 16 }
  0x38   :  { %v1709_v46 = vsel %vm12789_vm13, %v1704_v35, %v1708_v12  ;;  %v1350_v47 = vshrl.u32 %v1193_v38, 16  ;;  %v1356_v48 = vshll.u32 %v1255_v42, 16  ;;  %v361_v49 = vor.u32 %v359_v26, %v358_v29  ;;  %v978_v50 = vld [vmem:[#allocation2 + $0x24] sm:$0xf]  ;;  %v291_v15 = vld [vmem:[%s17988_s0 + $0x90] sm:$0xf] }
  0x39   :  { %v10560_v53 = vcombine.low %v1709_v46, %v1719_v41  ;;  %v1339_v54 = vrot.slane %v1337_v43, 4  ;;  %v1342_v55 = vrot.slane %v1340_v44, 5  ;;  %v1348_v56 = vrot.slane %v1346_v45, 5  ;;  %v210_v63 = vld [vmem:[#allocation2 + $0x104] sm:$0x1] }
  0x3a   :  { %v1352_v58 = vrot.slane %v1350_v47, 4  ;;  %v1358_v59 = vrot.slane %v1356_v48, 5  ;;  %v1225_v1 = vld [vmem:[#allocation2 + $0xf4] sm:$0xf]  ;;  %v362_v60 = vrot.slane %v358_v29, 4  ;;  %v369_v61 = vor.u32 %v367_v33, %v12877_v40 }
  0x3b   :  { %11619 = vmatmul.mubr.msk.bf16.vlgmr.msra.gmra.mxu1 %vm2154_vm12, %v10560_v53  ;;  %v1343_v39 = vor.u32 %v1342_v55, %v1339_v54  ;;  %v1224_v2 = vld [vmem:[#allocation2 + $0xf0] sm:$0xf]  ;;  %v1271_v3 = vld [vmem:[#allocation2 + $0xf8] sm:$0x1]  ;;  %v1730_v7 = vshll.u32 %v1225_v1, 16  ;;  %v1734_v10 = vshrl.u32 %v1225_v1, 16  ;;  %v979_v11 = vsel %vm12717_vm8, %v361_v49, %v978_v50 }
  0x3c   :  { %11651 = vmatpush3.bf16.msra.mxu1 %v12767_v62  ;;  %v1353_v12 = vor.u32 %v1352_v58, %v1348_v56  ;;  %v1721_v13 = vshrl.u32 %v1224_v2, 16  ;;  %v1724_v51 = vshll.u32 %v1224_v2, 16  ;;  %v1740_v6 = vshll.u32 %v1271_v3, 16  ;;  %980 = vst [vmem:[#allocation2 + $0x24] sm:$0xf] %v979_v11 }
  0x3d   :  { %v1344_v18 = vrot.slane %v1343_v39, 4  ;;  %v1732_v19 = vrot.slane %v1730_v7, 5  ;;  %v1736_v0 = vrot.slane %v1734_v10, 4  ;;  %v370_v9 = vsel %vm12734_vm10, %v362_v60, %v369_v61  ;;  %v292_v21 = vld [vmem:[%s17988_s0 + $0x94] sm:$0xf] }
  0x3e   :  { %v1354_v62 = vrot.slane %v1353_v12, 4  ;;  %v1723_v22 = vrot.slane %v1721_v13, 4  ;;  %v1726_v23 = vrot.slane %v1724_v51, 5  ;;  %v1742_v24 = vrot.slane %v1740_v6, 5  ;;  %981 = vst.msk [vmem:[#allocation2 + $0x28] sm:$0xf] %vm19_vm1, %v370_v9 }
  0x3f   :  { %v982_v25 = vld [vmem:[#allocation2 + $0x2c] sm:$0x1]  ;;  %v1349_v26 = vsel %vm12789_vm13, %v1344_v18, %v1348_v56  ;;  %v1737_v27 = vor.u32 %v1736_v0, %v1732_v19  ;;  %v371_v28 = vrot.slane %v12877_v40, 4  ;;  %v211_v29 = vsel %vm12694_vm6, 0, %v210_v63  ;;  %v49_v33 = vld [vmem:[#allocation2 + $0x30] sm:$0x1] }
  0x40   :  { %v1359_v34 = vsel %vm12789_vm13, %v1354_v62, %v1358_v59  ;;  %v1727_v35 = vor.u32 %v1726_v23, %v1723_v22  ;;  %212 = vst [vmem:[#allocation2 + $0x104] sm:$0x1] %v211_v29  ;;  %v628_v36 = vshrl.u32 %v291_v15, 16  ;;  %v631_v38 = vshll.u32 %v291_v15, 16  ;;  %v159_v41 = vld [vmem:[#allocation2 + $0x38] sm:$0x1] }
  0x41   :  { %v261_v42 = vld [vmem:[%s17988_s0 + $0x18] sm:$0xf]  ;;  %v10545_v43 = vcombine.low %v1349_v26, %v1359_v34  ;;  %v1738_v44 = vrot.slane %v1737_v27, 4  ;;  %v983_v40 = vsel %vm12688_vm5, %v371_v28, %v982_v25  ;;  %v636_v45 = vshrl.u32 %v292_v21, 16  ;;  %v1090_v61 = vld [vmem:[#allocation2 + $0xfc] sm:$0xf] }
  0x42   :  { %v1728_v46 = vrot.slane %v1727_v35, 4  ;;  %984 = vst [vmem:[#allocation2 + $0x2c] sm:$0x1] %v983_v40  ;;  %v630_v47 = vrot.slane %v628_v36, 7  ;;  %v639_v48 = vshll.u32 %v292_v21, 16  ;;  %v50_v49 = vsel %vm12688_vm5, 0, %v49_v33 }
  0x43   :  { %11590 = vmatprep.mubr.msk.bf16.mxu0 %vm2154_vm12, %v10545_v43  ;;  %v1743_v50 = vsel %vm12789_vm13, %v1738_v44, %v1742_v24  ;;  %v1194_v53 = vld [vmem:[#allocation2 + $0x24] sm:$0xf]  ;;  %v638_v54 = vrot.slane %v636_v45, 7  ;;  %51 = vst [vmem:[#allocation2 + $0x30] sm:$0x1] %v50_v49  ;;  %v160_v55 = vsel %vm12694_vm6, 0, %v159_v41 }
  0x44   :  { %v373_v56 = vshrl.u32 %v261_v42, 16  ;;  %v1733_v58 = vsel %vm12789_vm13, %v1728_v46, %v1732_v19  ;;  %v1361_v59 = vshrl.u32 %v1194_v53, 16  ;;  %v1364_v1 = vshll.u32 %v1194_v53, 16  ;;  %161 = vst [vmem:[#allocation2 + $0x38] sm:$0x1] %v160_v55 }
  0x45   :  { %v633_v60 = vor.u32 %v631_v38, %v630_v47  ;;  %v10561_v63 = vcombine.low %v1733_v58, %v1743_v50  ;;  %v1195_v39 = vld [vmem:[#allocation2 + $0x28] sm:$0xf]  ;;  %v634_v2 = vrot.slane %v630_v47, 4  ;;  %v641_v3 = vor.u32 %v639_v48, %v638_v54  ;;  %v262_v10 = vld [vmem:[%s17988_s0 + $0x1c] sm:$0xf] }
  0x46   :  { %v643_v7 = vrot.slane %v638_v54, 4  ;;  %v1363_v11 = vrot.slane %v1361_v59, 4  ;;  %v1366_v12 = vrot.slane %v1364_v1, 5  ;;  %v1370_v13 = vshll.u32 %v1195_v39, 16  ;;  %v103_v6 = vld [vmem:[#allocation2 + $0x108] sm:$0x1] }
  0x47   :  { %v1374_v51 = vshrl.u32 %v1195_v39, 16  ;;  %11622 = vmatprep.mubr.msk.bf16.mxu1 %vm2154_vm12, %v10561_v63  ;;  %v642_v15 = vsel %vm12734_vm10, %v634_v2, %v641_v3  ;;  %v1091_v18 = vsel %vm12717_vm8, %v633_v60, %v1090_v61  ;;  %v1094_v19 = vld [vmem:[#allocation2 + $0x104] sm:$0x1]  ;;  %v375_v0 = vrot.slane %v373_v56, 7  ;;  %v213_v21 = vld [vmem:[#allocation2 + $0x110] sm:$0x1] }
  0x48   :  { %v376_v9 = vshll.u32 %v261_v42, 16  ;;  %v1367_v62 = vor.u32 %v1366_v12, %v1363_v11  ;;  %v1372_v22 = vrot.slane %v1370_v13, 5  ;;  %1092 = vst [vmem:[#allocation2 + $0xfc] sm:$0xf] %v1091_v18  ;;  %1093 = vst.msk [vmem:[#allocation2 + $0x100] sm:$0xf] %vm19_vm1, %v642_v15  ;;  %v1095_v24 = vsel %vm12688_vm5, %v643_v7, %v1094_v19 }
  0x49   :  { %v1376_v23 = vrot.slane %v1374_v51, 4  ;;  %v293_v25 = vld [vmem:[%s17988_s0 + $0x98] sm:$0xf]  ;;  %v12935_v26 = vld [vmem:[%s17988_s0 + $0x9c] sm:$0xf]  ;;  %v379_v29 = vrot.slane %v375_v0, 4 }
  0x4a   :  { %v1256_v27 = vld [vmem:[#allocation2 + $0x2c] sm:$0x1]  ;;  %1096 = vst [vmem:[#allocation2 + $0x104] sm:$0x1] %v1095_v24  ;;  %v378_v28 = vor.u32 %v376_v9, %v375_v0  ;;  %v381_v33 = vshrl.u32 %v262_v10, 16  ;;  %v384_v34 = vshll.u32 %v262_v10, 16 }
  0x4b   :  { %v52_v35 = vld [vmem:[#allocation2 + $0x3c] sm:$0x1]  ;;  %v1368_v36 = vrot.slane %v1367_v62, 4  ;;  %v1377_v38 = vor.u32 %v1376_v23, %v1372_v22  ;;  %v1380_v41 = vshll.u32 %v1256_v27, 16  ;;  %v985_v42 = vld [vmem:[#allocation2 + $0x30] sm:$0xf] }
  0x4c   :  { %v104_v43 = vsel %vm12688_vm5, 0, %v103_v6  ;;  %v383_v44 = vrot.slane %v381_v33, 7  ;;  %v986_v40 = vsel %vm12717_vm8, %v378_v28, %v985_v42  ;;  %v214_v45 = vsel %vm12694_vm6, 0, %v213_v21  ;;  %v162_v47 = vld [vmem:[#allocation2 + $0x44] sm:$0x1] }
  0x4d   :  { %105 = vst [vmem:[#allocation2 + $0x108] sm:$0x1] %v104_v43  ;;  %v645_v46 = vshrl.u32 %v293_v25, 16  ;;  %v1373_v48 = vsel %vm12789_vm13, %v1368_v36, %v1372_v22  ;;  %v1378_v49 = vrot.slane %v1377_v38, 4  ;;  %v1382_v50 = vrot.slane %v1380_v41, 5 }
  0x4e   :  { %987 = vst [vmem:[#allocation2 + $0x30] sm:$0xf] %v986_v40  ;;  %v989_v53 = vld [vmem:[#allocation2 + $0x38] sm:$0x1]  ;;  %215 = vst [vmem:[#allocation2 + $0x110] sm:$0x1] %v214_v45  ;;  %v386_v55 = vor.u32 %v384_v34, %v383_v44 }
  0x4f   :  { %v648_v54 = vshll.u32 %v293_v25, 16  ;;  %v388_v56 = vrot.slane %v383_v44, 4  ;;  %v647_v58 = vrot.slane %v645_v46, 7  ;;  %v653_v59 = vshrl.u32 %v12935_v26, 16  ;;  %v263_v39 = vld [vmem:[%s17988_s0 + $0x20] sm:$0xf] }
  0x50   :  { %v1383_v1 = vsel %vm12789_vm13, %v1378_v49, %v1382_v50  ;;  %v656_v60 = vshll.u32 %v12935_v26, 16  ;;  %v53_v61 = vsel %vm12688_vm5, 0, %v52_v35  ;;  %v163_v63 = vsel %vm12694_vm6, 0, %v162_v47  ;;  %v1226_v3 = vld [vmem:[#allocation2 + $0xfc] sm:$0xf] }
  0x51   :  { %v10546_v2 = vcombine.low %v1373_v48, %v1383_v1  ;;  %v1227_v7 = vld [vmem:[#allocation2 + $0x100] sm:$0xf]  ;;  %v387_v10 = vsel %vm12734_vm10, %v379_v29, %v386_v55  ;;  %v990_v11 = vsel %vm12688_vm5, %v388_v56, %v989_v53  ;;  %v650_v12 = vor.u32 %v648_v54, %v647_v58  ;;  %54 = vst [vmem:[#allocation2 + $0x3c] sm:$0x1] %v53_v61  ;;  %v1272_v13 = vld [vmem:[#allocation2 + $0x104] sm:$0x1] }
  0x52   :  { %164 = vst [vmem:[#allocation2 + $0x44] sm:$0x1] %v163_v63  ;;  %v1745_v51 = vshrl.u32 %v1226_v3, 16  ;;  %v1748_v6 = vshll.u32 %v1226_v3, 16  ;;  %v1754_v15 = vshll.u32 %v1227_v7, 16  ;;  %v1758_v18 = vshrl.u32 %v1227_v7, 16 }
  0x53   :  { %988 = vst.msk [vmem:[#allocation2 + $0x34] sm:$0xf] %vm19_vm1, %v387_v10  ;;  %991 = vst [vmem:[#allocation2 + $0x38] sm:$0x1] %v990_v11  ;;  %11591 = vmatmul.mubr.msk.bf16.gmra.mxu0 %vm2154_vm12, %v10546_v2  ;;  %v1764_v19 = vshll.u32 %v1272_v13, 16  ;;  %v651_v0 = vrot.slane %v647_v58, 4 }
  0x54   :  { %v655_v9 = vrot.slane %v653_v59, 7  ;;  %v390_v21 = vshrl.u32 %v263_v39, 16  ;;  %v1747_v62 = vrot.slane %v1745_v51, 4  ;;  %v1750_v22 = vrot.slane %v1748_v6, 5  ;;  %v1097_v25 = vld [vmem:[#allocation2 + $0x108] sm:$0xf] }
  0x55   :  { %v1756_v23 = vrot.slane %v1754_v15, 5  ;;  %v1760_v24 = vrot.slane %v1758_v18, 4  ;;  %v1766_v26 = vrot.slane %v1764_v19, 5  ;;  %v1196_v27 = vld [vmem:[#allocation2 + $0x30] sm:$0xf]  ;;  %v1098_v33 = vsel %vm12717_vm8, %v650_v12, %v1097_v25 }
  0x56   :  { %v658_v28 = vor.u32 %v656_v60, %v655_v9  ;;  %v660_v29 = vrot.slane %v655_v9, 4  ;;  %v1101_v34 = vld [vmem:[#allocation2 + $0x110] sm:$0x1]  ;;  %v1751_v35 = vor.u32 %v1750_v22, %v1747_v62  ;;  %v1385_v38 = vshrl.u32 %v1196_v27, 16  ;;  %1099 = vst [vmem:[#allocation2 + $0x108] sm:$0xf] %v1098_v33 }
  0x57   :  { %v1761_v36 = vor.u32 %v1760_v24, %v1756_v23  ;;  %v1388_v41 = vshll.u32 %v1196_v27, 16  ;;  %v264_v42 = vld [vmem:[%s17988_s0 + $0x24] sm:$0xf]  ;;  %v392_v40 = vrot.slane %v390_v21, 7  ;;  %v393_v45 = vshll.u32 %v263_v39, 16 }
  0x58   :  { %v659_v43 = vsel %vm12734_vm10, %v651_v0, %v658_v28  ;;  %v1102_v44 = vsel %vm12688_vm5, %v660_v29, %v1101_v34  ;;  %v1752_v46 = vrot.slane %v1751_v35, 4  ;;  %v1387_v48 = vrot.slane %v1385_v38, 4  ;;  %v992_v50 = vld [vmem:[#allocation2 + $0x3c] sm:$0xf]  ;;  %v106_v63 = vld [vmem:[#allocation2 + $0x114] sm:$0x1] }
  0x59   :  { %v1762_v47 = vrot.slane %v1761_v36, 4  ;;  %v1390_v49 = vrot.slane %v1388_v41, 5  ;;  %1100 = vst.msk [vmem:[#allocation2 + $0x10c] sm:$0xf] %vm19_vm1, %v659_v43  ;;  %1103 = vst [vmem:[#allocation2 + $0x110] sm:$0x1] %v1102_v44  ;;  %v395_v55 = vor.u32 %v393_v45, %v392_v40 }
  0x5a   :  { %v1197_v53 = vld [vmem:[#allocation2 + $0x34] sm:$0xf]  ;;  %v1257_v54 = vld [vmem:[#allocation2 + $0x38] sm:$0x1]  ;;  %v396_v56 = vrot.slane %v392_v40, 4  ;;  %v398_v58 = vshrl.u32 %v264_v42, 16  ;;  %v1757_v59 = vsel %vm12789_vm13, %v1752_v46, %v1756_v23 }
  0x5b   :  { %v1767_v1 = vsel %vm12789_vm13, %v1762_v47, %v1766_v26  ;;  %v1391_v60 = vor.u32 %v1390_v49, %v1387_v48  ;;  %v1394_v61 = vshll.u32 %v1197_v53, 16  ;;  %v216_v39 = vld [vmem:[#allocation2 + $0x11c] sm:$0x1]  ;;  %v1398_v3 = vshrl.u32 %v1197_v53, 16  ;;  %v295_v11 = vld [vmem:[%s17988_s0 + $0xa0] sm:$0xf] }
  0x5c   :  { %v10562_v2 = vcombine.low %v1757_v59, %v1767_v1  ;;  %v1404_v7 = vshll.u32 %v1257_v54, 16  ;;  %v400_v10 = vrot.slane %v398_v58, 7  ;;  %v401_v51 = vshll.u32 %v264_v42, 16  ;;  %v996_v15 = vld [vmem:[#allocation2 + $0x44] sm:$0x1] }
  0x5d   :  { %v1392_v12 = vrot.slane %v1391_v60, 4  ;;  %v1396_v13 = vrot.slane %v1394_v61, 5  ;;  %v993_v6 = vsel %vm12717_vm8, %v395_v55, %v992_v50  ;;  %v1400_v18 = vrot.slane %v1398_v3, 4  ;;  %v1228_v0 = vld [vmem:[#allocation2 + $0x108] sm:$0xf] }
  0x5e   :  { %11623 = vmatmul.mubr.msk.bf16.gmra.mxu1 %vm2154_vm12, %v10562_v2  ;;  %v1406_v19 = vrot.slane %v1404_v7, 5  ;;  %v405_v9 = vrot.slane %v400_v10, 4  ;;  %994 = vst [vmem:[#allocation2 + $0x3c] sm:$0xf] %v993_v6  ;;  %v107_v21 = vsel %vm12688_vm5, 0, %v106_v63  ;;  %v1769_v22 = vshrl.u32 %v1228_v0, 16 }
  0x5f   :  { %v1397_v62 = vsel %vm12789_vm13, %v1392_v12, %v1396_v13  ;;  %v1772_v23 = vshll.u32 %v1228_v0, 16  ;;  %v403_v24 = vor.u32 %v401_v51, %v400_v10  ;;  %108 = vst [vmem:[#allocation2 + $0x114] sm:$0x1] %v107_v21  ;;  %v1401_v25 = vor.u32 %v1400_v18, %v1396_v13  ;;  %v296_v41 = vld [vmem:[%s17988_s0 + $0xa4] sm:$0xf] }
  0x60   :  { %v1229_v26 = vld [vmem:[#allocation2 + $0x10c] sm:$0xf]  ;;  %v1273_v27 = vld [vmem:[#allocation2 + $0x110] sm:$0x1]  ;;  %v997_v28 = vsel %vm12688_vm5, %v405_v9, %v996_v15  ;;  %v217_v29 = vsel %vm12694_vm6, 0, %v216_v39  ;;  %v662_v33 = vshrl.u32 %v295_v11, 16 }
  0x61   :  { %v1771_v34 = vrot.slane %v1769_v22, 4  ;;  %v1774_v35 = vrot.slane %v1772_v23, 5  ;;  %v1778_v36 = vshll.u32 %v1229_v26, 16  ;;  %v1782_v38 = vshrl.u32 %v1229_v26, 16  ;;  %998 = vst [vmem:[#allocation2 + $0x44] sm:$0x1] %v997_v28 }
  0x62   :  { %218 = vst [vmem:[#allocation2 + $0x11c] sm:$0x1] %v217_v29  ;;  %v1402_v42 = vrot.slane %v1401_v25, 4  ;;  %v1788_v43 = vshll.u32 %v1273_v27, 16  ;;  %v404_v44 = vsel %vm12734_vm10, %v396_v56, %v403_v24  ;;  %v664_v40 = vrot.slane %v662_v33, 7 }
  0x63   :  { %v1775_v45 = vor.u32 %v1774_v35, %v1771_v34  ;;  %v1780_v46 = vrot.slane %v1778_v36, 5  ;;  %v1784_v47 = vrot.slane %v1782_v38, 4  ;;  %995 = vst.msk [vmem:[#allocation2 + $0x40] sm:$0xf] %vm19_vm1, %v404_v44  ;;  %v665_v48 = vshll.u32 %v295_v11, 16 }
  0x64   :  { %v55_v49 = vld [vmem:[#allocation2 + $0x48] sm:$0x1]  ;;  %v1407_v50 = vsel %vm12789_vm13, %v1402_v42, %v1406_v19  ;;  %v1790_v53 = vrot.slane %v1788_v43, 5  ;;  %v668_v54 = vrot.slane %v664_v40, 4  ;;  %v670_v55 = vshrl.u32 %v296_v41, 16 }
  0x65   :  { %v165_v58 = vld [vmem:[#allocation2 + $0x50] sm:$0x1]  ;;  %v10547_v59 = vcombine.low %v1397_v62, %v1407_v50  ;;  %v1776_v1 = vrot.slane %v1775_v45, 4  ;;  %v1785_v60 = vor.u32 %v1784_v47, %v1780_v46  ;;  %v1198_v61 = vld [vmem:[#allocation2 + $0x3c] sm:$0xf]  ;;  %v667_v56 = vor.u32 %v665_v48, %v664_v40 }
  0x66   :  { %v265_v63 = vld [vmem:[%s17988_s0 + $0x28] sm:$0xf]  ;;  %v1409_v39 = vshrl.u32 %v1198_v61, 16  ;;  %v1412_v2 = vshll.u32 %v1198_v61, 16  ;;  %v672_v3 = vrot.slane %v670_v55, 7  ;;  %v673_v7 = vshll.u32 %v296_v41, 16 }
  0x67   :  { %v1104_v10 = vld [vmem:[#allocation2 + $0x114] sm:$0xf]  ;;  %11594 = vmatprep.mubr.msk.bf16.mxu0 %vm2154_vm12, %v10547_v59  ;;  %v1781_v11 = vsel %vm12789_vm13, %v1776_v1, %v1780_v46  ;;  %v1786_v12 = vrot.slane %v1785_v60, 4  ;;  %v56_v51 = vsel %vm12688_vm5, 0, %v55_v49  ;;  %v266_v6 = vld [vmem:[%s17988_s0 + $0x2c] sm:$0xf] }
  0x68   :  { %v1105_v13 = vsel %vm12717_vm8, %v667_v56, %v1104_v10  ;;  %v1258_v15 = vld [vmem:[#allocation2 + $0x44] sm:$0x1]  ;;  %v1411_v18 = vrot.slane %v1409_v39, 4  ;;  %v1414_v19 = vrot.slane %v1412_v2, 5  ;;  %v675_v0 = vor.u32 %v673_v7, %v672_v3  ;;  %57 = vst [vmem:[#allocation2 + $0x48] sm:$0x1] %v56_v51 }
  0x69   :  { %v677_v9 = vrot.slane %v672_v3, 4  ;;  %1106 = vst [vmem:[#allocation2 + $0x114] sm:$0xf] %v1105_v13  ;;  %v1791_v21 = vsel %vm12789_vm13, %v1786_v12, %v1790_v53  ;;  %v1428_v62 = vshll.u32 %v1258_v15, 16  ;;  %v1108_v22 = vld [vmem:[#allocation2 + $0x11c] sm:$0x1] }
  0x6a   :  { %v166_v23 = vsel %vm12694_vm6, 0, %v165_v58  ;;  %v407_v24 = vshrl.u32 %v265_v63, 16  ;;  %v10563_v25 = vcombine.low %v1781_v11, %v1791_v21  ;;  %v1199_v26 = vld [vmem:[#allocation2 + $0x40] sm:$0xf]  ;;  %v1415_v27 = vor.u32 %v1414_v19, %v1411_v18  ;;  %v219_v34 = vld [vmem:[#allocation2 + $0x128] sm:$0x1] }
  0x6b   :  { %v676_v28 = vsel %vm12734_vm10, %v668_v54, %v675_v0  ;;  %v1109_v29 = vsel %vm12688_vm5, %v677_v9, %v1108_v22  ;;  %167 = vst [vmem:[#allocation2 + $0x50] sm:$0x1] %v166_v23  ;;  %v109_v33 = vld [vmem:[#allocation2 + $0x120] sm:$0x1]  ;;  %v1418_v35 = vshll.u32 %v1199_v26, 16  ;;  %v1422_v36 = vshrl.u32 %v1199_v26, 16 }
  0x6c   :  { %v1430_v38 = vrot.slane %v1428_v62, 5  ;;  %1107 = vst.msk [vmem:[#allocation2 + $0x118] sm:$0xf] %vm19_vm1, %v676_v28  ;;  %1110 = vst [vmem:[#allocation2 + $0x11c] sm:$0x1] %v1109_v29  ;;  %v409_v41 = vrot.slane %v407_v24, 7  ;;  %11626 = vmatprep.mubr.msk.bf16.mxu1 %vm2154_vm12, %v10563_v25 }
  0x6d   :  { %v297_v42 = vld [vmem:[%s17988_s0 + $0xa8] sm:$0xf]  ;;  %v1416_v43 = vrot.slane %v1415_v27, 4  ;;  %v410_v44 = vshll.u32 %v265_v63, 16  ;;  %v415_v40 = vshrl.u32 %v266_v6, 16  ;;  %v418_v45 = vshll.u32 %v266_v6, 16 }
  0x6e   :  { %v298_v46 = vld [vmem:[%s17988_s0 + $0xac] sm:$0xf]  ;;  %v1420_v47 = vrot.slane %v1418_v35, 5  ;;  %v1424_v48 = vrot.slane %v1422_v36, 4  ;;  %v413_v49 = vrot.slane %v409_v41, 4  ;;  %v110_v50 = vsel %vm12688_vm5, 0, %v109_v33 }
  0x6f   :  { %v412_v53 = vor.u32 %v410_v44, %v409_v41  ;;  %v417_v54 = vrot.slane %v415_v40, 7  ;;  %111 = vst [vmem:[#allocation2 + $0x120] sm:$0x1] %v110_v50  ;;  %v220_v55 = vsel %vm12694_vm6, 0, %v219_v34  ;;  %v679_v58 = vshrl.u32 %v297_v42, 16 }
  0x70   :  { %v1421_v59 = vsel %vm12789_vm13, %v1416_v43, %v1420_v47  ;;  %v1425_v1 = vor.u32 %v1424_v48, %v1420_v47  ;;  %v1230_v60 = vld [vmem:[#allocation2 + $0x114] sm:$0xf]  ;;  %v999_v61 = vld [vmem:[#allocation2 + $0x48] sm:$0xf]  ;;  %221 = vst [vmem:[#allocation2 + $0x128] sm:$0x1] %v220_v55 }
  0x71   :  { %v682_v56 = vshll.u32 %v297_v42, 16  ;;  %v687_v63 = vshrl.u32 %v298_v46, 16  ;;  %v1793_v39 = vshrl.u32 %v1230_v60, 16  ;;  %v1796_v2 = vshll.u32 %v1230_v60, 16  ;;  %v58_v6 = vld [vmem:[#allocation2 + $0x54] sm:$0x1] }
  0x72   :  { %v420_v3 = vor.u32 %v418_v45, %v417_v54  ;;  %v422_v7 = vrot.slane %v417_v54, 4  ;;  %v1426_v10 = vrot.slane %v1425_v1, 4  ;;  %v1000_v11 = vsel %vm12717_vm8, %v412_v53, %v999_v61  ;;  %v1003_v12 = vld [vmem:[#allocation2 + $0x50] sm:$0x1]  ;;  %v168_v25 = vld [vmem:[#allocation2 + $0x5c] sm:$0x1] }
  0x73   :  { %v681_v13 = vrot.slane %v679_v58, 7  ;;  %v689_v51 = vrot.slane %v687_v63, 7  ;;  %v1231_v15 = vld [vmem:[#allocation2 + $0x118] sm:$0xf]  ;;  %v1274_v18 = vld [vmem:[#allocation2 + $0x11c] sm:$0x1] }
  0x74   :  { %v1795_v19 = vrot.slane %v1793_v39, 4  ;;  %v1798_v0 = vrot.slane %v1796_v2, 5  ;;  %v421_v9 = vsel %vm12734_vm10, %v413_v49, %v420_v3  ;;  %1001 = vst [vmem:[#allocation2 + $0x48] sm:$0xf] %v1000_v11  ;;  %v1004_v21 = vsel %vm12688_vm5, %v422_v7, %v1003_v12  ;;  %v267_v33 = vld [vmem:[%s17988_s0 + $0x30] sm:$0xf] }
  0x75   :  { %v1431_v62 = vsel %vm12789_vm13, %v1426_v10, %v1430_v38  ;;  %v1802_v22 = vshll.u32 %v1231_v15, 16  ;;  %v1806_v23 = vshrl.u32 %v1231_v15, 16  ;;  %v1812_v24 = vshll.u32 %v1274_v18, 16  ;;  %1002 = vst.msk [vmem:[#allocation2 + $0x4c] sm:$0xf] %vm19_vm1, %v421_v9 }
  0x76   :  { %1005 = vst [vmem:[#allocation2 + $0x50] sm:$0x1] %v1004_v21  ;;  %v10548_v26 = vcombine.low %v1421_v59, %v1431_v62  ;;  %v1799_v27 = vor.u32 %v1798_v0, %v1795_v19  ;;  %v684_v28 = vor.u32 %v682_v56, %v681_v13  ;;  %v685_v29 = vrot.slane %v681_v13, 4  ;;  %v13048_v34 = vld [vmem:[%s17988_s0 + $0x34] sm:$0xf] }
  0x77   :  { %v1804_v35 = vrot.slane %v1802_v22, 5  ;;  %v1808_v36 = vrot.slane %v1806_v23, 4  ;;  %v1814_v38 = vrot.slane %v1812_v24, 5  ;;  %v690_v41 = vshll.u32 %v298_v46, 16  ;;  %v1111_v42 = vld [vmem:[#allocation2 + $0x120] sm:$0xf] }
  0x78   :  { %11595 = vmatmul.mubr.msk.bf16.gmra.mxu0 %vm2154_vm12, %v10548_v26  ;;  %v1800_v43 = vrot.slane %v1799_v27, 4  ;;  %v694_v44 = vrot.slane %v689_v51, 4  ;;  %v1112_v40 = vsel %vm12717_vm8, %v684_v28, %v1111_v42  ;;  %v1115_v45 = vld [vmem:[#allocation2 + $0x128] sm:$0x1]  ;;  %v59_v47 = vsel %vm12688_vm5, 0, %v58_v6 }
  0x79   :  { %v1809_v48 = vor.u32 %v1808_v36, %v1804_v35  ;;  %v692_v49 = vor.u32 %v690_v41, %v689_v51  ;;  %1113 = vst [vmem:[#allocation2 + $0x120] sm:$0xf] %v1112_v40  ;;  %60 = vst [vmem:[#allocation2 + $0x54] sm:$0x1] %v59_v47  ;;  %v169_v50 = vsel %vm12694_vm6, 0, %v168_v25  ;;  %v424_v46 = vshrl.u32 %v267_v33, 16 }
  0x7a   :  { %v1805_v53 = vsel %vm12789_vm13, %v1800_v43, %v1804_v35  ;;  %v1116_v54 = vsel %vm12688_vm5, %v694_v44, %v1115_v45  ;;  %170 = vst [vmem:[#allocation2 + $0x5c] sm:$0x1] %v169_v50  ;;  %v427_v55 = vshll.u32 %v267_v33, 16  ;;  %v432_v58 = vshrl.u32 %v13048_v34, 16  ;;  %v112_v13 = vld [vmem:[#allocation2 + $0x12c] sm:$0x1] }
  0x7b   :  { %v1810_v59 = vrot.slane %v1809_v48, 4  ;;  %v1200_v1 = vld [vmem:[#allocation2 + $0x48] sm:$0xf]  ;;  %v693_v60 = vsel %vm12734_vm10, %v685_v29, %v692_v49  ;;  %1117 = vst [vmem:[#allocation2 + $0x128] sm:$0x1] %v1116_v54  ;;  %v426_v61 = vrot.slane %v424_v46, 7 }
  0x7c   :  { %v435_v56 = vshll.u32 %v13048_v34, 16  ;;  %v1201_v63 = vld [vmem:[#allocation2 + $0x4c] sm:$0xf]  ;;  %v1433_v2 = vshrl.u32 %v1200_v1, 16  ;;  %v1436_v3 = vshll.u32 %v1200_v1, 16  ;;  %v434_v24 = vrot.slane %v432_v58, 7 }
  0x7d   :  { %v1259_v39 = vld [vmem:[#allocation2 + $0x50] sm:$0x1]  ;;  %1114 = vst.msk [vmem:[#allocation2 + $0x124] sm:$0xf] %vm19_vm1, %v693_v60  ;;  %v1815_v7 = vsel %vm12789_vm13, %v1810_v59, %v1814_v38  ;;  %v1442_v10 = vshll.u32 %v1201_v63, 16  ;;  %v1446_v11 = vshrl.u32 %v1201_v63, 16  ;;  %v429_v18 = vor.u32 %v427_v55, %v426_v61 }
  0x7e   :  { %v1452_v12 = vshll.u32 %v1259_v39, 16  ;;  %v10564_v51 = vcombine.low %v1805_v53, %v1815_v7  ;;  %v1435_v6 = vrot.slane %v1433_v2, 4  ;;  %v1438_v15 = vrot.slane %v1436_v3, 5  ;;  %v222_v62 = vld [vmem:[#allocation2 + $0x134] sm:$0x1] }
  0x7f   :  { %v1444_v19 = vrot.slane %v1442_v10, 5  ;;  %v1448_v0 = vrot.slane %v1446_v11, 4  ;;  %v430_v21 = vrot.slane %v426_v61, 4  ;;  %v113_v26 = vsel %vm12688_vm5, 0, %v112_v13  ;;  %v299_v35 = vld [vmem:[%s17988_s0 + $0xb0] sm:$0xf] }
  0x80   :  { %v1454_v9 = vrot.slane %v1452_v12, 5  ;;  %11627 = vmatmul.mubr.msk.bf16.gmra.mxu1 %vm2154_vm12, %v10564_v51  ;;  %v1439_v22 = vor.u32 %v1438_v15, %v1435_v6  ;;  %v1232_v23 = vld [vmem:[#allocation2 + $0x120] sm:$0xf]  ;;  %v1006_v25 = vld [vmem:[#allocation2 + $0x54] sm:$0xf]  ;;  %v437_v41 = vor.u32 %v435_v56, %v434_v24  ;;  %v439_v42 = vrot.slane %v434_v24, 4 }
  0x81   :  { %v1449_v27 = vor.u32 %v1448_v0, %v1444_v19  ;;  %v1817_v28 = vshrl.u32 %v1232_v23, 16  ;;  %v1820_v29 = vshll.u32 %v1232_v23, 16  ;;  %v1007_v33 = vsel %vm12717_vm8, %v429_v18, %v1006_v25  ;;  %v1010_v34 = vld [vmem:[#allocation2 + $0x5c] sm:$0x1]  ;;  %114 = vst [vmem:[#allocation2 + $0x12c] sm:$0x1] %v113_v26 }
  0x82   :  { %v1440_v36 = vrot.slane %v1439_v22, 4  ;;  %v1275_v38 = vld [vmem:[#allocation2 + $0x128] sm:$0x1]  ;;  %1008 = vst [vmem:[#allocation2 + $0x54] sm:$0xf] %v1007_v33  ;;  %v223_v43 = vsel %vm12694_vm6, 0, %v222_v62  ;;  %v438_v53 = vsel %vm12734_vm10, %v430_v21, %v437_v41  ;;  %v1011_v1 = vsel %vm12688_vm5, %v439_v42, %v1010_v34 }
  0x83   :  { %v1450_v44 = vrot.slane %v1449_v27, 4  ;;  %v1819_v45 = vrot.slane %v1817_v28, 4  ;;  %v1822_v47 = vrot.slane %v1820_v29, 5  ;;  %v1836_v48 = vshll.u32 %v1275_v38, 16  ;;  %224 = vst [vmem:[#allocation2 + $0x134] sm:$0x1] %v223_v43 }
  0x84   :  { %v1233_v40 = vld [vmem:[#allocation2 + $0x124] sm:$0xf]  ;;  %v1445_v49 = vsel %vm12789_vm13, %v1440_v36, %v1444_v19  ;;  %v300_v54 = vld [vmem:[%s17988_s0 + $0xb4] sm:$0xf]  ;;  %1009 = vst.msk [vmem:[#allocation2 + $0x58] sm:$0xf] %vm19_vm1, %v438_v53 }
  0x85   :  { %v1826_v50 = vshll.u32 %v1233_v40, 16  ;;  %v1830_v46 = vshrl.u32 %v1233_v40, 16  ;;  %v1455_v55 = vsel %vm12789_vm13, %v1450_v44, %v1454_v9  ;;  %v1823_v58 = vor.u32 %v1822_v47, %v1819_v45  ;;  %v61_v60 = vld [vmem:[#allocation2 + $0x60] sm:$0x1]  ;;  %v171_v61 = vld [vmem:[#allocation2 + $0x68] sm:$0x1] }
  0x86   :  { %v1838_v59 = vrot.slane %v1836_v48, 5  ;;  %v10549_v56 = vcombine.low %v1445_v49, %v1455_v55  ;;  %1012 = vst [vmem:[#allocation2 + $0x5c] sm:$0x1] %v1011_v1  ;;  %v696_v2 = vshrl.u32 %v299_v35, 16  ;;  %v269_v3 = vld [vmem:[%s17988_s0 + $0x38] sm:$0xf] }
  0x87   :  { %v1828_v63 = vrot.slane %v1826_v50, 5  ;;  %v1832_v39 = vrot.slane %v1830_v46, 4  ;;  %v1824_v7 = vrot.slane %v1823_v58, 4  ;;  %v699_v10 = vshll.u32 %v299_v35, 16  ;;  %v270_v42 = vld [vmem:[%s17988_s0 + $0x3c] sm:$0xf] }
  0x88   :  { %v704_v11 = vshrl.u32 %v300_v54, 16  ;;  %v707_v12 = vshll.u32 %v300_v54, 16  ;;  %11598 = vmatprep.mubr.msk.bf16.mxu0 %vm2154_vm12, %v10549_v56  ;;  %v698_v51 = vrot.slane %v696_v2, 7  ;;  %v1118_v6 = vld [vmem:[#allocation2 + $0x12c] sm:$0xf]  ;;  %v62_v15 = vsel %vm12688_vm5, 0, %v61_v60 }
  0x89   :  { %v1833_v13 = vor.u32 %v1832_v39, %v1828_v63  ;;  %v172_v18 = vsel %vm12694_vm6, 0, %v171_v61  ;;  %v1829_v19 = vsel %vm12789_vm13, %v1824_v7, %v1828_v63  ;;  %v1202_v0 = vld [vmem:[#allocation2 + $0x54] sm:$0xf]  ;;  %63 = vst [vmem:[#allocation2 + $0x60] sm:$0x1] %v62_v15  ;;  %v441_v21 = vshrl.u32 %v269_v3, 16 }
  0x8a   :  { %v706_v9 = vrot.slane %v704_v11, 7  ;;  %173 = vst [vmem:[#allocation2 + $0x68] sm:$0x1] %v172_v18  ;;  %v444_v62 = vshll.u32 %v269_v3, 16  ;;  %v1457_v23 = vshrl.u32 %v1202_v0, 16  ;;  %v1460_v24 = vshll.u32 %v1202_v0, 16 }
  0x8b   :  { %v1834_v22 = vrot.slane %v1833_v13, 4  ;;  %v701_v25 = vor.u32 %v699_v10, %v698_v51  ;;  %v702_v26 = vrot.slane %v698_v51, 4  ;;  %v1122_v29 = vld [vmem:[#allocation2 + $0x134] sm:$0x1]  ;;  %v443_v33 = vrot.slane %v441_v21, 7 }
  0x8c   :  { %v709_v27 = vor.u32 %v707_v12, %v706_v9  ;;  %v711_v28 = vrot.slane %v706_v9, 4  ;;  %v1203_v35 = vld [vmem:[#allocation2 + $0x58] sm:$0xf]  ;;  %v1459_v36 = vrot.slane %v1457_v23, 4  ;;  %v1462_v38 = vrot.slane %v1460_v24, 5 }
  0x8d   :  { %v1839_v34 = vsel %vm12789_vm13, %v1834_v22, %v1838_v59  ;;  %v1119_v41 = vsel %vm12717_vm8, %v701_v25, %v1118_v6  ;;  %v1260_v44 = vld [vmem:[#allocation2 + $0x5c] sm:$0x1]  ;;  %v1466_v40 = vshll.u32 %v1203_v35, 16  ;;  %v1470_v45 = vshrl.u32 %v1203_v35, 16  ;;  %v115_v48 = vld [vmem:[#allocation2 + $0x138] sm:$0x1] }
  0x8e   :  { %v10565_v43 = vcombine.low %v1829_v19, %v1839_v34  ;;  %v710_v47 = vsel %vm12734_vm10, %v702_v26, %v709_v27  ;;  %1120 = vst [vmem:[#allocation2 + $0x12c] sm:$0xf] %v1119_v41  ;;  %v1463_v49 = vor.u32 %v1462_v38, %v1459_v36  ;;  %v1476_v50 = vshll.u32 %v1260_v44, 16  ;;  %v225_v54 = vld [vmem:[#allocation2 + $0x140] sm:$0x1] }
  0x8f   :  { %1121 = vst.msk [vmem:[#allocation2 + $0x130] sm:$0xf] %vm19_vm1, %v710_v47  ;;  %v1123_v46 = vsel %vm12688_vm5, %v711_v28, %v1122_v29  ;;  %v446_v53 = vor.u32 %v444_v62, %v443_v33  ;;  %v301_v55 = vld [vmem:[%s17988_s0 + $0xb8] sm:$0xf]  ;;  %v1468_v58 = vrot.slane %v1466_v40, 5  ;;  %v1472_v59 = vrot.slane %v1470_v45, 4 }
  0x90   :  { %11630 = vmatprep.mubr.msk.bf16.mxu1 %vm2154_vm12, %v10565_v43  ;;  %1124 = vst [vmem:[#allocation2 + $0x134] sm:$0x1] %v1123_v46  ;;  %v447_v1 = vrot.slane %v443_v33, 4  ;;  %v449_v60 = vshrl.u32 %v270_v42, 16  ;;  %v302_v61 = vld [vmem:[%s17988_s0 + $0xbc] sm:$0xf] }
  0x91   :  { %v1464_v56 = vrot.slane %v1463_v49, 4  ;;  %v1478_v63 = vrot.slane %v1476_v50, 5  ;;  %v452_v39 = vshll.u32 %v270_v42, 16  ;;  %v1013_v2 = vld [vmem:[#allocation2 + $0x60] sm:$0xf]  ;;  %v116_v3 = vsel %vm12688_vm5, 0, %v115_v48 }
  0x92   :  { %v1473_v7 = vor.u32 %v1472_v59, %v1468_v58  ;;  %v451_v10 = vrot.slane %v449_v60, 7  ;;  %v1014_v11 = vsel %vm12717_vm8, %v446_v53, %v1013_v2  ;;  %117 = vst [vmem:[#allocation2 + $0x138] sm:$0x1] %v116_v3  ;;  %v226_v12 = vsel %vm12694_vm6, 0, %v225_v54  ;;  %v64_v13 = vld [vmem:[#allocation2 + $0x6c] sm:$0x1] }
  0x93   :  { %v174_v51 = vld [vmem:[#allocation2 + $0x74] sm:$0x1]  ;;  %v1469_v6 = vsel %vm12789_vm13, %v1464_v56, %v1468_v58  ;;  %1015 = vst [vmem:[#allocation2 + $0x60] sm:$0xf] %v1014_v11  ;;  %227 = vst [vmem:[#allocation2 + $0x140] sm:$0x1] %v226_v12 }
  0x94   :  { %v713_v15 = vshrl.u32 %v301_v55, 16  ;;  %v716_v18 = vshll.u32 %v301_v55, 16  ;;  %v721_v19 = vshrl.u32 %v302_v61, 16  ;;  %v1474_v0 = vrot.slane %v1473_v7, 4  ;;  %v1017_v62 = vld [vmem:[#allocation2 + $0x68] sm:$0x1] }
  0x95   :  { %v454_v9 = vor.u32 %v452_v39, %v451_v10  ;;  %v456_v21 = vrot.slane %v451_v10, 4  ;;  %v724_v22 = vshll.u32 %v302_v61, 16  ;;  %v1234_v23 = vld [vmem:[#allocation2 + $0x12c] sm:$0xf]  ;;  %v65_v26 = vsel %vm12688_vm5, 0, %v64_v13 }
  0x96   :  { %v715_v24 = vrot.slane %v713_v15, 7  ;;  %v723_v25 = vrot.slane %v721_v19, 7  ;;  %v175_v27 = vsel %vm12694_vm6, 0, %v174_v51  ;;  %v1479_v28 = vsel %vm12789_vm13, %v1474_v0, %v1478_v63  ;;  %v1235_v29 = vld [vmem:[#allocation2 + $0x130] sm:$0xf] }
  0x97   :  { %v1841_v33 = vshrl.u32 %v1234_v23, 16  ;;  %v1844_v34 = vshll.u32 %v1234_v23, 16  ;;  %v455_v35 = vsel %vm12734_vm10, %v447_v1, %v454_v9  ;;  %66 = vst [vmem:[#allocation2 + $0x6c] sm:$0x1] %v65_v26  ;;  %176 = vst [vmem:[#allocation2 + $0x74] sm:$0x1] %v175_v27  ;;  %v10550_v36 = vcombine.low %v1469_v6, %v1479_v28 }
  0x98   :  { %v1276_v38 = vld [vmem:[#allocation2 + $0x134] sm:$0x1]  ;;  %v1850_v41 = vshll.u32 %v1235_v29, 16  ;;  %v1854_v42 = vshrl.u32 %v1235_v29, 16  ;;  %1016 = vst.msk [vmem:[#allocation2 + $0x64] sm:$0xf] %vm19_vm1, %v455_v35  ;;  %v1018_v43 = vsel %vm12688_vm5, %v456_v21, %v1017_v62  ;;  %v718_v48 = vor.u32 %v716_v18, %v715_v24 }
  0x99   :  { %v271_v44 = vld [vmem:[%s17988_s0 + $0x40] sm:$0xf]  ;;  %v1843_v40 = vrot.slane %v1841_v33, 4  ;;  %v1846_v45 = vrot.slane %v1844_v34, 5  ;;  %v1860_v47 = vshll.u32 %v1276_v38, 16  ;;  %11599 = vmatmul.mubr.msk.bf16.gmra.mxu0 %vm2154_vm12, %v10550_v36  ;;  %v719_v53 = vrot.slane %v715_v24, 4 }
  0x9a   :  { %1019 = vst [vmem:[#allocation2 + $0x68] sm:$0x1] %v1018_v43  ;;  %v13144_v49 = vld [vmem:[%s17988_s0 + $0x44] sm:$0xf]  ;;  %v1852_v50 = vrot.slane %v1850_v41, 5  ;;  %v1856_v46 = vrot.slane %v1854_v42, 4  ;;  %v726_v54 = vor.u32 %v724_v22, %v723_v25 }
  0x9b   :  { %v1125_v55 = vld [vmem:[#allocation2 + $0x138] sm:$0xf]  ;;  %v1847_v58 = vor.u32 %v1846_v45, %v1843_v40  ;;  %v1862_v59 = vrot.slane %v1860_v47, 5  ;;  %v1204_v1 = vld [vmem:[#allocation2 + $0x60] sm:$0xf]  ;;  %v728_v60 = vrot.slane %v723_v25, 4 }
  0x9c   :  { %v1126_v61 = vsel %vm12717_vm8, %v718_v48, %v1125_v55  ;;  %v1129_v56 = vld [vmem:[#allocation2 + $0x140] sm:$0x1]  ;;  %v1857_v63 = vor.u32 %v1856_v46, %v1852_v50  ;;  %v1481_v39 = vshrl.u32 %v1204_v1, 16  ;;  %v1484_v2 = vshll.u32 %v1204_v1, 16  ;;  %v118_v18 = vld [vmem:[#allocation2 + $0x144] sm:$0x1] }
  0x9d   :  { %v727_v3 = vsel %vm12734_vm10, %v719_v53, %v726_v54  ;;  %1127 = vst [vmem:[#allocation2 + $0x138] sm:$0xf] %v1126_v61  ;;  %v1848_v7 = vrot.slane %v1847_v58, 4  ;;  %v1130_v10 = vsel %vm12688_vm5, %v728_v60, %v1129_v56  ;;  %v458_v11 = vshrl.u32 %v271_v44, 16  ;;  %v228_v62 = vld [vmem:[#allocation2 + $0x14c] sm:$0x1] }
  0x9e   :  { %1128 = vst.msk [vmem:[#allocation2 + $0x13c] sm:$0xf] %vm19_vm1, %v727_v3  ;;  %v461_v12 = vshll.u32 %v271_v44, 16  ;;  %v1858_v13 = vrot.slane %v1857_v63, 4  ;;  %v1483_v51 = vrot.slane %v1481_v39, 4  ;;  %v1486_v6 = vrot.slane %v1484_v2, 5 }
  0x9f   :  { %1131 = vst [vmem:[#allocation2 + $0x140] sm:$0x1] %v1130_v10  ;;  %v466_v15 = vshrl.u32 %v13144_v49, 16  ;;  %v1853_v19 = vsel %vm12789_vm13, %v1848_v7, %v1852_v50  ;;  %v1205_v0 = vld [vmem:[#allocation2 + $0x64] sm:$0xf]  ;;  %v460_v9 = vrot.slane %v458_v11, 7 }
  0xa0   :  { %v469_v21 = vshll.u32 %v13144_v49, 16  ;;  %v1863_v22 = vsel %vm12789_vm13, %v1858_v13, %v1862_v59  ;;  %v1487_v24 = vor.u32 %v1486_v6, %v1483_v51  ;;  %v1490_v25 = vshll.u32 %v1205_v0, 16  ;;  %v1020_v27 = vld [vmem:[#allocation2 + $0x6c] sm:$0xf]  ;;  %v303_v47 = vld [vmem:[%s17988_s0 + $0xc0] sm:$0xf] }
  0xa1   :  { %v1261_v23 = vld [vmem:[#allocation2 + $0x68] sm:$0x1]  ;;  %v1494_v26 = vshrl.u32 %v1205_v0, 16  ;;  %v10566_v28 = vcombine.low %v1853_v19, %v1863_v22  ;;  %v463_v33 = vor.u32 %v461_v12, %v460_v9  ;;  %v464_v34 = vrot.slane %v460_v9, 4  ;;  %v1024_v54 = vld [vmem:[#allocation2 + $0x74] sm:$0x1] }
  0xa2   :  { %v1500_v29 = vshll.u32 %v1261_v23, 16  ;;  %v1488_v35 = vrot.slane %v1487_v24, 4  ;;  %v1492_v36 = vrot.slane %v1490_v25, 5  ;;  %v468_v41 = vrot.slane %v466_v15, 7  ;;  %v304_v2 = vld [vmem:[%s17988_s0 + $0xc4] sm:$0xf] }
  0xa3   :  { %v1496_v38 = vrot.slane %v1494_v26, 4  ;;  %11631 = vmatmul.mubr.msk.bf16.gmra.mxu1 %vm2154_vm12, %v10566_v28  ;;  %v1021_v44 = vsel %vm12717_vm8, %v463_v33, %v1020_v27  ;;  %v119_v40 = vsel %vm12688_vm5, 0, %v118_v18  ;;  %v229_v45 = vsel %vm12694_vm6, 0, %v228_v62  ;;  %v67_v12 = vld [vmem:[#allocation2 + $0x78] sm:$0x1] }
  0xa4   :  { %v1502_v42 = vrot.slane %v1500_v29, 5  ;;  %v1236_v43 = vld [vmem:[#allocation2 + $0x138] sm:$0xf]  ;;  %v1493_v48 = vsel %vm12789_vm13, %v1488_v35, %v1492_v36  ;;  %1022 = vst [vmem:[#allocation2 + $0x6c] sm:$0xf] %v1021_v44  ;;  %v471_v1 = vor.u32 %v469_v21, %v468_v41  ;;  %v473_v60 = vrot.slane %v468_v41, 4 }
  0xa5   :  { %v1497_v49 = vor.u32 %v1496_v38, %v1492_v36  ;;  %v1237_v50 = vld [vmem:[#allocation2 + $0x13c] sm:$0xf]  ;;  %v1865_v46 = vshrl.u32 %v1236_v43, 16  ;;  %v1868_v53 = vshll.u32 %v1236_v43, 16  ;;  %120 = vst [vmem:[#allocation2 + $0x144] sm:$0x1] %v119_v40 }
  0xa6   :  { %230 = vst [vmem:[#allocation2 + $0x14c] sm:$0x1] %v229_v45  ;;  %v1277_v55 = vld [vmem:[#allocation2 + $0x140] sm:$0x1]  ;;  %v1874_v58 = vshll.u32 %v1237_v50, 16  ;;  %v1878_v59 = vshrl.u32 %v1237_v50, 16  ;;  %v472_v10 = vsel %vm12734_vm10, %v464_v34, %v471_v1  ;;  %v1025_v11 = vsel %vm12688_vm5, %v473_v60, %v1024_v54 }
  0xa7   :  { %v1498_v61 = vrot.slane %v1497_v49, 4  ;;  %v1867_v56 = vrot.slane %v1865_v46, 4  ;;  %v1870_v63 = vrot.slane %v1868_v53, 5  ;;  %v1884_v39 = vshll.u32 %v1277_v55, 16  ;;  %1023 = vst.msk [vmem:[#allocation2 + $0x70] sm:$0xf] %vm19_vm1, %v472_v10 }
  0xa8   :  { %v1876_v3 = vrot.slane %v1874_v58, 5  ;;  %v1880_v7 = vrot.slane %v1878_v59, 4  ;;  %1026 = vst [vmem:[#allocation2 + $0x74] sm:$0x1] %v1025_v11  ;;  %v730_v15 = vshrl.u32 %v303_v47, 16  ;;  %v733_v0 = vshll.u32 %v303_v47, 16 }
  0xa9   :  { %v1503_v13 = vsel %vm12789_vm13, %v1498_v61, %v1502_v42  ;;  %v1871_v51 = vor.u32 %v1870_v63, %v1867_v56  ;;  %v1886_v6 = vrot.slane %v1884_v39, 5  ;;  %v738_v9 = vshrl.u32 %v304_v2, 16  ;;  %v10768_v21 = vld [vmem:[%s17987_s1 + $0x6] sm:$0x3]  ;;  %v177_v25 = vld [vmem:[#allocation2 + $0x80] sm:$0x1] }
  0xaa   :  { %v10551_v18 = vcombine.low %v1493_v48, %v1503_v13  ;;  %v1881_v19 = vor.u32 %v1880_v7, %v1876_v3  ;;  %v732_v22 = vrot.slane %v730_v15, 7  ;;  %v741_v23 = vshll.u32 %v304_v2, 16  ;;  %v273_v26 = vld [vmem:[%s17988_s0 + $0x48] sm:$0xf]  ;;  %12184 = vmatprep.subr.msk.bf16.mxu1 %vm2251_vm0, %v10768_v21  ;;  %v274_v42 = vld [vmem:[%s17988_s0 + $0x4c] sm:$0xf] }
  0xab   :  { %v1872_v62 = vrot.slane %v1871_v51, 4  ;;  %v68_v24 = vsel %vm12688_vm5, 0, %v67_v12  ;;  %v1206_v28 = vld [vmem:[#allocation2 + $0x6c] sm:$0xf]  ;;  %v740_v29 = vrot.slane %v738_v9, 7  ;;  %v178_v59 = vsel %vm12694_vm6, 0, %v177_v25 }
  0xac   :  { %11602 = vmatprep.mubr.msk.bf16.mxu0 %vm2154_vm12, %v10551_v18  ;;  %v1882_v27 = vrot.slane %v1881_v19, 4  ;;  %v1132_v33 = vld [vmem:[#allocation2 + $0x144] sm:$0xf]  ;;  %69 = vst [vmem:[#allocation2 + $0x78] sm:$0x1] %v68_v24  ;;  %v1505_v35 = vshrl.u32 %v1206_v28, 16  ;;  %v735_v38 = vor.u32 %v733_v0, %v732_v22 }
  0xad   :  { %v1877_v34 = vsel %vm12789_vm13, %v1872_v62, %v1876_v3  ;;  %v1508_v36 = vshll.u32 %v1206_v28, 16  ;;  %v1136_v41 = vld [vmem:[#allocation2 + $0x14c] sm:$0x1]  ;;  %v736_v44 = vrot.slane %v732_v22, 4  ;;  %v743_v40 = vor.u32 %v741_v23, %v740_v29  ;;  %v121_v46 = vld [vmem:[#allocation2 + $0x150] sm:$0x1] }
  0xae   :  { %v1887_v43 = vsel %vm12789_vm13, %v1882_v27, %v1886_v6  ;;  %v745_v45 = vrot.slane %v740_v29, 4  ;;  %v1507_v48 = vrot.slane %v1505_v35, 4  ;;  %v1133_v50 = vsel %vm12717_vm8, %v735_v38, %v1132_v33  ;;  %v1207_v53 = vld [vmem:[#allocation2 + $0x70] sm:$0xf]  ;;  %v231_v60 = vld [vmem:[#allocation2 + $0x158] sm:$0x1] }
  0xaf   :  { %v10567_v47 = vcombine.low %v1877_v34, %v1887_v43  ;;  %v1510_v49 = vrot.slane %v1508_v36, 5  ;;  %v1262_v54 = vld [vmem:[#allocation2 + $0x74] sm:$0x1]  ;;  %v744_v55 = vsel %vm12734_vm10, %v736_v44, %v743_v40  ;;  %1134 = vst [vmem:[#allocation2 + $0x144] sm:$0xf] %v1133_v50  ;;  %v475_v1 = vshrl.u32 %v273_v26, 16 }
  0xb0   :  { %v1137_v58 = vsel %vm12688_vm5, %v745_v45, %v1136_v41  ;;  %v1514_v56 = vshll.u32 %v1207_v53, 16  ;;  %v1518_v63 = vshrl.u32 %v1207_v53, 16  ;;  %v1524_v39 = vshll.u32 %v1262_v54, 16  ;;  %1135 = vst.msk [vmem:[#allocation2 + $0x148] sm:$0xf] %vm19_vm1, %v744_v55 }
  0xb1   :  { %11634 = vmatprep.mubr.msk.bf16.mxu1 %vm2154_vm12, %v10567_v47  ;;  %v1511_v61 = vor.u32 %v1510_v49, %v1507_v48  ;;  %1138 = vst [vmem:[#allocation2 + $0x14c] sm:$0x1] %v1137_v58  ;;  %179 = vst [vmem:[#allocation2 + $0x80] sm:$0x1] %v178_v59  ;;  %v10833_v2 = vld [vmem:[%s17987_s1 + $0x8] sm:$0x3] }
  0xb2   :  { %v477_v3 = vrot.slane %v475_v1, 7  ;;  %v478_v7 = vshll.u32 %v273_v26, 16  ;;  %v483_v10 = vshrl.u32 %v274_v42, 16  ;;  %v486_v11 = vshll.u32 %v274_v42, 16  ;;  %v305_v12 = vld [vmem:[%s17988_s0 + $0xc8] sm:$0xf]  ;;  %12185 = vmatprep.subr.msk.bf16.mxu0 %vm2251_vm0, %v10833_v2 }
  0xb3   :  { %v1512_v13 = vrot.slane %v1511_v61, 4  ;;  %v1516_v51 = vrot.slane %v1514_v56, 5  ;;  %v1520_v6 = vrot.slane %v1518_v63, 4  ;;  %v1526_v15 = vrot.slane %v1524_v39, 5  ;;  %v1027_v18 = vld [vmem:[#allocation2 + $0x78] sm:$0xf] }
  0xb4   :  { %v480_v19 = vor.u32 %v478_v7, %v477_v3  ;;  %v481_v0 = vrot.slane %v477_v3, 4  ;;  %v485_v9 = vrot.slane %v483_v10, 7  ;;  %v122_v21 = vsel %vm12688_vm5, 0, %v121_v46  ;;  %v306_v62 = vld [vmem:[%s17988_s0 + $0xcc] sm:$0xf] }
  0xb5   :  { %v1517_v22 = vsel %vm12789_vm13, %v1512_v13, %v1516_v51  ;;  %v1521_v23 = vor.u32 %v1520_v6, %v1516_v51  ;;  %123 = vst [vmem:[#allocation2 + $0x150] sm:$0x1] %v122_v21  ;;  %v232_v24 = vsel %vm12694_vm6, 0, %v231_v60  ;;  %v747_v25 = vshrl.u32 %v305_v12, 16  ;;  %v70_v41 = vld [vmem:[#allocation2 + $0x84] sm:$0x1] }
  0xb6   :  { %v488_v26 = vor.u32 %v486_v11, %v485_v9  ;;  %v490_v27 = vrot.slane %v485_v9, 4  ;;  %v1028_v28 = vsel %vm12717_vm8, %v480_v19, %v1027_v18  ;;  %233 = vst [vmem:[#allocation2 + $0x158] sm:$0x1] %v232_v24  ;;  %v750_v29 = vshll.u32 %v305_v12, 16  ;;  %v1238_v34 = vld [vmem:[#allocation2 + $0x144] sm:$0xf] }
  0xb7   :  { %v1522_v33 = vrot.slane %v1521_v23, 4  ;;  %1029 = vst [vmem:[#allocation2 + $0x78] sm:$0xf] %v1028_v28  ;;  %v749_v35 = vrot.slane %v747_v25, 7  ;;  %v755_v36 = vshrl.u32 %v306_v62, 16  ;;  %v758_v38 = vshll.u32 %v306_v62, 16 }
  0xb8   :  { %v1239_v42 = vld [vmem:[#allocation2 + $0x148] sm:$0xf]  ;;  %v1278_v43 = vld [vmem:[#allocation2 + $0x14c] sm:$0x1]  ;;  %v1889_v44 = vshrl.u32 %v1238_v34, 16  ;;  %v1892_v40 = vshll.u32 %v1238_v34, 16  ;;  %v489_v45 = vsel %vm12734_vm10, %v481_v0, %v488_v26 }
  0xb9   :  { %v1527_v47 = vsel %vm12789_vm13, %v1522_v33, %v1526_v15  ;;  %v1898_v48 = vshll.u32 %v1239_v42, 16  ;;  %v1902_v49 = vshrl.u32 %v1239_v42, 16  ;;  %v1908_v50 = vshll.u32 %v1278_v43, 16  ;;  %1030 = vst.msk [vmem:[#allocation2 + $0x7c] sm:$0xf] %vm19_vm1, %v489_v45 }
  0xba   :  { %v1031_v46 = vld [vmem:[#allocation2 + $0x80] sm:$0x1]  ;;  %v10552_v53 = vcombine.low %v1517_v22, %v1527_v47  ;;  %v1891_v54 = vrot.slane %v1889_v44, 4  ;;  %v1894_v55 = vrot.slane %v1892_v40, 5  ;;  %v180_v59 = vld [vmem:[#allocation2 + $0x8c] sm:$0x1]  ;;  %v752_v63 = vor.u32 %v750_v29, %v749_v35 }
  0xbb   :  { %v1032_v58 = vsel %vm12688_vm5, %v490_v27, %v1031_v46  ;;  %v275_v1 = vld [vmem:[%s17988_s0 + $0x50] sm:$0xf]  ;;  %v1900_v60 = vrot.slane %v1898_v48, 5  ;;  %v1904_v61 = vrot.slane %v1902_v49, 4  ;;  %v1910_v56 = vrot.slane %v1908_v50, 5 }
  0xbc   :  { %1033 = vst [vmem:[#allocation2 + $0x80] sm:$0x1] %v1032_v58  ;;  %v13240_v39 = vld [vmem:[%s17988_s0 + $0x54] sm:$0xf]  ;;  %11603 = vmatmul.mubr.msk.bf16.gmra.mxu0 %vm2154_vm12, %v10552_v53  ;;  %v1895_v2 = vor.u32 %v1894_v55, %v1891_v54  ;;  %v753_v3 = vrot.slane %v749_v35, 4  ;;  %v757_v7 = vrot.slane %v755_v36, 7 }
  0xbd   :  { %v1139_v10 = vld [vmem:[#allocation2 + $0x150] sm:$0xf]  ;;  %v71_v11 = vsel %vm12688_vm5, 0, %v70_v41  ;;  %v1905_v12 = vor.u32 %v1904_v61, %v1900_v60  ;;  %v1143_v51 = vld [vmem:[#allocation2 + $0x158] sm:$0x1]  ;;  %v181_v6 = vsel %vm12694_vm6, 0, %v180_v59 }
  0xbe   :  { %v1140_v13 = vsel %vm12717_vm8, %v752_v63, %v1139_v10  ;;  %72 = vst [vmem:[#allocation2 + $0x84] sm:$0x1] %v71_v11  ;;  %v492_v15 = vshrl.u32 %v275_v1, 16  ;;  %v1896_v18 = vrot.slane %v1895_v2, 4  ;;  %v1208_v19 = vld [vmem:[#allocation2 + $0x78] sm:$0xf]  ;;  %v760_v0 = vor.u32 %v758_v38, %v757_v7 }
  0xbf   :  { %v762_v9 = vrot.slane %v757_v7, 4  ;;  %1141 = vst [vmem:[#allocation2 + $0x150] sm:$0xf] %v1140_v13  ;;  %182 = vst [vmem:[#allocation2 + $0x8c] sm:$0x1] %v181_v6  ;;  %v495_v21 = vshll.u32 %v275_v1, 16 }
  0xc0   :  { %v1906_v62 = vrot.slane %v1905_v12, 4  ;;  %v1529_v22 = vshrl.u32 %v1208_v19, 16  ;;  %v1532_v23 = vshll.u32 %v1208_v19, 16  ;;  %v494_v24 = vrot.slane %v492_v15, 7  ;;  %v1209_v26 = vld [vmem:[#allocation2 + $0x7c] sm:$0xf] }
  0xc1   :  { %v1901_v25 = vsel %vm12789_vm13, %v1896_v18, %v1900_v60  ;;  %v761_v27 = vsel %vm12734_vm10, %v753_v3, %v760_v0  ;;  %v1144_v28 = vsel %vm12688_vm5, %v762_v9, %v1143_v51  ;;  %v500_v29 = vshrl.u32 %v13240_v39, 16  ;;  %v124_v33 = vld [vmem:[#allocation2 + $0x15c] sm:$0x1]  ;;  %v234_v41 = vld [vmem:[#allocation2 + $0x164] sm:$0x1] }
  0xc2   :  { %v1911_v34 = vsel %vm12789_vm13, %v1906_v62, %v1910_v56  ;;  %v1531_v35 = vrot.slane %v1529_v22, 4  ;;  %v1534_v36 = vrot.slane %v1532_v23, 5  ;;  %v1538_v38 = vshll.u32 %v1209_v26, 16  ;;  %1142 = vst.msk [vmem:[#allocation2 + $0x154] sm:$0xf] %vm19_vm1, %v761_v27 }
  0xc3   :  { %1145 = vst [vmem:[#allocation2 + $0x158] sm:$0x1] %v1144_v28  ;;  %v10568_v42 = vcombine.low %v1901_v25, %v1911_v34  ;;  %v1263_v43 = vld [vmem:[#allocation2 + $0x80] sm:$0x1]  ;;  %v1542_v44 = vshrl.u32 %v1209_v26, 16  ;;  %v497_v40 = vor.u32 %v495_v21, %v494_v24  ;;  %v498_v45 = vrot.slane %v494_v24, 4 }
  0xc4   :  { %v307_v47 = vld [vmem:[%s17988_s0 + $0xd0] sm:$0xf]  ;;  %v1535_v48 = vor.u32 %v1534_v36, %v1531_v35  ;;  %v1540_v49 = vrot.slane %v1538_v38, 5  ;;  %v1548_v50 = vshll.u32 %v1263_v43, 16  ;;  %v502_v46 = vrot.slane %v500_v29, 7 }
  0xc5   :  { %11635 = vmatmul.mubr.msk.bf16.gmra.mxu1 %vm2154_vm12, %v10568_v42  ;;  %v1544_v53 = vrot.slane %v1542_v44, 4  ;;  %v503_v54 = vshll.u32 %v13240_v39, 16  ;;  %v1034_v55 = vld [vmem:[#allocation2 + $0x84] sm:$0xf]  ;;  %v125_v58 = vsel %vm12688_vm5, 0, %v124_v33  ;;  %v235_v59 = vsel %vm12694_vm6, 0, %v234_v41 }
  0xc6   :  { %v1536_v1 = vrot.slane %v1535_v48, 4  ;;  %v1550_v60 = vrot.slane %v1548_v50, 5  ;;  %v1240_v61 = vld [vmem:[#allocation2 + $0x150] sm:$0xf]  ;;  %v507_v56 = vrot.slane %v502_v46, 4  ;;  %v1035_v63 = vsel %vm12717_vm8, %v497_v40, %v1034_v55 }
  0xc7   :  { %126 = vst [vmem:[#allocation2 + $0x15c] sm:$0x1] %v125_v58  ;;  %236 = vst [vmem:[#allocation2 + $0x164] sm:$0x1] %v235_v59  ;;  %v308_v39 = vld [vmem:[%s17988_s0 + $0xd4] sm:$0xf]  ;;  %v1545_v2 = vor.u32 %v1544_v53, %v1540_v49  ;;  %v505_v10 = vor.u32 %v503_v54, %v502_v46 }
  0xc8   :  { %v1913_v3 = vshrl.u32 %v1240_v61, 16  ;;  %v1916_v7 = vshll.u32 %v1240_v61, 16  ;;  %1036 = vst [vmem:[#allocation2 + $0x84] sm:$0xf] %v1035_v63  ;;  %v1038_v11 = vld [vmem:[#allocation2 + $0x8c] sm:$0x1]  ;;  %v1541_v6 = vsel %vm12789_vm13, %v1536_v1, %v1540_v49 }
  0xc9   :  { %v1039_v12 = vsel %vm12688_vm5, %v507_v56, %v1038_v11  ;;  %v764_v13 = vshrl.u32 %v307_v47, 16  ;;  %v767_v51 = vshll.u32 %v307_v47, 16  ;;  %v1546_v15 = vrot.slane %v1545_v2, 4  ;;  %v1241_v18 = vld [vmem:[#allocation2 + $0x154] sm:$0xf] }
  0xca   :  { %v1279_v19 = vld [vmem:[#allocation2 + $0x158] sm:$0x1]  ;;  %v1915_v0 = vrot.slane %v1913_v3, 4  ;;  %v506_v9 = vsel %vm12734_vm10, %v498_v45, %v505_v10  ;;  %1040 = vst [vmem:[#allocation2 + $0x8c] sm:$0x1] %v1039_v12  ;;  %v1918_v21 = vrot.slane %v1916_v7, 5 }
  0xcb   :  { %v1922_v62 = vshll.u32 %v1241_v18, 16  ;;  %v1926_v22 = vshrl.u32 %v1241_v18, 16  ;;  %v1932_v23 = vshll.u32 %v1279_v19, 16  ;;  %1037 = vst.msk [vmem:[#allocation2 + $0x88] sm:$0xf] %vm19_vm1, %v506_v9  ;;  %v1551_v25 = vsel %vm12789_vm13, %v1546_v15, %v1550_v60 }
  0xcc   :  { %v73_v24 = vld [vmem:[#allocation2 + $0x90] sm:$0x1]  ;;  %v766_v26 = vrot.slane %v764_v13, 7  ;;  %v772_v27 = vshrl.u32 %v308_v39, 16  ;;  %v775_v28 = vshll.u32 %v308_v39, 16  ;;  %v10553_v33 = vcombine.low %v1541_v6, %v1551_v25 }
  0xcd   :  { %v183_v29 = vld [vmem:[#allocation2 + $0x98] sm:$0x1]  ;;  %v1919_v34 = vor.u32 %v1918_v21, %v1915_v0  ;;  %v1924_v35 = vrot.slane %v1922_v62, 5  ;;  %v1928_v36 = vrot.slane %v1926_v22, 4  ;;  %v1934_v38 = vrot.slane %v1932_v23, 5 }
  0xce   :  { %v769_v41 = vor.u32 %v767_v51, %v766_v26  ;;  %v770_v42 = vrot.slane %v766_v26, 4  ;;  %v774_v43 = vrot.slane %v772_v27, 7  ;;  %v1146_v44 = vld [vmem:[#allocation2 + $0x15c] sm:$0xf]  ;;  %11606 = vmatprep.mubr.msk.bf16.mxu0 %vm2154_vm12, %v10553_v33  ;;  %v1150_v48 = vld [vmem:[#allocation2 + $0x164] sm:$0x1] }
  0xcf   :  { %v1920_v40 = vrot.slane %v1919_v34, 4  ;;  %v1929_v45 = vor.u32 %v1928_v36, %v1924_v35  ;;  %v1210_v47 = vld [vmem:[#allocation2 + $0x84] sm:$0xf]  ;;  %v74_v49 = vsel %vm12688_vm5, 0, %v73_v24  ;;  %v277_v50 = vld [vmem:[%s17988_s0 + $0x58] sm:$0xf] }
  0xd0   :  { %v13288_v46 = vld [vmem:[#allocation2 + $0x4] sm:$0xf]  ;;  %v13290_v53 = vld [vmem:[#allocation2] sm:$0xf]  ;;  %v1553_v55 = vshrl.u32 %v1210_v47, 16  ;;  %v1556_v58 = vshll.u32 %v1210_v47, 16  ;;  %v777_v59 = vor.u32 %v775_v28, %v774_v43  ;;  %v1147_v39 = vsel %vm12717_vm8, %v769_v41, %v1146_v44 }
  0xd1   :  { %v779_v1 = vrot.slane %v774_v43, 4  ;;  %75 = vst [vmem:[#allocation2 + $0x90] sm:$0x1] %v74_v49  ;;  %v278_v60 = vld [vmem:[%s17988_s0 + $0x5c] sm:$0xf]  ;;  %v1925_v61 = vsel %vm12789_vm13, %v1920_v40, %v1924_v35  ;;  %v1930_v56 = vrot.slane %v1929_v45, 4 }
  0xd2   :  { %v1264_v63 = vld [vmem:[#allocation2 + $0x8c] sm:$0x1]  ;;  %v184_v2 = vsel %vm12694_vm6, 0, %v183_v29  ;;  %v127_v3 = vld [vmem:[#allocation2 + $0x168] sm:$0x1]  ;;  %v1555_v10 = vrot.slane %v1553_v55, 4  ;;  %v778_v13 = vsel %vm12734_vm10, %v770_v42, %v777_v59 }
  0xd3   :  { %v1211_v7 = vld [vmem:[#allocation2 + $0x88] sm:$0xf]  ;;  %v1558_v11 = vrot.slane %v1556_v58, 5  ;;  %v1572_v12 = vshll.u32 %v1264_v63, 16  ;;  %1148 = vst [vmem:[#allocation2 + $0x15c] sm:$0xf] %v1147_v39  ;;  %v1935_v51 = vsel %vm12789_vm13, %v1930_v56, %v1934_v38  ;;  %v1151_v18 = vsel %vm12688_vm5, %v779_v1, %v1150_v48 }
  0xd4   :  { %185 = vst [vmem:[#allocation2 + $0x98] sm:$0x1] %v184_v2  ;;  %v1562_v6 = vshll.u32 %v1211_v7, 16  ;;  %v1566_v15 = vshrl.u32 %v1211_v7, 16  ;;  %1149 = vst.msk [vmem:[#allocation2 + $0x160] sm:$0xf] %vm19_vm1, %v778_v13  ;;  %v10569_v9 = vcombine.low %v1925_v61, %v1935_v51 }
  0xd5   :  { %v237_v19 = vld [vmem:[#allocation2 + $0x170] sm:$0x1]  ;;  %v309_v0 = vld [vmem:[%s17988_s0 + $0xd8] sm:$0xf]  ;;  %v1559_v21 = vor.u32 %v1558_v11, %v1555_v10  ;;  %v1574_v62 = vrot.slane %v1572_v12, 5  ;;  %v509_v22 = vshrl.u32 %v277_v50, 16 }
  0xd6   :  { %1152 = vst [vmem:[#allocation2 + $0x164] sm:$0x1] %v1151_v18  ;;  %v1564_v23 = vrot.slane %v1562_v6, 5  ;;  %v1568_v24 = vrot.slane %v1566_v15, 4  ;;  %v512_v25 = vshll.u32 %v277_v50, 16  ;;  %v517_v26 = vshrl.u32 %v278_v60, 16  ;;  %11638 = vmatprep.mubr.msk.bf16.mxu1 %vm2154_vm12, %v10569_v9 }
  0xd7   :  { %v1560_v27 = vrot.slane %v1559_v21, 4  ;;  %v511_v28 = vrot.slane %v509_v22, 7  ;;  %v520_v29 = vshll.u32 %v278_v60, 16  ;;  %v128_v33 = vsel %vm12688_vm5, 0, %v127_v3  ;;  %v13318_v40 = vld [vmem:[#allocation2 + $0xc] sm:$0xf] }
  0xd8   :  { %v1569_v34 = vor.u32 %v1568_v24, %v1564_v23  ;;  %v519_v35 = vrot.slane %v517_v26, 7  ;;  %v1041_v36 = vld [vmem:[#allocation2 + $0x90] sm:$0xf]  ;;  %129 = vst [vmem:[#allocation2 + $0x168] sm:$0x1] %v128_v33  ;;  %v238_v38 = vsel %vm12694_vm6, 0, %v237_v19 }
  0xd9   :  { %v781_v41 = vshrl.u32 %v309_v0, 16  ;;  %v514_v42 = vor.u32 %v512_v25, %v511_v28  ;;  %v515_v43 = vrot.slane %v511_v28, 4  ;;  %239 = vst [vmem:[#allocation2 + $0x170] sm:$0x1] %v238_v38  ;;  %v784_v44 = vshll.u32 %v309_v0, 16 }
  0xda   :  { %v13320_v45 = vld [vmem:[#allocation2 + $0x10] sm:$0xf]  ;;  %v1565_v48 = vsel %vm12789_vm13, %v1560_v27, %v1564_v23  ;;  %v1570_v49 = vrot.slane %v1569_v34, 4  ;;  %v1242_v50 = vld [vmem:[#allocation2 + $0x15c] sm:$0xf]  ;;  %v522_v55 = vor.u32 %v520_v29, %v519_v35  ;;  %v524_v58 = vrot.slane %v519_v35, 4 }
  0xdb   :  { %v1045_v59 = vld [vmem:[#allocation2 + $0x98] sm:$0x1]  ;;  %v310_v1 = vld [vmem:[%s17988_s0 + $0xdc] sm:$0xf]  ;;  %v1243_v60 = vld [vmem:[#allocation2 + $0x160] sm:$0xf]  ;;  %v1042_v63 = vsel %vm12717_vm8, %v514_v42, %v1041_v36 }
  0xdc   :  { %v1937_v61 = vshrl.u32 %v1242_v50, 16  ;;  %v1940_v56 = vshll.u32 %v1242_v50, 16  ;;  %v783_v39 = vrot.slane %v781_v41, 7  ;;  %v76_v2 = vld [vmem:[#allocation2 + $0x9c] sm:$0x1]  ;;  %v1575_v3 = vsel %vm12789_vm13, %v1570_v49, %v1574_v62 }
  0xdd   :  { %v1280_v7 = vld [vmem:[#allocation2 + $0x164] sm:$0x1]  ;;  %v1946_v10 = vshll.u32 %v1243_v60, 16  ;;  %v1950_v11 = vshrl.u32 %v1243_v60, 16  ;;  %v523_v12 = vsel %vm12734_vm10, %v515_v43, %v522_v55  ;;  %1043 = vst [vmem:[#allocation2 + $0x90] sm:$0xf] %v1042_v63  ;;  %v10554_v6 = vcombine.low %v1565_v48, %v1575_v3 }
  0xde   :  { %v186_v13 = vld [vmem:[#allocation2 + $0xa4] sm:$0x1]  ;;  %v279_v51 = vld [vmem:[%s17988_s0 + $0x60] sm:$0xf]  ;;  %v1939_v15 = vrot.slane %v1937_v61, 4  ;;  %v1942_v18 = vrot.slane %v1940_v56, 5  ;;  %v1046_v62 = vsel %vm12688_vm5, %v524_v58, %v1045_v59  ;;  %v786_v22 = vor.u32 %v784_v44, %v783_v39 }
  0xdf   :  { %v1956_v19 = vshll.u32 %v1280_v7, 16  ;;  %1044 = vst.msk [vmem:[#allocation2 + $0x94] sm:$0xf] %vm19_vm1, %v523_v12  ;;  %v280_v0 = vld [vmem:[%s17988_s0 + $0x64] sm:$0xf]  ;;  %v1948_v9 = vrot.slane %v1946_v10, 5  ;;  %11607 = vmatmul.mubr.msk.bf16.gmra.mxu0 %vm2154_vm12, %v10554_v6 }
  0xe0   :  { %v1952_v21 = vrot.slane %v1950_v11, 4  ;;  %v1943_v23 = vor.u32 %v1942_v18, %v1939_v15  ;;  %1047 = vst [vmem:[#allocation2 + $0x98] sm:$0x1] %v1046_v62  ;;  %v787_v25 = vrot.slane %v783_v39, 4  ;;  %v789_v26 = vshrl.u32 %v310_v1, 16 }
  0xe1   :  { %v1958_v24 = vrot.slane %v1956_v19, 5  ;;  %v1153_v27 = vld [vmem:[#allocation2 + $0x168] sm:$0xf]  ;;  %v792_v29 = vshll.u32 %v310_v1, 16  ;;  %v77_v34 = vsel %vm12688_vm5, 0, %v76_v2  ;;  %v187_v38 = vsel %vm12694_vm6, 0, %v186_v13 }
  0xe2   :  { %v1953_v28 = vor.u32 %v1952_v21, %v1948_v9  ;;  %v1154_v33 = vsel %vm12717_vm8, %v786_v22, %v1153_v27  ;;  %v1944_v35 = vrot.slane %v1943_v23, 4  ;;  %v791_v36 = vrot.slane %v789_v26, 7  ;;  %78 = vst [vmem:[#allocation2 + $0x9c] sm:$0x1] %v77_v34  ;;  %188 = vst [vmem:[#allocation2 + $0xa4] sm:$0x1] %v187_v38 }
  0xe3   :  { %1155 = vst [vmem:[#allocation2 + $0x168] sm:$0xf] %v1154_v33  ;;  %v526_v41 = vshrl.u32 %v279_v51, 16  ;;  %v529_v43 = vshll.u32 %v279_v51, 16  ;;  %v534_v44 = vshrl.u32 %v280_v0, 16  ;;  %v537_v48 = vshll.u32 %v280_v0, 16 }
  0xe4   :  { %v1954_v42 = vrot.slane %v1953_v28, 4  ;;  %v1949_v49 = vsel %vm12789_vm13, %v1944_v35, %v1948_v9  ;;  %v13353_v50 = vld [vmem:[#allocation2 + $0x90] sm:$0xf]  ;;  %v794_v55 = vor.u32 %v792_v29, %v791_v36  ;;  %v796_v58 = vrot.slane %v791_v36, 4  ;;  %v130_v60 = vld [vmem:[#allocation2 + $0x174] sm:$0x1] }
  0xe5   :  { %v1157_v59 = vld [vmem:[#allocation2 + $0x170] sm:$0x1]  ;;  %v528_v1 = vrot.slane %v526_v41, 7  ;;  %v1577_v63 = vshrl.u32 %v13353_v50, 16  ;;  %v1580_v39 = vshll.u32 %v13353_v50, 16  ;;  %v536_v2 = vrot.slane %v534_v44, 7 }
  0xe6   :  { %v1959_v61 = vsel %vm12789_vm13, %v1954_v42, %v1958_v24  ;;  %v13357_v56 = vld [vmem:[#allocation2 + $0x94] sm:$0xf]  ;;  %v795_v11 = vsel %vm12734_vm10, %v787_v25, %v794_v55  ;;  %v1158_v6 = vsel %vm12688_vm5, %v796_v58, %v1157_v59  ;;  %v240_v18 = vld [vmem:[#allocation2 + $0x17c] sm:$0x1]  ;;  %v311_v62 = vld [vmem:[%s17988_s0 + $0xe0] sm:$0xf] }
  0xe7   :  { %v10570_v3 = vcombine.low %v1949_v49, %v1959_v61  ;;  %v1586_v7 = vshll.u32 %v13357_v56, 16  ;;  %v1590_v10 = vshrl.u32 %v13357_v56, 16  ;;  %v13365_v12 = vld [vmem:[#allocation2 + $0x98] sm:$0x1]  ;;  %v1579_v13 = vrot.slane %v1577_v63, 4 }
  0xe8   :  { %v1582_v51 = vrot.slane %v1580_v39, 5  ;;  %1156 = vst.msk [vmem:[#allocation2 + $0x16c] sm:$0xf] %vm19_vm1, %v795_v11  ;;  %v531_v15 = vor.u32 %v529_v43, %v528_v1  ;;  %v1596_v9 = vshll.u32 %v13365_v12, 16  ;;  %1159 = vst [vmem:[#allocation2 + $0x170] sm:$0x1] %v1158_v6  ;;  %v539_v25 = vor.u32 %v537_v48, %v536_v2 }
  0xe9   :  { %11639 = vmatmul.mubr.msk.bf16.gmra.mxu1 %vm2154_vm12, %v10570_v3  ;;  %v1588_v19 = vrot.slane %v1586_v7, 5  ;;  %v1592_v0 = vrot.slane %v1590_v10, 4  ;;  %v532_v21 = vrot.slane %v528_v1, 4  ;;  %v312_v22 = vld [vmem:[%s17988_s0 + $0xe4] sm:$0xf]  ;;  %v541_v26 = vrot.slane %v536_v2, 4 }
  0xea   :  { %v1583_v23 = vor.u32 %v1582_v51, %v1579_v13  ;;  %v1244_v24 = vld [vmem:[#allocation2 + $0x168] sm:$0xf]  ;;  %v1048_v27 = vld [vmem:[#allocation2 + $0x9c] sm:$0xf]  ;;  %v131_v28 = vsel %vm12688_vm5, 0, %v130_v60  ;;  %v1598_v34 = vrot.slane %v1596_v9, 5 }
  0xeb   :  { %v79_v29 = vld [vmem:[#allocation2 + $0xa8] sm:$0x1]  ;;  %v1593_v33 = vor.u32 %v1592_v0, %v1588_v19  ;;  %v1961_v35 = vshrl.u32 %v1244_v24, 16  ;;  %v1964_v36 = vshll.u32 %v1244_v24, 16  ;;  %v1052_v38 = vld [vmem:[#allocation2 + $0xa4] sm:$0x1]  ;;  %v540_v42 = vsel %vm12734_vm10, %v532_v21, %v539_v25 }
  0xec   :  { %132 = vst [vmem:[#allocation2 + $0x174] sm:$0x1] %v131_v28  ;;  %v1584_v41 = vrot.slane %v1583_v23, 4  ;;  %v1049_v43 = vsel %vm12717_vm8, %v531_v15, %v1048_v27  ;;  %v1053_v44 = vsel %vm12688_vm5, %v541_v26, %v1052_v38  ;;  %1051 = vst.msk [vmem:[#allocation2 + $0xa0] sm:$0xf] %vm19_vm1, %v540_v42  ;;  %v241_v58 = vsel %vm12694_vm6, 0, %v240_v18 }
  0xed   :  { %v1594_v48 = vrot.slane %v1593_v33, 4  ;;  %v1963_v49 = vrot.slane %v1961_v35, 4  ;;  %v1966_v55 = vrot.slane %v1964_v36, 5  ;;  %1050 = vst [vmem:[#allocation2 + $0x9c] sm:$0xf] %v1049_v43  ;;  %v798_v60 = vshrl.u32 %v311_v62, 16 }
  0xee   :  { %1054 = vst [vmem:[#allocation2 + $0xa4] sm:$0x1] %v1053_v44  ;;  %v189_v59 = vld [vmem:[#allocation2 + $0xb0] sm:$0x1]  ;;  %v1589_v1 = vsel %vm12789_vm13, %v1584_v41, %v1588_v19  ;;  %242 = vst [vmem:[#allocation2 + $0x17c] sm:$0x1] %v241_v58 }
  0xef   :  { %v801_v61 = vshll.u32 %v311_v62, 16  ;;  %v806_v63 = vshrl.u32 %v312_v22, 16  ;;  %v13394_v39 = vld [vmem:[%s17988_s0 + $0x68] sm:$0xf]  ;;  %v1599_v2 = vsel %vm12789_vm13, %v1594_v48, %v1598_v34  ;;  %v1245_v3 = vld [vmem:[#allocation2 + $0x16c] sm:$0xf]  ;;  %v1967_v7 = vor.u32 %v1966_v55, %v1963_v49 }
  0xf0   :  { %v809_v10 = vshll.u32 %v312_v22, 16  ;;  %v80_v11 = vsel %vm12688_vm5, 0, %v79_v29  ;;  %v10555_v13 = vcombine.low %v1589_v1, %v1599_v2  ;;  %v1281_v51 = vld [vmem:[#allocation2 + $0x170] sm:$0x1]  ;;  %v1970_v6 = vshll.u32 %v1245_v3, 16 }
  0xf1   :  { %v1974_v15 = vshrl.u32 %v1245_v3, 16  ;;  %v800_v18 = vrot.slane %v798_v60, 7  ;;  %81 = vst [vmem:[#allocation2 + $0xa8] sm:$0x1] %v80_v11  ;;  %v1968_v19 = vrot.slane %v1967_v7, 4  ;;  %v1980_v0 = vshll.u32 %v1281_v51, 16 }
  0xf2   :  { %v808_v9 = vrot.slane %v806_v63, 7  ;;  %v190_v21 = vsel %vm12694_vm6, 0, %v189_v59  ;;  %11610 = vmatprep.mubr.msk.bf16.mxu0 %vm2154_vm12, %v10555_v13  ;;  %v1972_v62 = vrot.slane %v1970_v6, 5  ;;  %v543_v29 = vshrl.u32 %v13394_v39, 16  ;;  %v282_v42 = vld [vmem:[%s17988_s0 + $0x6c] sm:$0xf] }
  0xf3   :  { %v1976_v23 = vrot.slane %v1974_v15, 4  ;;  %v803_v22 = vor.u32 %v801_v61, %v800_v18  ;;  %v804_v24 = vrot.slane %v800_v18, 4  ;;  %v1160_v25 = vld [vmem:[#allocation2 + $0x174] sm:$0xf]  ;;  %191 = vst [vmem:[#allocation2 + $0xb0] sm:$0x1] %v190_v21 }
  0xf4   :  { %v1982_v26 = vrot.slane %v1980_v0, 5  ;;  %v811_v27 = vor.u32 %v809_v10, %v808_v9  ;;  %v813_v28 = vrot.slane %v808_v9, 4  ;;  %v1973_v33 = vsel %vm12789_vm13, %v1968_v19, %v1972_v62  ;;  %v13406_v35 = vld [vmem:[#allocation2 + $0x9c] sm:$0xf]  ;;  %v13408_v36 = vld [vmem:[#allocation2 + $0xa0] sm:$0xf] }
  0xf5   :  { %v1977_v34 = vor.u32 %v1976_v23, %v1972_v62  ;;  %v13410_v38 = vld [vmem:[#allocation2 + $0xa4] sm:$0x1]  ;;  %v1161_v41 = vsel %vm12717_vm8, %v803_v22, %v1160_v25  ;;  %v13417_v43 = vld [vmem:[#allocation2 + $0x18] sm:$0xf]  ;;  %v13419_v44 = vld [vmem:[#allocation2 + $0x1c] sm:$0xf] }
  0xf6   :  { %v1601_v49 = vshrl.u32 %v13406_v35, 16  ;;  %v1604_v55 = vshll.u32 %v13406_v35, 16  ;;  %v1610_v58 = vshll.u32 %v13408_v36, 16  ;;  %v1614_v59 = vshrl.u32 %v13408_v36, 16  ;;  %1162 = vst [vmem:[#allocation2 + $0x174] sm:$0xf] %v1161_v41 }
  0xf7   :  { %v1164_v1 = vld [vmem:[#allocation2 + $0x17c] sm:$0x1]  ;;  %v1978_v60 = vrot.slane %v1977_v34, 4  ;;  %v1620_v61 = vshll.u32 %v13410_v38, 16  ;;  %v812_v63 = vsel %vm12734_vm10, %v804_v24, %v811_v27  ;;  %v133_v3 = vld [vmem:[#allocation2 + $0x180] sm:$0x1] }
  0xf8   :  { %v1165_v2 = vsel %vm12688_vm5, %v813_v28, %v1164_v1  ;;  %v243_v7 = vld [vmem:[#allocation2 + $0x188] sm:$0x1]  ;;  %v1603_v10 = vrot.slane %v1601_v49, 4  ;;  %v1606_v11 = vrot.slane %v1604_v55, 5  ;;  %v1612_v13 = vrot.slane %v1610_v58, 5 }
  0xf9   :  { %v1616_v51 = vrot.slane %v1614_v59, 4  ;;  %1163 = vst.msk [vmem:[#allocation2 + $0x178] sm:$0xf] %vm19_vm1, %v812_v63  ;;  %1166 = vst [vmem:[#allocation2 + $0x17c] sm:$0x1] %v1165_v2  ;;  %v1983_v15 = vsel %vm12789_vm13, %v1978_v60, %v1982_v26  ;;  %v1622_v18 = vrot.slane %v1620_v61, 5 }
  0xfa   :  { %v313_v6 = vld [vmem:[%s17988_s0 + $0xe8] sm:$0xf]  ;;  %v545_v19 = vrot.slane %v543_v29, 7  ;;  %v546_v0 = vshll.u32 %v13394_v39, 16  ;;  %v13442_v9 = vld [vmem:[%s17988_s0 + $0xec] sm:$0xf]  ;;  %v10571_v21 = vcombine.low %v1973_v33, %v1983_v15  ;;  %v1607_v62 = vor.u32 %v1606_v11, %v1603_v10 }
  0xfb   :  { %v1617_v23 = vor.u32 %v1616_v51, %v1612_v13  ;;  %v551_v22 = vshrl.u32 %v282_v42, 16  ;;  %v1055_v24 = vld [vmem:[#allocation2 + $0xa8] sm:$0xf]  ;;  %v554_v28 = vshll.u32 %v282_v42, 16  ;;  %v134_v26 = vsel %vm12688_vm5, 0, %v133_v3 }
  0xfc   :  { %v548_v25 = vor.u32 %v546_v0, %v545_v19  ;;  %v549_v27 = vrot.slane %v545_v19, 4  ;;  %11642 = vmatprep.mubr.msk.bf16.mxu1 %vm2154_vm12, %v10571_v21  ;;  %v1608_v29 = vrot.slane %v1607_v62, 4  ;;  %135 = vst [vmem:[#allocation2 + $0x180] sm:$0x1] %v134_v26  ;;  %v244_v41 = vsel %vm12694_vm6, 0, %v243_v7 }
  0xfd   :  { %v1618_v39 = vrot.slane %v1617_v23, 4  ;;  %v553_v34 = vrot.slane %v551_v22, 7  ;;  %v1246_v33 = vld [vmem:[#allocation2 + $0x174] sm:$0xf]  ;;  %245 = vst [vmem:[#allocation2 + $0x188] sm:$0x1] %v244_v41 }
  0xfe   :  { %v1056_v49 = vsel %vm12717_vm8, %v548_v25, %v1055_v24  ;;  %v815_v55 = vshrl.u32 %v313_v6, 16  ;;  %v818_v58 = vshll.u32 %v313_v6, 16  ;;  %v823_v42 = vshrl.u32 %v13442_v9, 16  ;;  %v1059_v63 = vld [vmem:[#allocation2 + $0xb0] sm:$0x1] }
  0xff   :  { %v1613_v59 = vsel %vm12789_vm13, %v1608_v29, %v1612_v13  ;;  %v1623_v1 = vsel %vm12789_vm13, %v1618_v39, %v1622_v18  ;;  %v1985_v60 = vshrl.u32 %v1246_v33, 16  ;;  %v1988_v61 = vshll.u32 %v1246_v33, 16  ;;  %1057 = vst [vmem:[#allocation2 + $0xa8] sm:$0xf] %v1056_v49  ;;  %v82_v2 = vld [vmem:[#allocation2 + $0xb4] sm:$0x1] }
 0x100   :  { %v10556_v3 = vcombine.low %v1613_v59, %v1623_v1  ;;  %v1247_v7 = vld [vmem:[#allocation2 + $0x178] sm:$0xf]  ;;  %v1282_v10 = vld [vmem:[#allocation2 + $0x17c] sm:$0x1]  ;;  %v556_v11 = vor.u32 %v554_v28, %v553_v34  ;;  %v558_v51 = vrot.slane %v553_v34, 4  ;;  %v817_v15 = vrot.slane %v815_v55, 7 }
 0x101   :  { %v192_v6 = vld [vmem:[#allocation2 + $0xbc] sm:$0x1]  ;;  %v1987_v19 = vrot.slane %v1985_v60, 4  ;;  %v1990_v0 = vrot.slane %v1988_v61, 5  ;;  %v1994_v21 = vshll.u32 %v1247_v7, 16  ;;  %v1998_v62 = vshrl.u32 %v1247_v7, 16 }
 0x102   :  { %v283_v13 = vld [vmem:[%s17988_s0 + $0x70] sm:$0xf]  ;;  %11611 = vmatmul.mubr.msk.bf16.gmra.mxu0 %vm2154_vm12, %v10556_v3  ;;  %v2004_v18 = vshll.u32 %v1282_v10, 16  ;;  %v557_v23 = vsel %vm12734_vm10, %v549_v27, %v556_v11  ;;  %v1060_v22 = vsel %vm12688_vm5, %v558_v51, %v1059_v63  ;;  %v820_v24 = vor.u32 %v818_v58, %v817_v15  ;;  %v284_v39 = vld [vmem:[%s17988_s0 + $0x74] sm:$0xf] }
 0x103   :  { %v1991_v25 = vor.u32 %v1990_v0, %v1987_v19  ;;  %v1996_v28 = vrot.slane %v1994_v21, 5  ;;  %v2000_v26 = vrot.slane %v1998_v62, 4  ;;  %1058 = vst.msk [vmem:[#allocation2 + $0xac] sm:$0xf] %vm19_vm1, %v557_v23  ;;  %1061 = vst [vmem:[#allocation2 + $0xb0] sm:$0x1] %v1060_v22 }
 0x104   :  { %v821_v29 = vrot.slane %v817_v15, 4  ;;  %v2006_v34 = vrot.slane %v2004_v18, 5  ;;  %v825_v41 = vrot.slane %v823_v42, 7  ;;  %v826_v33 = vshll.u32 %v13442_v9, 16  ;;  %v1167_v27 = vld [vmem:[#allocation2 + $0x180] sm:$0xf] }
 0x105   :  { %v83_v49 = vsel %vm12688_vm5, 0, %v82_v2  ;;  %v1992_v55 = vrot.slane %v1991_v25, 4  ;;  %v2001_v58 = vor.u32 %v2000_v26, %v1996_v28  ;;  %v1168_v59 = vsel %vm12717_vm8, %v820_v24, %v1167_v27  ;;  %v1171_v1 = vld [vmem:[#allocation2 + $0x188] sm:$0x1]  ;;  %v136_v0 = vld [vmem:[#allocation2 + $0x18c] sm:$0x1] }
 0x106   :  { %84 = vst [vmem:[#allocation2 + $0xb4] sm:$0x1] %v83_v49  ;;  %v193_v60 = vsel %vm12694_vm6, 0, %v192_v6  ;;  %v13475_v61 = vld [vmem:[#allocation2 + $0xa8] sm:$0xf]  ;;  %v828_v63 = vor.u32 %v826_v33, %v825_v41  ;;  %v830_v42 = vrot.slane %v825_v41, 4 }
 0x107   :  { %1169 = vst [vmem:[#allocation2 + $0x180] sm:$0xf] %v1168_v59  ;;  %194 = vst [vmem:[#allocation2 + $0xbc] sm:$0x1] %v193_v60  ;;  %v560_v9 = vshrl.u32 %v283_v13, 16  ;;  %v563_v3 = vshll.u32 %v283_v13, 16  ;;  %v1997_v2 = vsel %vm12789_vm13, %v1992_v55, %v1996_v28 }
 0x108   :  { %v2002_v7 = vrot.slane %v2001_v58, 4  ;;  %v1625_v10 = vshrl.u32 %v13475_v61, 16  ;;  %v1628_v11 = vshll.u32 %v13475_v61, 16  ;;  %v829_v51 = vsel %vm12734_vm10, %v821_v29, %v828_v63  ;;  %v246_v21 = vld [vmem:[#allocation2 + $0x194] sm:$0x1] }
 0x109   :  { %v1172_v15 = vsel %vm12688_vm5, %v830_v42, %v1171_v1  ;;  %v562_v6 = vrot.slane %v560_v9, 7  ;;  %v568_v19 = vshrl.u32 %v284_v39, 16  ;;  %1170 = vst.msk [vmem:[#allocation2 + $0x184] sm:$0xf] %vm19_vm1, %v829_v51  ;;  %v571_v23 = vshll.u32 %v284_v39, 16 }
 0x10a   :  { %v2007_v62 = vsel %vm12789_vm13, %v2002_v7, %v2006_v34  ;;  %v1627_v13 = vrot.slane %v1625_v10, 4  ;;  %v1630_v18 = vrot.slane %v1628_v11, 5  ;;  %1173 = vst [vmem:[#allocation2 + $0x188] sm:$0x1] %v1172_v15  ;;  %v13488_v24 = vld [vmem:[#allocation2 + $0xac] sm:$0xf] }
 0x10b   :  { %v10572_v22 = vcombine.low %v1997_v2, %v2007_v62  ;;  %v13490_v25 = vld [vmem:[#allocation2 + $0xb0] sm:$0x1]  ;;  %v565_v28 = vor.u32 %v563_v3, %v562_v6  ;;  %v566_v26 = vrot.slane %v562_v6, 4  ;;  %v570_v29 = vrot.slane %v568_v19, 7  ;;  %v13505_v3 = vld [vmem:[#allocation2 + $0x24] sm:$0xf] }
 0x10c   :  { %v315_v41 = vld [vmem:[%s17988_s0 + $0xf0] sm:$0xf]  ;;  %v1631_v33 = vor.u32 %v1630_v18, %v1627_v13  ;;  %v1634_v34 = vshll.u32 %v13488_v24, 16  ;;  %v1638_v27 = vshrl.u32 %v13488_v24, 16  ;;  %v1644_v49 = vshll.u32 %v13490_v25, 16 }
 0x10d   :  { %11643 = vmatmul.mubr.msk.bf16.gmra.mxu1 %vm2154_vm12, %v10572_v22  ;;  %v573_v39 = vor.u32 %v571_v23, %v570_v29  ;;  %v575_v55 = vrot.slane %v570_v29, 4  ;;  %v1062_v58 = vld [vmem:[#allocation2 + $0xb4] sm:$0xf]  ;;  %v137_v59 = vsel %vm12688_vm5, 0, %v136_v0  ;;  %v247_v1 = vsel %vm12694_vm6, 0, %v246_v21 }
 0x10e   :  { %v1632_v60 = vrot.slane %v1631_v33, 4  ;;  %v1636_v63 = vrot.slane %v1634_v34, 5  ;;  %v1640_v42 = vrot.slane %v1638_v27, 4  ;;  %v13503_v9 = vld [vmem:[#allocation2 + $0x180] sm:$0xf]  ;;  %v1063_v15 = vsel %vm12717_vm8, %v565_v28, %v1062_v58 }
 0x10f   :  { %18098 = vst [vmem:[#allocation8_spill] sm:$0xff] %v13503_v9  ;;  %138 = vst [vmem:[#allocation2 + $0x18c] sm:$0x1] %v137_v59  ;;  %v13507_v2 = vld [vmem:[#allocation2 + $0x28] sm:$0xf]  ;;  %v2009_v10 = vshrl.u32 %v13503_v9, 16  ;;  %v574_v51 = vsel %vm12734_vm10, %v566_v26, %v573_v39 }
 0x110   :  { %248 = vst [vmem:[#allocation2 + $0x194] sm:$0x1] %v247_v1  ;;  %v2012_v11 = vshll.u32 %v13503_v9, 16  ;;  %v1066_v6 = vld [vmem:[#allocation2 + $0xbc] sm:$0x1]  ;;  %v1641_v19 = vor.u32 %v1640_v42, %v1636_v63  ;;  %v1646_v0 = vrot.slane %v1644_v49, 5  ;;  %v1637_v18 = vsel %vm12789_vm13, %v1632_v60, %v1636_v63 }
 0x111   :  { %1064 = vst [vmem:[#allocation2 + $0xb4] sm:$0xf] %v1063_v15  ;;  %1065 = vst.msk [vmem:[#allocation2 + $0xb8] sm:$0xf] %vm19_vm1, %v574_v51  ;;  %v1067_v21 = vsel %vm12688_vm5, %v575_v55, %v1066_v6  ;;  %v316_v62 = vld [vmem:[%s17988_s0 + $0xf4] sm:$0xf] }
 0x112   :  { %v832_v13 = vshrl.u32 %v315_v41, 16  ;;  %v13525_v23 = vld [vmem:[#allocation2 + $0x184] sm:$0xf]  ;;  %v13527_v22 = vld [vmem:[#allocation2 + $0x188] sm:$0x1]  ;;  %v2011_v28 = vrot.slane %v2009_v10, 4 }
 0x113   :  { %18099 = vst [vmem:[#allocation9_spill] sm:$0xff] %v13525_v23  ;;  %18100 = vst [vmem:[#allocation10_spill] sm:$0xff] %v13527_v22  ;;  %v2014_v26 = vrot.slane %v2012_v11, 5  ;;  %v13529_v29 = vld [vmem:[#allocation2 + $0x30] sm:$0xf]  ;;  %v1642_v27 = vrot.slane %v1641_v19, 4 }
 0x114   :  { %1068 = vst [vmem:[#allocation2 + $0xbc] sm:$0x1] %v1067_v21  ;;  %v13531_v33 = vld [vmem:[#allocation2 + $0x34] sm:$0xf]  ;;  %v2018_v49 = vshll.u32 %v13525_v23, 16  ;;  %v2022_v39 = vshrl.u32 %v13525_v23, 16 }
 0x115   :  { %v2028_v55 = vshll.u32 %v13527_v22, 16  ;;  %v13538_v58 = vld [vmem:[#allocation2] sm:$0xe]  ;;  %v2015_v59 = vor.u32 %v2014_v26, %v2011_v28  ;;  %v834_v1 = vrot.slane %v832_v13, 7  ;;  %v835_v60 = vshll.u32 %v315_v41, 16 }
 0x116   :  { %v840_v63 = vshrl.u32 %v316_v62, 16  ;;  %v1647_v42 = vsel %vm12789_vm13, %v1642_v27, %v1646_v0  ;;  %v2020_v10 = vrot.slane %v2018_v49, 5  ;;  %v2024_v11 = vrot.slane %v2022_v39, 4  ;;  %v1174_v30 = vld [vmem:[#allocation2 + $0x18c] sm:$0xf] }
 0x117   :  { %v2030_v51 = vrot.slane %v2028_v55, 5  ;;  %v10557_v15 = vcombine.low %v1637_v18, %v1647_v42  ;;  %v2016_v6 = vrot.slane %v2015_v59, 4  ;;  %v837_v19 = vor.u32 %v835_v60, %v834_v1  ;;  %v3095_v54 = vld [vmem:[#allocation2 + $0x24] sm:$0xe]  ;;  %v3098_v23 = vld [vmem:[#allocation2 + $0x48] sm:$0xe] }
 0x118   :  { %v838_v21 = vrot.slane %v834_v1, 4  ;;  %v2025_v34 = vor.u32 %v2024_v11, %v2020_v10  ;;  %v842_v7 = vrot.slane %v840_v63, 7  ;;  %v843_v48 = vshll.u32 %v316_v62, 16  ;;  %v13545_v13 = vld [vmem:[#allocation2 + $0xb4] sm:$0xf] }
 0x119   :  { %11614 = vmatprep.mubr.msk.bf16.mxu0 %vm2154_vm12, %v10557_v15  ;;  %v2021_v41 = vsel %vm12789_vm13, %v2016_v6, %v2020_v10  ;;  %v13547_v0 = vld [vmem:[#allocation2 + $0xb8] sm:$0xf]  ;;  %v1175_v18 = vsel %vm12717_vm8, %v837_v19, %v1174_v30  ;;  %vm3189_vm15 = vcmask 1046532   ;;  %v10671_v28 = vrot.slane %v13538_v58, 9  ;;  %v1178_v30 = vld [vmem:[#allocation2 + $0x194] sm:$0x1] }
 0x11a   :  { %v2026_v26 = vrot.slane %v2025_v34, 4  ;;  %v1649_v62 = vshrl.u32 %v13545_v13, 16  ;;  %v1652_v49 = vshll.u32 %v13545_v13, 16  ;;  %v1658_v39 = vshll.u32 %v13547_v0, 16  ;;  %1176 = vst [vmem:[#allocation2 + $0x18c] sm:$0xf] %v1175_v18  ;;  %vm13565_vm2 = vmor %vm3188_vm14, %vm3189_vm15 }
 0x11b   :  { %v13552_v27 = vld [vmem:[#allocation2 + $0xbc] sm:$0x1]  ;;  %v1662_v55 = vshrl.u32 %v13547_v0, 16  ;;  %v845_v1 = vor.u32 %v843_v48, %v842_v7  ;;  %v847_v60 = vrot.slane %v842_v7, 4  ;;  %v3093_v10 = vld [vmem:[#allocation2 + $0xc] sm:$0xe] }
 0x11c   :  { %v1668_v59 = vshll.u32 %v13552_v27, 16  ;;  %v2031_v58 = vsel %vm12789_vm13, %v2026_v26, %v2030_v51  ;;  %v1651_v34 = vrot.slane %v1649_v62, 4  ;;  %v1654_v63 = vrot.slane %v1652_v49, 5  ;;  %v13569_v48 = vld [vmem:[#allocation2 + $0x3c] sm:$0xf] }
 0x11d   :  { %v1660_v42 = vrot.slane %v1658_v39, 5  ;;  %v10573_v11 = vcombine.low %v2021_v41, %v2031_v58  ;;  %v1664_v15 = vrot.slane %v1662_v55, 4  ;;  %v846_v6 = vsel %vm12734_vm10, %v838_v21, %v845_v1  ;;  %v13571_v7 = vld [vmem:[#allocation2 + $0x40] sm:$0xf]  ;;  %v13579_v26 = vld [vmem:[#allocation2 + $0x48] sm:$0xf] }
 0x11e   :  { %v1655_v18 = vor.u32 %v1654_v63, %v1651_v34  ;;  %1177 = vst.msk [vmem:[#allocation2 + $0x190] sm:$0xf] %vm19_vm1, %v846_v6  ;;  %v1179_v41 = vsel %vm12688_vm5, %v847_v60, %v1178_v30  ;;  %v3193_v21 = vrot.slane %v13288_v46, 5  ;;  %v13581_v62 = vld [vmem:[#allocation2 + $0x4c] sm:$0xf]  ;;  %v1670_v55 = vrot.slane %v1668_v59, 5 }
 0x11f   :  { %11646 = vmatprep.mubr.msk.bf16.mxu1 %vm2154_vm12, %v10573_v11  ;;  %v1665_v39 = vor.u32 %v1664_v15, %v1660_v42  ;;  %1180 = vst [vmem:[#allocation2 + $0x194] sm:$0x1] %v1179_v41  ;;  %v10672_v1 = vrot.slane %v3093_v10, 9  ;;  %v3094_v58 = vld [vmem:[#allocation2 + $0x18] sm:$0xe]  ;;  %v3202_v41 = vrot.slane %v3200_v52, 4 }
 0x120   :  { %v13586_v34 = vld [vmem:[#allocation2 + $0x54] sm:$0xf]  ;;  %v13588_v63 = vld [vmem:[#allocation2 + $0x58] sm:$0xf]  ;;  %v1656_v30 = vrot.slane %v1655_v18, 4  ;;  %v3194_v6 = vsel %vm13565_vm2, %v10671_v28, %v3193_v21  ;;  %v3195_v51 = vrot.slane %v3193_v21, 4 }
 0x121   :  { %v13594_v49 = vld [vmem:[#allocation2 + $0x60] sm:$0xf]  ;;  %v13596_v11 = vld [vmem:[#allocation2 + $0x64] sm:$0xf]  ;;  %v1666_v10 = vrot.slane %v1665_v39, 4  ;;  %v3207_v21 = vrot.slane %v13419_v44, 5  ;;  %v3201_v20 = vsel %vm13565_vm2, %v10672_v1, %v3200_v52 }
 0x122   :  { %v13600_v15 = vld [vmem:[#allocation2 + $0x18c] sm:$0xf]  ;;  %v12530_v18 = vld [vmem:[%s17987_s1 + $0x8] sm:$0x3]  ;;  %v1661_v60 = vsel %vm12789_vm13, %v1656_v30, %v1660_v42  ;;  %v3197_v47 = vsel %vm13565_vm2, %v3195_v51, %v3196_v14  ;;  %v10673_v42 = vrot.slane %v3094_v58, 9  ;;  %v18105_v14 = vrot.slane %v12803_v37, 5 }
 0x123   :  { %18103 = vst [vmem:[#allocation11_spill] sm:$0xff] %v13600_v15  ;;  %v13608_v28 = vsel %vm2251_vm0, %v12530_v18, 0  ;;  %v2033_v59 = vshrl.u32 %v13600_v15, 16  ;;  %v2036_v39 = vshll.u32 %v13600_v15, 16  ;;  %v1671_v57 = vsel %vm12789_vm13, %v1666_v10, %v1670_v55  ;;  %v3096_v30 = vld [vmem:[#allocation2 + $0x30] sm:$0xe] }
 0x124   :  { %v10704_v18 = vcombine.low %v3194_v6, %v3197_v47  ;;  %v10558_v32 = vcombine.low %v1661_v60, %v1671_v57  ;;  %v3209_v22 = vrot.slane %v3207_v21, 4  ;;  %v3204_v51 = vsel %vm13565_vm2, %v3202_v41, %v18105_v14  ;;  %v12531_v55 = vld [vmem:[#allocation2 + $0x20] sm:$0x1]  ;;  %v3097_v10 = vld [vmem:[#allocation2 + $0x3c] sm:$0xe] }
 0x125   :  { %v2035_v5 = vrot.slane %v2033_v59, 4  ;;  %v2038_v4 = vrot.slane %v2036_v39, 5  ;;  %v13625_v8 = vld [vmem:[#allocation2 + $0x190] sm:$0xf]  ;;  %v3210_v47 = vrot.slane %v12531_v55, 5  ;;  %v10674_v6 = vrot.slane %v3095_v54, 9 }
 0x126   :  { %18104 = vst [vmem:[#allocation12_spill] sm:$0xff] %v13625_v8  ;;  %v3214_v31 = vrot.slane %v13507_v2, 5  ;;  %11615 = vmatmul.mubr.msk.bf16.gmra.mxu0 %vm2154_vm12, %v10558_v32  ;;  %v13633_v52 = vld [vmem:[#allocation2 + $0x194] sm:$0x1]  ;;  %v2042_v1 = vshll.u32 %v13625_v8, 16  ;;  %v2046_v58 = vshrl.u32 %v13625_v8, 16  ;;  %v3208_v54 = vsel %vm13565_vm2, %v10673_v42, %v3207_v21 }
 0x127   :  { %18106 = vst [vmem:[#allocation13_spill] sm:$0xff] %v13633_v52  ;;  %v2039_v57 = vor.u32 %v2038_v4, %v2035_v5  ;;  %v12532_v60 = vld [vmem:[#allocation2 + $0x2c] sm:$0x1]  ;;  %v2052_v59 = vshll.u32 %v13633_v52, 16  ;;  %11718 = vmatprep.mubr.msk.bf16.mxu0 %vm2154_vm12, %v10704_v18  ;;  %v3211_v41 = vsel %vm13565_vm2, %v3209_v22, %v3210_v47  ;;  %v10675_v5 = vrot.slane %v3096_v30, 9 }
 0x128   :  { %v3217_v37 = vrot.slane %v12532_v60, 5  ;;  %v3216_v32 = vrot.slane %v3214_v31, 4  ;;  %v2044_v14 = vrot.slane %v2042_v1, 5  ;;  %v2048_v4 = vrot.slane %v2046_v58, 4  ;;  %v12533_v52 = vld [vmem:[#allocation2 + $0x38] sm:$0x1] }
 0x129   :  { %v2040_v39 = vrot.slane %v2039_v57, 4  ;;  %v10705_v55 = vcombine.low %v3201_v20, %v3204_v51  ;;  %v13645_v15 = vsel %vm13565_vm2, %v10674_v6, %v3214_v31  ;;  %v3221_v60 = vrot.slane %v13531_v33, 5  ;;  %v12534_v30 = vld [vmem:[#allocation2 + $0x44] sm:$0x1]  ;;  %v3099_v6 = vld [vmem:[#allocation2 + $0x54] sm:$0xe] }
 0x12a   :  { %v3224_v18 = vrot.slane %v12533_v52, 5  ;;  %v2049_v8 = vor.u32 %v2048_v4, %v2044_v14  ;;  %v2054_v9 = vrot.slane %v2052_v59, 5  ;;  %v10706_v21 = vcombine.low %v3208_v54, %v3211_v41  ;;  %v12535_v59 = vld [vmem:[#allocation2 + $0x50] sm:$0x1]  ;;  %v3100_v41 = vld [vmem:[#allocation2 + $0x60] sm:$0xe] }
 0x12b   :  { %v10676_v42 = vrot.slane %v3097_v10, 9  ;;  %v13650_v22 = vsel %vm13565_vm2, %v3216_v32, %v3217_v37  ;;  %v3223_v47 = vrot.slane %v3221_v60, 4  ;;  %v3228_v20 = vrot.slane %v13571_v7, 5  ;;  %v3101_v4 = vld [vmem:[#allocation2 + $0x6c] sm:$0xe] }
 0x12c   :  { %v3231_v51 = vrot.slane %v12534_v30, 5  ;;  %v2045_v31 = vsel %vm12789_vm13, %v2040_v39, %v2044_v14  ;;  %v2050_v57 = vrot.slane %v2049_v8, 4  ;;  %v13657_v52 = vsel %vm13565_vm2, %v10675_v5, %v3221_v60  ;;  %v12536_v60 = vld [vmem:[#allocation2 + $0x5c] sm:$0x1] }
 0x12d   :  { %v3235_v10 = vrot.slane %v13581_v62, 5  ;;  %v13662_v1 = vsel %vm13565_vm2, %v3223_v47, %v3224_v18  ;;  %v3230_v58 = vrot.slane %v3228_v20, 4  ;;  %v10677_v37 = vrot.slane %v3098_v23, 9  ;;  %v12537_v18 = vld [vmem:[%s17987_s1 + $0x6] sm:$0x3] }
 0x12e   :  { %v3238_v54 = vrot.slane %v12535_v59, 5  ;;  %v2055_v32 = vsel %vm12789_vm13, %v2050_v57, %v2054_v9  ;;  %11719 = vmatmul.mubr.msk.bf16.vlgmr.msra.gmra.mxu0 %vm2154_vm12, %v10705_v55  ;;  %v13669_v8 = vsel %vm13565_vm2, %v10676_v42, %v3228_v20  ;;  %v10678_v14 = vrot.slane %v3099_v6, 9  ;;  %v12538_v6 = vld [vmem:[#allocation2 + $0x68] sm:$0x1]  ;;  %v3102_v57 = vld [vmem:[#allocation2 + $0x78] sm:$0xe] }
 0x12f   :  { %v3237_v39 = vrot.slane %v3235_v10, 4  ;;  %v10574_v5 = vcombine.low %v2045_v31, %v2055_v32  ;;  %11849 = vmatpush3.bf16.msra.mxu0 %v13608_v28  ;;  %11722 = vmatprep.mubr.msk.bf16.mxu0 %vm2154_vm12, %v10706_v21  ;;  %v13675_v23 = vsel %vm13565_vm2, %v3230_v58, %v3231_v51  ;;  %v3242_v9 = vrot.slane %v13588_v63, 5 }
 0x130   :  { %v3245_v55 = vrot.slane %v12536_v60, 5  ;;  %v4289_v42 = vsel %vm2251_vm0, %v12537_v18, 0  ;;  %v10707_v47 = vcombine.low %v13645_v15, %v13650_v22  ;;  %v10679_v28 = vrot.slane %v3100_v41, 9  ;;  %v13710_v41 = vld [vmem:[#allocation2 + $0x70] sm:$0xf] }
 0x131   :  { %v3249_v21 = vrot.slane %v13596_v11, 5  ;;  %11647 = vmatmul.mubr.msk.bf16.gmra.mxu1 %vm2154_vm12, %v10574_v5  ;;  %v13688_v20 = vsel %vm13565_vm2, %v10677_v37, %v3235_v10  ;;  %v13692_v30 = vsel %vm13565_vm2, %v3237_v39, %v3238_v54  ;;  %v3244_v51 = vrot.slane %v3242_v9, 4  ;;  %v3103_v5 = vld [vmem:[#allocation2 + $0x84] sm:$0xe]  ;;  %v13726_v60 = vld [vmem:[#allocation2 + $0x6c] sm:$0xf] }
 0x132   :  { %v3252_v31 = vrot.slane %v12538_v6, 5  ;;  %v18107_v15 = vcombine.low %v13290_v53, %v13288_v46  ;;  %v10708_v22 = vcombine.low %v13657_v52, %v13662_v1  ;;  %v10680_v37 = vrot.slane %v3101_v4, 9  ;;  %v12540_v53 = vld [vmem:[#allocation2 + $0x74] sm:$0x1]  ;;  %v3106_v52 = vld [vmem:[#allocation2 + $0xa8] sm:$0xe] }
 0x133   :  { %v3251_v58 = vrot.slane %v3249_v21, 4  ;;  %v13704_v59 = vsel %vm13565_vm2, %v10678_v14, %v3242_v9  ;;  %v13708_v54 = vsel %vm13565_vm2, %v3244_v51, %v3245_v55  ;;  %v3256_v46 = vrot.slane %v13710_v41, 5  ;;  %v13719_v14 = vld [vmem:[#allocation2 + $0x7c] sm:$0xf]  ;;  %v12543_v51 = vld [vmem:[#allocation2 + $0x80] sm:$0x1] }
 0x134   :  { %11652 = vmatprep.mubr.msk.bf16.mxu1 %vm2154_vm12, %v18107_v15  ;;  %v3259_v32 = vrot.slane %v12540_v53, 5  ;;  %v13717_v1 = vsel %vm13565_vm2, %v10679_v28, %v3249_v21  ;;  %v10681_v39 = vrot.slane %v3102_v57, 9  ;;  %v3263_v4 = vrot.slane %v13719_v14, 5  ;;  %v3104_v28 = vld [vmem:[#allocation2 + $0x90] sm:$0xe] }
 0x135   :  { %v13724_v9 = vsel %vm13565_vm2, %v3251_v58, %v3252_v31  ;;  %v3258_v18 = vrot.slane %v3256_v46, 4  ;;  %v3266_v6 = vrot.slane %v12543_v51, 5  ;;  %v13735_v57 = vsel %vm13565_vm2, %v10680_v37, %v3256_v46  ;;  %v13737_v31 = vld [vmem:[#allocation2 + $0x78] sm:$0xf]  ;;  %v3105_v53 = vld [vmem:[#allocation2 + $0x9c] sm:$0xe] }
 0x136   :  { %11723 = vmatmul.mubr.msk.bf16.gmra.mxu0 %vm2154_vm12, %v10707_v47  ;;  %v3265_v58 = vrot.slane %v3263_v4, 4  ;;  %v13748_v47 = vsel %vm13565_vm2, %v10681_v39, %v3263_v4  ;;  %v10682_v55 = vrot.slane %v3103_v5, 9  ;;  %v13750_v37 = vld [vmem:[#allocation2 + $0x88] sm:$0xf]  ;;  %v18109_v4 = vcombine.low %v13318_v40, %v13320_v45  ;;  %v13769_v5 = vld [vmem:[#allocation2 + $0x84] sm:$0xf] }
 0x137   :  { %11726 = vmatprep.mubr.msk.bf16.mxu0 %vm2154_vm12, %v10708_v22  ;;  %v13744_v51 = vsel %vm13565_vm2, %v3258_v18, %v3259_v32  ;;  %v3270_v46 = vrot.slane %v13750_v37, 5  ;;  %v10683_v22 = vrot.slane %v3104_v28, 9  ;;  %v3277_v32 = vrot.slane %v13357_v56, 5  ;;  %v13763_v39 = vld [vmem:[%s17987_s1 + $0xa] sm:$0x3] }
 0x138   :  { %v13757_v21 = vsel %vm13565_vm2, %v3265_v58, %v3266_v6  ;;  %18108 = vst [vmem:[#allocation14_spill] sm:$0xff] %v13763_v39  ;;  %v12547_v58 = vld [vmem:[#allocation2 + $0x8c] sm:$0x1]  ;;  %v18110_v10 = vcombine.low %v13417_v43, %v13419_v44  ;;  %v3280_v18 = vrot.slane %v13365_v12, 5  ;;  %v10684_v44 = vrot.slane %v3105_v53, 9 }
 0x139   :  { %11653 = vmatmul.mubr.msk.bf16.vlgmr.msra.gmra.mxu1 %vm2154_vm12, %v18109_v4  ;;  %v3272_v6 = vrot.slane %v3270_v46, 4  ;;  %v3273_v28 = vrot.slane %v12547_v58, 5  ;;  %v3279_v4 = vrot.slane %v3277_v32, 4  ;;  %v3107_v58 = vld [vmem:[#allocation2 + $0xb4] sm:$0xe]  ;;  %v13791_v43 = vsel %vm13565_vm2, %v10682_v55, %v3270_v46 }
 0x13a   :  { %11783 = vmatpush3.bf16.msra.mxu1 %v4289_v42  ;;  %11656 = vmatprep.mubr.msk.bf16.mxu1 %vm2154_vm12, %v18110_v10  ;;  %v13787_v15 = vld [vmem:[%s17987_s1 + $0xc] sm:$0x3]  ;;  %v3284_v42 = vrot.slane %v13408_v36, 5  ;;  %v13802_v12 = vsel %vm13565_vm2, %v10683_v22, %v3277_v32  ;;  %v3287_v45 = vrot.slane %v13410_v38, 5  ;;  %v10685_v55 = vrot.slane %v3106_v52, 9 }
 0x13b   :  { %18111 = vst [vmem:[#allocation15_spill] sm:$0xff] %v13787_v15  ;;  %12186 = vmatprep.subr.msk.bf16.mxu1 %vm2251_vm0, %v13763_v39  ;;  %12187 = vmatprep.subr.msk.bf16.mxu0 %vm2251_vm0, %v13787_v15  ;;  %v3291_v53 = vrot.slane %v13488_v24, 5  ;;  %v13808_v46 = vsel %vm13565_vm2, %v3272_v6, %v3273_v28  ;;  %v3294_v16 = vrot.slane %v13490_v25, 5  ;;  %v3108_v15 = vld [vmem:[#allocation2 + $0xd8] sm:$0xe]  ;;  %v18112_v22 = vcombine.low %v13669_v8, %v13675_v23 }
 0x13c   :  { %v3286_v40 = vrot.slane %v3284_v42, 4  ;;  %v3109_v39 = vld [vmem:[#allocation2 + $0xe4] sm:$0xe]  ;;  %v10686_v6 = vrot.slane %v3107_v58, 9  ;;  %v18113_v28 = vcombine.low %v13688_v20, %v13692_v30  ;;  %v13829_v25 = vsel %vm13565_vm2, %v3279_v4, %v3280_v18  ;;  %v3110_v4 = vld [vmem:[#allocation2 + $0xf0] sm:$0xe] }
 0x13d   :  { %v13819_v38 = vsel %vm13565_vm2, %v10685_v55, %v3291_v53  ;;  %v3293_v52 = vrot.slane %v3291_v53, 4  ;;  %v13833_v8 = vsel %vm13565_vm2, %v10684_v44, %v3284_v42  ;;  %v3298_v23 = vrot.slane %v13547_v0, 5  ;;  %v13845_v53 = vld [vmem:[#allocation2 + $0xdc] sm:$0xf] }
 0x13e   :  { %11727 = vmatmul.mubr.msk.bf16.gmra.mxu0 %vm2154_vm12, %v18112_v22  ;;  %v3301_v55 = vrot.slane %v13552_v27, 5  ;;  %v13839_v58 = vsel %vm13565_vm2, %v3286_v40, %v3287_v45  ;;  %v10687_v30 = vrot.slane %v3108_v15, 9  ;;  %18114 = vst [vmem:[#allocation16_spill] sm:$0xff] %v13845_v53  ;;  %v3305_v18 = vrot.slane %v13845_v53, 5  ;;  %v3111_v45 = vld [vmem:[#allocation2 + $0xfc] sm:$0xe] }
 0x13f   :  { %11730 = vmatprep.mubr.msk.bf16.mxu0 %vm2154_vm12, %v18113_v28  ;;  %v13843_v20 = vsel %vm13565_vm2, %v3293_v52, %v3294_v16  ;;  %v18115_v44 = vcombine.low %v13505_v3, %v13507_v2  ;;  %v13858_v16 = vsel %vm13565_vm2, %v10686_v6, %v3298_v23  ;;  %v3300_v15 = vrot.slane %v3298_v23, 4  ;;  %v13866_v52 = vld [vmem:[#allocation2 + $0xe8] sm:$0xf]  ;;  %v13895_v6 = vld [vmem:[#allocation2 + $0xf4] sm:$0xf] }
 0x140   :  { %v18116_v42 = vcombine.low %v13529_v29, %v13531_v33  ;;  %v3307_v2 = vrot.slane %v3305_v18, 4  ;;  %v10688_v22 = vrot.slane %v3109_v39, 9  ;;  %18117 = vst [vmem:[#allocation17_spill] sm:$0xff] %v13866_v52  ;;  %v3312_v28 = vrot.slane %v13866_v52, 5  ;;  %v12551_v33 = vld [vmem:[#allocation2 + $0xec] sm:$0x1] }
 0x141   :  { %11657 = vmatmul.mubr.msk.bf16.gmra.mxu1 %vm2154_vm12, %v18115_v44  ;;  %v13873_v23 = vsel %vm13565_vm2, %v3300_v15, %v3301_v55  ;;  %v13875_v44 = vld [vmem:[#allocation2 + $0xd8] sm:$0xf]  ;;  %v13883_v32 = vsel %vm13565_vm2, %v10687_v30, %v3305_v18  ;;  %v18118_v10 = vrot.slane %v12793_v17, 5  ;;  %v3112_v40 = vld [vmem:[#allocation2 + $0x108] sm:$0xe]  ;;  %18119 = vst [vmem:[#allocation18_spill] sm:$0xff] %v13895_v6  ;;  %v18120_v17 = vcombine.low %v13704_v59, %v13708_v54 }
 0x142   :  { %11660 = vmatprep.mubr.msk.bf16.mxu1 %vm2154_vm12, %v18116_v42  ;;  %v3315_v42 = vrot.slane %v12551_v33, 5  ;;  %v3314_v15 = vrot.slane %v3312_v28, 4  ;;  %v13893_v29 = vsel %vm13565_vm2, %v10688_v22, %v3312_v28  ;;  %v10689_v33 = vrot.slane %v3110_v4, 9  ;;  %v12553_v3 = vld [vmem:[#allocation2 + $0xf8] sm:$0x1] }
 0x143   :  { %v13889_v55 = vsel %vm13565_vm2, %v3307_v2, %v18118_v10  ;;  %v3319_v39 = vrot.slane %v13895_v6, 5  ;;  %v3322_v30 = vrot.slane %v12553_v3, 5  ;;  %v13898_v18 = vld [vmem:[#allocation2 + $0x114] sm:$0xe]  ;;  %v10690_v2 = vrot.slane %v3111_v45, 9 }
 0x144   :  { %v13906_v10 = vsel %vm13565_vm2, %v3314_v15, %v3315_v42  ;;  %v13908_v22 = vld [vmem:[#allocation2 + $0x100] sm:$0xf]  ;;  %v12555_v28 = vld [vmem:[#allocation2 + $0x104] sm:$0x1]  ;;  %v18122_v3 = vcombine.low %v13717_v1, %v13724_v9  ;;  %v13921_v45 = vld [vmem:[#allocation2 + $0xf0] sm:$0xf]  ;;  %v18127_v42 = vcombine.low %v13569_v48, %v13571_v7  ;;  %v18128_v48 = vcombine.low %v13579_v26, %v13581_v62 }
 0x145   :  { %18121 = vst [vmem:[#allocation19_spill] sm:$0xff] %v13908_v22  ;;  %v3326_v4 = vrot.slane %v13908_v22, 5  ;;  %v3329_v27 = vrot.slane %v12555_v28, 5  ;;  %v13917_v54 = vld [vmem:[#allocation2 + $0xe4] sm:$0xf]  ;;  %18124 = vst [vmem:[#allocation21_spill] sm:$0xff] %v13921_v45  ;;  %v13940_v6 = vsel %vm13565_vm2, %v10689_v33, %v3319_v39 }
 0x146   :  { %11731 = vmatmul.mubr.msk.bf16.gmra.mxu0 %vm2154_vm12, %v18120_v17  ;;  %18123 = vst [vmem:[#allocation20_spill] sm:$0xff] %v13917_v54  ;;  %v3321_v17 = vrot.slane %v3319_v39, 4  ;;  %v13925_v28 = vld [vmem:[#allocation2 + $0xfc] sm:$0xf]  ;;  %v13929_v53 = vld [vmem:[#allocation2 + $0x10c] sm:$0xf] }
 0x147   :  { %11734 = vmatprep.mubr.msk.bf16.mxu0 %vm2154_vm12, %v18122_v3  ;;  %18125 = vst [vmem:[#allocation22_spill] sm:$0xff] %v13925_v28  ;;  %v3328_v9 = vrot.slane %v3326_v4, 4  ;;  %v10691_v3 = vrot.slane %v3112_v40, 9  ;;  %18126 = vst [vmem:[#allocation23_spill] sm:$0xff] %v13929_v53  ;;  %v3333_v59 = vrot.slane %v13929_v53, 5  ;;  %v13944_v1 = vsel %vm13565_vm2, %v10690_v2, %v3326_v4 }
 0x148   :  { %v12560_v40 = vld [vmem:[#allocation2 + $0x110] sm:$0x1]  ;;  %v3114_v28 = vld [vmem:[#allocation2 + $0x120] sm:$0xe]  ;;  %v3115_v45 = vld [vmem:[#allocation2 + $0x12c] sm:$0xe]  ;;  %v13952_v7 = vsel %vm13565_vm2, %v3321_v17, %v3322_v30 }
 0x149   :  { %11661 = vmatmul.mubr.msk.bf16.gmra.mxu1 %vm2154_vm12, %v18127_v42  ;;  %v3336_v22 = vrot.slane %v12560_v40, 5  ;;  %v13956_v39 = vsel %vm13565_vm2, %v3328_v9, %v3329_v27  ;;  %v3335_v33 = vrot.slane %v3333_v59, 4  ;;  %v10692_v2 = vrot.slane %v13898_v18, 9  ;;  %v13959_v4 = vld [vmem:[#allocation2 + $0x108] sm:$0xf] }
 0x14a   :  { %11664 = vmatprep.mubr.msk.bf16.mxu1 %vm2154_vm12, %v18128_v48  ;;  %18129 = vst [vmem:[#allocation24_spill] sm:$0xff] %v13956_v39  ;;  %18130 = vst [vmem:[#allocation25_spill] sm:$0xff] %v13959_v4  ;;  %v13965_v26 = vsel %vm13565_vm2, %v10691_v3, %v3333_v59  ;;  %v13967_v62 = vld [vmem:[#allocation2 + $0x118] sm:$0xf]  ;;  %v12563_v17 = vld [vmem:[#allocation2 + $0x11c] sm:$0x1] }
 0x14b   :  { %v3340_v30 = vrot.slane %v13967_v62, 5  ;;  %v3343_v40 = vrot.slane %v12563_v17, 5  ;;  %v13972_v27 = vsel %vm13565_vm2, %v3335_v33, %v3336_v22  ;;  %v10693_v18 = vrot.slane %v3114_v28, 9  ;;  %v13974_v9 = vld [vmem:[#allocation2 + $0x124] sm:$0xf] }
 0x14c   :  { %18131 = vst [vmem:[#allocation26_spill] sm:$0xff] %v13974_v9  ;;  %v3347_v48 = vrot.slane %v13974_v9, 5  ;;  %v12565_v42 = vld [vmem:[#allocation2 + $0x128] sm:$0x1]  ;;  %v13981_v53 = vld [vmem:[#allocation2 + $0x114] sm:$0xf]  ;;  %v18132_v28 = vcombine.low %v13735_v57, %v13744_v51  ;;  %v18135_v17 = vcombine.low %v13748_v47, %v13757_v21 }
 0x14d   :  { %v3350_v15 = vrot.slane %v12565_v42, 5  ;;  %v3342_v22 = vrot.slane %v3340_v30, 4  ;;  %v3116_v33 = vld [vmem:[#allocation2 + $0x138] sm:$0xe]  ;;  %v13989_v4 = vld [vmem:[#allocation2 + $0x120] sm:$0xf]  ;;  %v14004_v51 = vsel %vm13565_vm2, %v10692_v2, %v3340_v30  ;;  %v18137_v30 = vcombine.low %v13586_v34, %v13588_v63 }
 0x14e   :  { %11735 = vmatmul.mubr.msk.bf16.gmra.mxu0 %vm2154_vm12, %v18132_v28  ;;  %18133 = vst [vmem:[#allocation27_spill] sm:$0xff] %v13989_v4  ;;  %v3349_v59 = vrot.slane %v3347_v48, 4  ;;  %v10694_v52 = vrot.slane %v3115_v45, 9  ;;  %v13993_v3 = vld [vmem:[#allocation2 + $0x130] sm:$0xf]  ;;  %v14016_v21 = vsel %vm13565_vm2, %v10693_v18, %v3347_v48 }
 0x14f   :  { %18134 = vst [vmem:[#allocation28_spill] sm:$0xff] %v13993_v3  ;;  %v3354_v54 = vrot.slane %v13993_v3, 5  ;;  %v3117_v39 = vld [vmem:[#allocation2 + $0x144] sm:$0xe]  ;;  %11738 = vmatprep.mubr.msk.bf16.mxu0 %vm2154_vm12, %v18135_v17  ;;  %v14006_v28 = vld [vmem:[#allocation2 + $0x12c] sm:$0xf]  ;;  %v14012_v4 = vsel %vm13565_vm2, %v3342_v22, %v3343_v40 }
 0x150   :  { %18136 = vst [vmem:[#allocation29_spill] sm:$0xff] %v14006_v28  ;;  %v12570_v42 = vld [vmem:[#allocation2 + $0x134] sm:$0x1]  ;;  %v14020_v47 = vsel %vm13565_vm2, %v3349_v59, %v3350_v15  ;;  %v10695_v40 = vrot.slane %v3116_v33, 9  ;;  %v14030_v22 = vld [vmem:[#allocation2 + $0x13c] sm:$0xf]  ;;  %v18139_v15 = vcombine.low %v13594_v49, %v13596_v11 }
 0x151   :  { %v3357_v9 = vrot.slane %v12570_v42, 5  ;;  %v3356_v2 = vrot.slane %v3354_v54, 4  ;;  %11665 = vmatmul.mubr.msk.bf16.gmra.mxu1 %vm2154_vm12, %v18137_v30  ;;  %v14028_v17 = vsel %vm13565_vm2, %v10694_v52, %v3354_v54  ;;  %18138 = vst [vmem:[#allocation30_spill] sm:$0xff] %v14030_v22  ;;  %v3361_v18 = vrot.slane %v14030_v22, 5  ;;  %v12572_v48 = vld [vmem:[#allocation2 + $0x140] sm:$0x1] }
 0x152   :  { %v3364_v42 = vrot.slane %v12572_v48, 5  ;;  %v3118_v45 = vld [vmem:[#allocation2 + $0x150] sm:$0xe]  ;;  %11668 = vmatprep.mubr.msk.bf16.mxu1 %vm2154_vm12, %v18139_v15  ;;  %v10696_v63 = vrot.slane %v3117_v39, 9  ;;  %v14041_v52 = vld [vmem:[#allocation2 + $0x148] sm:$0xf] }
 0x153   :  { %v14039_v34 = vsel %vm13565_vm2, %v3356_v2, %v3357_v9  ;;  %18140 = vst [vmem:[#allocation31_spill] sm:$0xff] %v14041_v52  ;;  %v3368_v54 = vrot.slane %v14041_v52, 5  ;;  %v12574_v59 = vld [vmem:[#allocation2 + $0x14c] sm:$0x1]  ;;  %v14048_v49 = vld [vmem:[#allocation2 + $0x138] sm:$0xf]  ;;  %v14063_v28 = vsel %vm13565_vm2, %v10695_v40, %v3361_v18 }
 0x154   :  { %v3371_v33 = vrot.slane %v12574_v59, 5  ;;  %18141 = vst [vmem:[#allocation32_spill] sm:$0xff] %v14048_v49  ;;  %v3363_v9 = vrot.slane %v3361_v18, 4  ;;  %v3119_v2 = vld [vmem:[#allocation2 + $0x15c] sm:$0xe]  ;;  %v10697_v59 = vrot.slane %v3118_v45, 9  ;;  %v18144_v45 = vcombine.low %v13791_v43, %v13808_v46 }
 0x155   :  { %v14052_v39 = vld [vmem:[#allocation2 + $0x144] sm:$0xf]  ;;  %v3370_v57 = vrot.slane %v3368_v54, 4  ;;  %v14056_v3 = vld [vmem:[#allocation2 + $0x154] sm:$0xf]  ;;  %v14067_v11 = vsel %vm13565_vm2, %v10696_v63, %v3368_v54  ;;  %v10698_v48 = vrot.slane %v3119_v2, 9  ;;  %v18146_v63 = vcombine.low %v13802_v12, %v13829_v25 }
 0x156   :  { %18142 = vst [vmem:[#allocation33_spill] sm:$0xff] %v14052_v39  ;;  %18143 = vst [vmem:[#allocation34_spill] sm:$0xff] %v14056_v3  ;;  %v3375_v30 = vrot.slane %v14056_v3, 5  ;;  %v12578_v22 = vld [vmem:[#allocation2 + $0x158] sm:$0x1]  ;;  %11739 = vmatmul.mubr.msk.bf16.gmra.mxu0 %vm2154_vm12, %v18144_v45  ;;  %v14075_v52 = vsel %vm13565_vm2, %v3363_v9, %v3364_v42  ;;  %v18164_v3 = vld [vmem:[#allocation13_spill] sm:$0xff] }
 0x157   :  { %v3378_v49 = vrot.slane %v12578_v22, 5  ;;  %v3120_v15 = vld [vmem:[#allocation2 + $0x168] sm:$0xe]  ;;  %v14079_v40 = vsel %vm13565_vm2, %v3370_v57, %v3371_v33  ;;  %11742 = vmatprep.mubr.msk.bf16.mxu0 %vm2154_vm12, %v18146_v63  ;;  %v14085_v22 = vld [vmem:[#allocation2 + $0x150] sm:$0xf]  ;;  %v18153_v63 = vcombine.low %v13726_v60, %v13710_v41 }
 0x158   :  { %18145 = vst [vmem:[#allocation35_spill] sm:$0xff] %v14079_v40  ;;  %v3377_v18 = vrot.slane %v3375_v30, 4  ;;  %18147 = vst [vmem:[#allocation36_spill] sm:$0xff] %v14085_v22  ;;  %v14091_v46 = vsel %vm13565_vm2, %v10697_v59, %v3375_v30  ;;  %v14093_v42 = vld [vmem:[#allocation2 + $0x160] sm:$0xf]  ;;  %v10699_v2 = vrot.slane %v3120_v15, 9 }
 0x159   :  { %18148 = vst [vmem:[#allocation37_spill] sm:$0xff] %v14091_v46  ;;  %18149 = vst [vmem:[#allocation38_spill] sm:$0xff] %v14093_v42  ;;  %v3382_v57 = vrot.slane %v14093_v42, 5  ;;  %v12581_v54 = vld [vmem:[#allocation2 + $0x164] sm:$0x1]  ;;  %11669 = vmatmul.mubr.msk.bf16.gmra.mxu1 %vm2154_vm12, %v18153_v63  ;;  %v18155_v42 = vcombine.low %v13737_v31, %v13719_v14  ;;  %v18160_v40 = vld [vmem:[#allocation12_spill] sm:$0xff] }
 0x15a   :  { %v3385_v33 = vrot.slane %v12581_v54, 5  ;;  %v14098_v12 = vsel %vm13565_vm2, %v3377_v18, %v3378_v49  ;;  %v14100_v25 = vld [vmem:[#allocation2 + $0x15c] sm:$0xf]  ;;  %v14104_v45 = vld [vmem:[#allocation2 + $0x16c] sm:$0xf] }
 0x15b   :  { %18150 = vst [vmem:[#allocation39_spill] sm:$0xff] %v14098_v12  ;;  %18151 = vst [vmem:[#allocation40_spill] sm:$0xff] %v14100_v25  ;;  %v3389_v30 = vrot.slane %v14104_v45, 5  ;;  %v3121_v59 = vld [vmem:[#allocation2 + $0x174] sm:$0xe]  ;;  %v3384_v54 = vrot.slane %v3382_v57, 4  ;;  %11672 = vmatprep.mubr.msk.bf16.mxu1 %vm2154_vm12, %v18155_v42  ;;  %v14127_v60 = vsel %vm13565_vm2, %v10698_v48, %v3382_v57 }
 0x15c   :  { %18152 = vst [vmem:[#allocation41_spill] sm:$0xff] %v14104_v45  ;;  %v14115_v43 = vld [vmem:[#allocation2 + $0x168] sm:$0xf]  ;;  %v3122_v9 = vld [vmem:[#allocation2 + $0x180] sm:$0xe]  ;;  %v10700_v41 = vrot.slane %v3121_v59, 9 }
 0x15d   :  { %18154 = vst [vmem:[#allocation42_spill] sm:$0xff] %v14115_v43  ;;  %v12585_v63 = vld [vmem:[#allocation2 + $0x170] sm:$0x1]  ;;  %v14129_v49 = vld [vmem:[#allocation2 + $0x178] sm:$0xf]  ;;  %v14134_v45 = vsel %vm13565_vm2, %v3384_v54, %v3385_v33  ;;  %v3391_v14 = vrot.slane %v3389_v30, 4  ;;  %v14142_v48 = vsel %vm13565_vm2, %v10699_v2, %v3389_v30  ;;  %v18162_v2 = vcombine.low %v13833_v8, %v13839_v58 }
 0x15e   :  { %v3392_v18 = vrot.slane %v12585_v63, 5  ;;  %18156 = vst [vmem:[#allocation43_spill] sm:$0xff] %v14129_v49  ;;  %v3396_v25 = vrot.slane %v14129_v49, 5  ;;  %v3123_v15 = vld [vmem:[#allocation2 + $0x18c] sm:$0xe]  ;;  %v18158_v43 = vld [vmem:[#allocation9_spill] sm:$0xff] }
 0x15f   :  { %v14136_v31 = vld [vmem:[#allocation2 + $0x174] sm:$0xf]  ;;  %v12588_v57 = vld [vmem:[#allocation2 + $0x17c] sm:$0x1]  ;;  %v10701_v39 = vrot.slane %v3122_v9, 9  ;;  %v3403_v46 = vrot.slane %v18158_v43, 5  ;;  %11743 = vmatmul.mubr.msk.bf16.gmra.mxu0 %vm2154_vm12, %v18162_v2  ;;  %v18165_v43 = vcombine.low %v13819_v38, %v13843_v20  ;;  %v18166_v20 = vcombine.low %v13769_v5, %v13750_v37 }
 0x160   :  { %18157 = vst [vmem:[#allocation44_spill] sm:$0xff] %v14136_v31  ;;  %v3399_v63 = vrot.slane %v12588_v57, 5  ;;  %v4644_v12 = vld [vmem:[#allocation2 + $0xc] sm:$0xf]  ;;  %v3398_v54 = vrot.slane %v3396_v25, 4  ;;  %v18161_v42 = vld [vmem:[#allocation11_spill] sm:$0xff]  ;;  %v14164_v59 = vsel %vm13565_vm2, %v3391_v14, %v3392_v18  ;;  %v14168_v8 = vsel %vm13565_vm2, %v10700_v41, %v3396_v25 }
 0x161   :  { %v4645_v49 = vld [vmem:[#allocation2 + $0x10] sm:$0xf]  ;;  %v18163_v30 = vld [vmem:[#allocation10_spill] sm:$0xff]  ;;  %v10702_v22 = vrot.slane %v3123_v15, 9  ;;  %v3410_v9 = vrot.slane %v18160_v40, 5  ;;  %v3413_v31 = vrot.slane %v18164_v3, 5  ;;  %11746 = vmatprep.mubr.msk.bf16.mxu0 %vm2154_vm12, %v18165_v43  ;;  %11673 = vmatmul.mubr.msk.bf16.gmra.mxu1 %vm2154_vm12, %v18166_v20  ;;  %v14184_v25 = vsel %vm13565_vm2, %v10701_v39, %v3403_v46 }
 0x162   :  { %v3406_v57 = vrot.slane %v18163_v30, 5  ;;  %v4647_v33 = vld [vmem:[#allocation2 + $0x18] sm:$0xf]  ;;  %v3405_v58 = vrot.slane %v3403_v46, 4  ;;  %v4741_v15 = vshrl.u32 %v4644_v12, 16  ;;  %v4744_v40 = vshll.u32 %v4644_v12, 16 }
 0x163   :  { %v14172_v2 = vsel %vm13565_vm2, %v10702_v22, %v3410_v9  ;;  %v3412_v3 = vrot.slane %v3410_v9, 4  ;;  %v4646_v30 = vld [vmem:[#allocation2 + $0x14] sm:$0x1]  ;;  %v4750_v38 = vshll.u32 %v4645_v49, 16  ;;  %v14180_v43 = vsel %vm13565_vm2, %v3398_v54, %v3399_v63  ;;  %v14186_v41 = vld [vmem:[#allocation2 + $0x1c] sm:$0xf] }
 0x164   :  { %v4743_v18 = vrot.slane %v4741_v15, 4  ;;  %v4754_v22 = vshrl.u32 %v4645_v49, 16  ;;  %v18167_v12 = vcombine.low %v13353_v50, %v13357_v56  ;;  %v14194_v37 = vsel %vm13565_vm2, %v3405_v58, %v3406_v57  ;;  %v14202_v46 = vld [vmem:[#allocation2 + $0x20] sm:$0x1] }
 0x165   :  { %v14198_v5 = vsel %vm13565_vm2, %v3412_v3, %v3413_v31  ;;  %v4746_v14 = vrot.slane %v4744_v40, 5  ;;  %v14200_v39 = vrot.slane %v4750_v38, 5  ;;  %v4760_v50 = vshll.u32 %v4646_v30, 16  ;;  %v4650_v38 = vld [vmem:[#allocation2 + $0x24] sm:$0xf] }
 0x166   :  { %11676 = vmatprep.mubr.msk.bf16.mxu1 %vm2154_vm12, %v18167_v12  ;;  %v4756_v63 = vrot.slane %v4754_v22, 4  ;;  %v4765_v56 = vshrl.u32 %v4647_v33, 16  ;;  %v4768_v9 = vshll.u32 %v4647_v33, 16  ;;  %v4774_v57 = vshll.u32 %v14186_v41, 16  ;;  %v4651_v12 = vld [vmem:[#allocation2 + $0x28] sm:$0xf] }
 0x167   :  { %v4747_v54 = vor.u32 %v4746_v14, %v4743_v18  ;;  %v4778_v58 = vshrl.u32 %v14186_v41, 16  ;;  %v4784_v3 = vshll.u32 %v14202_v46, 16  ;;  %v18168_v20 = vcombine.low %v13858_v16, %v13873_v23 }
 0x168   :  { %v4757_v40 = vor.u32 %v4756_v63, %v14200_v39  ;;  %v4767_v15 = vrot.slane %v4765_v56, 4  ;;  %v4770_v30 = vrot.slane %v4768_v9, 5  ;;  %v4776_v18 = vrot.slane %v4774_v57, 5  ;;  %v4652_v9 = vld [vmem:[#allocation2 + $0x2c] sm:$0x1] }
 0x169   :  { %11747 = vmatmul.mubr.msk.bf16.gmra.mxu0 %vm2154_vm12, %v18168_v20  ;;  %v4780_v22 = vrot.slane %v4778_v58, 4  ;;  %v18169_v14 = vcombine.low %v13883_v32, %v13889_v55  ;;  %v4748_v56 = vrot.slane %v4747_v54, 4  ;;  %v4762_v49 = vrot.slane %v4760_v50, 5  ;;  %v4653_v63 = vld [vmem:[#allocation2 + $0x30] sm:$0xf] }
 0x16a   :  { %v4758_v23 = vrot.slane %v4757_v40, 4  ;;  %v4771_v20 = vor.u32 %v4770_v30, %v4767_v15  ;;  %v4786_v33 = vrot.slane %v4784_v3, 5  ;;  %v18170_v57 = vcombine.low %v13406_v35, %v13408_v36  ;;  %v18172_v15 = vld [vmem:[#allocation14_spill] sm:$0xff] }
 0x16b   :  { %11750 = vmatprep.mubr.msk.bf16.mxu0 %vm2154_vm12, %v18169_v14  ;;  %v4781_v31 = vor.u32 %v4780_v22, %v4776_v18  ;;  %v4789_v55 = vshrl.u32 %v4650_v38, 16  ;;  %v4792_v58 = vshll.u32 %v4650_v38, 16  ;;  %v4798_v14 = vshll.u32 %v4651_v12, 16  ;;  %v4654_v38 = vld [vmem:[#allocation2 + $0x34] sm:$0xf] }
 0x16c   :  { %11677 = vmatmul.mubr.msk.bf16.gmra.mxu1 %vm2154_vm12, %v18170_v57  ;;  %v18171_v50 = vcombine.low %v13475_v61, %v13488_v24  ;;  %v4772_v54 = vrot.slane %v4771_v20, 4  ;;  %v14236_v3 = vsel %vm2251_vm0, %v18172_v15, 0  ;;  %v4802_v35 = vshrl.u32 %v4651_v12, 16 }
 0x16d   :  { %v4782_v40 = vrot.slane %v4781_v31, 4  ;;  %v4791_v36 = vrot.slane %v4789_v55, 4  ;;  %v4794_v30 = vrot.slane %v4792_v58, 5  ;;  %v14238_v22 = vrot.slane %v4798_v14, 5  ;;  %v4656_v14 = vld [vmem:[#allocation2 + $0x3c] sm:$0xf] }
 0x16e   :  { %11680 = vmatprep.mubr.msk.bf16.mxu1 %vm2154_vm12, %v18171_v50  ;;  %v4808_v57 = vshll.u32 %v4652_v9, 16  ;;  %v4753_v16 = vsel %vm12789_vm13, %v4748_v56, %v14200_v39  ;;  %v4763_v61 = vsel %vm12789_vm13, %v4758_v23, %v4762_v49  ;;  %v4804_v24 = vrot.slane %v4802_v35, 4  ;;  %v14254_v56 = vld [vmem:[#allocation2 + $0x38] sm:$0x1] }
 0x16f   :  { %v4813_v31 = vshrl.u32 %v4653_v63, 16  ;;  %v4777_v20 = vsel %vm12789_vm13, %v4772_v54, %v4776_v18  ;;  %v4787_v12 = vsel %vm12789_vm13, %v4782_v40, %v4786_v33  ;;  %v4795_v55 = vor.u32 %v4794_v30, %v4791_v36  ;;  %v18176_v33 = vld [vmem:[#allocation15_spill] sm:$0xff]  ;;  %v4657_v40 = vld [vmem:[#allocation2 + $0x40] sm:$0xf] }
 0x170   :  { %v4816_v58 = vshll.u32 %v4653_v63, 16  ;;  %v18174_v9 = vcombine.low %v13893_v29, %v13906_v10  ;;  %v4805_v39 = vor.u32 %v4804_v24, %v14238_v22  ;;  %v4822_v23 = vshll.u32 %v4654_v38, 16 }
 0x171   :  { %v4815_v49 = vrot.slane %v4813_v31, 4  ;;  %v4826_v50 = vshrl.u32 %v4654_v38, 16  ;;  %v18175_v18 = vcombine.low %v13940_v6, %v13952_v7  ;;  %v14262_v63 = vsel %vm2251_vm0, %v18176_v33, 0 }
 0x172   :  { %11751 = vmatmul.mubr.msk.bf16.gmra.mxu0 %vm2154_vm12, %v18174_v9  ;;  %v4796_v54 = vrot.slane %v4795_v55, 4  ;;  %v4810_v29 = vrot.slane %v4808_v57, 5  ;;  %v4818_v10 = vrot.slane %v4816_v58, 5  ;;  %v4806_v15 = vrot.slane %v4805_v39, 4  ;;  %v4659_v55 = vld [vmem:[#allocation2 + $0x48] sm:$0xf] }
 0x173   :  { %11754 = vmatprep.mubr.msk.bf16.mxu0 %vm2154_vm12, %v18175_v18  ;;  %v14264_v35 = vrot.slane %v4822_v23, 5  ;;  %v4828_v36 = vrot.slane %v4826_v50, 4  ;;  %v4837_v30 = vshrl.u32 %v4656_v14, 16  ;;  %v18177_v38 = vcombine.low %v13545_v13, %v13547_v0  ;;  %v18178_v57 = vld [vmem:[#allocation16_spill] sm:$0xff]  ;;  %v4658_v23 = vld [vmem:[#allocation2 + $0x44] sm:$0x1] }
 0x174   :  { %v14270_v6 = vcombine.low %v4753_v16, %v4763_v61  ;;  %v14272_v7 = vcombine.low %v4777_v20, %v4787_v12  ;;  %v4819_v24 = vor.u32 %v4818_v10, %v4815_v49  ;;  %v4840_v31 = vshll.u32 %v4656_v14, 16  ;;  %v4660_v14 = vld [vmem:[#allocation2 + $0x4c] sm:$0xf] }
 0x175   :  { %11681 = vmatmul.mubr.msk.bf16.gmra.mxu1 %vm2154_vm12, %v18177_v38  ;;  %v18179_v58 = vcombine.low %v13875_v44, %v18178_v57  ;;  %v4829_v9 = vor.u32 %v4828_v36, %v14264_v35  ;;  %v4832_v39 = vshll.u32 %v14254_v56, 16  ;;  %v4839_v13 = vrot.slane %v4837_v30, 4  ;;  %v14290_v30 = vld [vmem:[#allocation2 + $0x50] sm:$0x1]  ;;  %v4662_v57 = vld [vmem:[#allocation2 + $0x54] sm:$0xf] }
 0x176   :  { %v4846_v0 = vshll.u32 %v4657_v40, 16  ;;  %v4801_v16 = vsel %vm12789_vm13, %v4796_v54, %v14238_v22  ;;  %v4842_v20 = vrot.slane %v4840_v31, 5  ;;  %v4850_v12 = vshrl.u32 %v4657_v40, 16  ;;  %v18180_v22 = vld [vmem:[#allocation24_spill] sm:$0xff]  ;;  %v14296_v40 = vpop.f32.mrf.mxu0 }
 0x177   :  { %11684 = vmatprep.mubr.msk.bf16.mxu1 %vm2154_vm12, %v18179_v58  ;;  %v4811_v44 = vsel %vm12789_vm13, %v4806_v15, %v4810_v29  ;;  %v14286_v49 = vrot.slane %v4819_v24, 4  ;;  %v4861_v18 = vshrl.u32 %v4659_v55, 16  ;;  %v4856_v36 = vshll.u32 %v4658_v23, 16 }
 0x178   :  { %v14288_v50 = vrot.slane %v4846_v0, 5  ;;  %v4843_v33 = vor.u32 %v4842_v20, %v4839_v13  ;;  %v4852_v10 = vrot.slane %v4850_v12, 4  ;;  %v4864_v38 = vshll.u32 %v4659_v55, 16  ;;  %v4663_v0 = vld [vmem:[#allocation2 + $0x58] sm:$0xf] }
 0x179   :  { %v18181_v54 = vcombine.low %v13944_v1, %v18180_v22  ;;  %v4830_v31 = vrot.slane %v4829_v9, 4  ;;  %v4834_v29 = vrot.slane %v4832_v39, 5  ;;  %v4863_v15 = vrot.slane %v4861_v18, 4  ;;  %v18183_v18 = vld [vmem:[#allocation20_spill] sm:$0xff]  ;;  %v18186_v22 = vld [vmem:[#allocation21_spill] sm:$0xff] }
 0x17a   :  { %v4870_v24 = vshll.u32 %v4660_v14, 16  ;;  %v18182_v58 = vcombine.low %v13965_v26, %v13972_v27  ;;  %v14302_v23 = vcombine.low %v4801_v16, %v4811_v44  ;;  %v4844_v55 = vrot.slane %v4843_v33, 4  ;;  %v18184_v26 = vld [vmem:[#allocation17_spill] sm:$0xff] }
 0x17b   :  { %11755 = vmatmul.mubr.msk.bf16.gmra.mxu0 %vm2154_vm12, %v18181_v54  ;;  %v4853_v13 = vor.u32 %v4852_v10, %v14288_v50  ;;  %v4866_v1 = vrot.slane %v4864_v38, 5  ;;  %v4825_v9 = vsel %vm12789_vm13, %v14286_v49, %v14264_v35  ;;  %v4874_v20 = vshrl.u32 %v4660_v14, 16  ;;  %v4665_v38 = vld [vmem:[#allocation2 + $0x60] sm:$0xf]  ;;  %v18187_v54 = vld [vmem:[#allocation18_spill] sm:$0xff]  ;;  %v14318_v35 = vpop.f32.mrf.mxu0 }
 0x17c   :  { %11758 = vmatprep.mubr.msk.bf16.mxu0 %vm2154_vm12, %v18182_v58  ;;  %v4872_v39 = vrot.slane %v4870_v24, 5  ;;  %v4880_v12 = vshll.u32 %v14290_v30, 16  ;;  %v18185_v27 = vcombine.low %v18183_v18, %v18184_v26  ;;  %v4858_v44 = vrot.slane %v4856_v36, 5  ;;  %18189 = vst [vmem:[#allocation11_spill] sm:$0xff] %v14318_v35  ;;  %v4664_v24 = vld [vmem:[#allocation2 + $0x5c] sm:$0x1] }
 0x17d   :  { %v4854_v16 = vrot.slane %v4853_v13, 4  ;;  %v4867_v33 = vor.u32 %v4866_v1, %v4863_v15  ;;  %v4885_v10 = vshrl.u32 %v4662_v57, 16  ;;  %v18188_v58 = vcombine.low %v18186_v22, %v18187_v54 }
 0x17e   :  { %11685 = vmatmul.mubr.msk.bf16.gmra.mxu1 %vm2154_vm12, %v18185_v27  ;;  %v4835_v14 = vsel %vm12789_vm13, %v4830_v31, %v4834_v29  ;;  %v4876_v49 = vrot.slane %v4874_v20, 4  ;;  %v4888_v18 = vshll.u32 %v4662_v57, 16  ;;  %v4894_v26 = vshll.u32 %v4663_v0, 16  ;;  %v4666_v27 = vld [vmem:[#allocation2 + $0x64] sm:$0xf] }
 0x17f   :  { %11688 = vmatprep.mubr.msk.bf16.mxu1 %vm2154_vm12, %v18188_v58  ;;  %v4849_v36 = vsel %vm12789_vm13, %v4844_v55, %v14288_v50  ;;  %v4868_v15 = vrot.slane %v4867_v33, 4  ;;  %v4887_v13 = vrot.slane %v4885_v10, 4  ;;  %v4898_v1 = vshrl.u32 %v4663_v0, 16  ;;  %v14333_v50 = vpop.f32.mrf.mxu0  ;;  %v14335_v33 = vld [vmem:[#allocation2 + $0x68] sm:$0x1] }
 0x180   :  { %v4877_v22 = vor.u32 %v4876_v49, %v4872_v39  ;;  %v4882_v54 = vrot.slane %v4880_v12, 5  ;;  %v4890_v58 = vrot.slane %v4888_v18, 5  ;;  %v14325_v61 = vrot.slane %v4894_v26, 5  ;;  %18191 = vst [vmem:[#allocation10_spill] sm:$0xff] %v14335_v33 }
 0x181   :  { %v4859_v31 = vsel %vm12789_vm13, %v4854_v16, %v4858_v44  ;;  %v4900_v29 = vrot.slane %v4898_v1, 4  ;;  %v4904_v20 = vshll.u32 %v4664_v24, 16  ;;  %v4909_v57 = vshrl.u32 %v4665_v38, 16  ;;  %v14354_v1 = vpop.f32.mrf.mxu1 }
 0x182   :  { %v18190_v35 = vcombine.low %v14004_v51, %v14012_v4  ;;  %v4878_v55 = vrot.slane %v4877_v22, 4  ;;  %v4891_v0 = vor.u32 %v4890_v58, %v4887_v13  ;;  %v4912_v12 = vshll.u32 %v4665_v38, 16  ;;  %v18193_v13 = vld [vmem:[#allocation22_spill] sm:$0xff]  ;;  %18196 = vst [vmem:[#allocation13_spill] sm:$0xff] %v14354_v1  ;;  %v18197_v58 = vld [vmem:[#allocation25_spill] sm:$0xff] }
 0x183   :  { %v4918_v10 = vshll.u32 %v4666_v27, 16  ;;  %v18192_v49 = vcombine.low %v14016_v21, %v14020_v47  ;;  %v4873_v16 = vsel %vm12789_vm13, %v4868_v15, %v4872_v39  ;;  %v4901_v4 = vor.u32 %v4900_v29, %v14325_v61  ;;  %v18194_v21 = vld [vmem:[#allocation19_spill] sm:$0xff] }
 0x184   :  { %11759 = vmatmul.mubr.msk.bf16.gmra.mxu0 %vm2154_vm12, %v18190_v35  ;;  %v4911_v51 = vrot.slane %v4909_v57, 4  ;;  %v4922_v44 = vshrl.u32 %v4666_v27, 16  ;;  %v4668_v35 = vld [vmem:[#allocation2 + $0x6c] sm:$0xf]  ;;  %v4883_v24 = vsel %vm12789_vm13, %v4878_v55, %v4882_v54  ;;  %v14346_v18 = vrot.slane %v4891_v0, 4  ;;  %v18198_v29 = vld [vmem:[#allocation23_spill] sm:$0xff]  ;;  %v14364_v55 = vpop.f32.mrf.mxu0 }
 0x185   :  { %11762 = vmatprep.mubr.msk.bf16.mxu0 %vm2154_vm12, %v18192_v49  ;;  %v4914_v38 = vrot.slane %v4912_v12, 5  ;;  %v14348_v26 = vrot.slane %v4918_v10, 5  ;;  %v18195_v47 = vcombine.low %v18193_v13, %v18194_v21  ;;  %v14356_v39 = vcombine.low %v4825_v9, %v4835_v14  ;;  %v4669_v54 = vld [vmem:[#allocation2 + $0x70] sm:$0xf]  ;;  %v4671_v21 = vld [vmem:[#allocation2 + $0x78] sm:$0xf] }
 0x186   :  { %v4924_v27 = vrot.slane %v4922_v44, 4  ;;  %v4928_v22 = vshll.u32 %v14335_v33, 16  ;;  %v18199_v57 = vcombine.low %v18197_v58, %v18198_v29  ;;  %v14366_v0 = vcombine.low %v4849_v36, %v4859_v31  ;;  %v4670_v29 = vld [vmem:[#allocation2 + $0x74] sm:$0x1]  ;;  %v14375_v31 = vpop.f32.mrf.mxu1  ;;  %v4683_v33 = vld [vmem:[#allocation2 + $0xa8] sm:$0xf] }
 0x187   :  { %11689 = vmatmul.mubr.msk.bf16.gmra.mxu1 %vm2154_vm12, %v18195_v47  ;;  %v4906_v12 = vrot.slane %v4904_v20, 5  ;;  %v4915_v10 = vor.u32 %v4914_v38, %v4911_v51  ;;  %v4933_v49 = vshrl.u32 %v4668_v35, 16  ;;  %v14368_v9 = vcombine.low %v4873_v16, %v4883_v24  ;;  %18200 = vst [vmem:[#allocation14_spill] sm:$0xff] %v14375_v31  ;;  %v14381_v38 = vpop.f32.mrf.mxu0  ;;  %v18222_v31 = vld [vmem:[#allocation30_spill] sm:$0xff] }
 0x188   :  { %11692 = vmatprep.mubr.msk.bf16.mxu1 %vm2154_vm12, %v18199_v57  ;;  %v4902_v14 = vrot.slane %v4901_v4, 4  ;;  %v4925_v44 = vor.u32 %v4924_v27, %v14348_v26  ;;  %v4936_v13 = vshll.u32 %v4668_v35, 16  ;;  %v4897_v47 = vsel %vm12789_vm13, %v14346_v18, %v14325_v61  ;;  %v4672_v4 = vld [vmem:[#allocation2 + $0x7c] sm:$0xf]  ;;  %18202 = vst [vmem:[#allocation7_spill] sm:$0xff] %v14381_v38 }
 0x189   :  { %v4916_v58 = vrot.slane %v4915_v10, 4  ;;  %v4935_v57 = vrot.slane %v4933_v49, 4  ;;  %v4942_v36 = vshll.u32 %v4669_v54, 16  ;;  %v4930_v51 = vrot.slane %v4928_v22, 5 }
 0x18a   :  { %v4926_v20 = vrot.slane %v4925_v44, 4  ;;  %v4938_v16 = vrot.slane %v4936_v13, 5  ;;  %v4946_v24 = vshrl.u32 %v4669_v54, 16  ;;  %v18201_v35 = vcombine.low %v14028_v17, %v14039_v34  ;;  %v4674_v44 = vld [vmem:[#allocation2 + $0x84] sm:$0xf] }
 0x18b   :  { %v14384_v18 = vrot.slane %v4942_v36, 5  ;;  %v4957_v27 = vshrl.u32 %v4671_v21, 16  ;;  %v4960_v10 = vshll.u32 %v4671_v21, 16  ;;  %v18203_v49 = vcombine.low %v14063_v28, %v14075_v52  ;;  %v4673_v36 = vld [vmem:[#allocation2 + $0x80] sm:$0x1]  ;;  %v14399_v52 = vpop.f32.mrf.mxu1 }
 0x18c   :  { %11763 = vmatmul.mubr.msk.bf16.gmra.mxu0 %vm2154_vm12, %v18201_v35  ;;  %v4907_v22 = vsel %vm12789_vm13, %v4902_v14, %v4906_v12  ;;  %v4939_v54 = vor.u32 %v4938_v16, %v4935_v57  ;;  %v4948_v17 = vrot.slane %v4946_v24, 4  ;;  %v4952_v34 = vshll.u32 %v4670_v29, 16  ;;  %18205 = vst [vmem:[#allocation15_spill] sm:$0xff] %v14399_v52  ;;  %v18207_v16 = vld [vmem:[#allocation26_spill] sm:$0xff] }
 0x18d   :  { %11766 = vmatprep.mubr.msk.bf16.mxu0 %vm2154_vm12, %v18203_v49  ;;  %v4921_v13 = vsel %vm12789_vm13, %v4916_v58, %v14348_v26  ;;  %v4959_v35 = vrot.slane %v4957_v27, 4  ;;  %v4962_v61 = vrot.slane %v4960_v10, 5  ;;  %v4966_v21 = vshll.u32 %v4672_v4, 16  ;;  %v4675_v26 = vld [vmem:[#allocation2 + $0x88] sm:$0xf]  ;;  %v18206_v58 = vld [vmem:[#allocation27_spill] sm:$0xff]  ;;  %v14410_v27 = vpop.f32.mrf.mxu0  ;;  %v14420_v52 = vpop.f32.mrf.mxu1 }
 0x18e   :  { %v18204_v28 = vcombine.low %v13981_v53, %v13967_v62  ;;  %v4931_v12 = vsel %vm12789_vm13, %v4926_v20, %v4930_v51  ;;  %v14403_v14 = vrot.slane %v4939_v54, 4  ;;  %v4949_v29 = vor.u32 %v4948_v17, %v14384_v18  ;;  %18209 = vst [vmem:[#allocation16_spill] sm:$0xff] %v14410_v27  ;;  %18210 = vst [vmem:[#allocation24_spill] sm:$0xff] %v14420_v52  ;;  %v18217_v52 = vld [vmem:[#allocation29_spill] sm:$0xff] }
 0x18f   :  { %v4970_v57 = vshrl.u32 %v4672_v4, 16  ;;  %v18208_v24 = vcombine.low %v18206_v58, %v18207_v16  ;;  %v4963_v53 = vor.u32 %v4962_v61, %v4959_v35  ;;  %v14412_v62 = vrot.slane %v4966_v21, 5  ;;  %v4676_v4 = vld [vmem:[#allocation2 + $0x8c] sm:$0x1]  ;;  %v14431_v21 = vpop.f32.mrf.mxu0  ;;  %v4682_v27 = vld [vmem:[#allocation2 + $0xa4] sm:$0x1] }
 0x190   :  { %11693 = vmatmul.mubr.msk.bf16.gmra.mxu1 %vm2154_vm12, %v18204_v28  ;;  %v4981_v10 = vshrl.u32 %v4674_v44, 16  ;;  %v4984_v49 = vshll.u32 %v4674_v44, 16  ;;  %v14414_v28 = vcombine.low %v4897_v47, %v4907_v22  ;;  %v14416_v20 = vrot.slane %v4952_v34, 5  ;;  %v4678_v34 = vld [vmem:[#allocation2 + $0x94] sm:$0xf]  ;;  %18213 = vst [vmem:[#allocation20_spill] sm:$0xff] %v14431_v21 }
 0x191   :  { %11696 = vmatprep.mubr.msk.bf16.mxu1 %vm2154_vm12, %v18208_v24  ;;  %v4972_v51 = vrot.slane %v4970_v57, 4  ;;  %v4976_v54 = vshll.u32 %v4673_v36, 16  ;;  %v14418_v17 = vrot.slane %v4949_v29, 4  ;;  %v4990_v16 = vshll.u32 %v4675_v26, 16  ;;  %v4677_v24 = vld [vmem:[#allocation2 + $0x90] sm:$0xf] }
 0x192   :  { %v4983_v15 = vrot.slane %v4981_v10, 4  ;;  %v4986_v58 = vrot.slane %v4984_v49, 5  ;;  %v14422_v61 = vcombine.low %v4921_v13, %v4931_v12  ;;  %v14424_v35 = vrot.slane %v4963_v53, 4  ;;  %v18211_v44 = vld [vmem:[#allocation35_spill] sm:$0xff]  ;;  %v18214_v53 = vld [vmem:[#allocation37_spill] sm:$0xff] }
 0x193   :  { %v4973_v47 = vor.u32 %v4972_v51, %v14412_v62  ;;  %v4994_v22 = vshrl.u32 %v4675_v26, 16  ;;  %v18212_v36 = vcombine.low %v14067_v11, %v18211_v44  ;;  %v14437_v12 = vrot.slane %v4990_v16, 5  ;;  %v18215_v10 = vld [vmem:[#allocation39_spill] sm:$0xff]  ;;  %v4679_v44 = vld [vmem:[#allocation2 + $0x98] sm:$0x1] }
 0x194   :  { %v4987_v13 = vor.u32 %v4986_v58, %v4983_v15  ;;  %v5000_v57 = vshll.u32 %v4676_v4, 16  ;;  %v18216_v26 = vcombine.low %v18214_v53, %v18215_v10  ;;  %v14445_v11 = vrot.slane %v4976_v54, 5  ;;  %v4680_v29 = vld [vmem:[#allocation2 + $0x9c] sm:$0xf]  ;;  %v4681_v15 = vld [vmem:[#allocation2 + $0xa0] sm:$0xf] }
 0x195   :  { %11767 = vmatmul.mubr.msk.bf16.gmra.mxu0 %vm2154_vm12, %v18212_v36  ;;  %v14443_v49 = vrot.slane %v4973_v47, 4  ;;  %v4996_v51 = vrot.slane %v4994_v22, 4  ;;  %v5005_v36 = vshrl.u32 %v4677_v24, 16  ;;  %v5008_v58 = vshll.u32 %v4677_v24, 16  ;;  %v18218_v53 = vld [vmem:[#allocation28_spill] sm:$0xff]  ;;  %v14455_v47 = vpop.f32.mrf.mxu1 }
 0x196   :  { %11770 = vmatprep.mubr.msk.bf16.mxu0 %vm2154_vm12, %v18216_v26  ;;  %v5014_v16 = vshll.u32 %v4678_v34, 16  ;;  %v5018_v4 = vshrl.u32 %v4678_v34, 16  ;;  %v18219_v10 = vcombine.low %v18217_v52, %v18218_v53  ;;  %18220 = vst [vmem:[#allocation17_spill] sm:$0xff] %v14455_v47  ;;  %v14461_v22 = vrot.slane %v4987_v13, 4  ;;  %v18221_v34 = vld [vmem:[#allocation32_spill] sm:$0xff]  ;;  %v14468_v52 = vpop.f32.mrf.mxu0 }
 0x197   :  { %v4997_v26 = vor.u32 %v4996_v51, %v14437_v12  ;;  %v5007_v24 = vrot.slane %v5005_v36, 4  ;;  %v18223_v1 = vcombine.low %v18221_v34, %v18222_v31  ;;  %18224 = vst [vmem:[#allocation21_spill] sm:$0xff] %v14468_v52  ;;  %v5002_v53 = vrot.slane %v5000_v57, 5  ;;  %v14476_v52 = vpop.f32.mrf.mxu1 }
 0x198   :  { %11697 = vmatmul.mubr.msk.bf16.gmra.mxu1 %vm2154_vm12, %v18219_v10  ;;  %v5010_v10 = vrot.slane %v5008_v58, 5  ;;  %v14470_v47 = vrot.slane %v5014_v16, 5  ;;  %v5024_v21 = vshll.u32 %v4679_v44, 16  ;;  %v4979_v13 = vsel %vm12789_vm13, %v14443_v49, %v14445_v11  ;;  %18225 = vst [vmem:[#allocation18_spill] sm:$0xff] %v14476_v52  ;;  %v4684_v49 = vld [vmem:[#allocation2 + $0xac] sm:$0xf] }
 0x199   :  { %11700 = vmatprep.mubr.msk.bf16.mxu1 %vm2154_vm12, %v18223_v1  ;;  %v4998_v51 = vrot.slane %v4997_v26, 4  ;;  %v5020_v36 = vrot.slane %v5018_v4, 4  ;;  %v5029_v54 = vshrl.u32 %v4680_v29, 16  ;;  %v5032_v31 = vshll.u32 %v4680_v29, 16  ;;  %v14487_v29 = vpop.f32.mrf.mxu0 }
 0x19a   :  { %v5011_v38 = vor.u32 %v5010_v10, %v5007_v24  ;;  %v5038_v34 = vshll.u32 %v4681_v15, 16  ;;  %v5042_v1 = vshrl.u32 %v4681_v15, 16  ;;  %v4993_v57 = vsel %vm12789_vm13, %v14461_v22, %v14437_v12 }
 0x19b   :  { %v5021_v44 = vor.u32 %v5020_v36, %v14470_v47  ;;  %v5031_v58 = vrot.slane %v5029_v54, 4  ;;  %v5048_v16 = vshll.u32 %v4682_v27, 16  ;;  %v18226_v11 = vcombine.low %v14127_v60, %v14134_v45  ;;  %v4685_v45 = vld [vmem:[#allocation2 + $0xb0] sm:$0x1] }
 0x19c   :  { %v5012_v15 = vrot.slane %v5011_v38, 4  ;;  %v5026_v4 = vrot.slane %v5024_v21, 5  ;;  %v5034_v26 = vrot.slane %v5032_v31, 5  ;;  %v14489_v24 = vrot.slane %v5038_v34, 5  ;;  %v4686_v21 = vld [vmem:[#allocation2 + $0xb4] sm:$0xf] }
 0x19d   :  { %11771 = vmatmul.mubr.msk.bf16.gmra.mxu0 %vm2154_vm12, %v18226_v11  ;;  %v18227_v12 = vcombine.low %v14142_v48, %v14164_v59  ;;  %v5003_v27 = vsel %vm12789_vm13, %v4998_v51, %v5002_v53  ;;  %v5022_v54 = vrot.slane %v5021_v44, 4  ;;  %v5044_v22 = vrot.slane %v5042_v1, 4  ;;  %v18228_v31 = vld [vmem:[#allocation33_spill] sm:$0xff]  ;;  %v18229_v34 = vld [vmem:[#allocation31_spill] sm:$0xff]  ;;  %v14501_v48 = vpop.f32.mrf.mxu1  ;;  %v4687_v44 = vld [vmem:[#allocation2 + $0xb8] sm:$0xf] }
 0x19e   :  { %v5053_v60 = vshrl.u32 %v4683_v33, 16  ;;  %v5035_v10 = vor.u32 %v5034_v26, %v5031_v58  ;;  %v5050_v36 = vrot.slane %v5048_v16, 5  ;;  %v5056_v11 = vshll.u32 %v4683_v33, 16  ;;  %18231 = vst [vmem:[#allocation22_spill] sm:$0xff] %v14501_v48  ;;  %v18232_v58 = vld [vmem:[#allocation36_spill] sm:$0xff]  ;;  %v18233_v33 = vld [vmem:[#allocation34_spill] sm:$0xff]  ;;  %v14511_v26 = vpop.f32.mrf.mxu0 }
 0x19f   :  { %11774 = vmatprep.mubr.msk.bf16.mxu0 %vm2154_vm12, %v18227_v12  ;;  %v5062_v38 = vshll.u32 %v4684_v49, 16  ;;  %v18230_v52 = vcombine.low %v18228_v31, %v18229_v34  ;;  %v5017_v59 = vsel %vm12789_vm13, %v5012_v15, %v14470_v47  ;;  %v5045_v53 = vor.u32 %v5044_v22, %v14489_v24  ;;  %v18256_v48 = vld [vmem:[#allocation44_spill] sm:$0xff] }
 0x1a0   :  { %v5055_v51 = vrot.slane %v5053_v60, 4  ;;  %v5066_v1 = vshrl.u32 %v4684_v49, 16  ;;  %v18234_v16 = vcombine.low %v18232_v58, %v18233_v33  ;;  %v5036_v12 = vrot.slane %v5035_v10, 4 }
 0x1a1   :  { %11701 = vmatmul.mubr.msk.bf16.gmra.mxu1 %vm2154_vm12, %v18230_v52  ;;  %v5027_v52 = vsel %vm12789_vm13, %v5022_v54, %v5026_v4  ;;  %v5058_v31 = vrot.slane %v5056_v11, 5  ;;  %v14515_v34 = vrot.slane %v5062_v38, 5  ;;  %v5046_v47 = vrot.slane %v5045_v53, 4  ;;  %v85_v11 = vld [vmem:[#allocation2 + $0xc0] sm:$0x1]  ;;  %v14529_v38 = vpop.f32.mrf.mxu1 }
 0x1a2   :  { %11704 = vmatprep.mubr.msk.bf16.mxu1 %vm2154_vm12, %v18234_v16  ;;  %v5068_v15 = vrot.slane %v5066_v1, 4  ;;  %v5072_v22 = vshll.u32 %v4685_v45, 16  ;;  %v5077_v60 = vshrl.u32 %v4686_v21, 16  ;;  %v18235_v49 = vsel %vm12789_vm13, %v14418_v17, %v14416_v20  ;;  %18237 = vst [vmem:[#allocation19_spill] sm:$0xff] %v14529_v38  ;;  %v4698_v38 = vld [vmem:[#allocation2 + $0xfc] sm:$0xf] }
 0x1a3   :  { %v18236_v58 = vsel %vm12789_vm13, %v14403_v14, %v14384_v18  ;;  %v5059_v4 = vor.u32 %v5058_v31, %v5055_v51  ;;  %v5080_v54 = vshll.u32 %v4686_v21, 16  ;;  %v5086_v10 = vshll.u32 %v4687_v44, 16  ;;  %v285_v14 = vld [vmem:[%s17988_s0 + $0x78] sm:$0xf]  ;;  %v14548_v51 = vpop.f32.mrf.mxu0 }
 0x1a4   :  { %v14527_v33 = vcombine.low %v18236_v58, %v18235_v49  ;;  %v18238_v45 = vsel %vm12789_vm13, %v14424_v35, %v14412_v62  ;;  %v14538_v20 = vcombine.low %v4993_v57, %v5003_v27  ;;  %v5069_v17 = vor.u32 %v5068_v15, %v14515_v34  ;;  %v286_v27 = vld [vmem:[%s17988_s0 + $0x7c] sm:$0xf] }
 0x1a5   :  { %v14536_v53 = vcombine.low %v18238_v45, %v4979_v13  ;;  %v5079_v18 = vrot.slane %v5077_v60, 4  ;;  %v18239_v21 = vcombine.low %v14168_v8, %v14180_v43  ;;  %v14550_v1 = vcombine.low %v5017_v59, %v5027_v52  ;;  %v4688_v13 = vld [vmem:[#allocation2 + $0xbc] sm:$0x1]  ;;  %v4692_v60 = vld [vmem:[#allocation2 + $0xe4] sm:$0xf] }
 0x1a6   :  { %v5041_v62 = vsel %vm12789_vm13, %v5036_v12, %v14489_v24  ;;  %v5051_v35 = vsel %vm12789_vm13, %v5046_v47, %v5050_v36  ;;  %v5082_v57 = vrot.slane %v5080_v54, 5  ;;  %v18240_v8 = vcombine.low %v14184_v25, %v14194_v37  ;;  %v195_v36 = vld [vmem:[#allocation2 + $0xc8] sm:$0x1]  ;;  %v18242_v49 = vld [vmem:[#allocation40_spill] sm:$0xff]  ;;  %v7641_v24 = vld [vmem:[#allocation2 + $0x20] sm:$0x1] }
 0x1a7   :  { %11775 = vmatmul.mubr.msk.bf16.gmra.mxu0 %vm2154_vm12, %v18239_v21  ;;  %v14564_v43 = vrot.slane %v5072_v22, 5  ;;  %v14566_v59 = vrot.slane %v5086_v10, 5  ;;  %v5090_v16 = vshrl.u32 %v4687_v44, 16  ;;  %v86_v52 = vsel %vm12688_vm5, 0, %v85_v11  ;;  %v18243_v25 = vld [vmem:[#allocation38_spill] sm:$0xff]  ;;  %v14576_v22 = vpop.f32.mrf.mxu1 }
 0x1a8   :  { %11778 = vmatprep.mubr.msk.bf16.mxu0 %vm2154_vm12, %v18240_v8  ;;  %v14570_v12 = vrot.slane %v5059_v4, 4  ;;  %v5083_v31 = vor.u32 %v5082_v57, %v5079_v18  ;;  %87 = vst [vmem:[#allocation2 + $0xc0] sm:$0x1] %v86_v52  ;;  %v577_v47 = vshrl.u32 %v285_v14, 16  ;;  %v580_v15 = vshll.u32 %v285_v14, 16  ;;  %18245 = vst [vmem:[#allocation25_spill] sm:$0xff] %v14576_v22  ;;  %v14584_v18 = vpop.f32.mrf.mxu0 }
 0x1a9   :  { %v18244_v37 = vcombine.low %v18242_v49, %v18243_v25  ;;  %v14578_v58 = vrot.slane %v5069_v17, 4  ;;  %v5092_v44 = vrot.slane %v5090_v16, 4  ;;  %v5096_v54 = vshll.u32 %v4688_v13, 16  ;;  %v18246_v11 = vld [vmem:[#allocation42_spill] sm:$0xff]  ;;  %v18247_v4 = vld [vmem:[#allocation41_spill] sm:$0xff]  ;;  %18249 = vst [vmem:[#allocation23_spill] sm:$0xff] %v14584_v18 }
 0x1aa   :  { %v585_v10 = vshrl.u32 %v286_v27, 16  ;;  %v18248_v45 = vcombine.low %v18246_v11, %v18247_v4  ;;  %v14586_v14 = vcombine.low %v5041_v62, %v5051_v35  ;;  %v14588_v21 = vrot.slane %v5083_v31, 4  ;;  %v4693_v16 = vld [vmem:[#allocation2 + $0xe8] sm:$0xf]  ;;  %v4695_v31 = vld [vmem:[#allocation2 + $0xf0] sm:$0xf] }
 0x1ab   :  { %11705 = vmatmul.mubr.msk.bf16.gmra.mxu1 %vm2154_vm12, %v18244_v37  ;;  %v579_v57 = vrot.slane %v577_v47, 7  ;;  %v588_v8 = vshll.u32 %v286_v27, 16  ;;  %v5093_v52 = vor.u32 %v5092_v44, %v14566_v59  ;;  %v196_v13 = vsel %vm12694_vm6, 0, %v195_v36  ;;  %v14597_v47 = vpop.f32.mrf.mxu1  ;;  %v4696_v4 = vld [vmem:[#allocation2 + $0xf4] sm:$0xf]  ;;  %v18260_v18 = vld [vmem:[#allocation8_spill] sm:$0xff] }
 0x1ac   :  { %11708 = vmatprep.mubr.msk.bf16.mxu1 %vm2154_vm12, %v18248_v45  ;;  %v587_v17 = vrot.slane %v585_v10, 7  ;;  %v5125_v25 = vshrl.u32 %v4692_v60, 16  ;;  %197 = vst [vmem:[#allocation2 + $0xc8] sm:$0x1] %v196_v13  ;;  %v5128_v35 = vshll.u32 %v4692_v60, 16  ;;  %18251 = vst [vmem:[#allocation27_spill] sm:$0xff] %v14597_v47  ;;  %v18252_v45 = vcombine.low %v14172_v2, %v14198_v5 }
 0x1ad   :  { %v582_v11 = vor.u32 %v580_v15, %v579_v57  ;;  %v583_v62 = vrot.slane %v579_v57, 4  ;;  %v14603_v36 = vrot.slane %v5096_v54, 5  ;;  %v14609_v15 = vpop.f32.mrf.mxu0  ;;  %v5094_v60 = vrot.slane %v5093_v52, 4  ;;  %v4694_v57 = vld [vmem:[#allocation2 + $0xec] sm:$0x1]  ;;  %v12208_v49 = vld [vmem:[#allocation2 + $0xe4] sm:$0xff]  }
 0x1ae   :  { %v590_v44 = vor.u32 %v588_v8, %v587_v17  ;;  %v5127_v10 = vrot.slane %v5125_v25, 4  ;;  %18253 = vst [vmem:[#allocation26_spill] sm:$0xff] %v14609_v15  ;;  %v5130_v13 = vrot.slane %v5128_v35, 5  ;;  %v5134_v37 = vshll.u32 %v4693_v16, 16  ;;  %v4697_v25 = vld [vmem:[#allocation2 + $0xf8] sm:$0x1] }
 0x1af   :  { %11779 = vmatmul.mubr.msk.bf16.gmra.mxu0 %vm2154_vm12, %v18252_v45  ;;  %v5138_v47 = vshrl.u32 %v4693_v16, 16  ;;  %v5089_v54 = vsel %vm12789_vm13, %v14588_v21, %v14566_v59  ;;  %v1069_v5 = vld [vmem:[#allocation2 + $0xc0] sm:$0xf]  ;;  %v5149_v45 = vshrl.u32 %v4695_v31, 16  ;;  %v5152_v27 = vshll.u32 %v4695_v31, 16  ;;  %v18257_v15 = vld [vmem:[#allocation43_spill] sm:$0xff]  ;;  %v14628_v21 = vpop.f32.mrf.mxu1 }
 0x1b0   :  { %11850 = vmatprep.mubr.msk.bf16.mxu0 %vm2154_vm12, %v14270_v6  ;;  %v591_v2 = vsel %vm12734_vm10, %v583_v62, %v590_v44  ;;  %v592_v52 = vrot.slane %v587_v17, 4  ;;  %v1070_v35 = vsel %vm12717_vm8, %v582_v11, %v1069_v5  ;;  %v5131_v16 = vor.u32 %v5130_v13, %v5127_v10  ;;  %18259 = vst [vmem:[#allocation35_spill] sm:$0xff] %v14628_v21  ;;  %v18261_v11 = vld [vmem:[#allocation9_spill] sm:$0xff] }
 0x1b1   :  { %1072 = vst.msk [vmem:[#allocation2 + $0xc4] sm:$0xf] %vm19_vm1, %v591_v2  ;;  %v14622_v6 = vrot.slane %v5134_v37, 5  ;;  %v18258_v59 = vcombine.low %v18256_v48, %v18257_v15  ;;  %1071 = vst [vmem:[#allocation2 + $0xc0] sm:$0xf] %v1070_v35  ;;  %v5140_v62 = vrot.slane %v5138_v47, 4  ;;  %v18262_v5 = vcombine.low %v18260_v18, %v18261_v11  ;;  %v14634_v37 = vpop.f32.mrf.mxu0 }
 0x1b2   :  { %v5144_v31 = vshll.u32 %v4694_v57, 16  ;;  %v5151_v17 = vrot.slane %v5149_v45, 4  ;;  %v5154_v44 = vrot.slane %v5152_v27, 5  ;;  %v5099_v48 = vsel %vm12789_vm13, %v5094_v60, %v14603_v36  ;;  %v4699_v45 = vld [vmem:[#allocation2 + $0x100] sm:$0xf]  ;;  %v14646_v36 = vpop.f32.mrf.mxu1 }
 0x1b3   :  { %11709 = vmatmul.mubr.msk.bf16.gmra.mxu1 %vm2154_vm12, %v18258_v59  ;;  %v5158_v10 = vshll.u32 %v4696_v4, 16  ;;  %v5162_v15 = vshrl.u32 %v4696_v4, 16  ;;  %v5168_v13 = vshll.u32 %v4697_v25, 16  ;;  %v1073_v2 = vld [vmem:[#allocation2 + $0xc8] sm:$0x1]  ;;  %v5141_v47 = vor.u32 %v5140_v62, %v14622_v6  ;;  %18263 = vst [vmem:[#allocation37_spill] sm:$0xff] %v14646_v36 }
 0x1b4   :  { %11712 = vmatprep.mubr.msk.bf16.mxu1 %vm2154_vm12, %v18262_v5  ;;  %v5155_v57 = vor.u32 %v5154_v44, %v5151_v17  ;;  %v5173_v27 = vshrl.u32 %v4698_v38, 16  ;;  %v5176_v35 = vshll.u32 %v4698_v38, 16  ;;  %v1074_v18 = vsel %vm12688_vm5, %v592_v52, %v1073_v2  ;;  %v4700_v21 = vld [vmem:[#allocation2 + $0x104] sm:$0x1]  ;;  %v14654_v38 = vld [vmem:[#allocation2 + $0x108] sm:$0xf]  ;;  %v14658_v52 = vpop.f32.mrf.mxu0 }
 0x1b5   :  { %v14642_v59 = vrot.slane %v5131_v16, 4  ;;  %v14644_v11 = vrot.slane %v5158_v10, 5  ;;  %v5164_v5 = vrot.slane %v5162_v15, 4  ;;  %1075 = vst [vmem:[#allocation2 + $0xc8] sm:$0x1] %v1074_v18  ;;  %v14648_v4 = vrot.slane %v5141_v47, 4 }
 0x1b6   :  { %v14650_v60 = vrot.slane %v5144_v31, 5  ;;  %v14652_v25 = vrot.slane %v5155_v57, 4  ;;  %v5175_v62 = vrot.slane %v5173_v27, 4  ;;  %v12192_v17 = vld [vmem:[#allocation2 + $0xc] sm:$0xff]   ;;  %v5178_v44 = vrot.slane %v5176_v35, 5  ;;  %v18266_v18 = vld [vmem:[#allocation12_spill] sm:$0xff] }
 0x1b7   :  { %11851 = vmatmul.mubr.msk.bf16.vlgmr.msra.gmra.mxu0 %vm2154_vm12, %v14272_v7  ;;  %v5165_v16 = vor.u32 %v5164_v5, %v14644_v11  ;;  %v5182_v10 = vshll.u32 %v4699_v45, 16  ;;  %v5186_v15 = vshrl.u32 %v4699_v45, 16  ;;  %v18264_v31 = vsel %vm12789_vm13, %v14578_v58, %v14564_v43  ;;  %v14690_v5 = vpop.f32.mrf.mxu0  ;;  %v4706_v36 = vld [vmem:[#allocation2 + $0x11c] sm:$0x1] }
 0x1b8   :  { %11981 = vmatpush3.bf16.msra.mxu0 %v14262_v63  ;;  %11854 = vmatprep.mubr.msk.bf16.mxu0 %vm2154_vm12, %v14302_v23  ;;  %v18265_v7 = vsel %vm12789_vm13, %v14570_v12, %v14515_v34  ;;  %v14676_v47 = vcombine.low %v5089_v54, %v5099_v48  ;;  %v4690_v57 = vld [vmem:[#allocation2 + $0xc4] sm:$0xf]  ;;  %v5170_v45 = vrot.slane %v5168_v13, 5  ;;  %v5192_v63 = vshll.u32 %v4700_v21, 16  ;;  %v4689_v27 = vld [vmem:[#allocation2 + $0xc0] sm:$0xf]  ;;  %v14687_v12 = vpop.f32.mrf.mxu1 }
 0x1b9   :  { %v14674_v2 = vcombine.low %v18265_v7, %v18264_v31  ;;  %v5110_v35 = vshll.u32 %v4690_v57, 16  ;;  %v5137_v23 = vsel %vm12789_vm13, %v14642_v59, %v14622_v6  ;;  %v5179_v43 = vor.u32 %v5178_v44, %v5175_v62  ;;  %18268 = vst [vmem:[#allocation39_spill] sm:$0xff] %v14687_v12  ;;  %18269 = vst [vmem:[#allocation29_spill] sm:$0xff] %v14690_v5  ;;  %v12193_v12 = vld [vmem:[#allocation2 + $0x18] sm:$0xff]   ;;  %v12202_v5 = vld [vmem:[#allocation2 + $0x84] sm:$0xff]  }
 0x1ba   :  { %v5197_v58 = vshrl.u32 %v14654_v38, 16  ;;  %v18267_v34 = vcombine.low %v18161_v42, %v18266_v18  ;;  %v5101_v54 = vshrl.u32 %v4689_v27, 16  ;;  %v5104_v48 = vshll.u32 %v4689_v27, 16 }
 0x1bb   :  { %v5114_v21 = vshrl.u32 %v4690_v57, 16  ;;  %v5166_v13 = vrot.slane %v5165_v16, 4  ;;  %v14692_v31 = vrot.slane %v5110_v35, 5  ;;  %v5147_v6 = vsel %vm12789_vm13, %v14648_v4, %v14650_v60  ;;  %v12194_v4 = vld [vmem:[#allocation2 + $0x24] sm:$0xff]   ;;  %v14704_v60 = vpop.f32.mrf.mxu1 }
 0x1bc   :  { %11713 = vmatmul.mubr.msk.bf16.gmra.mxu1 %vm2154_vm12, %v18267_v34  ;;  %v5184_v42 = vrot.slane %v5182_v10, 5  ;;  %v5188_v59 = vrot.slane %v5186_v15, 4  ;;  %v5103_v62 = vrot.slane %v5101_v54, 4  ;;  %v5106_v44 = vrot.slane %v5104_v48, 5  ;;  %v4691_v57 = vld [vmem:[#allocation2 + $0xc8] sm:$0x1] }
 0x1bd   :  { %11784 = vmatprep.mubr.msk.bf16.mxu1 %vm2154_vm12, %v12192_v17  ;;  %v5116_v7 = vrot.slane %v5114_v21, 4  ;;  %v5161_v16 = vsel %vm12789_vm13, %v14652_v25, %v14644_v11  ;;  %v4702_v17 = vld [vmem:[#allocation2 + $0x10c] sm:$0xf]  ;;  %v5171_v27 = vsel %vm12789_vm13, %v5166_v13, %v5170_v45  ;;  %v5180_v35 = vrot.slane %v5179_v43, 4  ;;  %18270 = vst [vmem:[#allocation28_spill] sm:$0xff] %v14704_v60  ;;  %v14709_v11 = vpop.f32.mrf.mxu0 }
 0x1be   :  { %v5189_v18 = vor.u32 %v5188_v59, %v5184_v42  ;;  %v5194_v34 = vrot.slane %v5192_v63, 5  ;;  %v5107_v10 = vor.u32 %v5106_v44, %v5103_v62  ;;  %v5120_v54 = vshll.u32 %v4691_v57, 16  ;;  %v4703_v48 = vld [vmem:[#allocation2 + $0x110] sm:$0x1]  ;;  %18271 = vst [vmem:[#allocation32_spill] sm:$0xff] %v14709_v11  ;;  %v12199_v11 = vld [vmem:[#allocation2 + $0x60] sm:$0xff]  }
 0x1bf   :  { %v5117_v15 = vor.u32 %v5116_v7, %v14692_v31  ;;  %v5199_v21 = vrot.slane %v5197_v58, 4  ;;  %11855 = vmatmul.mubr.msk.bf16.gmra.mxu0 %vm2154_vm12, %v14356_v39  ;;  %v5200_v45 = vshll.u32 %v14654_v38, 16  ;;  %v5206_v43 = vshll.u32 %v4702_v17, 16  ;;  %v4704_v13 = vld [vmem:[#allocation2 + $0x114] sm:$0xf]  ;;  %v14721_v38 = vpop.f32.mrf.mxu1 }
 0x1c0   :  { %v5190_v25 = vrot.slane %v5189_v18, 4  ;;  %v5210_v63 = vshrl.u32 %v4702_v17, 16  ;;  %11858 = vmatprep.mubr.msk.bf16.mxu0 %vm2154_vm12, %v14366_v0  ;;  %v5108_v59 = vrot.slane %v5107_v10, 4  ;;  %v5122_v44 = vrot.slane %v5120_v54, 5  ;;  %v4705_v58 = vld [vmem:[#allocation2 + $0x118] sm:$0xf] }
 0x1c1   :  { %v5118_v62 = vrot.slane %v5117_v15, 4  ;;  %v14714_v7 = vcombine.low %v5137_v23, %v5147_v6  ;;  %v14716_v57 = vcombine.low %v5161_v16, %v5171_v27  ;;  %v5202_v39 = vrot.slane %v5200_v45, 5  ;;  %18272 = vst [vmem:[#allocation30_spill] sm:$0xff] %v14721_v38  ;;  %v4707_v17 = vld [vmem:[#allocation2 + $0x120] sm:$0xf]  ;;  %v14732_v27 = vpop.f32.mrf.mxu0 }
 0x1c2   :  { %v14718_v60 = vrot.slane %v5206_v43, 5  ;;  %v5212_v18 = vrot.slane %v5210_v63, 4  ;;  %v5113_v0 = vsel %vm12789_vm13, %v5108_v59, %v14692_v31  ;;  %v5185_v23 = vsel %vm12789_vm13, %v5180_v35, %v5184_v42  ;;  %18273 = vst [vmem:[#allocation33_spill] sm:$0xff] %v14732_v27  ;;  %v14740_v42 = vld [vmem:[%s17987_s1 + $0xe] sm:$0x3]  ;;  %v14751_v59 = vpop.f32.mrf.mxu1 }
 0x1c3   :  { %v5195_v6 = vsel %vm12789_vm13, %v5190_v25, %v5194_v34  ;;  %v5216_v16 = vshll.u32 %v4703_v48, 16  ;;  %v5203_v10 = vor.u32 %v5202_v39, %v5199_v21  ;;  %v5221_v15 = vshrl.u32 %v4704_v13, 16  ;;  %v4708_v48 = vld [vmem:[#allocation2 + $0x124] sm:$0xf]  ;;  %v14749_v63 = vld [vmem:[%s17987_s1 + $0x10] sm:$0x3] }
 0x1c4   :  { %11785 = vmatmul.mubr.msk.bf16.vlgmr.msra.gmra.mxu1 %vm2154_vm12, %v12193_v12  ;;  %v5123_v12 = vsel %vm12789_vm13, %v5118_v62, %v5122_v44  ;;  %v5213_v31 = vor.u32 %v5212_v18, %v14718_v60  ;;  %v5224_v35 = vshll.u32 %v4704_v13, 16  ;;  %v5230_v34 = vshll.u32 %v4705_v58, 16  ;;  %18274 = vst [vmem:[#allocation31_spill] sm:$0xff] %v14751_v59  ;;  %12189 = vmatprep.subr.msk.bf16.mxu0 %vm2251_vm0, %v14749_v63  ;;  %v12196_v39 = vld [vmem:[#allocation2 + $0x3c] sm:$0xff]   ;;  %v14757_v18 = vpop.f32.mrf.mxu0 }
 0x1c5   :  { %11915 = vmatpush3.bf16.msra.mxu1 %v14236_v3  ;;  %11788 = vmatprep.mubr.msk.bf16.mxu1 %vm2154_vm12, %v12194_v4  ;;  %v5234_v54 = vshrl.u32 %v4705_v58, 16  ;;  %v5240_v3 = vshll.u32 %v4706_v36, 16  ;;  %v12195_v4 = vld [vmem:[#allocation2 + $0x30] sm:$0xff]   ;;  %v14744_v25 = vcombine.low %v5185_v23, %v5195_v6  ;;  %v5204_v21 = vrot.slane %v5203_v10, 4  ;;  %v4710_v58 = vld [vmem:[#allocation2 + $0x12c] sm:$0xf] }
 0x1c6   :  { %12188 = vmatprep.subr.msk.bf16.mxu1 %vm2251_vm0, %v14740_v42  ;;  %v5223_v45 = vrot.slane %v5221_v15, 4  ;;  %v5245_v43 = vshrl.u32 %v4707_v17, 16  ;;  %v5218_v13 = vrot.slane %v5216_v16, 5  ;;  %v5226_v62 = vrot.slane %v5224_v35, 5  ;;  %18275 = vst [vmem:[#allocation36_spill] sm:$0xff] %v14757_v18 }
 0x1c7   :  { %v5232_v36 = vrot.slane %v5230_v34, 5  ;;  %v5236_v44 = vrot.slane %v5234_v54, 4  ;;  %11859 = vmatmul.mubr.msk.bf16.gmra.mxu0 %vm2154_vm12, %v14368_v9  ;;  %v14759_v23 = vcombine.low %v5113_v0, %v5123_v12  ;;  %v5214_v6 = vrot.slane %v5213_v31, 4  ;;  %v4709_v54 = vld [vmem:[#allocation2 + $0x128] sm:$0x1]  ;;  %v14767_v12 = vpop.f32.mrf.mxu1 }
 0x1c8   :  { %v5247_v10 = vrot.slane %v5245_v43, 4  ;;  %v5248_v15 = vshll.u32 %v4707_v17, 16  ;;  %11862 = vmatprep.mubr.msk.bf16.mxu0 %vm2154_vm12, %v14414_v28  ;;  %v5227_v16 = vor.u32 %v5226_v62, %v5223_v45  ;;  %v5242_v34 = vrot.slane %v5240_v3, 5  ;;  %v4711_v18 = vld [vmem:[#allocation2 + $0x130] sm:$0xf]  ;;  %18276 = vst [vmem:[#allocation34_spill] sm:$0xff] %v14767_v12  ;;  %v14772_v43 = vpop.f32.mrf.mxu0 }
 0x1c9   :  { %v5237_v35 = vor.u32 %v5236_v44, %v5232_v36  ;;  %v5254_v59 = vshll.u32 %v4708_v48, 16  ;;  %v5209_v38 = vsel %vm12789_vm13, %v5204_v21, %v14718_v60  ;;  %v5258_v27 = vshrl.u32 %v4708_v48, 16  ;;  %v4713_v3 = vld [vmem:[#allocation2 + $0x138] sm:$0xf]  ;;  %18277 = vst [vmem:[#allocation3_spill] sm:$0xff] %v14772_v43 }
 0x1ca   :  { %v5250_v9 = vrot.slane %v5248_v15, 5  ;;  %v5269_v0 = vshrl.u32 %v4710_v58, 16  ;;  %v5228_v17 = vrot.slane %v5227_v16, 4  ;;  %v5272_v45 = vshll.u32 %v4710_v58, 16  ;;  %v4712_v48 = vld [vmem:[#allocation2 + $0x134] sm:$0x1] }
 0x1cb   :  { %v5238_v31 = vrot.slane %v5237_v35, 4  ;;  %v14769_v28 = vrot.slane %v5254_v59, 5  ;;  %v5260_v60 = vrot.slane %v5258_v27, 4  ;;  %v5264_v21 = vshll.u32 %v4709_v54, 16  ;;  %v4714_v27 = vld [vmem:[#allocation2 + $0x13c] sm:$0xf] }
 0x1cc   :  { %11789 = vmatmul.mubr.msk.bf16.gmra.mxu1 %vm2154_vm12, %v12195_v4  ;;  %v5251_v62 = vor.u32 %v5250_v9, %v5247_v10  ;;  %v5271_v44 = vrot.slane %v5269_v0, 4  ;;  %v5219_v4 = vsel %vm12789_vm13, %v5214_v6, %v5218_v13  ;;  %v5233_v15 = vsel %vm12789_vm13, %v5228_v17, %v5232_v36  ;;  %v12197_v54 = vld [vmem:[#allocation2 + $0x48] sm:$0xff]   ;;  %v14783_v9 = vpop.f32.mrf.mxu1  ;;  %v12198_v36 = vld [vmem:[#allocation2 + $0x54] sm:$0xff]   ;;  %v14789_v17 = vpop.f32.mrf.mxu0 }
 0x1cd   :  { %11792 = vmatprep.mubr.msk.bf16.mxu1 %vm2154_vm12, %v12196_v39  ;;  %v5274_v16 = vrot.slane %v5272_v45, 5  ;;  %v5278_v59 = vshll.u32 %v4711_v18, 16  ;;  %v5243_v58 = vsel %vm12789_vm13, %v5238_v31, %v5242_v34  ;;  %v5261_v39 = vor.u32 %v5260_v60, %v14769_v28  ;;  %18278 = vst [vmem:[#allocation40_spill] sm:$0xff] %v14783_v9  ;;  %18279 = vst [vmem:[#allocation38_spill] sm:$0xff] %v14789_v17  ;;  %v4715_v45 = vld [vmem:[#allocation2 + $0x140] sm:$0x1] }
 0x1ce   :  { %v14780_v35 = vrot.slane %v5251_v62, 4  ;;  %v5282_v10 = vshrl.u32 %v4711_v18, 16  ;;  %v5288_v13 = vshll.u32 %v4712_v48, 16  ;;  %v5293_v6 = vshrl.u32 %v4713_v3, 16  ;;  %v4718_v43 = vld [vmem:[#allocation2 + $0x14c] sm:$0x1] }
 0x1cf   :  { %v5275_v0 = vor.u32 %v5274_v16, %v5271_v44  ;;  %v14785_v12 = vrot.slane %v5278_v59, 5  ;;  %11863 = vmatmul.mubr.msk.bf16.gmra.mxu0 %vm2154_vm12, %v14422_v61  ;;  %v14791_v34 = vcombine.low %v5209_v38, %v5219_v4  ;;  %v14793_v31 = vrot.slane %v5264_v21, 5  ;;  %v4716_v59 = vld [vmem:[#allocation2 + $0x144] sm:$0xf] }
 0x1d0   :  { %v5284_v18 = vrot.slane %v5282_v10, 4  ;;  %v5296_v62 = vshll.u32 %v4713_v3, 16  ;;  %11866 = vmatprep.mubr.msk.bf16.mxu0 %vm2154_vm12, %v14527_v33  ;;  %v14797_v60 = vcombine.low %v5233_v15, %v5243_v58  ;;  %v5262_v48 = vrot.slane %v5261_v39, 4  ;;  %v4717_v10 = vld [vmem:[#allocation2 + $0x148] sm:$0xf]  ;;  %v14805_v3 = vpop.f32.mrf.mxu1 }
 0x1d1   :  { %v5295_v44 = vrot.slane %v5293_v6, 4  ;;  %v5302_v16 = vshll.u32 %v4714_v27, 16  ;;  %v5257_v61 = vsel %vm12789_vm13, %v14780_v35, %v14769_v28  ;;  %v5306_v4 = vshrl.u32 %v4714_v27, 16  ;;  %18280 = vst [vmem:[#allocation42_spill] sm:$0xff] %v14805_v3  ;;  %v14808_v6 = vpop.f32.mrf.mxu0 }
 0x1d2   :  { %v5285_v38 = vor.u32 %v5284_v18, %v14785_v12  ;;  %v5298_v21 = vrot.slane %v5296_v62, 5  ;;  %v5276_v33 = vrot.slane %v5275_v0, 4  ;;  %v5290_v15 = vrot.slane %v5288_v13, 5  ;;  %18281 = vst [vmem:[#allocation41_spill] sm:$0xff] %v14808_v6  ;;  %v4719_v18 = vld [vmem:[#allocation2 + $0x150] sm:$0xf]  ;;  %v14813_v6 = vpop.f32.mrf.mxu1 }
 0x1d3   :  { %v5304_v58 = vrot.slane %v5302_v16, 5  ;;  %v5312_v39 = vshll.u32 %v4715_v45, 16  ;;  %v5308_v28 = vrot.slane %v5306_v4, 4  ;;  %v5317_v35 = vshrl.u32 %v4716_v59, 16  ;;  %v4720_v0 = vld [vmem:[#allocation2 + $0x154] sm:$0xf] }
 0x1d4   :  { %11793 = vmatmul.mubr.msk.bf16.gmra.mxu1 %vm2154_vm12, %v12197_v54  ;;  %v5286_v9 = vrot.slane %v5285_v38, 4  ;;  %v5299_v17 = vor.u32 %v5298_v21, %v5295_v44  ;;  %v5267_v27 = vsel %vm12789_vm13, %v5262_v48, %v14793_v31  ;;  %v5320_v54 = vshll.u32 %v4716_v59, 16  ;;  %18282 = vst [vmem:[#allocation6_spill] sm:$0xff] %v14813_v6  ;;  %v12200_v48 = vld [vmem:[#allocation2 + $0x6c] sm:$0xff]  }
 0x1d5   :  { %11796 = vmatprep.mubr.msk.bf16.mxu1 %vm2154_vm12, %v12198_v36  ;;  %v5326_v62 = vshll.u32 %v4717_v10, 16  ;;  %v5330_v3 = vshrl.u32 %v4717_v10, 16  ;;  %v5309_v16 = vor.u32 %v5308_v28, %v5304_v58  ;;  %v5314_v45 = vrot.slane %v5312_v39, 5  ;;  %v4721_v39 = vld [vmem:[#allocation2 + $0x158] sm:$0x1] }
 0x1d6   :  { %v5300_v13 = vrot.slane %v5299_v17, 4  ;;  %v5319_v36 = vrot.slane %v5317_v35, 4  ;;  %v5281_v44 = vsel %vm12789_vm13, %v5276_v33, %v14785_v12  ;;  %v5322_v38 = vrot.slane %v5320_v54, 5  ;;  %v14822_v17 = vpop.f32.mrf.mxu0  ;;  %v4722_v54 = vld [vmem:[#allocation2 + $0x15c] sm:$0xf] }
 0x1d7   :  { %v14818_v21 = vrot.slane %v5326_v62, 5  ;;  %v5332_v31 = vrot.slane %v5330_v3, 4  ;;  %11867 = vmatmul.mubr.msk.bf16.gmra.mxu0 %vm2154_vm12, %v14536_v53  ;;  %18283 = vst [vmem:[#allocation5_spill] sm:$0xff] %v14822_v17  ;;  %v5291_v59 = vsel %vm12789_vm13, %v5286_v9, %v5290_v15  ;;  %v5310_v10 = vrot.slane %v5309_v16, 4  ;;  %v4726_v17 = vld [vmem:[#allocation2 + $0x16c] sm:$0xf] }
 0x1d8   :  { %v5305_v4 = vsel %vm12789_vm13, %v5300_v13, %v5304_v58  ;;  %v5341_v28 = vshrl.u32 %v4719_v18, 16  ;;  %11870 = vmatprep.mubr.msk.bf16.mxu0 %vm2154_vm12, %v14538_v20  ;;  %v5323_v12 = vor.u32 %v5322_v38, %v5319_v36  ;;  %v5336_v3 = vshll.u32 %v4718_v43, 16  ;;  %v14834_v58 = vpop.f32.mrf.mxu1 }
 0x1d9   :  { %v5344_v33 = vshll.u32 %v4719_v18, 16  ;;  %v5350_v35 = vshll.u32 %v4720_v0, 16  ;;  %v5315_v53 = vsel %vm12789_vm13, %v5310_v10, %v5314_v45  ;;  %v5333_v62 = vor.u32 %v5332_v31, %v14818_v21  ;;  %18284 = vst [vmem:[#allocation44_spill] sm:$0xff] %v14834_v58  ;;  %v14841_v18 = vpop.f32.mrf.mxu0  ;;  %v4723_v31 = vld [vmem:[#allocation2 + $0x160] sm:$0xf] }
 0x1da   :  { %v5343_v9 = vrot.slane %v5341_v28, 4  ;;  %v5354_v15 = vshrl.u32 %v4720_v0, 16  ;;  %v14836_v13 = vcombine.low %v5257_v61, %v5267_v27  ;;  %v14838_v16 = vcombine.low %v5281_v44, %v5291_v59  ;;  %18285 = vst [vmem:[#allocation43_spill] sm:$0xff] %v14841_v18  ;;  %v4725_v61 = vld [vmem:[#allocation2 + $0x168] sm:$0xf]  ;;  %v12201_v27 = vld [vmem:[#allocation2 + $0x78] sm:$0xff]  }
 0x1db   :  { %v5324_v20 = vrot.slane %v5323_v12, 4  ;;  %v5346_v43 = vrot.slane %v5344_v33, 5  ;;  %v5352_v36 = vrot.slane %v5350_v35, 5  ;;  %v5360_v38 = vshll.u32 %v4721_v39, 16  ;;  %v4724_v33 = vld [vmem:[#allocation2 + $0x164] sm:$0x1] }
 0x1dc   :  { %11797 = vmatmul.mubr.msk.bf16.gmra.mxu1 %vm2154_vm12, %v12199_v11  ;;  %v5356_v45 = vrot.slane %v5354_v15, 4  ;;  %v5365_v10 = vshrl.u32 %v4722_v54, 16  ;;  %v14843_v0 = vcombine.low %v5305_v4, %v5315_v53  ;;  %v5338_v11 = vrot.slane %v5336_v3, 5  ;;  %v14849_v4 = vpop.f32.mrf.mxu0  ;;  %v4727_v53 = vld [vmem:[#allocation2 + $0x170] sm:$0x1] }
 0x1dd   :  { %11800 = vmatprep.mubr.msk.bf16.mxu1 %vm2154_vm12, %v12200_v48  ;;  %v5347_v28 = vor.u32 %v5346_v43, %v5343_v9  ;;  %v5368_v58 = vshll.u32 %v4722_v54, 16  ;;  %v5334_v44 = vrot.slane %v5333_v62, 4  ;;  %v5362_v12 = vrot.slane %v5360_v38, 5  ;;  %v14845_v48 = vpop.f32.mrf.mxu1 }
 0x1de   :  { %v5357_v59 = vor.u32 %v5356_v45, %v5352_v36  ;;  %v5367_v6 = vrot.slane %v5365_v10, 4  ;;  %18286 = vst [vmem:[#allocation8_spill] sm:$0xff] %v14845_v48  ;;  %v5374_v15 = vshll.u32 %v4723_v31, 16  ;;  %v5378_v39 = vshrl.u32 %v4723_v31, 16  ;;  %v4728_v31 = vld [vmem:[#allocation2 + $0x174] sm:$0xf] }
 0x1df   :  { %v5348_v18 = vrot.slane %v5347_v28, 4  ;;  %v5370_v35 = vrot.slane %v5368_v58, 5  ;;  %11871 = vmatmul.mubr.msk.bf16.gmra.mxu0 %vm2154_vm12, %v14550_v1  ;;  %v5329_v3 = vsel %vm12789_vm13, %v5324_v20, %v14818_v21  ;;  %v5389_v62 = vshrl.u32 %v4725_v61, 16  ;;  %v14863_v28 = vpop.f32.mrf.mxu1 }
 0x1e0   :  { %v5358_v54 = vrot.slane %v5357_v59, 4  ;;  %v5392_v9 = vshll.u32 %v4725_v61, 16  ;;  %11874 = vmatprep.mubr.msk.bf16.mxu0 %vm2154_vm12, %v14586_v14  ;;  %v14856_v43 = vrot.slane %v5374_v15, 5  ;;  %v5380_v45 = vrot.slane %v5378_v39, 4  ;;  %18287 = vst [vmem:[#allocation9_spill] sm:$0xff] %v14863_v28 }
 0x1e1   :  { %v5371_v58 = vor.u32 %v5370_v35, %v5367_v6  ;;  %v5384_v38 = vshll.u32 %v4724_v33, 16  ;;  %v5339_v1 = vsel %vm12789_vm13, %v5334_v44, %v5338_v11  ;;  %v5353_v10 = vsel %vm12789_vm13, %v5348_v18, %v5352_v36  ;;  %v14869_v33 = vpop.f32.mrf.mxu0  ;;  %v4729_v36 = vld [vmem:[#allocation2 + $0x178] sm:$0xf]  ;;  %v14875_v48 = vpop.f32.mrf.mxu1 }
 0x1e2   :  { %v5391_v21 = vrot.slane %v5389_v62, 4  ;;  %v5394_v20 = vrot.slane %v5392_v9, 5  ;;  %v5363_v14 = vsel %vm12789_vm13, %v5358_v54, %v5362_v12  ;;  %v5381_v61 = vor.u32 %v5380_v45, %v14856_v43  ;;  %18288 = vst [vmem:[#allocation12_spill] sm:$0xff] %v14869_v33  ;;  %v4730_v62 = vld [vmem:[#allocation2 + $0x17c] sm:$0x1]  ;;  %v12203_v12 = vld [vmem:[#allocation2 + $0x90] sm:$0xff]  }
 0x1e3   :  { %v5372_v6 = vrot.slane %v5371_v58, 4  ;;  %v5398_v59 = vshll.u32 %v4726_v17, 16  ;;  %v5402_v44 = vshrl.u32 %v4726_v17, 16  ;;  %v5408_v18 = vshll.u32 %v4727_v53, 16  ;;  %18289 = vst [vmem:[#allocation45_spill] sm:$0xff] %v14875_v48 }
 0x1e4   :  { %11801 = vmatmul.mubr.msk.bf16.gmra.mxu1 %vm2154_vm12, %v12201_v27  ;;  %v5395_v11 = vor.u32 %v5394_v20, %v5391_v21  ;;  %v5413_v35 = vshrl.u32 %v4728_v31, 16  ;;  %v14871_v15 = vcombine.low %v5329_v3, %v5339_v1  ;;  %v5386_v27 = vrot.slane %v5384_v38, 5  ;;  %v4732_v33 = vld [vmem:[#allocation2 + $0x184] sm:$0xf]  ;;  %v12204_v3 = vld [vmem:[#allocation2 + $0x9c] sm:$0xff]   ;;  %v14879_v38 = vpop.f32.mrf.mxu0 }
 0x1e5   :  { %11804 = vmatprep.mubr.msk.bf16.mxu1 %vm2154_vm12, %v12202_v5  ;;  %v5400_v39 = vrot.slane %v5398_v59, 5  ;;  %v5416_v9 = vshll.u32 %v4728_v31, 16  ;;  %v14873_v54 = vcombine.low %v5353_v10, %v5363_v14  ;;  %v5382_v58 = vrot.slane %v5381_v61, 4  ;;  %v4731_v5 = vld [vmem:[#allocation2 + $0x180] sm:$0xf] }
 0x1e6   :  { %v5404_v45 = vrot.slane %v5402_v44, 4  ;;  %v5415_v28 = vrot.slane %v5413_v35, 4  ;;  %v5396_v21 = vrot.slane %v5395_v11, 4  ;;  %v5422_v53 = vshll.u32 %v4729_v36, 16  ;;  %v4733_v44 = vld [vmem:[#allocation2 + $0x188] sm:$0x1] }
 0x1e7   :  { %v5418_v17 = vrot.slane %v5416_v9, 5  ;;  %v5426_v20 = vshrl.u32 %v4729_v36, 16  ;;  %11875 = vmatmul.mubr.msk.bf16.gmra.mxu0 %vm2154_vm12, %v14674_v2  ;;  %v5377_v31 = vsel %vm12789_vm13, %v5372_v6, %v14856_v43  ;;  %v5410_v10 = vrot.slane %v5408_v18, 5  ;;  %v14891_v43 = vpop.f32.mrf.mxu1 }
 0x1e8   :  { %v5405_v1 = vor.u32 %v5404_v45, %v5400_v39  ;;  %v5432_v14 = vshll.u32 %v4730_v62, 16  ;;  %11878 = vmatprep.mubr.msk.bf16.mxu0 %vm2154_vm12, %v14676_v47  ;;  %v14886_v59 = vrot.slane %v5422_v53, 5  ;;  %v5437_v36 = vshrl.u32 %v4731_v5, 16  ;;  %18290 = vst [vmem:[#allocation46_spill] sm:$0xff] %v14891_v43  ;;  %v4734_v62 = vld [vmem:[#allocation2 + $0x18c] sm:$0xf]  ;;  %v14897_v45 = vpop.f32.mrf.mxu0 }
 0x1e9   :  { %v5419_v61 = vor.u32 %v5418_v17, %v5415_v28  ;;  %v5428_v11 = vrot.slane %v5426_v20, 4  ;;  %v5387_v2 = vsel %vm12789_vm13, %v5382_v58, %v5386_v27  ;;  %v5440_v9 = vshll.u32 %v4731_v5, 16  ;;  %v4735_v17 = vld [vmem:[#allocation2 + $0x190] sm:$0xf]  ;;  %v139_v43 = vld [vmem:[#allocation2 + $0x198] sm:$0x1] }
 0x1ea   :  { %v5406_v35 = vrot.slane %v5405_v1, 4  ;;  %v5446_v48 = vshll.u32 %v4732_v33, 16  ;;  %v5401_v6 = vsel %vm12789_vm13, %v5396_v21, %v5400_v39  ;;  %v5439_v28 = vrot.slane %v5437_v36, 4  ;;  %v4736_v1 = vld [vmem:[#allocation2 + $0x194] sm:$0x1] }
 0x1eb   :  { %v5429_v47 = vor.u32 %v5428_v11, %v14886_v59  ;;  %v5450_v18 = vshrl.u32 %v4732_v33, 16  ;;  %v5442_v58 = vrot.slane %v5440_v9, 5  ;;  %v14903_v53 = vcombine.low %v5377_v31, %v5387_v2  ;;  %v14917_v9 = vpop.f32.mrf.mxu0 }
 0x1ec   :  { %11805 = vmatmul.mubr.msk.bf16.gmra.mxu1 %vm2154_vm12, %v12203_v12  ;;  %v5411_v27 = vsel %vm12789_vm13, %v5406_v35, %v5410_v10  ;;  %v14901_v5 = vrot.slane %v5446_v48, 5  ;;  %v5456_v12 = vshll.u32 %v4733_v44, 16  ;;  %v14905_v39 = vrot.slane %v5419_v61, 4  ;;  %v12205_v10 = vld [vmem:[#allocation2 + $0xa8] sm:$0xff]   ;;  %v14911_v35 = vpop.f32.mrf.mxu1  ;;  %v12206_v61 = vld [vmem:[#allocation2 + $0xb4] sm:$0xff]  }
 0x1ed   :  { %11808 = vmatprep.mubr.msk.bf16.mxu1 %vm2154_vm12, %v12204_v3  ;;  %v14907_v21 = vrot.slane %v5432_v14, 5  ;;  %v5452_v33 = vrot.slane %v5450_v18, 4  ;;  %v14909_v20 = vcombine.low %v5401_v6, %v5411_v27  ;;  %v5443_v3 = vor.u32 %v5442_v58, %v5439_v28  ;;  %18291 = vst [vmem:[#allocation47_spill] sm:$0xff] %v14911_v35  ;;  %v317_v14 = vld [vmem:[%s17988_s0 + $0xf8] sm:$0xf]  ;;  %v14926_v35 = vpop.f32.mrf.mxu0 }
 0x1ee   :  { %v5461_v11 = vshrl.u32 %v4734_v62, 16  ;;  %v5464_v36 = vshll.u32 %v4734_v62, 16  ;;  %v5430_v48 = vrot.slane %v5429_v47, 4  ;;  %v5470_v31 = vshll.u32 %v4735_v17, 16  ;;  %18292 = vst [vmem:[#allocation48_spill] sm:$0xff] %v14926_v35 }
 0x1ef   :  { %v5453_v44 = vor.u32 %v5452_v33, %v14901_v5  ;;  %v5474_v2 = vshrl.u32 %v4735_v17, 16  ;;  %11879 = vmatmul.mubr.msk.bf16.gmra.mxu0 %vm2154_vm12, %v14759_v23  ;;  %v5444_v6 = vrot.slane %v5443_v3, 4  ;;  %v5458_v28 = vrot.slane %v5456_v12, 5  ;;  %v318_v33 = vld [vmem:[%s17988_s0 + $0xfc] sm:$0xf] }
 0x1f0   :  { %v5463_v18 = vrot.slane %v5461_v11, 4  ;;  %v5466_v62 = vrot.slane %v5464_v36, 5  ;;  %11882 = vmatprep.mubr.msk.bf16.mxu0 %vm2154_vm12, %v14714_v7  ;;  %v5472_v27 = vrot.slane %v5470_v31, 5  ;;  %v5480_v17 = vshll.u32 %v4736_v1, 16  ;;  %v249_v11 = vld [vmem:[#allocation2 + $0x1a0] sm:$0x1]  ;;  %v14935_v1 = vpop.f32.mrf.mxu1 }
 0x1f1   :  { %v5454_v47 = vrot.slane %v5453_v44, 4  ;;  %v5476_v58 = vrot.slane %v5474_v2, 4  ;;  %v5425_v23 = vsel %vm12789_vm13, %v14905_v39, %v14886_v59  ;;  %v140_v3 = vsel %vm12688_vm5, 0, %v139_v43  ;;  %18293 = vst [vmem:[#allocation49_spill] sm:$0xff] %v14935_v1  ;;  %v6058_v35 = vld [vmem:[#allocation2 + $0xc] sm:$0xe]  ;;  %v14941_v59 = vpop.f32.mrf.mxu0 }
 0x1f2   :  { %v5467_v12 = vor.u32 %v5466_v62, %v5463_v18  ;;  %v849_v7 = vshrl.u32 %v317_v14, 16  ;;  %v5435_v36 = vsel %vm12789_vm13, %v5430_v48, %v14907_v21  ;;  %v5482_v31 = vrot.slane %v5480_v17, 5  ;;  %141 = vst [vmem:[#allocation2 + $0x198] sm:$0x1] %v140_v3  ;;  %v6059_v62 = vld [vmem:[#allocation2 + $0x18] sm:$0xe] }
 0x1f3   :  { %v5477_v44 = vor.u32 %v5476_v58, %v5472_v27  ;;  %v852_v2 = vshll.u32 %v317_v14, 16  ;;  %v5449_v43 = vsel %vm12789_vm13, %v5444_v6, %v14901_v5  ;;  %v857_v18 = vshrl.u32 %v318_v33, 16  ;;  %v14950_v17 = vpop.f32.mrf.mxu0  ;;  %v14954_v6 = vpop.f32.mrf.mxu1 }
 0x1f4   :  { %11809 = vmatmul.mubr.msk.bf16.gmra.mxu1 %vm2154_vm12, %v12205_v10  ;;  %v5468_v39 = vrot.slane %v5467_v12, 4  ;;  %v851_v10 = vrot.slane %v849_v7, 7  ;;  %v5459_v21 = vsel %vm12789_vm13, %v5454_v47, %v5458_v28  ;;  %v860_v58 = vshll.u32 %v318_v33, 16  ;;  %18294 = vst [vmem:[#allocation50_spill] sm:$0xff] %v14950_v17  ;;  %18295 = vst [vmem:[#allocation51_spill] sm:$0xff] %v14954_v6  ;;  %v12207_v12 = vld [vmem:[#allocation2 + $0xc0] sm:$0xff]  }
 0x1f5   :  { %11812 = vmatprep.mubr.msk.bf16.mxu1 %vm2154_vm12, %v12206_v61  ;;  %v5478_v48 = vrot.slane %v5477_v44, 4  ;;  %v250_v14 = vsel %vm12694_vm6, 0, %v249_v11  ;;  %v859_v1 = vrot.slane %v857_v18, 7  ;;  %v10898_v5 = vrot.slane %v6058_v35, 9  ;;  %v12589_v33 = vld [vmem:[#allocation2 + $0x10] sm:$0xf]  ;;  %v14958_v17 = vpop.f32.mrf.mxu0 }
 0x1f6   :  { %v5473_v61 = vsel %vm12789_vm13, %v5468_v39, %v5472_v27  ;;  %v855_v3 = vrot.slane %v851_v10, 4  ;;  %251 = vst [vmem:[#allocation2 + $0x1a0] sm:$0x1] %v250_v14  ;;  %v854_v47 = vor.u32 %v852_v2, %v851_v10  ;;  %v6188_v7 = vrot.slane %v12589_v33, 5  ;;  %v6060_v11 = vld [vmem:[#allocation2 + $0x24] sm:$0xe]  ;;  %v14988_v33 = vpop.f32.mrf.mxu1 }
 0x1f7   :  { %v5483_v28 = vsel %vm12789_vm13, %v5478_v48, %v5482_v31  ;;  %v10899_v44 = vrot.slane %v6059_v62, 9  ;;  %11883 = vmatmul.mubr.msk.bf16.gmra.mxu0 %vm2154_vm12, %v14716_v57  ;;  %v14962_v27 = vcombine.low %v5425_v23, %v5435_v36  ;;  %v14964_v35 = vcombine.low %v5449_v43, %v5459_v21  ;;  %v12590_v10 = vld [vmem:[#allocation2 + $0x14] sm:$0x1]  ;;  %v6061_v23 = vld [vmem:[#allocation2 + $0x30] sm:$0xe]  ;;  %v14978_v36 = vpop.f32.mrf.mxu0  ;;  %18301 = vst [vmem:[#allocation54_spill] sm:$0xff] %v14988_v33 }
 0x1f8   :  { %v862_v39 = vor.u32 %v860_v58, %v859_v1  ;;  %v18296_v18 = vrot.slane %v14186_v41, 5  ;;  %11886 = vmatprep.mubr.msk.bf16.mxu0 %vm2154_vm12, %v14744_v25  ;;  %v14970_v31 = vcombine.low %v5473_v61, %v5483_v28  ;;  %v6190_v2 = vrot.slane %v6188_v7, 4  ;;  %v6062_v41 = vld [vmem:[#allocation2 + $0x3c] sm:$0xe] }
 0x1f9   :  { %v6191_v62 = vrot.slane %v12590_v10, 5  ;;  %v864_v21 = vrot.slane %v859_v1, 4  ;;  %v1181_v58 = vld [vmem:[#allocation2 + $0x198] sm:$0xf]  ;;  %v18299_v25 = vrot.slane %v14202_v46, 5  ;;  %v10900_v28 = vrot.slane %v6060_v11, 9  ;;  %v15001_v11 = vpop.f32.mrf.mxu0 }
 0x1fa   :  { %v6197_v14 = vrot.slane %v18296_v18, 4  ;;  %v18297_v48 = vmov %v18296_v18  ;;  %v863_v43 = vsel %vm12734_vm10, %v855_v3, %v862_v39  ;;  %v14996_v8 = vsel %vm13565_vm2, %v10898_v5, %v6188_v7  ;;  %v12591_v1 = vld [vmem:[#allocation2 + $0x28] sm:$0xf]  ;;  %v12593_v18 = vld [vmem:[#allocation2 + $0x34] sm:$0xf] }
 0x1fb   :  { %v14976_v57 = vsel %vm13565_vm2, %v10899_v44, %v18297_v48  ;;  %v1182_v44 = vsel %vm12717_vm8, %v854_v47, %v1181_v58  ;;  %1184 = vst.msk [vmem:[#allocation2 + $0x19c] sm:$0xf] %vm19_vm1, %v863_v43  ;;  %v6202_v3 = vrot.slane %v12591_v1, 5  ;;  %v15005_v22 = vsel %vm2251_vm0, %v14740_v42, 0  ;;  %v6063_v7 = vld [vmem:[#allocation2 + $0x48] sm:$0xe] }
 0x1fc   :  { %18298 = vst [vmem:[#allocation52_spill] sm:$0xff] %v14976_v57  ;;  %v14986_v61 = vsel %vm13565_vm2, %v6197_v14, %v18299_v25  ;;  %11813 = vmatmul.mubr.msk.bf16.gmra.mxu1 %vm2154_vm12, %v12207_v12  ;;  %1183 = vst [vmem:[#allocation2 + $0x198] sm:$0xf] %v1182_v44  ;;  %v12592_v12 = vld [vmem:[#allocation2 + $0x2c] sm:$0x1]  ;;  %v10901_v39 = vrot.slane %v6061_v23, 9  ;;  %v15007_v14 = vpop.f32.mrf.mxu1  ;;  %v15011_v48 = vsel %vm13565_vm2, %v6190_v2, %v6191_v62  ;;  %v15013_v44 = vpop.f32.mrf.mxu0 }
 0x1fd   :  { %18300 = vst [vmem:[#allocation53_spill] sm:$0xff] %v14986_v61  ;;  %11816 = vmatprep.mubr.msk.bf16.mxu1 %vm2154_vm12, %v12208_v49  ;;  %18302 = vst [vmem:[#allocation55_spill] sm:$0xff] %v15005_v22  ;;  %v6205_v47 = vrot.slane %v12592_v12, 5  ;;  %v6209_v5 = vrot.slane %v12593_v18, 5  ;;  %v1185_v10 = vld [vmem:[#allocation2 + $0x1a0] sm:$0x1]  ;;  %v15019_v23 = vsel %vm13565_vm2, %v10900_v28, %v6202_v3 }
 0x1fe   :  { %18303 = vst [vmem:[#allocation56_spill] sm:$0xff] %v15007_v14  ;;  %v6204_v49 = vrot.slane %v6202_v3, 4  ;;  %v10902_v43 = vrot.slane %v6062_v41, 9  ;;  %v12594_v58 = vld [vmem:[#allocation2 + $0x40] sm:$0xf]  ;;  %v1186_v42 = vsel %vm12688_vm5, %v864_v21, %v1185_v10  ;;  %18304 = vst [vmem:[#allocation57_spill] sm:$0xff] %v15019_v23  ;;  %v15023_v2 = vpop.f32.mrf.mxu1 }
 0x1ff   :  { %v6216_v25 = vrot.slane %v12594_v58, 5  ;;  %v6211_v1 = vrot.slane %v6209_v5, 4  ;;  %v12595_v12 = vld [vmem:[#allocation2 + $0x44] sm:$0x1]  ;;  %v15021_v46 = vld [vmem:[#allocation2 + $0x54] sm:$0xe]  ;;  %v15031_v21 = vsel %vm13565_vm2, %v10901_v39, %v6209_v5  ;;  %v15033_v58 = vpop.f32.mrf.mxu0  ;;  %11887 = vmatmul.mubr.msk.bf16.gmra.mxu0 %vm2154_vm12, %v14791_v34 }
 0x200   :  { %v6219_v18 = vrot.slane %v12595_v12, 5  ;;  %18305 = vst [vmem:[#allocation58_spill] sm:$0xff] %v15023_v2  ;;  %v12209_v62 = vld [vmem:[#allocation2 + $0xf0] sm:$0xff]   ;;  %1187 = vst [vmem:[#allocation2 + $0x1a0] sm:$0x1] %v1186_v42  ;;  %v15027_v41 = vsel %vm13565_vm2, %v6204_v49, %v6205_v47  ;;  %v10903_v28 = vrot.slane %v6063_v7, 9  ;;  %v15051_v2 = vpop.f32.mrf.mxu1  ;;  %11890 = vmatprep.mubr.msk.bf16.mxu0 %vm2154_vm12, %v14797_v60 }
 0x201   :  { %18306 = vst [vmem:[#allocation59_spill] sm:$0xff] %v15027_v41  ;;  %18307 = vst [vmem:[#allocation60_spill] sm:$0xff] %v15031_v21  ;;  %v6218_v10 = vrot.slane %v6216_v25, 4  ;;  %v12210_v3 = vld [vmem:[#allocation2 + $0xfc] sm:$0xff]   ;;  %v15039_v12 = vsel %vm2251_vm0, %v14749_v63, 0  ;;  %v18308_v42 = vrot.slane %v14254_v56, 5  ;;  %v15049_v39 = vsel %vm13565_vm2, %v10902_v43, %v6216_v25  ;;  %v15062_v25 = vpop.f32.mrf.mxu0 }
 0x202   :  { %18310 = vst [vmem:[#allocation62_spill] sm:$0xff] %v15049_v39  ;;  %v12596_v5 = vld [vmem:[#allocation2 + $0x4c] sm:$0xf]  ;;  %v6065_v49 = vld [vmem:[#allocation2 + $0x60] sm:$0xe]  ;;  %18311 = vst [vmem:[#allocation63_spill] sm:$0xff] %v15051_v2  ;;  %v11654_v33 = vpop.f32.mrf.mxu1 }
 0x203   :  { %v15045_v47 = vsel %vm13565_vm2, %v6211_v1, %v18308_v42  ;;  %v6223_v7 = vrot.slane %v12596_v5, 5  ;;  %v15059_v56 = vsel %vm13565_vm2, %v6218_v10, %v6219_v18  ;;  %v10904_v34 = vrot.slane %v15021_v46, 9  ;;  %v12597_v1 = vld [vmem:[#allocation2 + $0x58] sm:$0xf]  ;;  %v15064_v42 = vld [vmem:[#allocation2 + $0x19c] sm:$0xf]  ;;  %v15080_v60 = vpop.f32.mrf.mxu0 }
 0x204   :  { %18309 = vst [vmem:[#allocation61_spill] sm:$0xff] %v15045_v47  ;;  %18312 = vst [vmem:[#allocation64_spill] sm:$0xff] %v15059_v56  ;;  %v6230_v43 = vrot.slane %v12597_v1, 5  ;;  %v12598_v63 = vld [vmem:[#allocation2 + $0x5c] sm:$0x1]  ;;  %11817 = vmatmul.mubr.msk.bf16.gmra.mxu1 %vm2154_vm12, %v12209_v62  ;;  %v5494_v46 = vshll.u32 %v15064_v42, 16  ;;  %v2846_v6 = vadd.f32 %v11654_v33, %v14296_v40  ;;  %v2837_v21 = vpop.f32.mrf.mxu1 }
 0x205   :  { %v6225_v2 = vrot.slane %v6223_v7, 4  ;;  %v6233_v14 = vrot.slane %v12598_v63, 5  ;;  %v4737_v18 = vld [vmem:[#allocation2 + $0x198] sm:$0xf]  ;;  %v15076_v1 = vsel %vm13565_vm2, %v10903_v28, %v6223_v7  ;;  %v10905_v5 = vrot.slane %v6065_v49, 9  ;;  %11820 = vmatprep.mubr.msk.bf16.mxu1 %vm2154_vm12, %v12210_v3  ;;  %v12211_v41 = vld [vmem:[#allocation2 + $0x108] sm:$0xff]   ;;  %v15095_v56 = vpop.f32.mrf.mxu0 }
 0x206   :  { %v5485_v63 = vshrl.u32 %v4737_v18, 16  ;;  %v5488_v47 = vshll.u32 %v4737_v18, 16  ;;  %v5498_v62 = vshrl.u32 %v15064_v42, 16  ;;  %v15083_v23 = vrot.slane %v5494_v46, 5  ;;  %v12599_v40 = vld [vmem:[#allocation2 + $0x64] sm:$0xf]  ;;  %v11655_v61 = vpop.f32.mrf.mxu1 }
 0x207   :  { %v18313_v10 = vrot.slane %v14290_v30, 5  ;;  %v6232_v7 = vrot.slane %v6230_v43, 4  ;;  %v6237_v33 = vrot.slane %v12599_v40, 5  ;;  %v15092_v3 = vadd.f32 %v14958_v17, %v2846_v6  ;;  %v18315_v49 = vld [vmem:[#allocation11_spill] sm:$0xff]  ;;  %v15097_v39 = vld [vmem:[#allocation2 + $0x1a0] sm:$0x1]  ;;  %11891 = vmatmul.mubr.msk.bf16.gmra.mxu0 %vm2154_vm12, %v14836_v13 }
 0x208   :  { %v2838_v18 = vadd.f32 %v2837_v21, %v18315_v49  ;;  %v5487_v46 = vrot.slane %v5485_v63, 4  ;;  %v5490_v22 = vrot.slane %v5488_v47, 5  ;;  %v5500_v30 = vrot.slane %v5498_v62, 4  ;;  %v6066_v17 = vld [vmem:[#allocation2 + $0x6c] sm:$0xe]  ;;  %v12212_v40 = vld [vmem:[#allocation2 + $0x114] sm:$0xff]   ;;  %v15110_v63 = vpop.f32.mrf.mxu0  ;;  %v2840_v49 = vpop.f32.mrf.mxu1  ;;  %11894 = vmatprep.mubr.msk.bf16.mxu0 %vm2154_vm12, %v14838_v16 }
 0x209   :  { %v15089_v28 = vsel %vm13565_vm2, %v6225_v2, %v18313_v10  ;;  %18314 = vst [vmem:[#allocation65_spill] sm:$0xff] %v15092_v3  ;;  %v5504_v57 = vshll.u32 %v15097_v39, 16  ;;  %v15104_v10 = vsel %vm13565_vm2, %v10904_v34, %v6230_v43  ;;  %v2849_v21 = vadd.f32 %v11655_v61, %v14333_v50 }
 0x20a   :  { %v15107_v6 = vadd.f32 %v14978_v36, %v2838_v18  ;;  %v5491_v47 = vor.u32 %v5490_v22, %v5487_v46  ;;  %v15116_v62 = vsel %vm13565_vm2, %v6232_v7, %v6233_v14  ;;  %v5501_v36 = vor.u32 %v5500_v30, %v15083_v23  ;;  %v15129_v22 = vpop.f32.mrf.mxu0  ;;  %v6067_v18 = vld [vmem:[#allocation2 + $0x78] sm:$0xe]  ;;  %v11658_v46 = vpop.f32.mrf.mxu1 }
 0x20b   :  { %v5506_v34 = vrot.slane %v5504_v57, 5  ;;  %v15123_v50 = vsel %vm13565_vm2, %v10905_v5, %v6237_v33  ;;  %v6239_v61 = vrot.slane %v6237_v33, 4  ;;  %v15126_v43 = vadd.f32 %v15001_v11, %v2849_v21  ;;  %v18318_v57 = vld [vmem:[#allocation10_spill] sm:$0xff]  ;;  %v12600_v33 = vld [vmem:[#allocation2 + $0x70] sm:$0xf] }
 0x20c   :  { %18316 = vst [vmem:[#allocation11_spill] sm:$0xff] %v15107_v6  ;;  %v2841_v13 = vadd.f32 %v2840_v49, %v14364_v55  ;;  %v5492_v14 = vrot.slane %v5491_v47, 4  ;;  %v10906_v7 = vrot.slane %v6066_v17, 9  ;;  %11821 = vmatmul.mubr.msk.bf16.gmra.mxu1 %vm2154_vm12, %v12211_v41  ;;  %v5502_v16 = vrot.slane %v5501_v36, 4  ;;  %v12601_v21 = vld [vmem:[#allocation2 + $0x74] sm:$0x1]  ;;  %v15143_v49 = vpop.f32.mrf.mxu0 }
 0x20d   :  { %18317 = vst [vmem:[#allocation66_spill] sm:$0xff] %v15126_v43  ;;  %v18319_v30 = vrot.slane %v18318_v57, 5  ;;  %v6244_v11 = vrot.slane %v12600_v33, 5  ;;  %v6247_v2 = vrot.slane %v12601_v21, 5  ;;  %v18321_v47 = vld [vmem:[#allocation7_spill] sm:$0xff]  ;;  %11824 = vmatprep.mubr.msk.bf16.mxu1 %vm2154_vm12, %v12212_v40  ;;  %v2853_v57 = vpop.f32.mrf.mxu1  ;;  %v10907_v40 = vrot.slane %v6067_v18, 9 }
 0x20e   :  { %v15139_v55 = vadd.f32 %v15013_v44, %v2841_v13  ;;  %v2862_v17 = vadd.f32 %v11658_v46, %v18321_v47  ;;  %v5497_v41 = vsel %vm12789_vm13, %v5492_v14, %v15083_v23  ;;  %v18323_v33 = vld [vmem:[#allocation16_spill] sm:$0xff]  ;;  %v15160_v23 = vpop.f32.mrf.mxu0  ;;  %v12214_v14 = vld [vmem:[#allocation2 + $0x12c] sm:$0xff]  }
 0x20f   :  { %v15136_v5 = vsel %vm13565_vm2, %v6239_v61, %v18319_v30  ;;  %v6068_v61 = vld [vmem:[#allocation2 + $0x84] sm:$0xe]  ;;  %v5507_v30 = vsel %vm12789_vm13, %v5502_v16, %v5506_v34  ;;  %v15154_v44 = vsel %vm13565_vm2, %v10906_v7, %v6244_v11  ;;  %v6246_v13 = vrot.slane %v6244_v11, 4  ;;  %v12602_v47 = vld [vmem:[#allocation2 + $0x7c] sm:$0xf]  ;;  %11895 = vmatmul.mubr.msk.bf16.gmra.mxu0 %vm2154_vm12, %v14843_v0 }
 0x210   :  { %18320 = vst [vmem:[#allocation10_spill] sm:$0xff] %v15139_v55  ;;  %v15157_v46 = vadd.f32 %v15033_v58, %v2862_v17  ;;  %v2854_v21 = vadd.f32 %v2853_v57, %v18323_v33  ;;  %v6251_v36 = vrot.slane %v12602_v47, 5  ;;  %v11659_v55 = vpop.f32.mrf.mxu1  ;;  %v12213_v34 = vld [vmem:[#allocation2 + $0x120] sm:$0xff]   ;;  %v10908_v11 = vrot.slane %v6068_v61, 9  ;;  %v12604_v58 = vld [vmem:[#allocation2 + $0x88] sm:$0xf]  ;;  %v15172_v6 = vpop.f32.mrf.mxu0  ;;  %11898 = vmatprep.mubr.msk.bf16.mxu0 %vm2154_vm12, %v14871_v15 }
 0x211   :  { %v15166_v7 = vsel %vm13565_vm2, %v6246_v13, %v6247_v2  ;;  %v12603_v16 = vld [vmem:[#allocation2 + $0x80] sm:$0x1]  ;;  %v6258_v17 = vrot.slane %v12604_v58, 5  ;;  %v18325_v33 = vld [vmem:[#allocation20_spill] sm:$0xff]  ;;  %v15176_v47 = vcombine.low %v5497_v41, %v5507_v30 }
 0x212   :  { %18322 = vst [vmem:[#allocation7_spill] sm:$0xff] %v15157_v46  ;;  %v6254_v18 = vrot.slane %v12603_v16, 5  ;;  %v6069_v46 = vld [vmem:[#allocation2 + $0x90] sm:$0xe]  ;;  %v15169_v57 = vadd.f32 %v15062_v25, %v2854_v21  ;;  %v2865_v43 = vadd.f32 %v11659_v55, %v18325_v33  ;;  %v2856_v61 = vpop.f32.mrf.mxu1  ;;  %v15184_v25 = vsel %vm13565_vm2, %v10907_v40, %v6251_v36  ;;  %v12605_v21 = vld [vmem:[#allocation2 + $0x8c] sm:$0x1]  ;;  %v15190_v33 = vpop.f32.mrf.mxu0 }
 0x213   :  { %v6253_v55 = vrot.slane %v6251_v36, 4  ;;  %v6260_v13 = vrot.slane %v6258_v17, 4  ;;  %v6261_v16 = vrot.slane %v12605_v21, 5  ;;  %v6070_v58 = vld [vmem:[#allocation2 + $0x9c] sm:$0xe]  ;;  %v18327_v41 = vld [vmem:[#allocation21_spill] sm:$0xff]  ;;  %v15199_v40 = vsel %vm13565_vm2, %v10908_v11, %v6258_v17 }
 0x214   :  { %18324 = vst [vmem:[#allocation16_spill] sm:$0xff] %v15169_v57  ;;  %v15187_v0 = vadd.f32 %v15080_v60, %v2865_v43  ;;  %v2857_v30 = vadd.f32 %v2856_v61, %v18327_v41  ;;  %v10909_v2 = vrot.slane %v6069_v46, 9  ;;  %v12606_v57 = vld [vmem:[#allocation2 + $0x94] sm:$0xf]  ;;  %v11662_v15 = vpop.f32.mrf.mxu1  ;;  %11825 = vmatmul.mubr.msk.bf16.gmra.mxu1 %vm2154_vm12, %v12213_v34  ;;  %v12607_v43 = vld [vmem:[#allocation2 + $0x98] sm:$0x1] }
 0x215   :  { %v6265_v3 = vrot.slane %v12606_v57, 5  ;;  %v15195_v36 = vsel %vm13565_vm2, %v6253_v55, %v6254_v18  ;;  %v15203_v60 = vsel %vm13565_vm2, %v6260_v13, %v6261_v16  ;;  %v6268_v61 = vrot.slane %v12607_v43, 5  ;;  %v6071_v46 = vld [vmem:[#allocation2 + $0xa8] sm:$0xe]  ;;  %11828 = vmatprep.mubr.msk.bf16.mxu1 %vm2154_vm12, %v12214_v14  ;;  %v15210_v18 = vpop.f32.mrf.mxu0  ;;  %v12608_v16 = vld [vmem:[#allocation2 + $0xa0] sm:$0xf] }
 0x216   :  { %18326 = vst [vmem:[#allocation20_spill] sm:$0xff] %v15187_v0  ;;  %18328 = vst [vmem:[#allocation21_spill] sm:$0xff] %v15195_v36  ;;  %v15206_v57 = vadd.f32 %v15095_v56, %v2857_v30  ;;  %v2878_v34 = vadd.f32 %v11662_v15, %v14487_v29  ;;  %v10910_v17 = vrot.slane %v6070_v58, 9  ;;  %v2869_v55 = vpop.f32.mrf.mxu1  ;;  %v6272_v41 = vrot.slane %v12608_v16, 5  ;;  %v12609_v56 = vld [vmem:[#allocation2 + $0xa4] sm:$0x1] }
 0x217   :  { %v15216_v13 = vsel %vm13565_vm2, %v10909_v2, %v6265_v3  ;;  %v6267_v21 = vrot.slane %v6265_v3, 4  ;;  %v6275_v30 = vrot.slane %v12609_v56, 5  ;;  %v2870_v14 = vadd.f32 %v2869_v55, %v14511_v26  ;;  %v15222_v15 = vpop.f32.mrf.mxu0  ;;  %v12610_v11 = vld [vmem:[#allocation2 + $0xac] sm:$0xf]  ;;  %v12215_v36 = vld [vmem:[#allocation2 + $0x138] sm:$0xff]   ;;  %v12216_v55 = vld [vmem:[#allocation2 + $0x144] sm:$0xff]   ;;  %11899 = vmatmul.mubr.msk.bf16.gmra.mxu0 %vm2154_vm12, %v14873_v54 }
 0x218   :  { %18329 = vst [vmem:[#allocation67_spill] sm:$0xff] %v15206_v57  ;;  %v15219_v29 = vadd.f32 %v15110_v63, %v2878_v34  ;;  %v10911_v43 = vrot.slane %v6071_v46, 9  ;;  %v6279_v58 = vrot.slane %v12610_v11, 5  ;;  %v6072_v57 = vld [vmem:[#allocation2 + $0xb4] sm:$0xe]  ;;  %v11663_v0 = vpop.f32.mrf.mxu1  ;;  %v6274_v16 = vrot.slane %v6272_v41, 4  ;;  %11902 = vmatprep.mubr.msk.bf16.mxu0 %vm2154_vm12, %v14903_v53 }
 0x219   :  { %v15228_v2 = vsel %vm13565_vm2, %v6267_v21, %v6268_v61  ;;  %v12611_v63 = vld [vmem:[#allocation2 + $0xb0] sm:$0x1]  ;;  %v15231_v26 = vadd.f32 %v15129_v22, %v2870_v14  ;;  %v2881_v46 = vadd.f32 %v11663_v0, %v14548_v51  ;;  %v15234_v11 = vpop.f32.mrf.mxu0  ;;  %v15242_v61 = vsel %vm13565_vm2, %v10910_v17, %v6272_v41  ;;  %v6073_v21 = vld [vmem:[#allocation2 + $0xc0] sm:$0xe]  ;;  %v12612_v14 = vld [vmem:[#allocation2 + $0xb8] sm:$0xf] }
 0x21a   :  { %18330 = vst [vmem:[#allocation68_spill] sm:$0xff] %v15219_v29  ;;  %18331 = vst [vmem:[#allocation69_spill] sm:$0xff] %v15228_v2  ;;  %v6282_v34 = vrot.slane %v12611_v63, 5  ;;  %v2872_v63 = vpop.f32.mrf.mxu1  ;;  %v15248_v51 = vsel %vm13565_vm2, %v6274_v16, %v6275_v30  ;;  %v6281_v22 = vrot.slane %v6279_v58, 4  ;;  %v10912_v0 = vrot.slane %v6072_v57, 9  ;;  %v18334_v56 = vld [vmem:[#allocation23_spill] sm:$0xff] }
 0x21b   :  { %18332 = vst [vmem:[#allocation70_spill] sm:$0xff] %v15231_v26  ;;  %v6286_v54 = vrot.slane %v12612_v14, 5  ;;  %v15251_v3 = vadd.f32 %v15143_v49, %v2881_v46  ;;  %v2873_v26 = vadd.f32 %v2872_v63, %v18334_v56  ;;  %v15254_v17 = vpop.f32.mrf.mxu0  ;;  %v15258_v41 = vsel %vm13565_vm2, %v10911_v43, %v6279_v58  ;;  %v12613_v53 = vld [vmem:[#allocation2 + $0xbc] sm:$0x1]  ;;  %v88_v2 = vld [vmem:[#allocation2 + $0xcc] sm:$0x1] }
 0x21c   :  { %v6289_v29 = vrot.slane %v12613_v53, 5  ;;  %v6074_v30 = vld [vmem:[#allocation2 + $0xe4] sm:$0xe]  ;;  %v11666_v16 = vpop.f32.mrf.mxu1  ;;  %11829 = vmatmul.mubr.msk.bf16.gmra.mxu1 %vm2154_vm12, %v12215_v36  ;;  %v15263_v57 = vsel %vm13565_vm2, %v6281_v22, %v6282_v34  ;;  %v10913_v56 = vrot.slane %v6073_v21, 9  ;;  %v18337_v58 = vld [vmem:[#allocation26_spill] sm:$0xff] }
 0x21d   :  { %18333 = vst [vmem:[#allocation71_spill] sm:$0xff] %v15251_v3  ;;  %v15267_v49 = vsel %vm13565_vm2, %v10912_v0, %v6286_v54  ;;  %v6288_v46 = vrot.slane %v6286_v54, 4  ;;  %v15270_v43 = vadd.f32 %v15160_v23, %v2873_v26  ;;  %v2894_v63 = vadd.f32 %v11666_v16, %v18337_v58  ;;  %11832 = vmatprep.mubr.msk.bf16.mxu1 %vm2154_vm12, %v12216_v55  ;;  %v15274_v14 = vpop.f32.mrf.mxu0  ;;  %v12614_v34 = vld [vmem:[#allocation2 + $0xc4] sm:$0xf]  ;;  %v12615_v21 = vld [vmem:[#allocation2 + $0xc8] sm:$0x1] }
 0x21e   :  { %18335 = vst [vmem:[#allocation23_spill] sm:$0xff] %v15267_v49  ;;  %v6293_v22 = vrot.slane %v12614_v34, 5  ;;  %v2885_v53 = vpop.f32.mrf.mxu1  ;;  %v6296_v54 = vrot.slane %v12615_v21, 5  ;;  %v89_v23 = vsel %vm12688_vm5, 0, %v88_v2  ;;  %v10914_v26 = vrot.slane %v6074_v30, 9  ;;  %v12217_v21 = vld [vmem:[#allocation2 + $0x150] sm:$0xff]  }
 0x21f   :  { %18336 = vst [vmem:[#allocation72_spill] sm:$0xff] %v15270_v43  ;;  %v15280_v0 = vsel %vm13565_vm2, %v6288_v46, %v6289_v29  ;;  %v6075_v16 = vld [vmem:[#allocation2 + $0xf0] sm:$0xe]  ;;  %v15285_v55 = vadd.f32 %v15172_v6, %v2894_v63  ;;  %v2886_v58 = vadd.f32 %v2885_v53, %v14634_v37  ;;  %v15288_v36 = vpop.f32.mrf.mxu0  ;;  %90 = vst [vmem:[#allocation2 + $0xcc] sm:$0x1] %v89_v23  ;;  %v12218_v3 = vld [vmem:[#allocation2 + $0x15c] sm:$0xff]   ;;  %11903 = vmatmul.mubr.msk.bf16.gmra.mxu0 %vm2154_vm12, %v14909_v20 }
 0x220   :  { %18338 = vst [vmem:[#allocation26_spill] sm:$0xff] %v15280_v0  ;;  %v11667_v46 = vpop.f32.mrf.mxu1  ;;  %v15296_v2 = vsel %vm13565_vm2, %v10913_v56, %v6293_v22  ;;  %v6295_v30 = vrot.slane %v6293_v22, 4  ;;  %v12616_v6 = vld [vmem:[#allocation2 + $0xe8] sm:$0xf]  ;;  %v6076_v53 = vld [vmem:[#allocation2 + $0xfc] sm:$0xe]  ;;  %11906 = vmatprep.mubr.msk.bf16.mxu0 %vm2154_vm12, %v14962_v27 }
 0x221   :  { %18339 = vst [vmem:[#allocation73_spill] sm:$0xff] %v15285_v55  ;;  %v6300_v63 = vrot.slane %v12616_v6, 5  ;;  %v12617_v55 = vld [vmem:[#allocation2 + $0xec] sm:$0x1]  ;;  %v15299_v43 = vadd.f32 %v15190_v33, %v2886_v58  ;;  %v2897_v34 = vadd.f32 %v11667_v46, %v14658_v52  ;;  %v15302_v29 = vpop.f32.mrf.mxu0  ;;  %v10915_v23 = vrot.slane %v6075_v16, 9  ;;  %v18344_v16 = vld [vmem:[#allocation29_spill] sm:$0xff] }
 0x222   :  { %v6303_v37 = vrot.slane %v12617_v55, 5  ;;  %v12618_v56 = vld [vmem:[#allocation2 + $0xf4] sm:$0xf]  ;;  %v2888_v22 = vpop.f32.mrf.mxu1  ;;  %v15310_v55 = vsel %vm13565_vm2, %v6295_v30, %v6296_v54  ;;  %v12619_v58 = vld [vmem:[#allocation2 + $0xf8] sm:$0x1]  ;;  %v10916_v54 = vrot.slane %v6076_v53, 9 }
 0x223   :  { %18340 = vst [vmem:[#allocation74_spill] sm:$0xff] %v15299_v43  ;;  %v6307_v0 = vrot.slane %v12618_v56, 5  ;;  %18341 = vst [vmem:[#allocation75_spill] sm:$0xff] %v15310_v55  ;;  %v15314_v52 = vsel %vm13565_vm2, %v10914_v26, %v6300_v63  ;;  %v6302_v33 = vrot.slane %v6300_v63, 4  ;;  %v6310_v46 = vrot.slane %v12619_v58, 5  ;;  %v15320_v43 = vpop.f32.mrf.mxu0 }
 0x224   :  { %18342 = vst [vmem:[#allocation76_spill] sm:$0xff] %v15314_v52  ;;  %v6077_v6 = vld [vmem:[#allocation2 + $0x108] sm:$0xe]  ;;  %v15317_v20 = vadd.f32 %v15210_v18, %v2897_v34  ;;  %v2889_v56 = vadd.f32 %v2888_v22, %v18344_v16  ;;  %v11670_v30 = vpop.f32.mrf.mxu1  ;;  %11833 = vmatmul.mubr.msk.bf16.gmra.mxu1 %vm2154_vm12, %v12217_v21  ;;  %v12620_v58 = vld [vmem:[#allocation2 + $0x100] sm:$0xf]  ;;  %v18347_v16 = vld [vmem:[#allocation32_spill] sm:$0xff] }
 0x225   :  { %v15327_v26 = vsel %vm13565_vm2, %v6302_v33, %v6303_v37  ;;  %v6309_v63 = vrot.slane %v6307_v0, 4  ;;  %v6314_v49 = vrot.slane %v12620_v58, 5  ;;  %v12621_v18 = vld [vmem:[#allocation2 + $0x104] sm:$0x1]  ;;  %11836 = vmatprep.mubr.msk.bf16.mxu1 %vm2154_vm12, %v12218_v3  ;;  %v15334_v53 = vpop.f32.mrf.mxu0  ;;  %v15338_v21 = vsel %vm13565_vm2, %v10915_v23, %v6307_v0  ;;  %v6078_v33 = vld [vmem:[#allocation2 + $0x114] sm:$0xe] }
 0x226   :  { %18343 = vst [vmem:[#allocation77_spill] sm:$0xff] %v15317_v20  ;;  %18345 = vst [vmem:[#allocation29_spill] sm:$0xff] %v15327_v26  ;;  %v6317_v34 = vrot.slane %v12621_v18, 5  ;;  %v15330_v22 = vadd.f32 %v15222_v15, %v2889_v56  ;;  %v2910_v20 = vadd.f32 %v11670_v30, %v18347_v16  ;;  %v10917_v37 = vrot.slane %v6077_v6, 9  ;;  %v2901_v27 = vpop.f32.mrf.mxu1  ;;  %v12622_v30 = vld [vmem:[#allocation2 + $0x10c] sm:$0xf] }
 0x227   :  { %18348 = vst [vmem:[#allocation32_spill] sm:$0xff] %v15338_v21  ;;  %v15344_v15 = vsel %vm13565_vm2, %v6309_v63, %v6310_v46  ;;  %v6316_v56 = vrot.slane %v6314_v49, 4  ;;  %v6321_v18 = vrot.slane %v12622_v30, 5  ;;  %v18351_v16 = vld [vmem:[#allocation33_spill] sm:$0xff]  ;;  %v15350_v0 = vpop.f32.mrf.mxu0  ;;  %v15354_v23 = vsel %vm13565_vm2, %v10916_v54, %v6314_v49  ;;  %v12623_v6 = vld [vmem:[#allocation2 + $0x110] sm:$0x1]  ;;  %11907 = vmatmul.mubr.msk.bf16.gmra.mxu0 %vm2154_vm12, %v14964_v35 }
 0x228   :  { %18346 = vst [vmem:[#allocation78_spill] sm:$0xff] %v15330_v22  ;;  %18349 = vst [vmem:[#allocation79_spill] sm:$0xff] %v15344_v15  ;;  %v15347_v3 = vadd.f32 %v15234_v11, %v2910_v20  ;;  %v2902_v22 = vadd.f32 %v2901_v27, %v18351_v16  ;;  %v6324_v58 = vrot.slane %v12623_v6, 5  ;;  %v6079_v26 = vld [vmem:[#allocation2 + $0x120] sm:$0xe]  ;;  %v11671_v52 = vpop.f32.mrf.mxu1  ;;  %v12219_v46 = vld [vmem:[#allocation2 + $0x168] sm:$0xff]   ;;  %11910 = vmatprep.mubr.msk.bf16.mxu0 %vm2154_vm12, %v14970_v31 }
 0x229   :  { %18352 = vst [vmem:[#allocation33_spill] sm:$0xff] %v15354_v23  ;;  %v15358_v63 = vsel %vm13565_vm2, %v6316_v56, %v6317_v34  ;;  %v15362_v11 = vsel %vm13565_vm2, %v10917_v37, %v6321_v18  ;;  %v6323_v20 = vrot.slane %v6321_v18, 4  ;;  %v10918_v27 = vrot.slane %v6078_v33, 9  ;;  %v18356_v49 = vld [vmem:[#allocation36_spill] sm:$0xff]  ;;  %v15368_v6 = vpop.f32.mrf.mxu0  ;;  %v12626_v18 = vld [vmem:[#allocation2 + $0x124] sm:$0xf] }
 0x22a   :  { %18350 = vst [vmem:[#allocation80_spill] sm:$0xff] %v15347_v3  ;;  %18353 = vst [vmem:[#allocation81_spill] sm:$0xff] %v15358_v63  ;;  %v15365_v30 = vadd.f32 %v15254_v17, %v2902_v22  ;;  %v2913_v54 = vadd.f32 %v11671_v52, %v18356_v49  ;;  %v12220_v16 = vld [vmem:[#allocation2 + $0x174] sm:$0xff]   ;;  %v2904_v37 = vpop.f32.mrf.mxu1  ;;  %v12625_v52 = vld [vmem:[#allocation2 + $0x11c] sm:$0x1]  ;;  %v10919_v33 = vrot.slane %v6079_v26, 9 }
 0x22b   :  { %18354 = vst [vmem:[#allocation82_spill] sm:$0xff] %v15362_v11  ;;  %v12624_v56 = vld [vmem:[#allocation2 + $0x118] sm:$0xf]  ;;  %v15378_v17 = vsel %vm13565_vm2, %v6323_v20, %v6324_v58  ;;  %v6331_v22 = vrot.slane %v12625_v52, 5  ;;  %v6335_v49 = vrot.slane %v12626_v18, 5  ;;  %v18359_v34 = vld [vmem:[#allocation3_spill] sm:$0xff] }
 0x22c   :  { %18355 = vst [vmem:[#allocation83_spill] sm:$0xff] %v15365_v30  ;;  %v6328_v3 = vrot.slane %v12624_v56, 5  ;;  %18357 = vst [vmem:[#allocation36_spill] sm:$0xff] %v15378_v17  ;;  %v6080_v30 = vld [vmem:[#allocation2 + $0x12c] sm:$0xe]  ;;  %v15381_v35 = vadd.f32 %v15274_v14, %v2913_v54  ;;  %v2905_v15 = vadd.f32 %v2904_v37, %v18359_v34  ;;  %v15384_v56 = vpop.f32.mrf.mxu0  ;;  %v11674_v20 = vpop.f32.mrf.mxu1  ;;  %11837 = vmatmul.mubr.msk.bf16.gmra.mxu1 %vm2154_vm12, %v12219_v46 }
 0x22d   :  { %v6337_v14 = vrot.slane %v6335_v49, 4  ;;  %v12627_v54 = vld [vmem:[#allocation2 + $0x128] sm:$0x1]  ;;  %v6081_v34 = vld [vmem:[#allocation2 + $0x138] sm:$0xe]  ;;  %11840 = vmatprep.mubr.msk.bf16.mxu1 %vm2154_vm12, %v12220_v16  ;;  %v10920_v17 = vrot.slane %v6080_v30, 9 }
 0x22e   :  { %18358 = vst [vmem:[#allocation84_spill] sm:$0xff] %v15381_v35  ;;  %v15393_v26 = vsel %vm13565_vm2, %v10918_v27, %v6328_v3  ;;  %v6330_v52 = vrot.slane %v6328_v3, 4  ;;  %v6338_v18 = vrot.slane %v12627_v54, 5  ;;  %v15396_v37 = vadd.f32 %v15288_v36, %v2905_v15  ;;  %v18361_v35 = vld [vmem:[#allocation38_spill] sm:$0xff]  ;;  %v15400_v58 = vpop.f32.mrf.mxu0  ;;  %v12628_v46 = vld [vmem:[#allocation2 + $0x130] sm:$0xf]  ;;  %v2917_v63 = vpop.f32.mrf.mxu1 }
 0x22f   :  { %v2926_v31 = vadd.f32 %v11674_v20, %v18361_v35  ;;  %v6342_v11 = vrot.slane %v12628_v46, 5  ;;  %v12224_v27 = vld [vmem:[#allocation2 + $0x18] sm:$0xff]   ;;  %v15408_v54 = vsel %vm13565_vm2, %v10919_v33, %v6335_v49  ;;  %v12629_v15 = vld [vmem:[#allocation2 + $0x134] sm:$0x1]  ;;  %v6082_v35 = vld [vmem:[#allocation2 + $0x144] sm:$0xe]  ;;  %11911 = vmatmul.mubr.msk.bf16.gmra.mxu0 %vm2154_vm12, %v15176_v47 }
 0x230   :  { %18360 = vst [vmem:[#allocation3_spill] sm:$0xff] %v15396_v37  ;;  %v15404_v3 = vsel %vm13565_vm2, %v6330_v52, %v6331_v22  ;;  %v15412_v36 = vsel %vm13565_vm2, %v6337_v14, %v6338_v18  ;;  %v6345_v16 = vrot.slane %v12629_v15, 5  ;;  %v18365_v20 = vld [vmem:[#allocation41_spill] sm:$0xff]  ;;  %v15418_v37 = vpop.f32.mrf.mxu0  ;;  %v10921_v52 = vrot.slane %v6081_v34, 9  ;;  %v11675_v33 = vpop.f32.mrf.mxu1  ;;  %v12630_v15 = vld [vmem:[#allocation2 + $0x13c] sm:$0xf]  ;;  %11982 = vmatprep.mubr.msk.bf16.mxu0 %vm2154_vm12, %v12224_v27 }
 0x231   :  { %18362 = vst [vmem:[#allocation38_spill] sm:$0xff] %v15404_v3  ;;  %18363 = vst [vmem:[#allocation85_spill] sm:$0xff] %v15412_v36  ;;  %v15415_v30 = vadd.f32 %v15302_v29, %v2926_v31  ;;  %v2918_v46 = vadd.f32 %v2917_v63, %v18365_v20  ;;  %v12221_v49 = vld [vmem:[#allocation2 + $0x180] sm:$0xff]   ;;  %v15424_v14 = vsel %vm13565_vm2, %v10920_v17, %v6342_v11  ;;  %v6344_v18 = vrot.slane %v6342_v11, 4  ;;  %v12632_v22 = vld [vmem:[#allocation2 + $0x148] sm:$0xf] }
 0x232   :  { %18366 = vst [vmem:[#allocation41_spill] sm:$0xff] %v15424_v14  ;;  %v6349_v23 = vrot.slane %v12630_v15, 5  ;;  %v12631_v21 = vld [vmem:[#allocation2 + $0x140] sm:$0x1]  ;;  %v15430_v55 = vpop.f32.mrf.mxu0  ;;  %v10922_v34 = vrot.slane %v6082_v35, 9  ;;  %v6356_v17 = vrot.slane %v12632_v22, 5  ;;  %v2920_v11 = vpop.f32.mrf.mxu1 }
 0x233   :  { %18364 = vst [vmem:[#allocation86_spill] sm:$0xff] %v15415_v30  ;;  %v6352_v29 = vrot.slane %v12631_v21, 5  ;;  %v15427_v31 = vadd.f32 %v15320_v43, %v2918_v46  ;;  %v18368_v63 = vld [vmem:[#allocation5_spill] sm:$0xff]  ;;  %v12222_v30 = vld [vmem:[#allocation2 + $0x18c] sm:$0xff]   ;;  %v15439_v43 = vsel %vm13565_vm2, %v6344_v18, %v6345_v16 }
 0x234   :  { %v2929_v20 = vadd.f32 %v11675_v33, %v18368_v63  ;;  %v6083_v3 = vld [vmem:[#allocation2 + $0x150] sm:$0xe]  ;;  %18369 = vst [vmem:[#allocation5_spill] sm:$0xff] %v15439_v43  ;;  %v6351_v46 = vrot.slane %v6349_v23, 4  ;;  %v12633_v33 = vld [vmem:[#allocation2 + $0x14c] sm:$0x1]  ;;  %v15445_v22 = vpop.f32.mrf.mxu0  ;;  %v15451_v21 = vsel %vm13565_vm2, %v10921_v52, %v6349_v23  ;;  %v11678_v16 = vpop.f32.mrf.mxu1  ;;  %11841 = vmatmul.mubr.msk.bf16.gmra.mxu1 %vm2154_vm12, %v12221_v49  ;;  %v15467_v49 = vsel %vm13565_vm2, %v10922_v34, %v6356_v17 }
 0x235   :  { %18367 = vst [vmem:[#allocation87_spill] sm:$0xff] %v15427_v31  ;;  %v6359_v15 = vrot.slane %v12633_v33, 5  ;;  %v18371_v47 = vld [vmem:[#allocation43_spill] sm:$0xff]  ;;  %v6084_v31 = vld [vmem:[#allocation2 + $0x15c] sm:$0xe]  ;;  %v2942_v27 = vadd.f32 %v11678_v16, %v14849_v4  ;;  %11844 = vmatprep.mubr.msk.bf16.mxu1 %vm2154_vm12, %v12222_v30  ;;  %v12225_v52 = vld [vmem:[#allocation2 + $0x24] sm:$0xff]  }
 0x236   :  { %v15442_v63 = vadd.f32 %v15334_v53, %v2929_v20  ;;  %v2921_v35 = vadd.f32 %v2920_v11, %v18371_v47  ;;  %v15456_v18 = vsel %vm13565_vm2, %v6351_v46, %v6352_v29  ;;  %v6358_v53 = vrot.slane %v6356_v17, 4  ;;  %v12634_v11 = vld [vmem:[#allocation2 + $0x154] sm:$0xf]  ;;  %v15463_v23 = vpop.f32.mrf.mxu0  ;;  %v12635_v29 = vld [vmem:[#allocation2 + $0x158] sm:$0x1] }
 0x237   :  { %v10923_v20 = vrot.slane %v6083_v3, 9  ;;  %v6363_v33 = vrot.slane %v12634_v11, 5  ;;  %v6366_v46 = vrot.slane %v12635_v29, 5  ;;  %v2933_v3 = vpop.f32.mrf.mxu1  ;;  %v12226_v43 = vld [vmem:[#allocation2 + $0x30] sm:$0xff]   ;;  %v15478_v16 = vadd.f32 %v15368_v6, %v2942_v27  ;;  %v18374_v34 = vld [vmem:[#allocation12_spill] sm:$0xff]  ;;  %11983 = vmatmul.mubr.msk.bf16.vlgmr.msra.gmra.mxu0 %vm2154_vm12, %v12225_v52 }
 0x238   :  { %18370 = vst [vmem:[#allocation88_spill] sm:$0xff] %v15442_v63  ;;  %v15459_v47 = vadd.f32 %v15350_v0, %v2921_v35  ;;  %v6085_v63 = vld [vmem:[#allocation2 + $0x168] sm:$0xe]  ;;  %v15471_v0 = vsel %vm13565_vm2, %v6358_v53, %v6359_v15  ;;  %v10924_v35 = vrot.slane %v6084_v31, 9  ;;  %v2934_v17 = vadd.f32 %v2933_v3, %v18374_v34  ;;  %v15481_v11 = vpop.f32.mrf.mxu0  ;;  %v12223_v53 = vld [vmem:[#allocation2 + $0x198] sm:$0xff]   ;;  %12113 = vmatpush3.bf16.msra.mxu0 %v15039_v12 }
 0x239   :  { %v15475_v4 = vsel %vm13565_vm2, %v10923_v20, %v6363_v33  ;;  %v6365_v30 = vrot.slane %v6363_v33, 4  ;;  %18373 = vst [vmem:[#allocation89_spill] sm:$0xff] %v15478_v16  ;;  %v11679_v15 = vpop.f32.mrf.mxu1  ;;  %v12637_v33 = vld [vmem:[#allocation2 + $0x164] sm:$0x1]  ;;  %v10925_v36 = vrot.slane %v6085_v63, 9  ;;  %11986 = vmatprep.mubr.msk.bf16.mxu0 %vm2154_vm12, %v12226_v43 }
 0x23a   :  { %18372 = vst [vmem:[#allocation43_spill] sm:$0xff] %v15459_v47  ;;  %v12636_v47 = vld [vmem:[#allocation2 + $0x160] sm:$0xf]  ;;  %v6373_v31 = vrot.slane %v12637_v33, 5  ;;  %v12638_v6 = vld [vmem:[#allocation2 + $0x16c] sm:$0xf]  ;;  %v15490_v3 = vadd.f32 %v15384_v56, %v2934_v17  ;;  %v2945_v34 = vadd.f32 %v11679_v15, %v14879_v38  ;;  %v15493_v29 = vpop.f32.mrf.mxu0 }
 0x23b   :  { %v6370_v14 = vrot.slane %v12636_v47, 5  ;;  %v15487_v20 = vsel %vm13565_vm2, %v6365_v30, %v6366_v46  ;;  %v6377_v27 = vrot.slane %v12638_v6, 5  ;;  %v6086_v16 = vld [vmem:[#allocation2 + $0x174] sm:$0xe]  ;;  %v6087_v30 = vld [vmem:[#allocation2 + $0x180] sm:$0xe]  ;;  %v2936_v63 = vpop.f32.mrf.mxu1 }
 0x23c   :  { %18375 = vst [vmem:[#allocation12_spill] sm:$0xff] %v15487_v20  ;;  %18376 = vst [vmem:[#allocation90_spill] sm:$0xff] %v15490_v3  ;;  %v12639_v15 = vld [vmem:[#allocation2 + $0x170] sm:$0x1]  ;;  %v15507_v33 = vadd.f32 %v15400_v58, %v2945_v34  ;;  %v2937_v6 = vadd.f32 %v2936_v63, %v14897_v45  ;;  %v15510_v46 = vpop.f32.mrf.mxu0  ;;  %v10926_v47 = vrot.slane %v6086_v16, 9  ;;  %11845 = vmatmul.mubr.msk.bf16.gmra.mxu1 %vm2154_vm12, %v12223_v53  ;;  %v10927_v34 = vrot.slane %v6087_v30, 9 }
 0x23d   :  { %v15504_v56 = vsel %vm13565_vm2, %v10924_v35, %v6370_v14  ;;  %v6372_v38 = vrot.slane %v6370_v14, 4  ;;  %v6379_v17 = vrot.slane %v6377_v27, 4  ;;  %v6380_v52 = vrot.slane %v12639_v15, 5  ;;  %v12640_v3 = vld [vmem:[#allocation2 + $0x178] sm:$0xf]  ;;  %v11682_v20 = vpop.f32.mrf.mxu1 }
 0x23e   :  { %18377 = vst [vmem:[#allocation91_spill] sm:$0xff] %v15507_v33  ;;  %v6384_v12 = vrot.slane %v12640_v3, 5  ;;  %v15519_v14 = vsel %vm13565_vm2, %v10925_v36, %v6377_v27  ;;  %v12641_v58 = vld [vmem:[#allocation2 + $0x17c] sm:$0x1]  ;;  %v6088_v45 = vld [vmem:[#allocation2 + $0x18c] sm:$0xe]  ;;  %v15522_v63 = vadd.f32 %v15418_v37, %v2937_v6  ;;  %v2958_v16 = vadd.f32 %v11682_v20, %v14917_v9 }
 0x23f   :  { %v15515_v43 = vsel %vm13565_vm2, %v6372_v38, %v6373_v31  ;;  %v6387_v35 = vrot.slane %v12641_v58, 5  ;;  %v18380_v53 = vcombine.low %v14996_v8, %v15011_v48  ;;  %v15529_v31 = vpop.f32.mrf.mxu0  ;;  %v12227_v3 = vld [vmem:[#allocation2 + $0x3c] sm:$0xff]   ;;  %v15535_v27 = vsel %vm13565_vm2, %v6379_v17, %v6380_v52  ;;  %v2949_v30 = vpop.f32.mrf.mxu1  ;;  %v12228_v37 = vld [vmem:[#allocation2 + $0x48] sm:$0xff]   ;;  %v12642_v8 = vld [vmem:[#allocation2 + $0x184] sm:$0xf] }
 0x240   :  { %18378 = vst [vmem:[#allocation92_spill] sm:$0xff] %v15515_v43  ;;  %18379 = vst [vmem:[#allocation93_spill] sm:$0xff] %v15522_v63  ;;  %v15539_v9 = vsel %vm13565_vm2, %v10926_v47, %v6384_v12  ;;  %v6386_v20 = vrot.slane %v6384_v12, 4  ;;  %v6391_v48 = vrot.slane %v12642_v8, 5  ;;  %v12643_v38 = vld [vmem:[#allocation2 + $0x188] sm:$0x1]  ;;  %v15542_v6 = vadd.f32 %v15430_v55, %v2958_v16  ;;  %11987 = vmatmul.mubr.msk.bf16.gmra.mxu0 %vm2154_vm12, %v12227_v3 }
 0x241   :  { %11916 = vmatprep.mubr.msk.bf16.mxu1 %vm2154_vm12, %v18380_v53  ;;  %18381 = vst [vmem:[#allocation94_spill] sm:$0xff] %v15535_v27  ;;  %18382 = vst [vmem:[#allocation95_spill] sm:$0xff] %v15539_v9  ;;  %v6394_v15 = vrot.slane %v12643_v38, 5  ;;  %v18384_v58 = vld [vmem:[#allocation48_spill] sm:$0xff]  ;;  %v15545_v36 = vpop.f32.mrf.mxu0  ;;  %v10928_v17 = vrot.slane %v6088_v45, 9  ;;  %v11683_v43 = vpop.f32.mrf.mxu1  ;;  %11990 = vmatprep.mubr.msk.bf16.mxu0 %vm2154_vm12, %v12228_v37  ;;  %v6408_v37 = vrot.slane %v15097_v39, 5 }
 0x242   :  { %18383 = vst [vmem:[#allocation96_spill] sm:$0xff] %v15542_v6  ;;  %v2950_v53 = vadd.f32 %v2949_v30, %v18384_v58  ;;  %v12644_v52 = vld [vmem:[#allocation2 + $0x190] sm:$0xf]  ;;  %v6089_v33 = vld [vmem:[#allocation2 + $0x198] sm:$0xe]  ;;  %v15551_v12 = vsel %vm13565_vm2, %v6386_v20, %v6387_v35  ;;  %v15555_v55 = vsel %vm13565_vm2, %v10927_v34, %v6391_v48  ;;  %v6393_v16 = vrot.slane %v6391_v48, 4 }
 0x243   :  { %v6398_v63 = vrot.slane %v12644_v52, 5  ;;  %18385 = vst [vmem:[#allocation48_spill] sm:$0xff] %v15551_v12  ;;  %18386 = vst [vmem:[#allocation97_spill] sm:$0xff] %v15555_v55  ;;  %v2961_v45 = vadd.f32 %v11683_v43, %v14941_v59  ;;  %v15561_v8 = vpop.f32.mrf.mxu0  ;;  %v12645_v58 = vld [vmem:[#allocation2 + $0x194] sm:$0x1]  ;;  %v2952_v52 = vpop.f32.mrf.mxu1  ;;  %v10929_v48 = vrot.slane %v6089_v33, 9 }
 0x244   :  { %v15558_v30 = vadd.f32 %v15445_v22, %v2950_v53  ;;  %v6401_v35 = vrot.slane %v12645_v58, 5  ;;  %v142_v20 = vld [vmem:[#allocation2 + $0x1a4] sm:$0x1]  ;;  %v15569_v34 = vsel %vm13565_vm2, %v6393_v16, %v6394_v15  ;;  %v6405_v59 = vrot.slane %v15064_v42, 5  ;;  %v7639_v43 = vld [vmem:[#allocation2 + $0x18] sm:$0xf] }
 0x245   :  { %18388 = vst [vmem:[#allocation99_spill] sm:$0xff] %v15569_v34  ;;  %v6400_v22 = vrot.slane %v6398_v63, 4  ;;  %v15573_v3 = vadd.f32 %v15463_v23, %v2961_v45  ;;  %v18390_v53 = vld [vmem:[#allocation50_spill] sm:$0xff]  ;;  %v15576_v47 = vpop.f32.mrf.mxu0  ;;  %v15580_v58 = vsel %vm13565_vm2, %v10928_v17, %v6398_v63  ;;  %v7640_v15 = vld [vmem:[#allocation2 + $0x1c] sm:$0xf]  ;;  %v11686_v16 = vpop.f32.mrf.mxu1  ;;  %v18392_v33 = vld [vmem:[#allocation53_spill] sm:$0xff] }
 0x246   :  { %18387 = vst [vmem:[#allocation98_spill] sm:$0xff] %v15558_v30  ;;  %v2953_v38 = vadd.f32 %v2952_v52, %v18390_v53  ;;  %v18391_v30 = vld [vmem:[#allocation52_spill] sm:$0xff]  ;;  %v15591_v23 = vsel %vm13565_vm2, %v10929_v48, %v6405_v59  ;;  %v6407_v45 = vrot.slane %v6405_v59, 4  ;;  %v143_v63 = vsel %vm12688_vm5, 0, %v142_v20  ;;  %v18396_v17 = vld [vmem:[#allocation13_spill] sm:$0xff]  ;;  %v18397_v53 = vld [vmem:[#allocation55_spill] sm:$0xff] }
 0x247   :  { %18389 = vst [vmem:[#allocation100_spill] sm:$0xff] %v15573_v3  ;;  %v18393_v6 = vcombine.low %v18391_v30, %v18392_v33  ;;  %18394 = vst [vmem:[#allocation50_spill] sm:$0xff] %v15591_v23  ;;  %v2974_v52 = vadd.f32 %v11686_v16, %v18396_v17  ;;  %v18398_v30 = vld [vmem:[#allocation57_spill] sm:$0xff]  ;;  %v15604_v42 = vpop.f32.mrf.mxu0  ;;  %v12229_v48 = vld [vmem:[#allocation2 + $0x54] sm:$0xff]   ;;  %v15608_v59 = vsel %vm13565_vm2, %v6400_v22, %v6401_v35  ;;  %v7739_v17 = vshll.u32 %v7639_v43, 16 }
 0x248   :  { %v15596_v39 = vadd.f32 %v15481_v11, %v2953_v38  ;;  %18401 = vst [vmem:[#allocation53_spill] sm:$0xff] %v15608_v59  ;;  %144 = vst [vmem:[#allocation2 + $0x1a4] sm:$0x1] %v143_v63  ;;  %v7736_v11 = vshrl.u32 %v7639_v43, 16  ;;  %v2965_v38 = vpop.f32.mrf.mxu1  ;;  %v12230_v20 = vld [vmem:[#allocation2 + $0x60] sm:$0xff]   ;;  %v15612_v16 = vsel %vm13565_vm2, %v6407_v45, %v6408_v37  ;;  %v7755_v45 = vshll.u32 %v7641_v24, 16  ;;  %11991 = vmatmul.mubr.msk.bf16.gmra.mxu0 %vm2154_vm12, %v12229_v48 }
 0x249   :  { %11917 = vmatmul.mubr.msk.bf16.vlgmr.msra.gmra.mxu1 %vm2154_vm12, %v18393_v6  ;;  %v18399_v6 = vld [vmem:[#allocation59_spill] sm:$0xff]  ;;  %18402 = vst [vmem:[#allocation13_spill] sm:$0xff] %v15612_v16  ;;  %v15618_v35 = vpop.f32.mrf.mxu0  ;;  %v7741_v55 = vrot.slane %v7739_v17, 5  ;;  %11994 = vmatprep.mubr.msk.bf16.mxu0 %vm2154_vm12, %v12230_v20  ;;  %v7643_v48 = vld [vmem:[#allocation2 + $0x28] sm:$0xf]  ;;  %v18410_v20 = vld [vmem:[#allocation61_spill] sm:$0xff] }
 0x24a   :  { %18395 = vst [vmem:[#allocation52_spill] sm:$0xff] %v15596_v39  ;;  %12047 = vmatpush3.bf16.msra.mxu1 %v18397_v53  ;;  %v18400_v33 = vcombine.low %v18398_v30, %v18399_v6  ;;  %v7745_v53 = vshll.u32 %v7640_v15, 16  ;;  %v7749_v30 = vshrl.u32 %v7640_v15, 16  ;;  %v9053_v6 = vld [vmem:[#allocation2 + $0x18] sm:$0xe]  ;;  %v18404_v39 = vld [vmem:[#allocation14_spill] sm:$0xff]  ;;  %v11687_v34 = vpop.f32.mrf.mxu1 }
 0x24b   :  { %v2966_v3 = vadd.f32 %v2965_v38, %v18404_v39  ;;  %v7738_v63 = vrot.slane %v7736_v11, 4  ;;  %v18406_v9 = vld [vmem:[#allocation15_spill] sm:$0xff]  ;;  %v11125_v39 = vrot.slane %v9053_v6, 9  ;;  %v7642_v38 = vld [vmem:[#allocation2 + $0x24] sm:$0xf]  ;;  %v7769_v23 = vshll.u32 %v7643_v48, 16 }
 0x24c   :  { %11920 = vmatprep.mubr.msk.bf16.mxu1 %vm2154_vm12, %v18400_v33  ;;  %v15615_v33 = vadd.f32 %v15493_v29, %v2974_v52  ;;  %v7747_v12 = vrot.slane %v7745_v53, 5  ;;  %v7751_v37 = vrot.slane %v7749_v30, 4  ;;  %v2977_v27 = vadd.f32 %v11687_v34, %v18406_v9  ;;  %v15626_v29 = vpop.f32.mrf.mxu0 }
 0x24d   :  { %v15623_v43 = vadd.f32 %v15510_v46, %v2966_v3  ;;  %v9183_v52 = vrot.slane %v7640_v15, 5  ;;  %v7742_v11 = vor.u32 %v7741_v55, %v7738_v63  ;;  %v7757_v53 = vrot.slane %v7755_v45, 5  ;;  %v18408_v46 = vld [vmem:[#allocation24_spill] sm:$0xff] }
 0x24e   :  { %18403 = vst [vmem:[#allocation55_spill] sm:$0xff] %v15615_v33  ;;  %v2968_v33 = vpop.f32.mrf.mxu1  ;;  %v7752_v17 = vor.u32 %v7751_v37, %v7747_v12  ;;  %v9186_v30 = vrot.slane %v7641_v24, 5  ;;  %v15631_v22 = vadd.f32 %v15529_v31, %v2977_v27  ;;  %v15634_v9 = vpop.f32.mrf.mxu0  ;;  %v18413_v37 = vld [vmem:[#allocation17_spill] sm:$0xff] }
 0x24f   :  { %18405 = vst [vmem:[#allocation57_spill] sm:$0xff] %v15623_v43  ;;  %v2969_v3 = vadd.f32 %v2968_v33, %v18408_v46  ;;  %v15638_v34 = vsel %vm13565_vm2, %v11125_v39, %v9183_v52  ;;  %v9185_v15 = vrot.slane %v9183_v52, 4  ;;  %v18409_v43 = vld [vmem:[#allocation60_spill] sm:$0xff]  ;;  %v7743_v27 = vrot.slane %v7742_v11, 4  ;;  %v18414_v39 = vld [vmem:[#allocation62_spill] sm:$0xff] }
 0x250   :  { %18407 = vst [vmem:[#allocation59_spill] sm:$0xff] %v15631_v22  ;;  %v11690_v6 = vpop.f32.mrf.mxu1  ;;  %v18411_v55 = vcombine.low %v18409_v43, %v18410_v20  ;;  %v7753_v24 = vrot.slane %v7752_v17, 4  ;;  %v7760_v33 = vshrl.u32 %v7642_v38, 16  ;;  %v18415_v52 = vld [vmem:[#allocation64_spill] sm:$0xff]  ;;  %v15654_v22 = vpop.f32.mrf.mxu0  ;;  %v12231_v43 = vld [vmem:[#allocation2 + $0x6c] sm:$0xff]   ;;  %v7763_v17 = vshll.u32 %v7642_v38, 16 }
 0x251   :  { %v15647_v63 = vadd.f32 %v15545_v36, %v2969_v3  ;;  %v2990_v45 = vadd.f32 %v11690_v6, %v18413_v37  ;;  %v18416_v46 = vcombine.low %v18414_v39, %v18415_v52  ;;  %v15658_v20 = vsel %vm13565_vm2, %v9185_v15, %v9186_v30  ;;  %v7644_v11 = vld [vmem:[#allocation2 + $0x2c] sm:$0x1]  ;;  %v12232_v36 = vld [vmem:[#allocation2 + $0x78] sm:$0xff]   ;;  %11995 = vmatmul.mubr.msk.bf16.gmra.mxu0 %vm2154_vm12, %v12231_v43 }
 0x252   :  { %11921 = vmatmul.mubr.msk.bf16.gmra.mxu1 %vm2154_vm12, %v18411_v55  ;;  %v9054_v55 = vld [vmem:[#allocation2 + $0x24] sm:$0xe]  ;;  %v2981_v31 = vpop.f32.mrf.mxu1  ;;  %v7748_v3 = vsel %vm12789_vm13, %v7743_v27, %v7747_v12  ;;  %v7758_v6 = vsel %vm12789_vm13, %v7753_v24, %v7757_v53  ;;  %v7762_v39 = vrot.slane %v7760_v33, 4  ;;  %v18418_v30 = vld [vmem:[#allocation18_spill] sm:$0xff]  ;;  %v7773_v12 = vshrl.u32 %v7643_v48, 16  ;;  %11998 = vmatprep.mubr.msk.bf16.mxu0 %vm2154_vm12, %v12232_v36 }
 0x253   :  { %18412 = vst [vmem:[#allocation14_spill] sm:$0xff] %v15647_v63  ;;  %11924 = vmatprep.mubr.msk.bf16.mxu1 %vm2154_vm12, %v18416_v46  ;;  %v15667_v52 = vadd.f32 %v15561_v8, %v2990_v45  ;;  %v2982_v15 = vadd.f32 %v2981_v31, %v18418_v30  ;;  %v15670_v46 = vpop.f32.mrf.mxu0  ;;  %v15672_v38 = vcombine.low %v7748_v3, %v7758_v6  ;;  %v7765_v63 = vrot.slane %v7763_v17, 5  ;;  %v18420_v24 = vld [vmem:[#allocation22_spill] sm:$0xff]  ;;  %v7645_v45 = vld [vmem:[#allocation2 + $0x30] sm:$0xf] }
 0x254   :  { %v11691_v16 = vpop.f32.mrf.mxu1  ;;  %v7779_v27 = vshll.u32 %v7644_v11, 16  ;;  %v11126_v59 = vrot.slane %v9054_v55, 9  ;;  %v9190_v31 = vrot.slane %v7643_v48, 5  ;;  %v7771_v17 = vrot.slane %v7769_v23, 5  ;;  %v7646_v55 = vld [vmem:[#allocation2 + $0x34] sm:$0xf] }
 0x255   :  { %18417 = vst [vmem:[#allocation15_spill] sm:$0xff] %v15667_v52  ;;  %v15675_v53 = vadd.f32 %v15576_v47, %v2982_v15  ;;  %v2993_v33 = vadd.f32 %v11691_v16, %v18420_v24  ;;  %v15678_v37 = vpop.f32.mrf.mxu0  ;;  %v7766_v8 = vor.u32 %v7765_v63, %v7762_v39  ;;  %v7775_v6 = vrot.slane %v7773_v12, 4  ;;  %v18422_v15 = vld [vmem:[#allocation19_spill] sm:$0xff]  ;;  %v18425_v12 = vld [vmem:[#allocation25_spill] sm:$0xff] }
 0x256   :  { %v2984_v3 = vpop.f32.mrf.mxu1  ;;  %v7781_v30 = vrot.slane %v7779_v27, 5  ;;  %v9193_v52 = vrot.slane %v7644_v11, 5  ;;  %v15690_v48 = vsel %vm13565_vm2, %v11126_v59, %v9190_v31  ;;  %v18423_v23 = vcombine.low %v15076_v1, %v15089_v28  ;;  %v7647_v28 = vld [vmem:[#allocation2 + $0x38] sm:$0x1] }
 0x257   :  { %18419 = vst [vmem:[#allocation24_spill] sm:$0xff] %v15675_v53  ;;  %v15683_v47 = vadd.f32 %v15604_v42, %v2993_v33  ;;  %v2985_v16 = vadd.f32 %v2984_v3, %v18422_v15  ;;  %v15686_v24 = vpop.f32.mrf.mxu0  ;;  %v7767_v53 = vrot.slane %v7766_v8, 4  ;;  %v7776_v43 = vor.u32 %v7775_v6, %v7771_v17  ;;  %v12233_v8 = vld [vmem:[#allocation2 + $0x84] sm:$0xff]  }
 0x258   :  { %v11694_v63 = vpop.f32.mrf.mxu1  ;;  %v9192_v11 = vrot.slane %v9190_v31, 4  ;;  %v7784_v36 = vshrl.u32 %v7645_v45, 16  ;;  %v7787_v42 = vshll.u32 %v7645_v45, 16  ;;  %v18426_v33 = vcombine.low %v15104_v10, %v15116_v62  ;;  %v12234_v45 = vld [vmem:[#allocation2 + $0x90] sm:$0xff]  }
 0x259   :  { %18421 = vst [vmem:[#allocation60_spill] sm:$0xff] %v15683_v47  ;;  %v15697_v39 = vadd.f32 %v15618_v35, %v2985_v16  ;;  %v3006_v27 = vadd.f32 %v11694_v63, %v18425_v12  ;;  %v15704_v59 = vpop.f32.mrf.mxu0  ;;  %v7772_v1 = vsel %vm12789_vm13, %v7767_v53, %v7771_v17  ;;  %v7793_v31 = vshll.u32 %v7646_v55, 16  ;;  %v9055_v10 = vld [vmem:[#allocation2 + $0x30] sm:$0xe]  ;;  %11999 = vmatmul.mubr.msk.bf16.gmra.mxu0 %vm2154_vm12, %v12233_v8  ;;  %v7663_v47 = vld [vmem:[#allocation2 + $0x78] sm:$0xf] }
 0x25a   :  { %11925 = vmatmul.mubr.msk.bf16.gmra.mxu1 %vm2154_vm12, %v18423_v23  ;;  %v2997_v3 = vpop.f32.mrf.mxu1  ;;  %v7777_v6 = vrot.slane %v7776_v43, 4  ;;  %v15710_v35 = vsel %vm13565_vm2, %v9192_v11, %v9193_v52  ;;  %v7786_v15 = vrot.slane %v7784_v36, 4  ;;  %v7789_v16 = vrot.slane %v7787_v42, 5  ;;  %v18428_v63 = vld [vmem:[#allocation27_spill] sm:$0xff]  ;;  %v7648_v42 = vld [vmem:[#allocation2 + $0x3c] sm:$0xf]  ;;  %12002 = vmatprep.mubr.msk.bf16.mxu0 %vm2154_vm12, %v12234_v45 }
 0x25b   :  { %18424 = vst [vmem:[#allocation61_spill] sm:$0xff] %v15697_v39  ;;  %11928 = vmatprep.mubr.msk.bf16.mxu1 %vm2154_vm12, %v18426_v33  ;;  %v15713_v62 = vadd.f32 %v15626_v29, %v3006_v27  ;;  %v2998_v23 = vadd.f32 %v2997_v3, %v18428_v63  ;;  %v15716_v12 = vpop.f32.mrf.mxu0  ;;  %v7795_v17 = vrot.slane %v7793_v31, 5  ;;  %v7797_v11 = vshrl.u32 %v7646_v55, 16  ;;  %v18430_v29 = vld [vmem:[#allocation35_spill] sm:$0xff] }
 0x25c   :  { %v11695_v33 = vpop.f32.mrf.mxu1  ;;  %v7782_v43 = vsel %vm12789_vm13, %v7777_v6, %v7781_v30  ;;  %v7790_v52 = vor.u32 %v7789_v16, %v7786_v15  ;;  %v7803_v36 = vshll.u32 %v7647_v28, 16  ;;  %v11127_v31 = vrot.slane %v9055_v10, 9 }
 0x25d   :  { %18427 = vst [vmem:[#allocation17_spill] sm:$0xff] %v15713_v62  ;;  %v15723_v39 = vadd.f32 %v15634_v9, %v2998_v23  ;;  %v3009_v27 = vadd.f32 %v11695_v33, %v18430_v29  ;;  %v15726_v3 = vpop.f32.mrf.mxu0  ;;  %v15729_v63 = vcombine.low %v7772_v1, %v7782_v43  ;;  %v7799_v6 = vrot.slane %v7797_v11, 4  ;;  %v18432_v9 = vld [vmem:[#allocation37_spill] sm:$0xff] }
 0x25e   :  { %v3000_v53 = vpop.f32.mrf.mxu1  ;;  %v7791_v30 = vrot.slane %v7790_v52, 4  ;;  %v7805_v15 = vrot.slane %v7803_v36, 5  ;;  %v9197_v16 = vrot.slane %v7646_v55, 5  ;;  %v9200_v29 = vrot.slane %v7647_v28, 5  ;;  %v18435_v28 = vld [vmem:[#allocation39_spill] sm:$0xff] }
 0x25f   :  { %18429 = vst [vmem:[#allocation62_spill] sm:$0xff] %v15723_v39  ;;  %v15733_v62 = vadd.f32 %v15654_v22, %v3009_v27  ;;  %v3001_v23 = vadd.f32 %v3000_v53, %v18432_v9  ;;  %v15736_v33 = vpop.f32.mrf.mxu0  ;;  %v7649_v39 = vld [vmem:[#allocation2 + $0x40] sm:$0xf]  ;;  %v7808_v8 = vshrl.u32 %v7648_v42, 16  ;;  %v18433_v10 = vcombine.low %v15123_v50, %v15136_v5  ;;  %v7650_v36 = vld [vmem:[#allocation2 + $0x44] sm:$0x1] }
 0x260   :  { %v11698_v1 = vpop.f32.mrf.mxu1  ;;  %v7796_v45 = vsel %vm12789_vm13, %v7791_v30, %v7795_v17  ;;  %v7800_v55 = vor.u32 %v7799_v6, %v7795_v17  ;;  %v15746_v22 = vsel %vm13565_vm2, %v11127_v31, %v9197_v16  ;;  %v9199_v53 = vrot.slane %v9197_v16, 4  ;;  %v12235_v5 = vld [vmem:[#allocation2 + $0x9c] sm:$0xff]   ;;  %v12236_v31 = vld [vmem:[#allocation2 + $0xa8] sm:$0xff]  }
 0x261   :  { %18431 = vst [vmem:[#allocation64_spill] sm:$0xff] %v15733_v62  ;;  %v15749_v43 = vadd.f32 %v15670_v46, %v3001_v23  ;;  %v3022_v52 = vadd.f32 %v11698_v1, %v18435_v28  ;;  %v18436_v11 = vcombine.low %v15154_v44, %v15166_v7  ;;  %v15756_v50 = vpop.f32.mrf.mxu0  ;;  %v7810_v17 = vrot.slane %v7808_v8, 4  ;;  %v18438_v44 = vld [vmem:[#allocation28_spill] sm:$0xff]  ;;  %12003 = vmatmul.mubr.msk.bf16.gmra.mxu0 %vm2154_vm12, %v12235_v5  ;;  %v7651_v8 = vld [vmem:[#allocation2 + $0x48] sm:$0xf] }
 0x262   :  { %11929 = vmatmul.mubr.msk.bf16.gmra.mxu1 %vm2154_vm12, %v18433_v10  ;;  %v7811_v27 = vshll.u32 %v7648_v42, 16  ;;  %v3013_v30 = vpop.f32.mrf.mxu1  ;;  %v7801_v6 = vrot.slane %v7800_v55, 4  ;;  %v15760_v46 = vsel %vm13565_vm2, %v9199_v53, %v9200_v29  ;;  %v7817_v16 = vshll.u32 %v7649_v39, 16  ;;  %v9056_v10 = vld [vmem:[#allocation2 + $0x3c] sm:$0xe]  ;;  %12006 = vmatprep.mubr.msk.bf16.mxu0 %vm2154_vm12, %v12236_v31 }
 0x263   :  { %18434 = vst [vmem:[#allocation18_spill] sm:$0xff] %v15749_v43  ;;  %11932 = vmatprep.mubr.msk.bf16.mxu1 %vm2154_vm12, %v18436_v11  ;;  %v7821_v9 = vshrl.u32 %v7649_v39, 16  ;;  %v15763_v23 = vadd.f32 %v15678_v37, %v3022_v52  ;;  %v3014_v7 = vadd.f32 %v3013_v30, %v18438_v44  ;;  %v15766_v1 = vpop.f32.mrf.mxu0  ;;  %v7827_v11 = vshll.u32 %v7650_v36, 16  ;;  %v18440_v37 = vld [vmem:[#allocation30_spill] sm:$0xff] }
 0x264   :  { %v7813_v42 = vrot.slane %v7811_v27, 5  ;;  %v11699_v28 = vpop.f32.mrf.mxu1  ;;  %v7806_v55 = vsel %vm12789_vm13, %v7801_v6, %v7805_v15  ;;  %v7819_v29 = vrot.slane %v7817_v16, 5  ;;  %v11128_v16 = vrot.slane %v9056_v10, 9 }
 0x265   :  { %18437 = vst [vmem:[#allocation22_spill] sm:$0xff] %v15763_v23  ;;  %v7823_v53 = vrot.slane %v7821_v9, 4  ;;  %v15773_v43 = vadd.f32 %v15686_v24, %v3014_v7  ;;  %v3025_v52 = vadd.f32 %v11699_v28, %v18440_v37  ;;  %v15776_v30 = vpop.f32.mrf.mxu0  ;;  %v15779_v44 = vcombine.low %v7796_v45, %v7806_v55  ;;  %v18442_v7 = vld [vmem:[#allocation31_spill] sm:$0xff]  ;;  %v7652_v45 = vld [vmem:[#allocation2 + $0x4c] sm:$0xf] }
 0x266   :  { %v7814_v27 = vor.u32 %v7813_v42, %v7810_v17  ;;  %v3016_v23 = vpop.f32.mrf.mxu1  ;;  %v7829_v6 = vrot.slane %v7827_v11, 5  ;;  %v9204_v9 = vrot.slane %v7649_v39, 5  ;;  %v9207_v5 = vrot.slane %v7650_v36, 5  ;;  %v18443_v17 = vld [vmem:[#allocation21_spill] sm:$0xff] }
 0x267   :  { %18439 = vst [vmem:[#allocation19_spill] sm:$0xff] %v15773_v43  ;;  %v7824_v15 = vor.u32 %v7823_v53, %v7819_v29  ;;  %v15783_v24 = vadd.f32 %v15704_v59, %v3025_v52  ;;  %v3017_v28 = vadd.f32 %v3016_v23, %v18442_v7  ;;  %v15786_v37 = vpop.f32.mrf.mxu0  ;;  %v18444_v42 = vcombine.low %v15184_v25, %v18443_v17  ;;  %v18446_v53 = vld [vmem:[#allocation34_spill] sm:$0xff]  ;;  %v12237_v52 = vld [vmem:[#allocation2 + $0xb4] sm:$0xff]   ;;  %v12238_v7 = vld [vmem:[#allocation2 + $0xc0] sm:$0xff]  }
 0x268   :  { %v7815_v43 = vrot.slane %v7814_v27, 4  ;;  %v11702_v55 = vpop.f32.mrf.mxu1  ;;  %v15794_v39 = vsel %vm13565_vm2, %v11128_v16, %v9204_v9  ;;  %v9206_v59 = vrot.slane %v9204_v9, 4  ;;  %v7832_v10 = vshrl.u32 %v7651_v8, 16 }
 0x269   :  { %18441 = vst [vmem:[#allocation25_spill] sm:$0xff] %v15783_v24  ;;  %v7825_v31 = vrot.slane %v7824_v15, 4  ;;  %v15797_v23 = vadd.f32 %v15716_v12, %v3017_v28  ;;  %v3038_v11 = vadd.f32 %v11702_v55, %v18446_v53  ;;  %v18447_v36 = vcombine.low %v15199_v40, %v15203_v60  ;;  %v15804_v25 = vpop.f32.mrf.mxu0  ;;  %v7653_v15 = vld [vmem:[#allocation2 + $0x50] sm:$0x1]  ;;  %v9057_v55 = vld [vmem:[#allocation2 + $0x48] sm:$0xe]  ;;  %12007 = vmatmul.mubr.msk.bf16.gmra.mxu0 %vm2154_vm12, %v12237_v52 }
 0x26a   :  { %11933 = vmatmul.mubr.msk.bf16.gmra.mxu1 %vm2154_vm12, %v18444_v42  ;;  %v7820_v27 = vsel %vm12789_vm13, %v7815_v43, %v7819_v29  ;;  %v7835_v16 = vshll.u32 %v7651_v8, 16  ;;  %v3029_v9 = vpop.f32.mrf.mxu1  ;;  %v15812_v28 = vsel %vm13565_vm2, %v9206_v59, %v9207_v5  ;;  %v7834_v40 = vrot.slane %v7832_v10, 4  ;;  %v18449_v42 = vld [vmem:[#allocation40_spill] sm:$0xff]  ;;  %12010 = vmatprep.mubr.msk.bf16.mxu0 %vm2154_vm12, %v12238_v7  ;;  %v18455_v7 = vld [vmem:[#allocation69_spill] sm:$0xff] }
 0x26b   :  { %18445 = vst [vmem:[#allocation27_spill] sm:$0xff] %v15797_v23  ;;  %11936 = vmatprep.mubr.msk.bf16.mxu1 %vm2154_vm12, %v18447_v36  ;;  %v7830_v12 = vsel %vm12789_vm13, %v7825_v31, %v7829_v6  ;;  %v7841_v60 = vshll.u32 %v7652_v45, 16  ;;  %v15815_v17 = vadd.f32 %v15726_v3, %v3038_v11  ;;  %v3030_v53 = vadd.f32 %v3029_v9, %v18449_v42  ;;  %v15818_v43 = vpop.f32.mrf.mxu0  ;;  %v18452_v23 = vld [vmem:[#allocation42_spill] sm:$0xff]  ;;  %v7655_v24 = vld [vmem:[#allocation2 + $0x58] sm:$0xf] }
 0x26c   :  { %v15820_v8 = vcombine.low %v7820_v27, %v7830_v12  ;;  %v11703_v6 = vpop.f32.mrf.mxu1  ;;  %v7837_v31 = vrot.slane %v7835_v16, 5  ;;  %v7845_v5 = vshrl.u32 %v7652_v45, 16  ;;  %v7851_v59 = vshll.u32 %v7653_v15, 16  ;;  %v7654_v12 = vld [vmem:[#allocation2 + $0x54] sm:$0xf] }
 0x26d   :  { %18448 = vst [vmem:[#allocation35_spill] sm:$0xff] %v15815_v17  ;;  %v7843_v36 = vrot.slane %v7841_v60, 5  ;;  %v15825_v10 = vadd.f32 %v15736_v33, %v3030_v53  ;;  %v3041_v3 = vadd.f32 %v11703_v6, %v18452_v23  ;;  %v15828_v11 = vpop.f32.mrf.mxu0  ;;  %v11129_v9 = vrot.slane %v9057_v55, 9  ;;  %v18454_v53 = vld [vmem:[#allocation6_spill] sm:$0xff] }
 0x26e   :  { %18450 = vst [vmem:[#allocation37_spill] sm:$0xff] %v15820_v8  ;;  %v9211_v27 = vrot.slane %v7652_v45, 5  ;;  %v3032_v42 = vpop.f32.mrf.mxu1  ;;  %v7838_v29 = vor.u32 %v7837_v31, %v7834_v40  ;;  %v7847_v16 = vrot.slane %v7845_v5, 4  ;;  %v7853_v60 = vrot.slane %v7851_v59, 5 }
 0x26f   :  { %18451 = vst [vmem:[#allocation39_spill] sm:$0xff] %v15825_v10  ;;  %v9214_v17 = vrot.slane %v7653_v15, 5  ;;  %v15833_v33 = vadd.f32 %v15756_v50, %v3041_v3  ;;  %v3033_v23 = vadd.f32 %v3032_v42, %v18454_v53  ;;  %v15836_v6 = vpop.f32.mrf.mxu0  ;;  %v18456_v40 = vcombine.low %v15216_v13, %v18455_v7  ;;  %v18458_v3 = vld [vmem:[#allocation44_spill] sm:$0xff]  ;;  %v12239_v53 = vld [vmem:[#allocation2 + $0xcc] sm:$0xff]  }
 0x270   :  { %v15840_v52 = vsel %vm13565_vm2, %v11129_v9, %v9211_v27  ;;  %v9213_v45 = vrot.slane %v9211_v27, 4  ;;  %v11706_v55 = vpop.f32.mrf.mxu1  ;;  %v7839_v15 = vrot.slane %v7838_v29, 4  ;;  %v7848_v31 = vor.u32 %v7847_v16, %v7843_v36  ;;  %v7656_v29 = vld [vmem:[#allocation2 + $0x5c] sm:$0x1] }
 0x271   :  { %18453 = vst [vmem:[#allocation28_spill] sm:$0xff] %v15833_v33  ;;  %v7856_v5 = vshrl.u32 %v7654_v12, 16  ;;  %v7859_v50 = vshll.u32 %v7654_v12, 16  ;;  %v15847_v59 = vadd.f32 %v15766_v1, %v3033_v23  ;;  %v3054_v42 = vadd.f32 %v11706_v55, %v18458_v3  ;;  %v15854_v27 = vpop.f32.mrf.mxu0  ;;  %v9058_v12 = vld [vmem:[#allocation2 + $0x54] sm:$0xe]  ;;  %v18461_v3 = vld [vmem:[#allocation8_spill] sm:$0xff]  ;;  %12011 = vmatmul.mubr.msk.bf16.gmra.mxu0 %vm2154_vm12, %v12239_v53 }
 0x272   :  { %11937 = vmatmul.mubr.msk.bf16.gmra.mxu1 %vm2154_vm12, %v18456_v40  ;;  %v18459_v9 = vcombine.low %v15242_v61, %v15248_v51  ;;  %v15858_v13 = vsel %vm13565_vm2, %v9213_v45, %v9214_v17  ;;  %v7865_v16 = vshll.u32 %v7655_v24, 16  ;;  %v3045_v7 = vpop.f32.mrf.mxu1  ;;  %v12240_v1 = vld [vmem:[#allocation2 + $0xf0] sm:$0xff]   ;;  %v7844_v23 = vsel %vm12789_vm13, %v7839_v15, %v7843_v36 }
 0x273   :  { %18457 = vst [vmem:[#allocation30_spill] sm:$0xff] %v15847_v59  ;;  %v7849_v55 = vrot.slane %v7848_v31, 4  ;;  %v7858_v51 = vrot.slane %v7856_v5, 4  ;;  %v15865_v40 = vadd.f32 %v15776_v30, %v3054_v42  ;;  %v15868_v17 = vpop.f32.mrf.mxu0  ;;  %v7861_v45 = vrot.slane %v7859_v50, 5  ;;  %v7657_v31 = vld [vmem:[#allocation2 + $0x60] sm:$0xf]  ;;  %12014 = vmatprep.mubr.msk.bf16.mxu0 %vm2154_vm12, %v12240_v1 }
 0x274   :  { %11940 = vmatprep.mubr.msk.bf16.mxu1 %vm2154_vm12, %v18459_v9  ;;  %v3046_v9 = vadd.f32 %v3045_v7, %v18461_v3  ;;  %v7867_v59 = vrot.slane %v7865_v16, 5  ;;  %v11707_v33 = vpop.f32.mrf.mxu1  ;;  %v7869_v62 = vshrl.u32 %v7655_v24, 16  ;;  %v7875_v36 = vshll.u32 %v7656_v29, 16  ;;  %v18463_v5 = vld [vmem:[#allocation9_spill] sm:$0xff] }
 0x275   :  { %18460 = vst [vmem:[#allocation31_spill] sm:$0xff] %v15865_v40  ;;  %v7854_v10 = vsel %vm12789_vm13, %v7849_v55, %v7853_v60  ;;  %v11130_v15 = vrot.slane %v9058_v12, 9  ;;  %v3057_v30 = vadd.f32 %v11707_v33, %v18463_v5  ;;  %v15876_v42 = vpop.f32.mrf.mxu0  ;;  %v7862_v50 = vor.u32 %v7861_v45, %v7858_v51  ;;  %v18469_v51 = vld [vmem:[#allocation46_spill] sm:$0xff] }
 0x276   :  { %v15873_v61 = vadd.f32 %v15786_v37, %v3046_v9  ;;  %v15879_v7 = vcombine.low %v7844_v23, %v7854_v10  ;;  %v3048_v16 = vpop.f32.mrf.mxu1  ;;  %v7871_v60 = vrot.slane %v7869_v62, 4  ;;  %v7877_v55 = vrot.slane %v7875_v36, 5  ;;  %v18466_v37 = vld [vmem:[#allocation45_spill] sm:$0xff]  ;;  %v18470_v36 = vld [vmem:[#allocation23_spill] sm:$0xff] }
 0x277   :  { %v9218_v3 = vrot.slane %v7655_v24, 5  ;;  %v9221_v12 = vrot.slane %v7656_v29, 5  ;;  %v15883_v40 = vadd.f32 %v15804_v25, %v3057_v30  ;;  %v3049_v9 = vadd.f32 %v3048_v16, %v18466_v37  ;;  %v15886_v33 = vpop.f32.mrf.mxu0  ;;  %v18471_v30 = vld [vmem:[#allocation26_spill] sm:$0xff] }
 0x278   :  { %18462 = vst [vmem:[#allocation21_spill] sm:$0xff] %v15873_v61  ;;  %18464 = vst [vmem:[#allocation34_spill] sm:$0xff] %v15879_v7  ;;  %v7863_v5 = vrot.slane %v7862_v50, 4  ;;  %v7658_v61 = vld [vmem:[#allocation2 + $0x64] sm:$0xf]  ;;  %v7880_v53 = vshrl.u32 %v7657_v31, 16  ;;  %v11710_v10 = vpop.f32.mrf.mxu1  ;;  %v18467_v23 = vcombine.low %v15258_v41, %v15263_v57  ;;  %v7872_v62 = vor.u32 %v7871_v60, %v7867_v59 }
 0x279   :  { %18465 = vst [vmem:[#allocation40_spill] sm:$0xff] %v15883_v40  ;;  %v15894_v24 = vsel %vm13565_vm2, %v11130_v15, %v9218_v3  ;;  %v9220_v25 = vrot.slane %v9218_v3, 4  ;;  %v7883_v29 = vshll.u32 %v7657_v31, 16  ;;  %v15897_v1 = vadd.f32 %v15818_v43, %v3049_v9  ;;  %v15904_v41 = vpop.f32.mrf.mxu0  ;;  %v12241_v57 = vld [vmem:[#allocation2 + $0xfc] sm:$0xff]   ;;  %v7659_v15 = vld [vmem:[#allocation2 + $0x68] sm:$0x1] }
 0x27a   :  { %11941 = vmatmul.mubr.msk.bf16.gmra.mxu1 %vm2154_vm12, %v18467_v23  ;;  %v3070_v45 = vadd.f32 %v11710_v10, %v18469_v51  ;;  %v18472_v50 = vcombine.low %v18470_v36, %v18471_v30  ;;  %v7868_v16 = vsel %vm12789_vm13, %v7863_v5, %v7867_v59  ;;  %v7882_v60 = vrot.slane %v7880_v53, 4  ;;  %v3061_v3 = vpop.f32.mrf.mxu1  ;;  %v12242_v31 = vld [vmem:[#allocation2 + $0x108] sm:$0xff]   ;;  %v18474_v51 = vld [vmem:[#allocation47_spill] sm:$0xff]  ;;  %v9059_v53 = vld [vmem:[#allocation2 + $0x60] sm:$0xe]  ;;  %12015 = vmatmul.mubr.msk.bf16.gmra.mxu0 %vm2154_vm12, %v12241_v57 }
 0x27b   :  { %18468 = vst [vmem:[#allocation42_spill] sm:$0xff] %v15897_v1  ;;  %v7873_v37 = vrot.slane %v7872_v62, 4  ;;  %v15910_v43 = vsel %vm13565_vm2, %v9220_v25, %v9221_v12  ;;  %v7885_v9 = vrot.slane %v7883_v29, 5  ;;  %v7889_v10 = vshll.u32 %v7658_v61, 16  ;;  %v15916_v30 = vpop.f32.mrf.mxu0  ;;  %12018 = vmatprep.mubr.msk.bf16.mxu0 %vm2154_vm12, %v12242_v31 }
 0x27c   :  { %11944 = vmatprep.mubr.msk.bf16.mxu1 %vm2154_vm12, %v18472_v50  ;;  %v15913_v23 = vadd.f32 %v15828_v11, %v3070_v45  ;;  %v3062_v36 = vadd.f32 %v3061_v3, %v18474_v51  ;;  %v7893_v5 = vshrl.u32 %v7658_v61, 16  ;;  %v11711_v50 = vpop.f32.mrf.mxu1  ;;  %v7899_v29 = vshll.u32 %v7659_v15, 16  ;;  %v18476_v11 = vld [vmem:[#allocation49_spill] sm:$0xff] }
 0x27d   :  { %v7878_v62 = vsel %vm12789_vm13, %v7873_v37, %v7877_v55  ;;  %v7886_v12 = vor.u32 %v7885_v9, %v7882_v60  ;;  %v7891_v25 = vrot.slane %v7889_v10, 5  ;;  %v3073_v45 = vadd.f32 %v11711_v50, %v18476_v11  ;;  %v15926_v3 = vpop.f32.mrf.mxu0  ;;  %v18479_v10 = vld [vmem:[#allocation51_spill] sm:$0xff] }
 0x27e   :  { %18473 = vst [vmem:[#allocation6_spill] sm:$0xff] %v15913_v23  ;;  %v15923_v1 = vadd.f32 %v15836_v6, %v3062_v36  ;;  %v15929_v51 = vcombine.low %v7868_v16, %v7878_v62  ;;  %v7895_v59 = vrot.slane %v7893_v5, 4  ;;  %v7660_v23 = vld [vmem:[#allocation2 + $0x6c] sm:$0xf]  ;;  %v3064_v40 = vpop.f32.mrf.mxu1  ;;  %v7901_v60 = vrot.slane %v7899_v29, 5  ;;  %v18480_v5 = vld [vmem:[#allocation75_spill] sm:$0xff] }
 0x27f   :  { %v7887_v55 = vrot.slane %v7886_v12, 4  ;;  %v11131_v37 = vrot.slane %v9059_v53, 9  ;;  %v9225_v9 = vrot.slane %v7658_v61, 5  ;;  %v15933_v6 = vadd.f32 %v15854_v27, %v3073_v45  ;;  %v15936_v50 = vpop.f32.mrf.mxu0  ;;  %v7661_v16 = vld [vmem:[#allocation2 + $0x70] sm:$0xf]  ;;  %v18484_v12 = vld [vmem:[#allocation76_spill] sm:$0xff] }
 0x280   :  { %18475 = vst [vmem:[#allocation69_spill] sm:$0xff] %v15923_v1  ;;  %18477 = vst [vmem:[#allocation44_spill] sm:$0xff] %v15929_v51  ;;  %v3065_v36 = vadd.f32 %v3064_v40, %v18479_v10  ;;  %v7896_v11 = vor.u32 %v7895_v59, %v7891_v25  ;;  %v9228_v57 = vrot.slane %v7659_v15, 5  ;;  %v11714_v62 = vpop.f32.mrf.mxu1  ;;  %v18481_v1 = vcombine.low %v15296_v2, %v18480_v5  ;;  %v18483_v15 = vld [vmem:[#allocation54_spill] sm:$0xff]  ;;  %v18485_v29 = vld [vmem:[#allocation29_spill] sm:$0xff] }
 0x281   :  { %18478 = vst [vmem:[#allocation8_spill] sm:$0xff] %v15933_v6  ;;  %v7892_v31 = vsel %vm12789_vm13, %v7887_v55, %v7891_v25  ;;  %v15946_v27 = vsel %vm13565_vm2, %v11131_v37, %v9225_v9  ;;  %v9227_v61 = vrot.slane %v9225_v9, 4  ;;  %v7904_v40 = vshrl.u32 %v7660_v23, 16  ;;  %v15956_v2 = vpop.f32.mrf.mxu0  ;;  %v7662_v55 = vld [vmem:[#allocation2 + $0x74] sm:$0x1]  ;;  %v12244_v5 = vld [vmem:[#allocation2 + $0x120] sm:$0xff]  }
 0x282   :  { %11945 = vmatmul.mubr.msk.bf16.gmra.mxu1 %vm2154_vm12, %v18481_v1  ;;  %v15949_v53 = vadd.f32 %v15868_v17, %v3065_v36  ;;  %v3086_v59 = vadd.f32 %v11714_v62, %v18483_v15  ;;  %v18486_v45 = vcombine.low %v18484_v12, %v18485_v29  ;;  %v12243_v1 = vld [vmem:[#allocation2 + $0x114] sm:$0xff]   ;;  %v7897_v25 = vrot.slane %v7896_v11, 4  ;;  %v3077_v37 = vpop.f32.mrf.mxu1  ;;  %v9060_v15 = vld [vmem:[#allocation2 + $0x6c] sm:$0xe] }
 0x283   :  { %v7907_v10 = vshll.u32 %v7660_v23, 16  ;;  %v15960_v9 = vsel %vm13565_vm2, %v9227_v61, %v9228_v57  ;;  %v7906_v17 = vrot.slane %v7904_v40, 4  ;;  %v7913_v36 = vshll.u32 %v7661_v16, 16  ;;  %v18488_v29 = vld [vmem:[#allocation56_spill] sm:$0xff]  ;;  %12019 = vmatmul.mubr.msk.bf16.gmra.mxu0 %vm2154_vm12, %v12243_v1 }
 0x284   :  { %18482 = vst [vmem:[#allocation9_spill] sm:$0xff] %v15949_v53  ;;  %11948 = vmatprep.mubr.msk.bf16.mxu1 %vm2154_vm12, %v18486_v45  ;;  %v7917_v62 = vshrl.u32 %v7661_v16, 16  ;;  %v15963_v12 = vadd.f32 %v15876_v42, %v3086_v59  ;;  %v3078_v45 = vadd.f32 %v3077_v37, %v18488_v29  ;;  %v15966_v53 = vpop.f32.mrf.mxu0  ;;  %v7902_v23 = vsel %vm12789_vm13, %v7897_v25, %v7901_v60  ;;  %v11715_v6 = vpop.f32.mrf.mxu1  ;;  %v18491_v59 = vld [vmem:[#allocation58_spill] sm:$0xff] }
 0x285   :  { %v15972_v57 = vcombine.low %v7892_v31, %v7902_v23  ;;  %v7909_v61 = vrot.slane %v7907_v10, 5  ;;  %v7915_v40 = vrot.slane %v7913_v36, 5  ;;  %v3089_v37 = vadd.f32 %v11715_v6, %v18491_v59  ;;  %12022 = vmatprep.mubr.msk.bf16.mxu0 %vm2154_vm12, %v12244_v5  ;;  %v7664_v59 = vld [vmem:[#allocation2 + $0x7c] sm:$0xf] }
 0x286   :  { %18487 = vst [vmem:[#allocation45_spill] sm:$0xff] %v15963_v12  ;;  %v7919_v51 = vrot.slane %v7917_v62, 4  ;;  %v15975_v42 = vadd.f32 %v15886_v33, %v3078_v45  ;;  %v15978_v29 = vpop.f32.mrf.mxu0  ;;  %v7923_v60 = vshll.u32 %v7662_v55, 16  ;;  %v11132_v25 = vrot.slane %v9060_v15, 9  ;;  %v3080_v12 = vpop.f32.mrf.mxu1  ;;  %v18493_v33 = vld [vmem:[#allocation63_spill] sm:$0xff] }
 0x287   :  { %18489 = vst [vmem:[#allocation46_spill] sm:$0xff] %v15972_v57  ;;  %v7910_v31 = vor.u32 %v7909_v61, %v7906_v17  ;;  %v9232_v10 = vrot.slane %v7661_v16, 5  ;;  %v9235_v36 = vrot.slane %v7662_v55, 5  ;;  %v15983_v62 = vadd.f32 %v15904_v41, %v3089_v37  ;;  %v18494_v57 = vld [vmem:[#allocation32_spill] sm:$0xff]  ;;  %v18495_v15 = vld [vmem:[#allocation79_spill] sm:$0xff]  ;;  %v18499_v17 = vld [vmem:[#allocation65_spill] sm:$0xff] }
 0x288   :  { %18490 = vst [vmem:[#allocation23_spill] sm:$0xff] %v15975_v42  ;;  %v7920_v23 = vor.u32 %v7919_v51, %v7915_v40  ;;  %v3081_v45 = vadd.f32 %v3080_v12, %v18493_v33  ;;  %v15986_v11 = vpop.f32.mrf.mxu0  ;;  %v7925_v6 = vrot.slane %v7923_v60, 5  ;;  %v7928_v42 = vshrl.u32 %v7663_v47, 16  ;;  %v11786_v1 = vpop.f32.mrf.mxu1  ;;  %v18500_v61 = vld [vmem:[#allocation33_spill] sm:$0xff] }
 0x289   :  { %18492 = vst [vmem:[#allocation26_spill] sm:$0xff] %v15983_v62  ;;  %v18496_v7 = vcombine.low %v18494_v57, %v18495_v15  ;;  %v7911_v5 = vrot.slane %v7910_v31, 4  ;;  %v15994_v16 = vsel %vm13565_vm2, %v11132_v25, %v9232_v10  ;;  %v9234_v41 = vrot.slane %v9232_v10, 4  ;;  %v18501_v37 = vld [vmem:[#allocation81_spill] sm:$0xff]  ;;  %v12246_v25 = vld [vmem:[#allocation2 + $0x138] sm:$0xff]   ;;  %v18508_v62 = vld [vmem:[#allocation66_spill] sm:$0xff] }
 0x28a   :  { %v7921_v51 = vrot.slane %v7920_v23, 4  ;;  %18497 = vst [vmem:[#allocation47_spill] sm:$0xff] %v15994_v16  ;;  %v15997_v55 = vadd.f32 %v15916_v30, %v3081_v45  ;;  %v4582_v12 = vadd.f32 %v11786_v1, %v18499_v17  ;;  %v18502_v60 = vcombine.low %v18500_v61, %v18501_v37  ;;  %v16004_v57 = vpop.f32.mrf.mxu0  ;;  %v7665_v31 = vld [vmem:[#allocation2 + $0x80] sm:$0x1]  ;;  %v4325_v15 = vpop.f32.mrf.mxu1  ;;  %v9061_v17 = vld [vmem:[#allocation2 + $0x78] sm:$0xe] }
 0x28b   :  { %11949 = vmatmul.mubr.msk.bf16.gmra.mxu1 %vm2154_vm12, %v18496_v7  ;;  %v12245_v7 = vld [vmem:[#allocation2 + $0x12c] sm:$0xff]   ;;  %v7930_v23 = vrot.slane %v7928_v42, 4  ;;  %v7931_v33 = vshll.u32 %v7663_v47, 16  ;;  %v7916_v10 = vsel %vm12789_vm13, %v7911_v5, %v7915_v40  ;;  %v16012_v45 = vsel %vm13565_vm2, %v9234_v41, %v9235_v36 }
 0x28c   :  { %18498 = vst [vmem:[#allocation49_spill] sm:$0xff] %v15997_v55  ;;  %11952 = vmatprep.mubr.msk.bf16.mxu1 %vm2154_vm12, %v18502_v60  ;;  %v7926_v30 = vsel %vm12789_vm13, %v7921_v51, %v7925_v6  ;;  %18503 = vst [vmem:[#allocation51_spill] sm:$0xff] %v16012_v45  ;;  %v7937_v1 = vshll.u32 %v7664_v59, 16  ;;  %v16015_v61 = vadd.f32 %v15926_v3, %v4582_v12  ;;  %v18505_v37 = vld [vmem:[#allocation11_spill] sm:$0xff]  ;;  %v16018_v47 = vpop.f32.mrf.mxu0  ;;  %v11787_v5 = vpop.f32.mrf.mxu1  ;;  %v7941_v55 = vshrl.u32 %v7664_v59, 16 }
 0x28d   :  { %v4580_v42 = vadd.f32 %v4325_v15, %v18505_v37  ;;  %v16020_v60 = vcombine.low %v7916_v10, %v7926_v30  ;;  %v7933_v6 = vrot.slane %v7931_v33, 5  ;;  %v7947_v36 = vshll.u32 %v7665_v31, 16  ;;  %12023 = vmatmul.mubr.msk.bf16.gmra.mxu0 %vm2154_vm12, %v12245_v7  ;;  %v7666_v30 = vld [vmem:[#allocation2 + $0x84] sm:$0xf] }
 0x28e   :  { %18504 = vst [vmem:[#allocation75_spill] sm:$0xff] %v16015_v61  ;;  %v7939_v51 = vrot.slane %v7937_v1, 5  ;;  %v4583_v3 = vadd.f32 %v11787_v5, %v18508_v62  ;;  %v16028_v12 = vpop.f32.mrf.mxu0  ;;  %v11133_v15 = vrot.slane %v9061_v17, 9  ;;  %v9239_v10 = vrot.slane %v7664_v59, 5  ;;  %v4328_v37 = vpop.f32.mrf.mxu1  ;;  %12026 = vmatprep.mubr.msk.bf16.mxu0 %vm2154_vm12, %v12246_v25  ;;  %v18512_v25 = vld [vmem:[#allocation36_spill] sm:$0xff] }
 0x28f   :  { %18506 = vst [vmem:[#allocation54_spill] sm:$0xff] %v16020_v60  ;;  %v16025_v41 = vadd.f32 %v15936_v50, %v4580_v42  ;;  %v7934_v40 = vor.u32 %v7933_v6, %v7930_v23  ;;  %v7943_v33 = vrot.slane %v7941_v55, 4  ;;  %v7949_v1 = vrot.slane %v7947_v36, 5  ;;  %v7667_v60 = vld [vmem:[#allocation2 + $0x88] sm:$0xf] }
 0x290   :  { %v9242_v61 = vrot.slane %v7665_v31, 5  ;;  %v16033_v50 = vadd.f32 %v15956_v2, %v4583_v3  ;;  %v18510_v42 = vld [vmem:[#allocation10_spill] sm:$0xff]  ;;  %v16036_v5 = vpop.f32.mrf.mxu0  ;;  %v16040_v7 = vsel %vm13565_vm2, %v11133_v15, %v9239_v10  ;;  %v9241_v59 = vrot.slane %v9239_v10, 4  ;;  %v11790_v17 = vpop.f32.mrf.mxu1  ;;  %v18515_v3 = vld [vmem:[#allocation7_spill] sm:$0xff] }
 0x291   :  { %18507 = vst [vmem:[#allocation76_spill] sm:$0xff] %v16025_v41  ;;  %v4581_v62 = vadd.f32 %v4328_v37, %v18510_v42  ;;  %v18511_v41 = vld [vmem:[#allocation82_spill] sm:$0xff]  ;;  %v7935_v55 = vrot.slane %v7934_v40, 4  ;;  %v7944_v31 = vor.u32 %v7943_v33, %v7939_v51  ;;  %v7952_v6 = vshrl.u32 %v7666_v30, 16 }
 0x292   :  { %18509 = vst [vmem:[#allocation29_spill] sm:$0xff] %v16033_v50  ;;  %v18513_v23 = vcombine.low %v18511_v41, %v18512_v25  ;;  %v7955_v2 = vshll.u32 %v7666_v30, 16  ;;  %v4586_v37 = vadd.f32 %v11790_v17, %v18515_v3  ;;  %v18516_v42 = vld [vmem:[#allocation38_spill] sm:$0xff]  ;;  %v16054_v10 = vpop.f32.mrf.mxu0  ;;  %v16058_v41 = vsel %vm13565_vm2, %v9241_v59, %v9242_v61  ;;  %v9062_v30 = vld [vmem:[#allocation2 + $0x84] sm:$0xe]  ;;  %v4341_v25 = vpop.f32.mrf.mxu1 }
 0x293   :  { %v16047_v36 = vadd.f32 %v15966_v53, %v4581_v62  ;;  %v18517_v15 = vcombine.low %v15393_v26, %v18516_v42  ;;  %v12247_v50 = vld [vmem:[#allocation2 + $0x144] sm:$0xff]   ;;  %v7668_v40 = vld [vmem:[#allocation2 + $0x8c] sm:$0x1]  ;;  %v7961_v33 = vshll.u32 %v7667_v60, 16  ;;  %v12248_v53 = vld [vmem:[#allocation2 + $0x150] sm:$0xff]   ;;  %v7940_v62 = vsel %vm12789_vm13, %v7935_v55, %v7939_v51 }
 0x294   :  { %11953 = vmatmul.mubr.msk.bf16.gmra.mxu1 %vm2154_vm12, %v18513_v23  ;;  %v7945_v17 = vrot.slane %v7944_v31, 4  ;;  %v7954_v23 = vrot.slane %v7952_v6, 4  ;;  %v16065_v3 = vadd.f32 %v15978_v29, %v4586_v37  ;;  %v18519_v42 = vld [vmem:[#allocation16_spill] sm:$0xff]  ;;  %v16068_v61 = vpop.f32.mrf.mxu0  ;;  %v7957_v59 = vrot.slane %v7955_v2, 5  ;;  %v11791_v45 = vpop.f32.mrf.mxu1  ;;  %v7669_v31 = vld [vmem:[#allocation2 + $0x90] sm:$0xf] }
 0x295   :  { %18514 = vst [vmem:[#allocation56_spill] sm:$0xff] %v16047_v36  ;;  %11956 = vmatprep.mubr.msk.bf16.mxu1 %vm2154_vm12, %v18517_v15  ;;  %v4584_v15 = vadd.f32 %v4341_v25, %v18519_v42  ;;  %v7963_v36 = vrot.slane %v7961_v33, 5  ;;  %v7965_v8 = vshrl.u32 %v7667_v60, 16  ;;  %v7971_v51 = vshll.u32 %v7668_v40, 16  ;;  %v18521_v6 = vld [vmem:[#allocation20_spill] sm:$0xff]  ;;  %12027 = vmatmul.mubr.msk.bf16.gmra.mxu0 %vm2154_vm12, %v12247_v50 }
 0x296   :  { %18518 = vst [vmem:[#allocation58_spill] sm:$0xff] %v16065_v3  ;;  %v7950_v16 = vsel %vm12789_vm13, %v7945_v17, %v7949_v1  ;;  %v11134_v55 = vrot.slane %v9062_v30, 9  ;;  %v4587_v29 = vadd.f32 %v11791_v45, %v18521_v6  ;;  %v16076_v37 = vpop.f32.mrf.mxu0  ;;  %v7958_v2 = vor.u32 %v7957_v59, %v7954_v23  ;;  %v4344_v33 = vpop.f32.mrf.mxu1  ;;  %12030 = vmatprep.mubr.msk.bf16.mxu0 %vm2154_vm12, %v12248_v53  ;;  %v18528_v59 = vld [vmem:[#allocation68_spill] sm:$0xff] }
 0x297   :  { %v16073_v26 = vadd.f32 %v15986_v11, %v4584_v15  ;;  %v16079_v25 = vcombine.low %v7940_v62, %v7950_v16  ;;  %v7967_v1 = vrot.slane %v7965_v8, 4  ;;  %v7973_v17 = vrot.slane %v7971_v51, 5  ;;  %v18524_v11 = vld [vmem:[#allocation67_spill] sm:$0xff]  ;;  %v18525_v62 = vld [vmem:[#allocation85_spill] sm:$0xff] }
 0x298   :  { %v9246_v42 = vrot.slane %v7667_v60, 5  ;;  %v9249_v30 = vrot.slane %v7668_v40, 5  ;;  %v16083_v3 = vadd.f32 %v16004_v57, %v4587_v29  ;;  %v4585_v15 = vadd.f32 %v4344_v33, %v18524_v11  ;;  %v16086_v45 = vpop.f32.mrf.mxu0  ;;  %v11794_v16 = vpop.f32.mrf.mxu1  ;;  %v18529_v29 = vld [vmem:[#allocation41_spill] sm:$0xff] }
 0x299   :  { %18520 = vst [vmem:[#allocation63_spill] sm:$0xff] %v16073_v26  ;;  %18522 = vst [vmem:[#allocation32_spill] sm:$0xff] %v16079_v25  ;;  %v7959_v6 = vrot.slane %v7958_v2, 4  ;;  %v7670_v26 = vld [vmem:[#allocation2 + $0x94] sm:$0xf]  ;;  %v7976_v50 = vshrl.u32 %v7669_v31, 16  ;;  %v18526_v23 = vcombine.low %v15408_v54, %v18525_v62  ;;  %v7968_v8 = vor.u32 %v7967_v1, %v7963_v36 }
 0x29a   :  { %18523 = vst [vmem:[#allocation79_spill] sm:$0xff] %v16083_v3  ;;  %v16094_v60 = vsel %vm13565_vm2, %v11134_v55, %v9246_v42  ;;  %v9248_v57 = vrot.slane %v9246_v42, 4  ;;  %v7979_v40 = vshll.u32 %v7669_v31, 16  ;;  %v16097_v53 = vadd.f32 %v16018_v47, %v4585_v15  ;;  %v18530_v2 = vld [vmem:[#allocation5_spill] sm:$0xff]  ;;  %v16104_v54 = vpop.f32.mrf.mxu0  ;;  %v7671_v55 = vld [vmem:[#allocation2 + $0x98] sm:$0x1]  ;;  %v4357_v42 = vpop.f32.mrf.mxu1 }
 0x29b   :  { %v4590_v51 = vadd.f32 %v11794_v16, %v18528_v59  ;;  %v18531_v33 = vcombine.low %v18529_v29, %v18530_v2  ;;  %v12249_v11 = vld [vmem:[#allocation2 + $0x15c] sm:$0xff]   ;;  %v7964_v1 = vsel %vm12789_vm13, %v7959_v6, %v7963_v36  ;;  %v7978_v62 = vrot.slane %v7976_v50, 4  ;;  %v12250_v31 = vld [vmem:[#allocation2 + $0x168] sm:$0xff]   ;;  %v9063_v50 = vld [vmem:[#allocation2 + $0x90] sm:$0xe] }
 0x29c   :  { %11957 = vmatmul.mubr.msk.bf16.gmra.mxu1 %vm2154_vm12, %v18526_v23  ;;  %18527 = vst [vmem:[#allocation65_spill] sm:$0xff] %v16097_v53  ;;  %v7969_v23 = vrot.slane %v7968_v8, 4  ;;  %v16110_v47 = vsel %vm13565_vm2, %v9248_v57, %v9249_v30  ;;  %v7981_v15 = vrot.slane %v7979_v40, 5  ;;  %v7985_v16 = vshll.u32 %v7670_v26, 16  ;;  %v18533_v29 = vld [vmem:[#allocation70_spill] sm:$0xff]  ;;  %v11795_v53 = vpop.f32.mrf.mxu1 }
 0x29d   :  { %11960 = vmatprep.mubr.msk.bf16.mxu1 %vm2154_vm12, %v18531_v33  ;;  %v16113_v59 = vadd.f32 %v16028_v12, %v4590_v51  ;;  %v4588_v2 = vadd.f32 %v4357_v42, %v18533_v29  ;;  %v16116_v33 = vpop.f32.mrf.mxu0  ;;  %v7989_v6 = vshrl.u32 %v7670_v26, 16  ;;  %v7995_v40 = vshll.u32 %v7671_v55, 16  ;;  %v18535_v12 = vld [vmem:[#allocation71_spill] sm:$0xff]  ;;  %12031 = vmatmul.mubr.msk.bf16.gmra.mxu0 %vm2154_vm12, %v12249_v11 }
 0x29e   :  { %v7974_v8 = vsel %vm12789_vm13, %v7969_v23, %v7973_v17  ;;  %v7982_v30 = vor.u32 %v7981_v15, %v7978_v62  ;;  %v7987_v57 = vrot.slane %v7985_v16, 5  ;;  %v4591_v51 = vadd.f32 %v11795_v53, %v18535_v12  ;;  %v4360_v25 = vpop.f32.mrf.mxu1  ;;  %12034 = vmatprep.mubr.msk.bf16.mxu0 %vm2154_vm12, %v12250_v31  ;;  %v18537_v16 = vld [vmem:[#allocation72_spill] sm:$0xff] }
 0x29f   :  { %18532 = vst [vmem:[#allocation33_spill] sm:$0xff] %v16113_v59  ;;  %v16123_v3 = vadd.f32 %v16036_v5, %v4588_v2  ;;  %v16126_v42 = vpop.f32.mrf.mxu0  ;;  %v16129_v29 = vcombine.low %v7964_v1, %v7974_v8  ;;  %v7991_v36 = vrot.slane %v7989_v6, 4  ;;  %v7672_v59 = vld [vmem:[#allocation2 + $0x9c] sm:$0xf]  ;;  %v7997_v62 = vrot.slane %v7995_v40, 5 }
 0x2a0   :  { %v7983_v17 = vrot.slane %v7982_v30, 4  ;;  %v11135_v23 = vrot.slane %v9063_v50, 9  ;;  %v9253_v15 = vrot.slane %v7670_v26, 5  ;;  %v16133_v5 = vadd.f32 %v16054_v10, %v4591_v51  ;;  %v7673_v1 = vld [vmem:[#allocation2 + $0xa0] sm:$0xf]  ;;  %v11798_v8 = vpop.f32.mrf.mxu1 }
 0x2a1   :  { %18534 = vst [vmem:[#allocation81_spill] sm:$0xff] %v16123_v3  ;;  %v4589_v53 = vadd.f32 %v4360_v25, %v18537_v16  ;;  %v16136_v2 = vpop.f32.mrf.mxu0  ;;  %v7992_v12 = vor.u32 %v7991_v36, %v7987_v57  ;;  %v9256_v11 = vrot.slane %v7671_v55, 5  ;;  %v18538_v6 = vcombine.low %v15451_v21, %v15456_v18  ;;  %v18540_v55 = vld [vmem:[#allocation73_spill] sm:$0xff]  ;;  %v12251_v18 = vld [vmem:[#allocation2 + $0x174] sm:$0xff]  }
 0x2a2   :  { %18536 = vst [vmem:[#allocation11_spill] sm:$0xff] %v16133_v5  ;;  %v7988_v31 = vsel %vm12789_vm13, %v7983_v17, %v7987_v57  ;;  %v16146_v10 = vsel %vm13565_vm2, %v11135_v23, %v9253_v15  ;;  %v9255_v26 = vrot.slane %v9253_v15, 4  ;;  %v8000_v25 = vshrl.u32 %v7672_v59, 16  ;;  %v7674_v40 = vld [vmem:[#allocation2 + $0xa4] sm:$0x1]  ;;  %v4373_v17 = vpop.f32.mrf.mxu1 }
 0x2a3   :  { %v16149_v50 = vadd.f32 %v16068_v61, %v4589_v53  ;;  %v4594_v36 = vadd.f32 %v11798_v8, %v18540_v55  ;;  %v18541_v30 = vcombine.low %v15467_v49, %v15471_v0  ;;  %v16156_v21 = vpop.f32.mrf.mxu0  ;;  %v7993_v57 = vrot.slane %v7992_v12, 4  ;;  %v12252_v23 = vld [vmem:[#allocation2 + $0x180] sm:$0xff]   ;;  %v9064_v8 = vld [vmem:[#allocation2 + $0x9c] sm:$0xe]  ;;  %v18543_v0 = vld [vmem:[#allocation74_spill] sm:$0xff] }
 0x2a4   :  { %11961 = vmatmul.mubr.msk.bf16.gmra.mxu1 %vm2154_vm12, %v18538_v6  ;;  %v8003_v51 = vshll.u32 %v7672_v59, 16  ;;  %v16160_v15 = vsel %vm13565_vm2, %v9255_v26, %v9256_v11  ;;  %v8002_v61 = vrot.slane %v8000_v25, 4  ;;  %v8009_v16 = vshll.u32 %v7673_v1, 16  ;;  %v7675_v5 = vld [vmem:[#allocation2 + $0xa8] sm:$0xf] }
 0x2a5   :  { %18539 = vst [vmem:[#allocation66_spill] sm:$0xff] %v16149_v50  ;;  %11964 = vmatprep.mubr.msk.bf16.mxu1 %vm2154_vm12, %v18541_v30  ;;  %v8013_v53 = vshrl.u32 %v7673_v1, 16  ;;  %v16163_v49 = vadd.f32 %v16076_v37, %v4594_v36  ;;  %v4592_v6 = vadd.f32 %v4373_v17, %v18543_v0  ;;  %v16166_v55 = vpop.f32.mrf.mxu0  ;;  %v7998_v59 = vsel %vm12789_vm13, %v7993_v57, %v7997_v62  ;;  %v11799_v30 = vpop.f32.mrf.mxu1  ;;  %v18546_v36 = vld [vmem:[#allocation77_spill] sm:$0xff] }
 0x2a6   :  { %v16172_v11 = vcombine.low %v7988_v31, %v7998_v59  ;;  %v8005_v26 = vrot.slane %v8003_v51, 5  ;;  %v8011_v25 = vrot.slane %v8009_v16, 5  ;;  %v4595_v17 = vadd.f32 %v11799_v30, %v18546_v36  ;;  %12035 = vmatmul.mubr.msk.bf16.gmra.mxu0 %vm2154_vm12, %v12251_v18  ;;  %v7676_v36 = vld [vmem:[#allocation2 + $0xac] sm:$0xf] }
 0x2a7   :  { %18542 = vst [vmem:[#allocation10_spill] sm:$0xff] %v16163_v49  ;;  %v8015_v50 = vrot.slane %v8013_v53, 4  ;;  %v16175_v37 = vadd.f32 %v16086_v45, %v4592_v6  ;;  %v16178_v0 = vpop.f32.mrf.mxu0  ;;  %v8019_v62 = vshll.u32 %v7674_v40, 16  ;;  %v11136_v57 = vrot.slane %v9064_v8, 9  ;;  %v4376_v49 = vpop.f32.mrf.mxu1  ;;  %12038 = vmatprep.mubr.msk.bf16.mxu0 %vm2154_vm12, %v12252_v23  ;;  %v18548_v45 = vld [vmem:[#allocation78_spill] sm:$0xff]  ;;  %v18549_v8 = vld [vmem:[#allocation12_spill] sm:$0xff] }
 0x2a8   :  { %18544 = vst [vmem:[#allocation82_spill] sm:$0xff] %v16172_v11  ;;  %v8006_v31 = vor.u32 %v8005_v26, %v8002_v61  ;;  %v9260_v51 = vrot.slane %v7673_v1, 5  ;;  %v9263_v16 = vrot.slane %v7674_v40, 5  ;;  %v16183_v53 = vadd.f32 %v16104_v54, %v4595_v17  ;;  %v18552_v61 = vld [vmem:[#allocation80_spill] sm:$0xff] }
 0x2a9   :  { %18545 = vst [vmem:[#allocation36_spill] sm:$0xff] %v16175_v37  ;;  %v8016_v59 = vor.u32 %v8015_v50, %v8011_v25  ;;  %v4593_v6 = vadd.f32 %v4376_v49, %v18548_v45  ;;  %v16186_v12 = vpop.f32.mrf.mxu0  ;;  %v8021_v30 = vrot.slane %v8019_v62, 5  ;;  %v8024_v37 = vshrl.u32 %v7675_v5, 16  ;;  %v11802_v18 = vpop.f32.mrf.mxu1  ;;  %v18553_v26 = vld [vmem:[#allocation92_spill] sm:$0xff]  ;;  %v7677_v62 = vld [vmem:[#allocation2 + $0xb0] sm:$0x1] }
 0x2aa   :  { %18547 = vst [vmem:[#allocation7_spill] sm:$0xff] %v16183_v53  ;;  %v18550_v3 = vcombine.low %v15475_v4, %v18549_v8  ;;  %v8007_v23 = vrot.slane %v8006_v31, 4  ;;  %v16194_v1 = vsel %vm13565_vm2, %v11136_v57, %v9260_v51  ;;  %v9262_v54 = vrot.slane %v9260_v51, 4  ;;  %v12254_v57 = vld [vmem:[#allocation2 + $0x198] sm:$0xff]  }
 0x2ab   :  { %v8017_v50 = vrot.slane %v8016_v59, 4  ;;  %v16197_v40 = vadd.f32 %v16116_v33, %v4593_v6  ;;  %v4598_v49 = vadd.f32 %v11802_v18, %v18552_v61  ;;  %v18554_v17 = vcombine.low %v15504_v56, %v18553_v26  ;;  %v16204_v4 = vpop.f32.mrf.mxu0  ;;  %v4389_v45 = vpop.f32.mrf.mxu1  ;;  %v9065_v18 = vld [vmem:[#allocation2 + $0xa8] sm:$0xe]  ;;  %v18556_v61 = vld [vmem:[#allocation83_spill] sm:$0xff]  ;;  %v7679_v53 = vld [vmem:[#allocation2 + $0xb8] sm:$0xf] }
 0x2ac   :  { %11965 = vmatmul.mubr.msk.bf16.gmra.mxu1 %vm2154_vm12, %v18550_v3  ;;  %v12253_v3 = vld [vmem:[#allocation2 + $0x18c] sm:$0xff]   ;;  %v8026_v31 = vrot.slane %v8024_v37, 4  ;;  %v8027_v59 = vshll.u32 %v7675_v5, 16  ;;  %v8012_v51 = vsel %vm12789_vm13, %v8007_v23, %v8011_v25  ;;  %v16212_v6 = vsel %vm13565_vm2, %v9262_v54, %v9263_v16 }
 0x2ad   :  { %18551 = vst [vmem:[#allocation38_spill] sm:$0xff] %v16197_v40  ;;  %11968 = vmatprep.mubr.msk.bf16.mxu1 %vm2154_vm12, %v18554_v17  ;;  %v8022_v33 = vsel %vm12789_vm13, %v8017_v50, %v8021_v30  ;;  %v8033_v56 = vshll.u32 %v7676_v36, 16  ;;  %v16215_v8 = vadd.f32 %v16126_v42, %v4598_v49  ;;  %v4596_v37 = vadd.f32 %v4389_v45, %v18556_v61  ;;  %v16218_v5 = vpop.f32.mrf.mxu0  ;;  %v11803_v23 = vpop.f32.mrf.mxu1  ;;  %v18559_v40 = vld [vmem:[#allocation84_spill] sm:$0xff] }
 0x2ae   :  { %v16220_v26 = vcombine.low %v8012_v51, %v8022_v33  ;;  %v8029_v30 = vrot.slane %v8027_v59, 5  ;;  %v8037_v17 = vshrl.u32 %v7676_v36, 16  ;;  %v8043_v16 = vshll.u32 %v7677_v62, 16  ;;  %12039 = vmatmul.mubr.msk.bf16.gmra.mxu0 %vm2154_vm12, %v12253_v3  ;;  %v7678_v33 = vld [vmem:[#allocation2 + $0xb4] sm:$0xf] }
 0x2af   :  { %18555 = vst [vmem:[#allocation16_spill] sm:$0xff] %v16215_v8  ;;  %v8035_v50 = vrot.slane %v8033_v56, 5  ;;  %v16225_v54 = vadd.f32 %v16136_v2, %v4596_v37  ;;  %v4599_v42 = vadd.f32 %v11803_v23, %v18559_v40  ;;  %v16228_v49 = vpop.f32.mrf.mxu0  ;;  %v11137_v45 = vrot.slane %v9065_v18, 9  ;;  %v4392_v61 = vpop.f32.mrf.mxu1  ;;  %12042 = vmatprep.mubr.msk.bf16.mxu0 %vm2154_vm12, %v12254_v57  ;;  %v18561_v37 = vld [vmem:[#allocation3_spill] sm:$0xff]  ;;  %v18562_v57 = vld [vmem:[#allocation94_spill] sm:$0xff] }
 0x2b0   :  { %18557 = vst [vmem:[#allocation20_spill] sm:$0xff] %v16220_v26  ;;  %v9267_v51 = vrot.slane %v7676_v36, 5  ;;  %v8030_v25 = vor.u32 %v8029_v30, %v8026_v31  ;;  %v8039_v59 = vrot.slane %v8037_v17, 4  ;;  %v8045_v56 = vrot.slane %v8043_v16, 5 }
 0x2b1   :  { %18558 = vst [vmem:[#allocation67_spill] sm:$0xff] %v16225_v54  ;;  %v9270_v8 = vrot.slane %v7677_v62, 5  ;;  %v16233_v2 = vadd.f32 %v16156_v21, %v4599_v42  ;;  %v4597_v40 = vadd.f32 %v4392_v61, %v18561_v37  ;;  %v16236_v23 = vpop.f32.mrf.mxu0  ;;  %v11806_v18 = vpop.f32.mrf.mxu1  ;;  %v18563_v31 = vcombine.low %v15519_v14, %v18562_v57  ;;  %v18565_v42 = vld [vmem:[#allocation86_spill] sm:$0xff]  ;;  %v18566_v37 = vld [vmem:[#allocation95_spill] sm:$0xff] }
 0x2b2   :  { %v16240_v3 = vsel %vm13565_vm2, %v11137_v45, %v9267_v51  ;;  %v9269_v36 = vrot.slane %v9267_v51, 4  ;;  %v8031_v62 = vrot.slane %v8030_v25, 4  ;;  %v8040_v30 = vor.u32 %v8039_v59, %v8035_v50  ;;  %v12255_v54 = vld [vmem:[#allocation2 + $0x1a4] sm:$0xff]   ;;  %v7680_v25 = vld [vmem:[#allocation2 + $0xbc] sm:$0x1] }
 0x2b3   :  { %18560 = vst [vmem:[#allocation85_spill] sm:$0xff] %v16233_v2  ;;  %v8048_v17 = vshrl.u32 %v7678_v33, 16  ;;  %v8051_v21 = vshll.u32 %v7678_v33, 16  ;;  %v16247_v16 = vadd.f32 %v16166_v55, %v4597_v40  ;;  %v4602_v61 = vadd.f32 %v11806_v18, %v18565_v42  ;;  %v18567_v2 = vld [vmem:[#allocation48_spill] sm:$0xff]  ;;  %v16254_v51 = vpop.f32.mrf.mxu0  ;;  %v9066_v33 = vld [vmem:[#allocation2 + $0xb4] sm:$0xe]  ;;  %v4405_v57 = vpop.f32.mrf.mxu1 }
 0x2b4   :  { %11969 = vmatmul.mubr.msk.bf16.gmra.mxu1 %vm2154_vm12, %v18563_v31  ;;  %v18568_v45 = vcombine.low %v18566_v37, %v18567_v2  ;;  %v16258_v14 = vsel %vm13565_vm2, %v9269_v36, %v9270_v8  ;;  %v8057_v59 = vshll.u32 %v7679_v53, 16  ;;  %v8036_v55 = vsel %vm12789_vm13, %v8031_v62, %v8035_v50  ;;  %v18570_v42 = vld [vmem:[#allocation87_spill] sm:$0xff] }
 0x2b5   :  { %18564 = vst [vmem:[#allocation68_spill] sm:$0xff] %v16247_v16  ;;  %v8041_v40 = vrot.slane %v8040_v30, 4  ;;  %v8050_v18 = vrot.slane %v8048_v17, 4  ;;  %v16265_v31 = vadd.f32 %v16178_v0, %v4602_v61  ;;  %v4600_v37 = vadd.f32 %v4405_v57, %v18570_v42  ;;  %v11807_v16 = vpop.f32.mrf.mxu1  ;;  %v7681_v30 = vld [vmem:[#allocation2 + $0xc0] sm:$0xf]  ;;  %v18572_v17 = vld [vmem:[#allocation88_spill] sm:$0xff] }
 0x2b6   :  { %11972 = vmatprep.mubr.msk.bf16.mxu1 %vm2154_vm12, %v18568_v45  ;;  %v16268_v45 = vpop.f32.mrf.mxu0  ;;  %v8053_v8 = vrot.slane %v8051_v21, 5  ;;  %v8059_v36 = vrot.slane %v8057_v59, 5  ;;  %v8061_v11 = vshrl.u32 %v7679_v53, 16  ;;  %v8067_v50 = vshll.u32 %v7680_v25, 16  ;;  %12043 = vmatmul.mubr.msk.bf16.gmra.mxu0 %vm2154_vm12, %v12255_v54  ;;  %v7682_v54 = vld [vmem:[#allocation2 + $0xc4] sm:$0xf] }
 0x2b7   :  { %18569 = vst [vmem:[#allocation41_spill] sm:$0xff] %v16265_v31  ;;  %v8046_v26 = vsel %vm12789_vm13, %v8041_v40, %v8045_v56  ;;  %v11138_v62 = vrot.slane %v9066_v33, 9  ;;  %v16273_v2 = vadd.f32 %v16186_v12, %v4600_v37  ;;  %v4603_v0 = vadd.f32 %v11807_v16, %v18572_v17  ;;  %v4408_v59 = vpop.f32.mrf.mxu1  ;;  %v18574_v16 = vld [vmem:[#allocation43_spill] sm:$0xff] }
 0x2b8   :  { %v16276_v61 = vpop.f32.mrf.mxu0  ;;  %v16279_v57 = vcombine.low %v8036_v55, %v8046_v26  ;;  %v8054_v21 = vor.u32 %v8053_v8, %v8050_v18  ;;  %v18573_v56 = vcombine.low %v15638_v34, %v15658_v20  ;;  %v8063_v33 = vrot.slane %v8061_v11, 4  ;;  %v18575_v8 = vld [vmem:[#allocation97_spill] sm:$0xff]  ;;  %v18576_v31 = vld [vmem:[#allocation99_spill] sm:$0xff] }
 0x2b9   :  { %18571 = vst [vmem:[#allocation5_spill] sm:$0xff] %v16273_v2  ;;  %v8069_v40 = vrot.slane %v8067_v50, 5  ;;  %v9274_v42 = vrot.slane %v7679_v53, 5  ;;  %v9277_v12 = vrot.slane %v7680_v25, 5  ;;  %v16286_v37 = vadd.f32 %v16204_v4, %v4603_v0  ;;  %v11810_v18 = vpop.f32.mrf.mxu1  ;;  %v18578_v50 = vld [vmem:[#allocation89_spill] sm:$0xff] }
 0x2ba   :  { %12114 = vmatprep.mubr.msk.bf16.mxu0 %vm2154_vm12, %v18573_v56  ;;  %v4601_v17 = vadd.f32 %v4408_v59, %v18574_v16  ;;  %v16289_v2 = vpop.f32.mrf.mxu0  ;;  %v8055_v26 = vrot.slane %v8054_v21, 4  ;;  %v8072_v55 = vshrl.u32 %v7681_v30, 16  ;;  %v18577_v34 = vcombine.low %v18575_v8, %v18576_v31  ;;  %v18579_v21 = vld [vmem:[#allocation53_spill] sm:$0xff] }
 0x2bb   :  { %v8064_v20 = vor.u32 %v8063_v33, %v8059_v36  ;;  %v16297_v11 = vsel %vm13565_vm2, %v11138_v62, %v9274_v42  ;;  %v9276_v53 = vrot.slane %v9274_v42, 4  ;;  %v8075_v4 = vshll.u32 %v7681_v30, 16  ;;  %v7683_v33 = vld [vmem:[#allocation2 + $0xc8] sm:$0x1]  ;;  %v4421_v16 = vpop.f32.mrf.mxu1 }
 0x2bc   :  { %11973 = vmatmul.mubr.msk.bf16.gmra.mxu1 %vm2154_vm12, %v18577_v34  ;;  %v16300_v25 = vadd.f32 %v16218_v5, %v4601_v17  ;;  %v4606_v0 = vadd.f32 %v11810_v18, %v18578_v50  ;;  %v18580_v59 = vcombine.low %v15580_v58, %v18579_v21  ;;  %v16307_v31 = vpop.f32.mrf.mxu0  ;;  %v8060_v56 = vsel %vm12789_vm13, %v8055_v26, %v8059_v36  ;;  %v18582_v58 = vld [vmem:[#allocation90_spill] sm:$0xff] }
 0x2bd   :  { %v8074_v62 = vrot.slane %v8072_v55, 4  ;;  %v8065_v42 = vrot.slane %v8064_v20, 4  ;;  %v16313_v5 = vsel %vm13565_vm2, %v9276_v53, %v9277_v12  ;;  %v8077_v30 = vrot.slane %v8075_v4, 5  ;;  %v9067_v55 = vld [vmem:[#allocation2 + $0xc0] sm:$0xe]  ;;  %v11811_v50 = vpop.f32.mrf.mxu1 }
 0x2be   :  { %11976 = vmatprep.mubr.msk.bf16.mxu1 %vm2154_vm12, %v18580_v59  ;;  %v8081_v17 = vshll.u32 %v7682_v54, 16  ;;  %v16316_v18 = vadd.f32 %v16228_v49, %v4606_v0  ;;  %v4604_v8 = vadd.f32 %v4421_v16, %v18582_v58  ;;  %v16319_v34 = vpop.f32.mrf.mxu0  ;;  %v8085_v26 = vshrl.u32 %v7682_v54, 16  ;;  %v18584_v49 = vld [vmem:[#allocation91_spill] sm:$0xff] }
 0x2bf   :  { %v8070_v20 = vsel %vm12789_vm13, %v8065_v42, %v8069_v40  ;;  %v8078_v12 = vor.u32 %v8077_v30, %v8074_v62  ;;  %v8091_v4 = vshll.u32 %v7683_v33, 16  ;;  %v4607_v0 = vadd.f32 %v11811_v50, %v18584_v49  ;;  %v4424_v40 = vpop.f32.mrf.mxu1  ;;  %v7685_v49 = vld [vmem:[#allocation2 + $0xd0] sm:$0xf] }
 0x2c0   :  { %18581 = vst [vmem:[#allocation70_spill] sm:$0xff] %v16316_v18  ;;  %v8083_v53 = vrot.slane %v8081_v17, 5  ;;  %v16326_v21 = vadd.f32 %v16236_v23, %v4604_v8  ;;  %v16329_v59 = vpop.f32.mrf.mxu0  ;;  %v18585_v16 = vcombine.low %v15690_v48, %v15710_v35  ;;  %v16335_v58 = vcombine.low %v8060_v56, %v8070_v20  ;;  %v198_v18 = vld [vmem:[#allocation2 + $0xd4] sm:$0x1]  ;;  %v7684_v8 = vld [vmem:[#allocation2 + $0xcc] sm:$0xf] }
 0x2c1   :  { %v8087_v36 = vrot.slane %v8085_v26, 4  ;;  %v18586_v62 = vcombine.low %v15746_v22, %v15760_v46  ;;  %v8079_v23 = vrot.slane %v8078_v12, 4  ;;  %v8093_v42 = vrot.slane %v8091_v4, 5  ;;  %v18587_v48 = vld [vmem:[#allocation93_spill] sm:$0xff]  ;;  %v16383_v12 = vld [vmem:[#allocation2 + $0xf4] sm:$0xf] }
 0x2c2   :  { %18583 = vst [vmem:[#allocation71_spill] sm:$0xff] %v16326_v21  ;;  %12115 = vmatmul.mubr.msk.bf16.vlgmr.msra.gmra.mxu0 %vm2154_vm12, %v18585_v16  ;;  %v11139_v30 = vrot.slane %v9067_v55, 9  ;;  %v9281_v17 = vrot.slane %v7682_v54, 5  ;;  %v16342_v50 = vadd.f32 %v16254_v51, %v4607_v0  ;;  %v4605_v35 = vadd.f32 %v4424_v40, %v18587_v48  ;;  %v16345_v56 = vpop.f32.mrf.mxu0  ;;  %v11814_v16 = vpop.f32.mrf.mxu1  ;;  %v18588_v21 = vld [vmem:[#allocation50_spill] sm:$0xff]  ;;  %v18589_v22 = vld [vmem:[#allocation13_spill] sm:$0xff] }
 0x2c3   :  { %12118 = vmatprep.mubr.msk.bf16.mxu0 %vm2154_vm12, %v18586_v62  ;;  %v8088_v26 = vor.u32 %v8087_v36, %v8083_v53  ;;  %v9284_v20 = vrot.slane %v7683_v33, 5  ;;  %v18590_v46 = vcombine.low %v18588_v21, %v18589_v22  ;;  %v8084_v54 = vsel %vm12789_vm13, %v8079_v23, %v8083_v53  ;;  %v18592_v36 = vld [vmem:[#allocation96_spill] sm:$0xff] }
 0x2c4   :  { %v16355_v51 = vsel %vm13565_vm2, %v11139_v30, %v9281_v17  ;;  %v9283_v55 = vrot.slane %v9281_v17, 4  ;;  %v199_v4 = vsel %vm12694_vm6, 0, %v198_v18  ;;  %v16360_v33 = vadd.f32 %v16268_v45, %v4605_v35  ;;  %v16365_v21 = vpop.f32.mrf.mxu0  ;;  %v4437_v62 = vpop.f32.mrf.mxu1  ;;  %v9068_v45 = vld [vmem:[#allocation2 + $0xcc] sm:$0xe] }
 0x2c5   :  { %11977 = vmatmul.mubr.msk.bf16.gmra.mxu1 %vm2154_vm12, %v18590_v46  ;;  %v4610_v0 = vadd.f32 %v11814_v16, %v18592_v36  ;;  %v8089_v40 = vrot.slane %v8088_v26, 4  ;;  %200 = vst [vmem:[#allocation2 + $0xd4] sm:$0x1] %v199_v4  ;;  %v8096_v53 = vshrl.u32 %v7684_v8, 16  ;;  %v8099_v30 = vshll.u32 %v7684_v8, 16  ;;  %v18593_v35 = vld [vmem:[#allocation98_spill] sm:$0xff] }
 0x2c6   :  { %12048 = vmatprep.mubr.msk.bf16.mxu1 %vm2154_vm12, %v15672_v38  ;;  %v16369_v23 = vsel %vm13565_vm2, %v9283_v55, %v9284_v20  ;;  %v8105_v18 = vshll.u32 %v7685_v49, 16  ;;  %v8109_v17 = vshrl.u32 %v7685_v49, 16  ;;  %v4608_v16 = vadd.f32 %v4437_v62, %v18593_v35  ;;  %v16375_v38 = vpop.f32.mrf.mxu0  ;;  %v7687_v46 = vld [vmem:[#allocation2 + $0xf0] sm:$0xf]  ;;  %v11815_v20 = vpop.f32.mrf.mxu1 }
 0x2c7   :  { %v16372_v48 = vadd.f32 %v16276_v61, %v4610_v0  ;;  %v8094_v26 = vsel %vm12789_vm13, %v8089_v40, %v8093_v42  ;;  %v8098_v8 = vrot.slane %v8096_v53, 4  ;;  %v8101_v4 = vrot.slane %v8099_v30, 5  ;;  %v18594_v0 = vld [vmem:[#allocation100_spill] sm:$0xff] }
 0x2c8   :  { %v16381_v55 = vcombine.low %v8084_v54, %v8094_v26  ;;  %v8107_v36 = vrot.slane %v8105_v18, 5  ;;  %v16386_v61 = vadd.f32 %v16289_v2, %v4608_v16  ;;  %v4611_v62 = vadd.f32 %v11815_v20, %v18594_v0  ;;  %v16389_v35 = vpop.f32.mrf.mxu0  ;;  %v4440_v26 = vpop.f32.mrf.mxu1  ;;  %v18598_v0 = vld [vmem:[#allocation52_spill] sm:$0xff] }
 0x2c9   :  { %v18595_v42 = vcombine.low %v15794_v39, %v15812_v28  ;;  %v8111_v40 = vrot.slane %v8109_v17, 4  ;;  %v11140_v54 = vrot.slane %v9068_v45, 9  ;;  %v18596_v53 = vcombine.low %v15840_v52, %v15858_v13 }
 0x2ca   :  { %v8102_v30 = vor.u32 %v8101_v4, %v8098_v8  ;;  %v9288_v2 = vrot.slane %v7685_v49, 5  ;;  %v8120_v18 = vshrl.u32 %v7687_v46, 16  ;;  %v8123_v16 = vshll.u32 %v7687_v46, 16  ;;  %v16403_v39 = vpop.f32.mrf.mxu0  ;;  %v11818_v45 = vpop.f32.mrf.mxu1  ;;  %v18600_v4 = vld [vmem:[#allocation55_spill] sm:$0xff] }
 0x2cb   :  { %12119 = vmatmul.mubr.msk.bf16.gmra.mxu0 %vm2154_vm12, %v18595_v42  ;;  %v16400_v20 = vadd.f32 %v16307_v31, %v4611_v62  ;;  %v4609_v22 = vadd.f32 %v4440_v26, %v18598_v0  ;;  %v8112_v28 = vor.u32 %v8111_v40, %v8107_v36  ;;  %v8129_v17 = vshll.u32 %v16383_v12, 16  ;;  %v7689_v26 = vld [vmem:[#allocation2 + $0xf8] sm:$0x1] }
 0x2cc   :  { %12122 = vmatprep.mubr.msk.bf16.mxu0 %vm2154_vm12, %v18596_v53  ;;  %v7686_v52 = vld [vmem:[#allocation2 + $0xd4] sm:$0x1]  ;;  %v8103_v13 = vrot.slane %v8102_v30, 4  ;;  %v16410_v49 = vsel %vm13565_vm2, %v11140_v54, %v9288_v2  ;;  %v9290_v46 = vrot.slane %v9288_v2, 4  ;;  %v8122_v31 = vrot.slane %v8120_v18, 4  ;;  %v16418_v42 = vpop.f32.mrf.mxu0  ;;  %v4453_v30 = vpop.f32.mrf.mxu1 }
 0x2cd   :  { %18597 = vst [vmem:[#allocation72_spill] sm:$0xff] %v16400_v20  ;;  %12049 = vmatmul.mubr.msk.bf16.vlgmr.msra.gmra.mxu1 %vm2154_vm12, %v15729_v63  ;;  %v16413_v8 = vadd.f32 %v16319_v34, %v4609_v22  ;;  %v4614_v62 = vadd.f32 %v11818_v45, %v18600_v4  ;;  %v8113_v40 = vrot.slane %v8112_v28, 4  ;;  %v8115_v63 = vshll.u32 %v7686_v52, 16  ;;  %v9069_v53 = vld [vmem:[#allocation2 + $0xf0] sm:$0xe]  ;;  %v18601_v22 = vld [vmem:[#allocation57_spill] sm:$0xff] }
 0x2ce   :  { %12052 = vmatprep.mubr.msk.bf16.mxu1 %vm2154_vm12, %v15779_v44  ;;  %v8108_v54 = vsel %vm12789_vm13, %v8103_v13, %v8107_v36  ;;  %v9291_v2 = vrot.slane %v7686_v52, 5  ;;  %v8125_v18 = vrot.slane %v8123_v16, 5  ;;  %v16422_v0 = vrot.slane %v8129_v17, 5  ;;  %v16428_v44 = vpop.f32.mrf.mxu0 }
 0x2cf   :  { %18599 = vst [vmem:[#allocation73_spill] sm:$0xff] %v16413_v8  ;;  %v16425_v34 = vadd.f32 %v16329_v59, %v4614_v62  ;;  %v4612_v45 = vadd.f32 %v4453_v30, %v18601_v22  ;;  %v8117_v4 = vrot.slane %v8115_v63, 5  ;;  %v8133_v28 = vshrl.u32 %v16383_v12, 16  ;;  %v11819_v8 = vpop.f32.mrf.mxu1  ;;  %v18603_v59 = vld [vmem:[#allocation59_spill] sm:$0xff]  ;;  %v18607_v22 = vld [vmem:[#allocation14_spill] sm:$0xff] }
 0x2d0   :  { %v16433_v20 = vsel %vm13565_vm2, %v9290_v46, %v9291_v2  ;;  %v8126_v36 = vor.u32 %v8125_v18, %v8122_v31  ;;  %v8139_v52 = vshll.u32 %v7689_v26, 16  ;;  %v11141_v16 = vrot.slane %v9069_v53, 9  ;;  %v16439_v62 = vpop.f32.mrf.mxu0  ;;  %v7690_v31 = vld [vmem:[#allocation2 + $0xfc] sm:$0xf] }
 0x2d1   :  { %v16436_v17 = vadd.f32 %v16345_v56, %v4612_v45  ;;  %v4615_v13 = vadd.f32 %v11819_v8, %v18603_v59  ;;  %v18604_v63 = vcombine.low %v15894_v24, %v15910_v43  ;;  %v8118_v30 = vsel %vm12789_vm13, %v8113_v40, %v8117_v4  ;;  %v4456_v53 = vpop.f32.mrf.mxu1 }
 0x2d2   :  { %v18605_v56 = vcombine.low %v15946_v27, %v15960_v9  ;;  %v16453_v8 = vcombine.low %v8108_v54, %v8118_v30  ;;  %v8127_v2 = vrot.slane %v8126_v36, 4  ;;  %v8135_v18 = vrot.slane %v8133_v28, 4  ;;  %v16459_v45 = vpop.f32.mrf.mxu0  ;;  %v18608_v27 = vld [vmem:[#allocation37_spill] sm:$0xff] }
 0x2d3   :  { %18602 = vst [vmem:[#allocation74_spill] sm:$0xff] %v16436_v17  ;;  %12123 = vmatmul.mubr.msk.bf16.gmra.mxu0 %vm2154_vm12, %v18604_v63  ;;  %v8141_v24 = vrot.slane %v8139_v52, 5  ;;  %v16456_v43 = vadd.f32 %v16365_v21, %v4615_v13  ;;  %v4613_v40 = vadd.f32 %v4456_v53, %v18607_v22  ;;  %v9295_v4 = vrot.slane %v16383_v12, 5  ;;  %v7691_v63 = vld [vmem:[#allocation2 + $0x100] sm:$0xf]  ;;  %v11822_v46 = vpop.f32.mrf.mxu1  ;;  %v18610_v52 = vld [vmem:[#allocation15_spill] sm:$0xff] }
 0x2d4   :  { %12126 = vmatprep.mubr.msk.bf16.mxu0 %vm2154_vm12, %v18605_v56  ;;  %v9298_v59 = vrot.slane %v7689_v26, 5  ;;  %v8132_v9 = vsel %vm12789_vm13, %v8127_v2, %v16422_v0  ;;  %v8136_v54 = vor.u32 %v8135_v18, %v16422_v0  ;;  %v8144_v21 = vshrl.u32 %v7690_v31, 16  ;;  %v18611_v12 = vld [vmem:[#allocation34_spill] sm:$0xff]  ;;  %v16474_v26 = vpop.f32.mrf.mxu0  ;;  %v18613_v22 = vld [vmem:[#allocation24_spill] sm:$0xff] }
 0x2d5   :  { %18606 = vst [vmem:[#allocation77_spill] sm:$0xff] %v16456_v43  ;;  %12053 = vmatmul.mubr.msk.bf16.gmra.mxu1 %vm2154_vm12, %v18608_v27  ;;  %v8147_v28 = vshll.u32 %v7690_v31, 16  ;;  %v16469_v36 = vadd.f32 %v16375_v38, %v4613_v40  ;;  %v4618_v13 = vadd.f32 %v11822_v46, %v18610_v52  ;;  %v16478_v30 = vsel %vm13565_vm2, %v11141_v16, %v9295_v4  ;;  %v4469_v56 = vpop.f32.mrf.mxu1  ;;  %v7692_v52 = vld [vmem:[#allocation2 + $0x104] sm:$0x1]  ;;  %v18633_v17 = vld [vmem:[#allocation54_spill] sm:$0xff] }
 0x2d6   :  { %12056 = vmatprep.mubr.msk.bf16.mxu1 %vm2154_vm12, %v18611_v12  ;;  %v9297_v53 = vrot.slane %v9295_v4, 4  ;;  %v8137_v2 = vrot.slane %v8136_v54, 4  ;;  %v8146_v0 = vrot.slane %v8144_v21, 4  ;;  %v8153_v31 = vshll.u32 %v7691_v63, 16  ;;  %v16484_v40 = vpop.f32.mrf.mxu0  ;;  %v9070_v12 = vld [vmem:[#allocation2 + $0xfc] sm:$0xe] }
 0x2d7   :  { %18609 = vst [vmem:[#allocation78_spill] sm:$0xff] %v16469_v36  ;;  %v8149_v18 = vrot.slane %v8147_v28, 5  ;;  %v16481_v38 = vadd.f32 %v16389_v35, %v4618_v13  ;;  %v4616_v46 = vadd.f32 %v4469_v56, %v18613_v22  ;;  %v8157_v16 = vshrl.u32 %v7691_v63, 16  ;;  %v11823_v4 = vpop.f32.mrf.mxu1  ;;  %v18615_v56 = vld [vmem:[#allocation60_spill] sm:$0xff] }
 0x2d8   :  { %v16488_v27 = vsel %vm13565_vm2, %v9297_v53, %v9298_v59  ;;  %v8142_v54 = vsel %vm12789_vm13, %v8137_v2, %v8141_v24  ;;  %v8155_v28 = vrot.slane %v8153_v31, 5  ;;  %v4619_v22 = vadd.f32 %v11823_v4, %v18615_v56  ;;  %v18616_v59 = vld [vmem:[#allocation47_spill] sm:$0xff]  ;;  %v7693_v4 = vld [vmem:[#allocation2 + $0x108] sm:$0xf] }
 0x2d9   :  { %18612 = vst [vmem:[#allocation12_spill] sm:$0xff] %v16481_v38  ;;  %v8150_v35 = vor.u32 %v8149_v18, %v8146_v0  ;;  %v16495_v13 = vadd.f32 %v16403_v39, %v4616_v46  ;;  %v16498_v38 = vpop.f32.mrf.mxu0  ;;  %v18617_v53 = vld [vmem:[#allocation51_spill] sm:$0xff]  ;;  %v16504_v43 = vcombine.low %v8132_v9, %v8142_v54  ;;  %v8159_v24 = vrot.slane %v8157_v16, 4  ;;  %v4472_v2 = vpop.f32.mrf.mxu1  ;;  %v7694_v54 = vld [vmem:[#allocation2 + $0x10c] sm:$0xf] }
 0x2da   :  { %v18618_v36 = vcombine.low %v18616_v59, %v18617_v53  ;;  %v18619_v0 = vcombine.low %v16040_v7, %v16058_v41  ;;  %v8163_v18 = vshll.u32 %v7692_v52, 16  ;;  %v11142_v31 = vrot.slane %v9070_v12, 9  ;;  %v18621_v59 = vld [vmem:[#allocation61_spill] sm:$0xff] }
 0x2db   :  { %18614 = vst [vmem:[#allocation80_spill] sm:$0xff] %v16495_v13  ;;  %v8151_v39 = vrot.slane %v8150_v35, 4  ;;  %v9302_v46 = vrot.slane %v7691_v63, 5  ;;  %v16511_v56 = vadd.f32 %v16418_v42, %v4619_v22  ;;  %v4617_v53 = vadd.f32 %v4472_v2, %v18621_v59  ;;  %v11826_v21 = vpop.f32.mrf.mxu1  ;;  %v18622_v13 = vld [vmem:[#allocation44_spill] sm:$0xff]  ;;  %v18624_v35 = vld [vmem:[#allocation17_spill] sm:$0xff] }
 0x2dc   :  { %12127 = vmatmul.mubr.msk.bf16.gmra.mxu0 %vm2154_vm12, %v18618_v36  ;;  %v16514_v36 = vpop.f32.mrf.mxu0  ;;  %v8160_v9 = vor.u32 %v8159_v24, %v8155_v28  ;;  %v9305_v16 = vrot.slane %v7692_v52, 5  ;;  %v8165_v41 = vrot.slane %v8163_v18, 5  ;;  %v4622_v22 = vadd.f32 %v11826_v21, %v18624_v35  ;;  %v18625_v52 = vld [vmem:[#allocation46_spill] sm:$0xff] }
 0x2dd   :  { %12130 = vmatprep.mubr.msk.bf16.mxu0 %vm2154_vm12, %v18619_v0  ;;  %18620 = vst [vmem:[#allocation92_spill] sm:$0xff] %v16511_v56  ;;  %12057 = vmatmul.mubr.msk.bf16.gmra.mxu1 %vm2154_vm12, %v18622_v13  ;;  %v8156_v7 = vsel %vm12789_vm13, %v8151_v39, %v8155_v28  ;;  %v16522_v63 = vsel %vm13565_vm2, %v11142_v31, %v9302_v46  ;;  %v9304_v42 = vrot.slane %v9302_v46, 4  ;;  %v8168_v2 = vshrl.u32 %v7693_v4, 16  ;;  %v4485_v0 = vpop.f32.mrf.mxu1  ;;  %v7695_v39 = vld [vmem:[#allocation2 + $0x110] sm:$0x1]  ;;  %v18627_v21 = vld [vmem:[#allocation62_spill] sm:$0xff] }
 0x2de   :  { %v16525_v12 = vadd.f32 %v16428_v44, %v4617_v53  ;;  %12060 = vmatprep.mubr.msk.bf16.mxu1 %vm2154_vm12, %v18625_v52  ;;  %v16530_v24 = vpop.f32.mrf.mxu0  ;;  %v8161_v13 = vrot.slane %v8160_v9, 4  ;;  %v8171_v18 = vshll.u32 %v7693_v4, 16  ;;  %v8177_v31 = vshll.u32 %v7694_v54, 16  ;;  %v9071_v52 = vld [vmem:[#allocation2 + $0x108] sm:$0xe] }
 0x2df   :  { %v16534_v28 = vsel %vm13565_vm2, %v9304_v42, %v9305_v16  ;;  %v8181_v46 = vshrl.u32 %v7694_v54, 16  ;;  %v16537_v44 = vadd.f32 %v16439_v62, %v4622_v22  ;;  %v4620_v59 = vadd.f32 %v4485_v0, %v18627_v21  ;;  %v11827_v16 = vpop.f32.mrf.mxu1  ;;  %v18629_v22 = vld [vmem:[#allocation64_spill] sm:$0xff] }
 0x2e0   :  { %18623 = vst [vmem:[#allocation83_spill] sm:$0xff] %v16525_v12  ;;  %v16540_v53 = vpop.f32.mrf.mxu0  ;;  %v8166_v9 = vsel %vm12789_vm13, %v8161_v13, %v8165_v41  ;;  %v8170_v4 = vrot.slane %v8168_v2, 4  ;;  %v8173_v12 = vrot.slane %v8171_v18, 5  ;;  %v8179_v56 = vrot.slane %v8177_v31, 5 }
 0x2e1   :  { %18626 = vst [vmem:[#allocation84_spill] sm:$0xff] %v16537_v44  ;;  %v16546_v42 = vcombine.low %v8156_v7, %v8166_v9  ;;  %v16549_v62 = vadd.f32 %v16459_v45, %v4620_v59  ;;  %v4623_v0 = vadd.f32 %v11827_v16, %v18629_v22  ;;  %v18630_v41 = vcombine.low %v16094_v60, %v16110_v47  ;;  %v7696_v44 = vld [vmem:[#allocation2 + $0x114] sm:$0xf]  ;;  %v4488_v7 = vpop.f32.mrf.mxu1  ;;  %v18632_v16 = vld [vmem:[#allocation18_spill] sm:$0xff] }
 0x2e2   :  { %v16552_v21 = vpop.f32.mrf.mxu0  ;;  %v8183_v13 = vrot.slane %v8181_v46, 4  ;;  %v8187_v35 = vshll.u32 %v7695_v39, 16  ;;  %v18631_v2 = vcombine.low %v16146_v10, %v16160_v15  ;;  %v8174_v45 = vor.u32 %v8173_v12, %v8170_v4  ;;  %v18635_v4 = vld [vmem:[#allocation32_spill] sm:$0xff] }
 0x2e3   :  { %18628 = vst [vmem:[#allocation3_spill] sm:$0xff] %v16549_v62  ;;  %v11143_v18 = vrot.slane %v9071_v52, 9  ;;  %v9309_v31 = vrot.slane %v7694_v54, 5  ;;  %v9312_v59 = vrot.slane %v7695_v39, 5  ;;  %v16563_v9 = vadd.f32 %v16474_v26, %v4623_v0  ;;  %v11830_v62 = vpop.f32.mrf.mxu1  ;;  %v18634_v39 = vld [vmem:[#allocation22_spill] sm:$0xff] }
 0x2e4   :  { %12131 = vmatmul.mubr.msk.bf16.gmra.mxu0 %vm2154_vm12, %v18630_v41  ;;  %v4621_v60 = vadd.f32 %v4488_v7, %v18632_v16  ;;  %v16566_v47 = vpop.f32.mrf.mxu0  ;;  %v8184_v46 = vor.u32 %v8183_v13, %v8179_v56  ;;  %v8189_v22 = vrot.slane %v8187_v35, 5  ;;  %v7697_v41 = vld [vmem:[#allocation2 + $0x118] sm:$0xf]  ;;  %v8175_v10 = vrot.slane %v8174_v45, 4  ;;  %v7698_v45 = vld [vmem:[#allocation2 + $0x11c] sm:$0x1] }
 0x2e5   :  { %12134 = vmatprep.mubr.msk.bf16.mxu0 %vm2154_vm12, %v18631_v2  ;;  %12061 = vmatmul.mubr.msk.bf16.gmra.mxu1 %vm2154_vm12, %v18633_v17  ;;  %v16572_v15 = vsel %vm13565_vm2, %v11143_v18, %v9309_v31  ;;  %v9311_v54 = vrot.slane %v9309_v31, 4  ;;  %v8192_v12 = vshrl.u32 %v7696_v44, 16  ;;  %v4626_v52 = vadd.f32 %v11830_v62, %v18634_v39  ;;  %v4501_v17 = vpop.f32.mrf.mxu1  ;;  %v9072_v31 = vld [vmem:[#allocation2 + $0x114] sm:$0xe] }
 0x2e6   :  { %v16575_v26 = vadd.f32 %v16484_v40, %v4621_v60  ;;  %12064 = vmatprep.mubr.msk.bf16.mxu1 %vm2154_vm12, %v18635_v4  ;;  %v16580_v35 = vpop.f32.mrf.mxu0  ;;  %v8185_v0 = vrot.slane %v8184_v46, 4  ;;  %v8195_v13 = vshll.u32 %v7696_v44, 16  ;;  %v8180_v7 = vsel %vm12789_vm13, %v8175_v10, %v8179_v56  ;;  %v18637_v16 = vld [vmem:[#allocation19_spill] sm:$0xff]  ;;  %v7699_v4 = vld [vmem:[#allocation2 + $0x120] sm:$0xf] }
 0x2e7   :  { %v16586_v2 = vsel %vm13565_vm2, %v9311_v54, %v9312_v59  ;;  %v8194_v40 = vrot.slane %v8192_v12, 4  ;;  %v8201_v18 = vshll.u32 %v7697_v41, 16  ;;  %v16589_v62 = vadd.f32 %v16498_v38, %v4626_v52  ;;  %v11831_v46 = vpop.f32.mrf.mxu1  ;;  %v18639_v52 = vld [vmem:[#allocation25_spill] sm:$0xff] }
 0x2e8   :  { %v4624_v60 = vadd.f32 %v4501_v17, %v18637_v16  ;;  %v16592_v39 = vpop.f32.mrf.mxu0  ;;  %v8190_v44 = vsel %vm12789_vm13, %v8185_v0, %v8189_v22  ;;  %v8197_v10 = vrot.slane %v8195_v13, 5  ;;  %v8205_v12 = vshrl.u32 %v7697_v41, 16 }
 0x2e9   :  { %18636 = vst [vmem:[#allocation94_spill] sm:$0xff] %v16589_v62  ;;  %v16598_v59 = vcombine.low %v8180_v7, %v8190_v44  ;;  %v8203_v54 = vrot.slane %v8201_v18, 5  ;;  %v4627_v17 = vadd.f32 %v11831_v46, %v18639_v52  ;;  %v18640_v22 = vcombine.low %v16194_v1, %v16212_v6  ;;  %v4504_v7 = vpop.f32.mrf.mxu1  ;;  %v18642_v52 = vld [vmem:[#allocation27_spill] sm:$0xff] }
 0x2ea   :  { %v16601_v38 = vadd.f32 %v16514_v36, %v4624_v60  ;;  %v16604_v16 = vpop.f32.mrf.mxu0  ;;  %v8211_v0 = vshll.u32 %v7698_v45, 16  ;;  %v11144_v56 = vrot.slane %v9072_v31, 9  ;;  %v18641_v13 = vcombine.low %v16240_v3, %v16258_v14 }
 0x2eb   :  { %v8198_v18 = vor.u32 %v8197_v10, %v8194_v40  ;;  %v8207_v36 = vrot.slane %v8205_v12, 4  ;;  %v9316_v60 = vrot.slane %v7697_v41, 5  ;;  %v9319_v44 = vrot.slane %v7698_v45, 5  ;;  %v11834_v62 = vpop.f32.mrf.mxu1  ;;  %v18643_v40 = vld [vmem:[#allocation35_spill] sm:$0xff]  ;;  %v18644_v12 = vld [vmem:[#allocation82_spill] sm:$0xff] }
 0x2ec   :  { %18638 = vst [vmem:[#allocation86_spill] sm:$0xff] %v16601_v38  ;;  %12135 = vmatmul.mubr.msk.bf16.gmra.mxu0 %vm2154_vm12, %v18640_v22  ;;  %v16615_v46 = vadd.f32 %v16530_v24, %v4627_v17  ;;  %v4625_v38 = vadd.f32 %v4504_v7, %v18642_v52  ;;  %v16618_v1 = vpop.f32.mrf.mxu0  ;;  %v8213_v6 = vrot.slane %v8211_v0, 5  ;;  %v7700_v22 = vld [vmem:[#allocation2 + $0x124] sm:$0xf]  ;;  %v8216_v31 = vshrl.u32 %v7699_v4, 16 }
 0x2ed   :  { %12138 = vmatprep.mubr.msk.bf16.mxu0 %vm2154_vm12, %v18641_v13  ;;  %12065 = vmatmul.mubr.msk.bf16.gmra.mxu1 %vm2154_vm12, %v16129_v29  ;;  %v8199_v3 = vrot.slane %v8198_v18, 4  ;;  %v8208_v14 = vor.u32 %v8207_v36, %v8203_v54  ;;  %v16624_v41 = vsel %vm13565_vm2, %v11144_v56, %v9316_v60  ;;  %v9318_v45 = vrot.slane %v9316_v60, 4  ;;  %v7701_v0 = vld [vmem:[#allocation2 + $0x128] sm:$0x1]  ;;  %v4517_v13 = vpop.f32.mrf.mxu1 }
 0x2ee   :  { %v16627_v24 = vadd.f32 %v16540_v53, %v4625_v38  ;;  %v4630_v10 = vadd.f32 %v11834_v62, %v18643_v40  ;;  %12068 = vmatprep.mubr.msk.bf16.mxu1 %vm2154_vm12, %v18644_v12  ;;  %v16632_v17 = vpop.f32.mrf.mxu0  ;;  %v8218_v7 = vrot.slane %v8216_v31, 4  ;;  %v8219_v29 = vshll.u32 %v7699_v4, 16  ;;  %v18646_v38 = vld [vmem:[#allocation39_spill] sm:$0xff]  ;;  %v9073_v40 = vld [vmem:[#allocation2 + $0x120] sm:$0xe] }
 0x2ef   :  { %v8204_v18 = vsel %vm12789_vm13, %v8199_v3, %v8203_v54  ;;  %v8209_v56 = vrot.slane %v8208_v14, 4  ;;  %v16638_v36 = vsel %vm13565_vm2, %v9318_v45, %v9319_v44  ;;  %v8225_v53 = vshll.u32 %v7700_v22, 16  ;;  %v11835_v12 = vpop.f32.mrf.mxu1 }
 0x2f0   :  { %v16641_v62 = vadd.f32 %v16552_v21, %v4630_v10  ;;  %v4628_v60 = vadd.f32 %v4517_v13, %v18646_v38  ;;  %v16644_v52 = vpop.f32.mrf.mxu0  ;;  %v8221_v31 = vrot.slane %v8219_v29, 5  ;;  %v8229_v44 = vshrl.u32 %v7700_v22, 16  ;;  %v18648_v21 = vld [vmem:[#allocation28_spill] sm:$0xff] }
 0x2f1   :  { %v8214_v54 = vsel %vm12789_vm13, %v8209_v56, %v8213_v6  ;;  %v8227_v3 = vrot.slane %v8225_v53, 5  ;;  %v8235_v14 = vshll.u32 %v7701_v0, 16  ;;  %v4631_v10 = vadd.f32 %v11835_v12, %v18648_v21  ;;  %v4520_v6 = vpop.f32.mrf.mxu1 }
 0x2f2   :  { %18645 = vst [vmem:[#allocation95_spill] sm:$0xff] %v16641_v62  ;;  %v16651_v45 = vadd.f32 %v16566_v47, %v4628_v60  ;;  %v16654_v13 = vpop.f32.mrf.mxu0  ;;  %v18649_v38 = vcombine.low %v16297_v11, %v16313_v5  ;;  %v16660_v29 = vcombine.low %v8204_v18, %v8214_v54  ;;  %v8222_v4 = vor.u32 %v8221_v31, %v8218_v7  ;;  %v7702_v62 = vld [vmem:[#allocation2 + $0x12c] sm:$0xf]  ;;  %v7703_v31 = vld [vmem:[#allocation2 + $0x130] sm:$0xf] }
 0x2f3   :  { %v18650_v56 = vcombine.low %v16355_v51, %v16369_v23  ;;  %v8231_v47 = vrot.slane %v8229_v44, 4  ;;  %v8237_v53 = vrot.slane %v8235_v14, 5  ;;  %v11145_v60 = vrot.slane %v9073_v40, 9  ;;  %v18651_v11 = vld [vmem:[#allocation30_spill] sm:$0xff]  ;;  %v11838_v54 = vpop.f32.mrf.mxu1  ;;  %v18653_v44 = vld [vmem:[#allocation31_spill] sm:$0xff] }
 0x2f4   :  { %18647 = vst [vmem:[#allocation48_spill] sm:$0xff] %v16651_v45  ;;  %12139 = vmatmul.mubr.msk.bf16.gmra.mxu0 %vm2154_vm12, %v18649_v38  ;;  %v9323_v12 = vrot.slane %v7700_v22, 5  ;;  %v16667_v21 = vadd.f32 %v16580_v35, %v4631_v10  ;;  %v4629_v5 = vadd.f32 %v4520_v6, %v18651_v11  ;;  %v16670_v38 = vpop.f32.mrf.mxu0  ;;  %v8223_v18 = vrot.slane %v8222_v4, 4  ;;  %v18652_v45 = vld [vmem:[#allocation20_spill] sm:$0xff]  ;;  %v18655_v11 = vld [vmem:[#allocation21_spill] sm:$0xff] }
 0x2f5   :  { %12142 = vmatprep.mubr.msk.bf16.mxu0 %vm2154_vm12, %v18650_v56  ;;  %v9326_v7 = vrot.slane %v7701_v0, 5  ;;  %12069 = vmatmul.mubr.msk.bf16.gmra.mxu1 %vm2154_vm12, %v18652_v45  ;;  %v8232_v51 = vor.u32 %v8231_v47, %v8227_v3  ;;  %v8240_v40 = vshrl.u32 %v7702_v62, 16  ;;  %v4634_v14 = vadd.f32 %v11838_v54, %v18653_v44  ;;  %v7704_v45 = vld [vmem:[#allocation2 + $0x134] sm:$0x1]  ;;  %v4533_v6 = vpop.f32.mrf.mxu1 }
 0x2f6   :  { %v16676_v23 = vsel %vm13565_vm2, %v11145_v60, %v9323_v12  ;;  %v9325_v22 = vrot.slane %v9323_v12, 4  ;;  %v16679_v35 = vadd.f32 %v16592_v39, %v4629_v5  ;;  %12072 = vmatprep.mubr.msk.bf16.mxu1 %vm2154_vm12, %v16279_v57  ;;  %v16684_v0 = vpop.f32.mrf.mxu0  ;;  %v8228_v4 = vsel %vm12789_vm13, %v8223_v18, %v8227_v3 }
 0x2f7   :  { %v8243_v10 = vshll.u32 %v7702_v62, 16  ;;  %v8233_v56 = vrot.slane %v8232_v51, 4  ;;  %v8242_v39 = vrot.slane %v8240_v40, 4  ;;  %v8249_v60 = vshll.u32 %v7703_v31, 16  ;;  %v9074_v62 = vld [vmem:[#allocation2 + $0x12c] sm:$0xe]  ;;  %v11839_v54 = vpop.f32.mrf.mxu1 }
 0x2f8   :  { %v16690_v47 = vsel %vm13565_vm2, %v9325_v22, %v9326_v7  ;;  %v16693_v12 = vadd.f32 %v16604_v16, %v4634_v14  ;;  %v4632_v57 = vadd.f32 %v4533_v6, %v18655_v11  ;;  %v16696_v5 = vpop.f32.mrf.mxu0  ;;  %v8253_v22 = vshrl.u32 %v7703_v31, 16  ;;  %v18656_v16 = vld [vmem:[#allocation40_spill] sm:$0xff] }
 0x2f9   :  { %v8245_v18 = vrot.slane %v8243_v10, 5  ;;  %v8238_v51 = vsel %vm12789_vm13, %v8233_v56, %v8237_v53  ;;  %v8251_v7 = vrot.slane %v8249_v60, 5  ;;  %v8259_v40 = vshll.u32 %v7704_v45, 16  ;;  %v4536_v53 = vpop.f32.mrf.mxu1 }
 0x2fa   :  { %18654 = vst [vmem:[#allocation87_spill] sm:$0xff] %v16693_v12  ;;  %v16703_v44 = vadd.f32 %v16618_v1, %v4632_v57  ;;  %v4635_v14 = vadd.f32 %v11839_v54, %v18656_v16  ;;  %v16706_v6 = vpop.f32.mrf.mxu0  ;;  %v18657_v11 = vcombine.low %v16410_v49, %v16433_v20  ;;  %v16712_v10 = vcombine.low %v8228_v4, %v8238_v51  ;;  %v7705_v12 = vld [vmem:[#allocation2 + $0x138] sm:$0xf]  ;;  %v18659_v20 = vld [vmem:[#allocation42_spill] sm:$0xff] }
 0x2fb   :  { %v8246_v3 = vor.u32 %v8245_v18, %v8242_v39  ;;  %v18658_v56 = vcombine.low %v16478_v30, %v16488_v27  ;;  %v8255_v1 = vrot.slane %v8253_v22, 4  ;;  %v8261_v60 = vrot.slane %v8259_v40, 5  ;;  %v7706_v18 = vld [vmem:[#allocation2 + $0x13c] sm:$0xf]  ;;  %v11842_v51 = vpop.f32.mrf.mxu1  ;;  %v18660_v22 = vld [vmem:[#allocation6_spill] sm:$0xff] }
 0x2fc   :  { %12143 = vmatmul.mubr.msk.bf16.gmra.mxu0 %vm2154_vm12, %v18657_v11  ;;  %v11146_v57 = vrot.slane %v9074_v62, 9  ;;  %v9330_v54 = vrot.slane %v7703_v31, 5  ;;  %v16719_v16 = vadd.f32 %v16632_v17, %v4635_v14  ;;  %v4633_v49 = vadd.f32 %v4536_v53, %v18659_v20  ;;  %v16722_v11 = vpop.f32.mrf.mxu0  ;;  %v18662_v20 = vld [vmem:[#allocation69_spill] sm:$0xff] }
 0x2fd   :  { %12146 = vmatprep.mubr.msk.bf16.mxu0 %vm2154_vm12, %v18658_v56  ;;  %v8247_v4 = vrot.slane %v8246_v3, 4  ;;  %v9333_v39 = vrot.slane %v7704_v45, 5  ;;  %12073 = vmatmul.mubr.msk.bf16.gmra.mxu1 %vm2154_vm12, %v16335_v58  ;;  %v8256_v30 = vor.u32 %v8255_v1, %v8251_v7  ;;  %v8264_v62 = vshrl.u32 %v7705_v12, 16  ;;  %v7707_v3 = vld [vmem:[#allocation2 + $0x140] sm:$0x1]  ;;  %v4549_v53 = vpop.f32.mrf.mxu1 }
 0x2fe   :  { %v16728_v27 = vsel %vm13565_vm2, %v11146_v57, %v9330_v54  ;;  %v9332_v31 = vrot.slane %v9330_v54, 4  ;;  %v16731_v17 = vadd.f32 %v16644_v52, %v4633_v49  ;;  %v4638_v40 = vadd.f32 %v11842_v51, %v18660_v22  ;;  %12076 = vmatprep.mubr.msk.bf16.mxu1 %vm2154_vm12, %v16381_v55  ;;  %v16736_v45 = vpop.f32.mrf.mxu0 }
 0x2ff   :  { %v8252_v58 = vsel %vm12789_vm13, %v8247_v4, %v8251_v7  ;;  %v8267_v14 = vshll.u32 %v7705_v12, 16  ;;  %v8257_v56 = vrot.slane %v8256_v30, 4  ;;  %v8266_v52 = vrot.slane %v8264_v62, 4  ;;  %v9075_v12 = vld [vmem:[#allocation2 + $0x138] sm:$0xe]  ;;  %v11843_v51 = vpop.f32.mrf.mxu1 }
 0x300   :  { %v16742_v1 = vsel %vm13565_vm2, %v9332_v31, %v9333_v39  ;;  %v8273_v57 = vshll.u32 %v7706_v18, 16  ;;  %v16745_v54 = vadd.f32 %v16654_v13, %v4638_v40  ;;  %v4636_v55 = vadd.f32 %v4549_v53, %v18662_v20  ;;  %v16748_v49 = vpop.f32.mrf.mxu0  ;;  %v18663_v13 = vld [vmem:[#allocation8_spill] sm:$0xff] }
 0x301   :  { %v8269_v4 = vrot.slane %v8267_v14, 5  ;;  %v8262_v30 = vsel %vm12789_vm13, %v8257_v56, %v8261_v60  ;;  %v8277_v31 = vshrl.u32 %v7706_v18, 16  ;;  %v8283_v62 = vshll.u32 %v7707_v3, 16  ;;  %v4552_v60 = vpop.f32.mrf.mxu1 }
 0x302   :  { %18661 = vst [vmem:[#allocation88_spill] sm:$0xff] %v16745_v54  ;;  %v8275_v39 = vrot.slane %v8273_v57, 5  ;;  %v16755_v22 = vadd.f32 %v16670_v38, %v4636_v55  ;;  %v4639_v40 = vadd.f32 %v11843_v51, %v18663_v13  ;;  %v16758_v53 = vpop.f32.mrf.mxu0  ;;  %v18664_v20 = vcombine.low %v16522_v63, %v16534_v28  ;;  %v7708_v54 = vld [vmem:[#allocation2 + $0x144] sm:$0xf] }
 0x303   :  { %v16764_v14 = vcombine.low %v8252_v58, %v8262_v30  ;;  %v8270_v7 = vor.u32 %v8269_v4, %v8266_v52  ;;  %v18665_v56 = vcombine.low %v16572_v15, %v16586_v2  ;;  %v8279_v38 = vrot.slane %v8277_v31, 4  ;;  %v18666_v63 = vld [vmem:[#allocation9_spill] sm:$0xff]  ;;  %v7709_v4 = vld [vmem:[#allocation2 + $0x148] sm:$0xf]  ;;  %v11846_v30 = vpop.f32.mrf.mxu1 }
 0x304   :  { %12147 = vmatmul.mubr.msk.bf16.gmra.mxu0 %vm2154_vm12, %v18664_v20  ;;  %v8285_v57 = vrot.slane %v8283_v62, 5  ;;  %v11147_v55 = vrot.slane %v9075_v12, 9  ;;  %v9337_v51 = vrot.slane %v7706_v18, 5  ;;  %v16771_v13 = vadd.f32 %v16684_v0, %v4639_v40  ;;  %v16774_v20 = vpop.f32.mrf.mxu0  ;;  %v18667_v31 = vld [vmem:[#allocation45_spill] sm:$0xff] }
 0x305   :  { %12150 = vmatprep.mubr.msk.bf16.mxu0 %vm2154_vm12, %v18665_v56  ;;  %v4637_v28 = vadd.f32 %v4552_v60, %v18666_v63  ;;  %v8271_v58 = vrot.slane %v8270_v7, 4  ;;  %v9340_v52 = vrot.slane %v7707_v3, 5  ;;  %12077 = vmatmul.mubr.msk.bf16.gmra.mxu1 %vm2154_vm12, %v16453_v8  ;;  %v8280_v15 = vor.u32 %v8279_v38, %v8275_v39  ;;  %v7710_v7 = vld [vmem:[#allocation2 + $0x14c] sm:$0x1]  ;;  %v4565_v60 = vpop.f32.mrf.mxu1  ;;  %v18669_v63 = vld [vmem:[#allocation23_spill] sm:$0xff] }
 0x306   :  { %v16780_v2 = vsel %vm13565_vm2, %v11147_v55, %v9337_v51  ;;  %v9339_v18 = vrot.slane %v9337_v51, 4  ;;  %v8288_v12 = vshrl.u32 %v7708_v54, 16  ;;  %v4642_v62 = vadd.f32 %v11846_v30, %v18667_v31  ;;  %12080 = vmatprep.mubr.msk.bf16.mxu1 %vm2154_vm12, %v16504_v43  ;;  %v16788_v3 = vpop.f32.mrf.mxu0 }
 0x307   :  { %v16783_v0 = vadd.f32 %v16696_v5, %v4637_v28  ;;  %v8276_v8 = vsel %vm12789_vm13, %v8271_v58, %v8275_v39  ;;  %v8291_v40 = vshll.u32 %v7708_v54, 16  ;;  %v8281_v56 = vrot.slane %v8280_v15, 4  ;;  %v9076_v54 = vld [vmem:[#allocation2 + $0x144] sm:$0xe]  ;;  %v11847_v30 = vpop.f32.mrf.mxu1 }
 0x308   :  { %v16794_v38 = vsel %vm13565_vm2, %v9339_v18, %v9340_v52  ;;  %v8290_v5 = vrot.slane %v8288_v12, 4  ;;  %v8297_v55 = vshll.u32 %v7709_v4, 16  ;;  %v16797_v51 = vadd.f32 %v16706_v6, %v4642_v62  ;;  %v16800_v28 = vpop.f32.mrf.mxu0  ;;  %v18670_v6 = vld [vmem:[#allocation26_spill] sm:$0xff] }
 0x309   :  { %v4640_v43 = vadd.f32 %v4565_v60, %v18669_v63  ;;  %v8293_v58 = vrot.slane %v8291_v40, 5  ;;  %v8286_v15 = vsel %vm12789_vm13, %v8281_v56, %v8285_v57  ;;  %v8301_v18 = vshrl.u32 %v7709_v4, 16  ;;  %v4568_v57 = vpop.f32.mrf.mxu1 }
 0x30a   :  { %18668 = vst [vmem:[#allocation43_spill] sm:$0xff] %v16797_v51  ;;  %v8299_v52 = vrot.slane %v8297_v55, 5  ;;  %v8307_v12 = vshll.u32 %v7710_v7, 16  ;;  %v4643_v62 = vadd.f32 %v11847_v30, %v18670_v6  ;;  %v16810_v60 = vpop.f32.mrf.mxu0  ;;  %v18671_v63 = vcombine.low %v16624_v41, %v16638_v36  ;;  %v7711_v51 = vld [vmem:[#allocation2 + $0x150] sm:$0xf]  ;;  %v18673_v41 = vld [vmem:[#allocation49_spill] sm:$0xff] }
 0x30b   :  { %v16807_v31 = vadd.f32 %v16722_v11, %v4640_v43  ;;  %v16816_v40 = vcombine.low %v8276_v8, %v8286_v15  ;;  %v8294_v39 = vor.u32 %v8293_v58, %v8290_v5  ;;  %v18672_v56 = vcombine.low %v16676_v23, %v16690_v47  ;;  %v7712_v58 = vld [vmem:[#allocation2 + $0x154] sm:$0xf]  ;;  %v11918_v15 = vpop.f32.mrf.mxu1 }
 0x30c   :  { %12151 = vmatmul.mubr.msk.bf16.gmra.mxu0 %vm2154_vm12, %v18671_v63  ;;  %v8303_v11 = vrot.slane %v8301_v18, 4  ;;  %v8309_v55 = vrot.slane %v8307_v12, 5  ;;  %v11148_v43 = vrot.slane %v9076_v54, 9  ;;  %v9344_v30 = vrot.slane %v7709_v4, 5  ;;  %v16826_v63 = vpop.f32.mrf.mxu0  ;;  %v18674_v18 = vld [vmem:[#allocation75_spill] sm:$0xff] }
 0x30d   :  { %12154 = vmatprep.mubr.msk.bf16.mxu0 %vm2154_vm12, %v18672_v56  ;;  %v16823_v6 = vadd.f32 %v16736_v45, %v4643_v62  ;;  %v4641_v36 = vadd.f32 %v4568_v57, %v18673_v41  ;;  %v8295_v8 = vrot.slane %v8294_v39, 4  ;;  %v9347_v5 = vrot.slane %v7710_v7, 5  ;;  %12081 = vmatmul.mubr.msk.bf16.gmra.mxu1 %vm2154_vm12, %v16546_v42  ;;  %v7713_v39 = vld [vmem:[#allocation2 + $0x158] sm:$0x1]  ;;  %v6641_v57 = vpop.f32.mrf.mxu1 }
 0x30e   :  { %v8304_v23 = vor.u32 %v8303_v11, %v8299_v52  ;;  %v16832_v47 = vsel %vm13565_vm2, %v11148_v43, %v9344_v30  ;;  %v9346_v4 = vrot.slane %v9344_v30, 4  ;;  %v8312_v54 = vshrl.u32 %v7711_v51, 16  ;;  %12084 = vmatprep.mubr.msk.bf16.mxu1 %vm2154_vm12, %v16598_v59  ;;  %v16840_v7 = vpop.f32.mrf.mxu0  ;;  %v18675_v41 = vld [vmem:[#allocation76_spill] sm:$0xff] }
 0x30f   :  { %v16835_v45 = vadd.f32 %v16748_v49, %v4641_v36  ;;  %v6898_v12 = vadd.f32 %v11918_v15, %v18674_v18  ;;  %v8300_v42 = vsel %vm12789_vm13, %v8295_v8, %v8299_v52  ;;  %v8315_v62 = vshll.u32 %v7711_v51, 16  ;;  %v9077_v51 = vld [vmem:[#allocation2 + $0x150] sm:$0xe]  ;;  %v11919_v15 = vpop.f32.mrf.mxu1 }
 0x310   :  { %v8305_v56 = vrot.slane %v8304_v23, 4  ;;  %v16846_v11 = vsel %vm13565_vm2, %v9346_v4, %v9347_v5  ;;  %v8314_v49 = vrot.slane %v8312_v54, 4  ;;  %v8321_v43 = vshll.u32 %v7712_v58, 16  ;;  %v16852_v36 = vpop.f32.mrf.mxu0 }
 0x311   :  { %v16849_v30 = vadd.f32 %v16758_v53, %v6898_v12  ;;  %v6896_v59 = vadd.f32 %v6641_v57, %v18675_v41  ;;  %v11181_v52 = vcombine.low %v16832_v47, %v16846_v11  ;;  %v8317_v8 = vrot.slane %v8315_v62, 5  ;;  %v18676_v53 = vld [vmem:[#allocation29_spill] sm:$0xff]  ;;  %v7714_v11 = vld [vmem:[#allocation2 + $0x15c] sm:$0xf] }
 0x312   :  { %v8310_v23 = vsel %vm12789_vm13, %v8305_v56, %v8309_v55  ;;  %v8323_v5 = vrot.slane %v8321_v43, 5  ;;  %v8325_v4 = vshrl.u32 %v7712_v58, 16  ;;  %v8331_v54 = vshll.u32 %v7713_v39, 16  ;;  %v16862_v57 = vpop.f32.mrf.mxu0  ;;  %v6644_v55 = vpop.f32.mrf.mxu1 }
 0x313   :  { %v16859_v18 = vadd.f32 %v16774_v20, %v6896_v59  ;;  %v6899_v12 = vadd.f32 %v11919_v15, %v18676_v53  ;;  %v18677_v41 = vcombine.low %v16728_v27, %v16742_v1  ;;  %v16868_v47 = vcombine.low %v8300_v42, %v8310_v23  ;;  %v18680_v27 = vld [vmem:[#allocation56_spill] sm:$0xff] }
 0x314   :  { %v8318_v62 = vor.u32 %v8317_v8, %v8314_v49  ;;  %v18678_v56 = vcombine.low %v16780_v2, %v16794_v38  ;;  %v8327_v20 = vrot.slane %v8325_v4, 4  ;;  %v8333_v43 = vrot.slane %v8331_v54, 5  ;;  %v7715_v8 = vld [vmem:[#allocation2 + $0x160] sm:$0xf]  ;;  %v11922_v23 = vpop.f32.mrf.mxu1  ;;  %v18682_v4 = vld [vmem:[#allocation58_spill] sm:$0xff] }
 0x315   :  { %12155 = vmatmul.mubr.msk.bf16.gmra.mxu0 %vm2154_vm12, %v18677_v41  ;;  %v11149_v59 = vrot.slane %v9077_v51, 9  ;;  %v9351_v15 = vrot.slane %v7712_v58, 5  ;;  %v16875_v53 = vadd.f32 %v16788_v3, %v6899_v12  ;;  %v6897_v1 = vadd.f32 %v6644_v55, %v18680_v27  ;;  %v16878_v41 = vpop.f32.mrf.mxu0  ;;  %12085 = vmatmul.mubr.msk.bf16.gmra.mxu1 %vm2154_vm12, %v16660_v29  ;;  %v7716_v29 = vld [vmem:[#allocation2 + $0x164] sm:$0x1]  ;;  %v18683_v27 = vld [vmem:[#allocation63_spill] sm:$0xff] }
 0x316   :  { %12158 = vmatprep.mubr.msk.bf16.mxu0 %vm2154_vm12, %v18678_v56  ;;  %v8319_v42 = vrot.slane %v8318_v62, 4  ;;  %v9354_v49 = vrot.slane %v7713_v39, 5  ;;  %v8328_v2 = vor.u32 %v8327_v20, %v8323_v5  ;;  %v8336_v58 = vshrl.u32 %v7714_v11, 16  ;;  %12088 = vmatprep.mubr.msk.bf16.mxu1 %vm2154_vm12, %v16712_v10  ;;  %v6657_v55 = vpop.f32.mrf.mxu1 }
 0x317   :  { %18679 = vst [vmem:[#allocation97_spill] sm:$0xff] %v16875_v53  ;;  %v9352_v38 = vsel %vm13565_vm2, %v11149_v59, %v9351_v15  ;;  %v9353_v51 = vrot.slane %v9351_v15, 4  ;;  %v16885_v3 = vadd.f32 %v16800_v28, %v6897_v1  ;;  %v6902_v54 = vadd.f32 %v11922_v23, %v18682_v4  ;;  %v16890_v39 = vpop.f32.mrf.mxu0 }
 0x318   :  { %v8324_v12 = vsel %vm12789_vm13, %v8319_v42, %v8323_v5  ;;  %v8339_v62 = vshll.u32 %v7714_v11, 16  ;;  %v8329_v56 = vrot.slane %v8328_v2, 4  ;;  %v8338_v59 = vrot.slane %v8336_v58, 4  ;;  %v11923_v5 = vpop.f32.mrf.mxu1 }
 0x319   :  { %18681 = vst [vmem:[#allocation99_spill] sm:$0xff] %v16885_v3  ;;  %v9355_v20 = vsel %vm13565_vm2, %v9353_v51, %v9354_v49  ;;  %v8345_v28 = vshll.u32 %v7715_v8, 16  ;;  %v16897_v15 = vadd.f32 %v16810_v60, %v6902_v54  ;;  %v6900_v1 = vadd.f32 %v6657_v55, %v18683_v27  ;;  %v16900_v10 = vpop.f32.mrf.mxu0  ;;  %v9078_v3 = vld [vmem:[#allocation2 + $0x15c] sm:$0xe]  ;;  %v18684_v51 = vld [vmem:[#allocation79_spill] sm:$0xff]  ;;  %v18686_v27 = vld [vmem:[#allocation65_spill] sm:$0xff] }
 0x31a   :  { %v11182_v23 = vcombine.low %v9352_v38, %v9355_v20  ;;  %v8341_v4 = vrot.slane %v8339_v62, 5  ;;  %v8334_v11 = vsel %vm12789_vm13, %v8329_v56, %v8333_v43  ;;  %v8349_v2 = vshrl.u32 %v7715_v8, 16  ;;  %v7717_v62 = vld [vmem:[#allocation2 + $0x168] sm:$0xf]  ;;  %v6660_v55 = vpop.f32.mrf.mxu1 }
 0x31b   :  { %v8347_v42 = vrot.slane %v8345_v28, 5  ;;  %v8355_v53 = vshll.u32 %v7716_v29, 16  ;;  %v16905_v49 = vadd.f32 %v16826_v63, %v6900_v1  ;;  %v6903_v60 = vadd.f32 %v11923_v5, %v18684_v51  ;;  %v16908_v58 = vpop.f32.mrf.mxu0 }
 0x31c   :  { %v16911_v54 = vcombine.low %v8324_v12, %v8334_v11  ;;  %v8342_v38 = vor.u32 %v8341_v4, %v8338_v59  ;;  %v8351_v43 = vrot.slane %v8349_v2, 4  ;;  %v11150_v20 = vrot.slane %v9078_v3, 9  ;;  %v7718_v12 = vld [vmem:[#allocation2 + $0x16c] sm:$0xf]  ;;  %v11926_v11 = vpop.f32.mrf.mxu1 }
 0x31d   :  { %12159 = vmatmul.mubr.msk.bf16.gmra.mxu0 %vm2154_vm12, %v11181_v52  ;;  %v8357_v56 = vrot.slane %v8355_v53, 5  ;;  %v9358_v28 = vrot.slane %v7715_v8, 5  ;;  %v16915_v63 = vadd.f32 %v16840_v7, %v6903_v60  ;;  %v6901_v1 = vadd.f32 %v6660_v55, %v18686_v27  ;;  %v16918_v5 = vpop.f32.mrf.mxu0  ;;  %12089 = vmatmul.mubr.msk.bf16.gmra.mxu1 %vm2154_vm12, %v16764_v14  ;;  %v7719_v14 = vld [vmem:[#allocation2 + $0x170] sm:$0x1]  ;;  %v18689_v27 = vld [vmem:[#allocation81_spill] sm:$0xff] }
 0x31e   :  { %12162 = vmatprep.mubr.msk.bf16.mxu0 %vm2154_vm12, %v11182_v23  ;;  %v8343_v51 = vrot.slane %v8342_v38, 4  ;;  %v9361_v52 = vrot.slane %v7716_v29, 5  ;;  %v8352_v59 = vor.u32 %v8351_v43, %v8347_v42  ;;  %v8360_v8 = vshrl.u32 %v7717_v62, 16  ;;  %v18688_v23 = vld [vmem:[#allocation33_spill] sm:$0xff]  ;;  %12092 = vmatprep.mubr.msk.bf16.mxu1 %vm2154_vm12, %v16816_v40  ;;  %v6673_v38 = vpop.f32.mrf.mxu1 }
 0x31f   :  { %18685 = vst [vmem:[#allocation89_spill] sm:$0xff] %v16915_v63  ;;  %v9359_v53 = vsel %vm13565_vm2, %v11150_v20, %v9358_v28  ;;  %v9360_v3 = vrot.slane %v9358_v28, 4  ;;  %v16925_v7 = vadd.f32 %v16852_v36, %v6901_v1  ;;  %v6906_v4 = vadd.f32 %v11926_v11, %v18688_v23  ;;  %v16930_v29 = vpop.f32.mrf.mxu0 }
 0x320   :  { %v8348_v2 = vsel %vm12789_vm13, %v8343_v51, %v8347_v42  ;;  %v8363_v60 = vshll.u32 %v7717_v62, 16  ;;  %v8353_v55 = vrot.slane %v8352_v59, 4  ;;  %v8362_v20 = vrot.slane %v8360_v8, 4  ;;  %v11927_v42 = vpop.f32.mrf.mxu1 }
 0x321   :  { %18687 = vst [vmem:[#allocation53_spill] sm:$0xff] %v16925_v7  ;;  %v9362_v43 = vsel %vm13565_vm2, %v9360_v3, %v9361_v52  ;;  %v8369_v36 = vshll.u32 %v7718_v12, 16  ;;  %v16937_v28 = vadd.f32 %v16862_v57, %v6906_v4  ;;  %v6904_v1 = vadd.f32 %v6673_v38, %v18689_v27  ;;  %v16940_v40 = vpop.f32.mrf.mxu0  ;;  %v9079_v7 = vld [vmem:[#allocation2 + $0x168] sm:$0xe]  ;;  %v18691_v3 = vld [vmem:[#allocation11_spill] sm:$0xff] }
 0x322   :  { %v11183_v11 = vcombine.low %v9359_v53, %v9362_v43  ;;  %v8365_v23 = vrot.slane %v8363_v60, 5  ;;  %v8358_v62 = vsel %vm12789_vm13, %v8353_v55, %v8357_v56  ;;  %v8373_v59 = vshrl.u32 %v7718_v12, 16  ;;  %v7720_v60 = vld [vmem:[#allocation2 + $0x174] sm:$0xf]  ;;  %v6676_v38 = vpop.f32.mrf.mxu1 }
 0x323   :  { %v8371_v51 = vrot.slane %v8369_v36, 5  ;;  %v8379_v63 = vshll.u32 %v7719_v14, 16  ;;  %v16945_v52 = vadd.f32 %v16878_v41, %v6904_v1  ;;  %v6907_v57 = vadd.f32 %v11927_v42, %v18691_v3  ;;  %v16948_v8 = vpop.f32.mrf.mxu0  ;;  %v18693_v41 = vld [vmem:[#allocation66_spill] sm:$0xff] }
 0x324   :  { %v16950_v4 = vcombine.low %v8348_v2, %v8358_v62  ;;  %v8366_v53 = vor.u32 %v8365_v23, %v8362_v20  ;;  %v8375_v43 = vrot.slane %v8373_v59, 4  ;;  %v11151_v56 = vrot.slane %v9079_v7, 9  ;;  %v7721_v2 = vld [vmem:[#allocation2 + $0x178] sm:$0xf]  ;;  %v11930_v62 = vpop.f32.mrf.mxu1 }
 0x325   :  { %18690 = vst [vmem:[#allocation90_spill] sm:$0xff] %v16945_v52  ;;  %12163 = vmatmul.mubr.msk.bf16.gmra.mxu0 %vm2154_vm12, %v11183_v11  ;;  %v8381_v27 = vrot.slane %v8379_v63, 5  ;;  %v9365_v55 = vrot.slane %v7718_v12, 5  ;;  %v16954_v36 = vadd.f32 %v16890_v39, %v6907_v57  ;;  %v6905_v1 = vadd.f32 %v6676_v38, %v18693_v41  ;;  %v16957_v52 = vpop.f32.mrf.mxu0  ;;  %12093 = vmatmul.mubr.msk.bf16.gmra.mxu1 %vm2154_vm12, %v16868_v47  ;;  %v18695_v11 = vld [vmem:[#allocation10_spill] sm:$0xff]  ;;  %v7722_v47 = vld [vmem:[#allocation2 + $0x17c] sm:$0x1] }
 0x326   :  { %v8367_v42 = vrot.slane %v8366_v53, 4  ;;  %v9368_v3 = vrot.slane %v7719_v14, 5  ;;  %v8376_v20 = vor.u32 %v8375_v43, %v8371_v51  ;;  %v8384_v12 = vshrl.u32 %v7720_v60, 16  ;;  %12096 = vmatprep.mubr.msk.bf16.mxu1 %vm2154_vm12, %v16911_v54  ;;  %v6689_v53 = vpop.f32.mrf.mxu1  ;;  %v18697_v41 = vld [vmem:[#allocation36_spill] sm:$0xff] }
 0x327   :  { %18692 = vst [vmem:[#allocation91_spill] sm:$0xff] %v16954_v36  ;;  %v9366_v63 = vsel %vm13565_vm2, %v11151_v56, %v9365_v55  ;;  %v9367_v7 = vrot.slane %v9365_v55, 4  ;;  %v16964_v39 = vadd.f32 %v16900_v10, %v6905_v1  ;;  %v6910_v23 = vadd.f32 %v11930_v62, %v18695_v11  ;;  %v16969_v14 = vpop.f32.mrf.mxu0 }
 0x328   :  { %v8372_v59 = vsel %vm12789_vm13, %v8367_v42, %v8371_v51  ;;  %v8387_v57 = vshll.u32 %v7720_v60, 16  ;;  %v8377_v38 = vrot.slane %v8376_v20, 4  ;;  %v8386_v56 = vrot.slane %v8384_v12, 4  ;;  %v11931_v51 = vpop.f32.mrf.mxu1 }
 0x329   :  { %18694 = vst [vmem:[#allocation93_spill] sm:$0xff] %v16964_v39  ;;  %v9369_v43 = vsel %vm13565_vm2, %v9367_v7, %v9368_v3  ;;  %v8393_v10 = vshll.u32 %v7721_v2, 16  ;;  %v16976_v55 = vadd.f32 %v16908_v58, %v6910_v23  ;;  %v6908_v1 = vadd.f32 %v6689_v53, %v18697_v41  ;;  %v16979_v54 = vpop.f32.mrf.mxu0  ;;  %v9080_v39 = vld [vmem:[#allocation2 + $0x174] sm:$0xe] }
 0x32a   :  { %v11184_v62 = vcombine.low %v9366_v63, %v9369_v43  ;;  %v8389_v11 = vrot.slane %v8387_v57, 5  ;;  %v8382_v60 = vsel %vm12789_vm13, %v8377_v38, %v8381_v27  ;;  %v8397_v20 = vshrl.u32 %v7721_v2, 16  ;;  %v18699_v7 = vld [vmem:[#allocation7_spill] sm:$0xff]  ;;  %v7723_v57 = vld [vmem:[#allocation2 + $0x180] sm:$0xf]  ;;  %v6692_v53 = vpop.f32.mrf.mxu1 }
 0x32b   :  { %18696 = vst [vmem:[#allocation50_spill] sm:$0xff] %v16976_v55  ;;  %v8395_v42 = vrot.slane %v8393_v10, 5  ;;  %v8403_v36 = vshll.u32 %v7722_v47, 16  ;;  %v16984_v3 = vadd.f32 %v16918_v5, %v6908_v1  ;;  %v6911_v58 = vadd.f32 %v11931_v51, %v18699_v7  ;;  %v16988_v23 = vpop.f32.mrf.mxu0  ;;  %v18700_v10 = vld [vmem:[#allocation38_spill] sm:$0xff] }
 0x32c   :  { %v11087_v12 = vcombine.low %v8372_v59, %v8382_v60  ;;  %12166 = vmatprep.mubr.msk.bf16.mxu0 %vm2154_vm12, %v11184_v62  ;;  %v8390_v63 = vor.u32 %v8389_v11, %v8386_v56  ;;  %v8399_v43 = vrot.slane %v8397_v20, 4  ;;  %v11152_v55 = vrot.slane %v9080_v39, 9  ;;  %v7724_v59 = vld [vmem:[#allocation2 + $0x184] sm:$0xf]  ;;  %v11934_v62 = vpop.f32.mrf.mxu1  ;;  %v18702_v11 = vld [vmem:[#allocation16_spill] sm:$0xff] }
 0x32d   :  { %18698 = vst [vmem:[#allocation13_spill] sm:$0xff] %v16984_v3  ;;  %v8405_v41 = vrot.slane %v8403_v36, 5  ;;  %v9372_v27 = vrot.slane %v7721_v2, 5  ;;  %v16991_v38 = vadd.f32 %v16930_v29, %v6911_v58  ;;  %v6909_v5 = vadd.f32 %v6692_v53, %v18700_v10  ;;  %v16994_v51 = vpop.f32.mrf.mxu0  ;;  %12097 = vmatmul.mubr.msk.bf16.gmra.mxu1 %vm2154_vm12, %v16950_v4  ;;  %v7725_v7 = vld [vmem:[#allocation2 + $0x188] sm:$0x1] }
 0x32e   :  { %v8391_v1 = vrot.slane %v8390_v63, 4  ;;  %v9375_v3 = vrot.slane %v7722_v47, 5  ;;  %v8400_v56 = vor.u32 %v8399_v43, %v8395_v42  ;;  %v8408_v2 = vshrl.u32 %v7723_v57, 16  ;;  %12100 = vmatprep.mubr.msk.bf16.mxu1 %vm2154_vm12, %v11087_v12  ;;  %v6705_v58 = vpop.f32.mrf.mxu1 }
 0x32f   :  { %v9373_v36 = vsel %vm13565_vm2, %v11152_v55, %v9372_v27  ;;  %v9374_v39 = vrot.slane %v9372_v27, 4  ;;  %v17001_v29 = vadd.f32 %v16940_v40, %v6909_v5  ;;  %v6914_v60 = vadd.f32 %v11934_v62, %v18702_v11  ;;  %v17007_v20 = vpop.f32.mrf.mxu0  ;;  %v18704_v27 = vld [vmem:[#allocation67_spill] sm:$0xff] }
 0x330   :  { %v8396_v47 = vsel %vm12789_vm13, %v8391_v1, %v8395_v42  ;;  %v8411_v4 = vshll.u32 %v7723_v57, 16  ;;  %v8401_v63 = vrot.slane %v8400_v56, 4  ;;  %v8410_v53 = vrot.slane %v8408_v2, 4  ;;  %v9081_v1 = vld [vmem:[#allocation2 + $0x180] sm:$0xe]  ;;  %v11935_v62 = vpop.f32.mrf.mxu1 }
 0x331   :  { %18701 = vst [vmem:[#allocation96_spill] sm:$0xff] %v17001_v29  ;;  %v9376_v55 = vsel %vm13565_vm2, %v9374_v39, %v9375_v3  ;;  %v8417_v43 = vshll.u32 %v7724_v59, 16  ;;  %v17012_v40 = vadd.f32 %v16948_v8, %v6914_v60  ;;  %v6912_v10 = vadd.f32 %v6705_v58, %v18704_v27  ;;  %v17015_v5 = vpop.f32.mrf.mxu0  ;;  %v18706_v39 = vld [vmem:[#allocation85_spill] sm:$0xff] }
 0x332   :  { %v11185_v12 = vcombine.low %v9373_v36, %v9376_v55  ;;  %v8413_v42 = vrot.slane %v8411_v4, 5  ;;  %v8406_v57 = vsel %vm12789_vm13, %v8401_v63, %v8405_v41  ;;  %v8421_v11 = vshrl.u32 %v7724_v59, 16  ;;  %v7726_v4 = vld [vmem:[#allocation2 + $0x18c] sm:$0xf]  ;;  %v6708_v58 = vpop.f32.mrf.mxu1 }
 0x333   :  { %18703 = vst [vmem:[#allocation98_spill] sm:$0xff] %v17012_v40  ;;  %v8419_v56 = vrot.slane %v8417_v43, 5  ;;  %v8427_v29 = vshll.u32 %v7725_v7, 16  ;;  %v17020_v3 = vadd.f32 %v16957_v52, %v6912_v10  ;;  %v6915_v8 = vadd.f32 %v11935_v62, %v18706_v39  ;;  %v17024_v60 = vpop.f32.mrf.mxu0  ;;  %v18708_v43 = vld [vmem:[#allocation68_spill] sm:$0xff]  ;;  %v7727_v62 = vld [vmem:[#allocation2 + $0x190] sm:$0xf] }
 0x334   :  { %v11088_v2 = vcombine.low %v8396_v47, %v8406_v57  ;;  %12167 = vmatmul.mubr.msk.bf16.gmra.mxu0 %vm2154_vm12, %v11185_v12  ;;  %v8414_v36 = vor.u32 %v8413_v42, %v8410_v53  ;;  %v8423_v55 = vrot.slane %v8421_v11, 4  ;;  %v11153_v40 = vrot.slane %v9081_v1, 9  ;;  %v11938_v12 = vpop.f32.mrf.mxu1  ;;  %v7728_v11 = vld [vmem:[#allocation2 + $0x194] sm:$0x1] }
 0x335   :  { %18705 = vst [vmem:[#allocation100_spill] sm:$0xff] %v17020_v3  ;;  %v8429_v27 = vrot.slane %v8427_v29, 5  ;;  %v9379_v41 = vrot.slane %v7724_v59, 5  ;;  %v17027_v63 = vadd.f32 %v16969_v14, %v6915_v8  ;;  %v6913_v52 = vadd.f32 %v6708_v58, %v18708_v43  ;;  %v17030_v47 = vpop.f32.mrf.mxu0  ;;  %v18710_v14 = vld [vmem:[#allocation41_spill] sm:$0xff] }
 0x336   :  { %v8415_v10 = vrot.slane %v8414_v36, 4  ;;  %v9382_v3 = vrot.slane %v7725_v7, 5  ;;  %12101 = vmatmul.mubr.msk.bf16.gmra.mxu1 %vm2154_vm12, %v11088_v2  ;;  %v8424_v53 = vor.u32 %v8423_v55, %v8419_v56  ;;  %v8432_v1 = vshrl.u32 %v7726_v4, 16  ;;  %v6721_v36 = vpop.f32.mrf.mxu1 }
 0x337   :  { %18707 = vst [vmem:[#allocation52_spill] sm:$0xff] %v17027_v63  ;;  %v9380_v42 = vsel %vm13565_vm2, %v11153_v40, %v9379_v41  ;;  %v9381_v29 = vrot.slane %v9379_v41, 4  ;;  %v17036_v59 = vadd.f32 %v16979_v54, %v6913_v52  ;;  %v6918_v57 = vadd.f32 %v11938_v12, %v18710_v14  ;;  %v17041_v8 = vpop.f32.mrf.mxu0  ;;  %v18711_v54 = vld [vmem:[#allocation5_spill] sm:$0xff]  ;;  %v9082_v14 = vld [vmem:[#allocation2 + $0x18c] sm:$0xe] }
 0x338   :  { %v8420_v7 = vsel %vm12789_vm13, %v8415_v10, %v8419_v56  ;;  %v8435_v39 = vshll.u32 %v7726_v4, 16  ;;  %v8425_v2 = vrot.slane %v8424_v53, 4  ;;  %v8434_v40 = vrot.slane %v8432_v1, 4  ;;  %v11939_v4 = vpop.f32.mrf.mxu1  ;;  %v7729_v1 = vld [vmem:[#allocation2 + $0x198] sm:$0xf] }
 0x339   :  { %18709 = vst [vmem:[#allocation55_spill] sm:$0xff] %v17036_v59  ;;  %v9383_v58 = vsel %vm13565_vm2, %v9381_v29, %v9382_v3  ;;  %v8441_v55 = vshll.u32 %v7727_v62, 16  ;;  %v17046_v41 = vadd.f32 %v16988_v23, %v6918_v57  ;;  %v6916_v43 = vadd.f32 %v6721_v36, %v18711_v54  ;;  %v17049_v56 = vpop.f32.mrf.mxu0 }
 0x33a   :  { %v11186_v52 = vcombine.low %v9380_v42, %v9383_v58  ;;  %v8437_v12 = vrot.slane %v8435_v39, 5  ;;  %v8430_v10 = vsel %vm12789_vm13, %v8425_v2, %v8429_v27  ;;  %v8445_v59 = vshrl.u32 %v7727_v62, 16  ;;  %v6724_v39 = vpop.f32.mrf.mxu1 }
 0x33b   :  { %v8443_v53 = vrot.slane %v8441_v55, 5  ;;  %v8451_v63 = vshll.u32 %v7728_v11, 16  ;;  %v17054_v3 = vadd.f32 %v16994_v51, %v6916_v43  ;;  %v6919_v23 = vadd.f32 %v11939_v4, %v16286_v37  ;;  %v17058_v57 = vpop.f32.mrf.mxu0  ;;  %v7730_v55 = vld [vmem:[#allocation2 + $0x19c] sm:$0xf]  ;;  %v7731_v4 = vld [vmem:[#allocation2 + $0x1a0] sm:$0x1] }
 0x33c   :  { %v11089_v29 = vcombine.low %v8420_v7, %v8430_v10  ;;  %12170 = vmatprep.mubr.msk.bf16.mxu0 %vm2154_vm12, %v11186_v52  ;;  %v8438_v42 = vor.u32 %v8437_v12, %v8434_v40  ;;  %v8447_v36 = vrot.slane %v8445_v59, 4  ;;  %v11154_v54 = vrot.slane %v9082_v14, 9  ;;  %v11942_v40 = vpop.f32.mrf.mxu1 }
 0x33d   :  { %v8453_v58 = vrot.slane %v8451_v63, 5  ;;  %v9386_v27 = vrot.slane %v7727_v62, 5  ;;  %v17061_v2 = vadd.f32 %v17007_v20, %v6919_v23  ;;  %v6917_v51 = vadd.f32 %v6724_v39, %v16300_v25  ;;  %v17065_v43 = vpop.f32.mrf.mxu0  ;;  %v18713_v20 = vld [vmem:[#allocation70_spill] sm:$0xff] }
 0x33e   :  { %12104 = vmatprep.mubr.msk.bf16.mxu1 %vm2154_vm12, %v11089_v29  ;;  %v8439_v37 = vrot.slane %v8438_v42, 4  ;;  %v9389_v7 = vrot.slane %v7728_v11, 5  ;;  %v8448_v52 = vor.u32 %v8447_v36, %v8443_v53  ;;  %v8456_v12 = vshrl.u32 %v7729_v1, 16  ;;  %v6737_v42 = vpop.f32.mrf.mxu1 }
 0x33f   :  { %v9387_v59 = vsel %vm13565_vm2, %v11154_v54, %v9386_v27  ;;  %v9388_v63 = vrot.slane %v9386_v27, 4  ;;  %v17070_v62 = vadd.f32 %v17015_v5, %v6917_v51  ;;  %v6922_v14 = vadd.f32 %v11942_v40, %v18713_v20  ;;  %v17075_v10 = vpop.f32.mrf.mxu0  ;;  %v18714_v27 = vld [vmem:[#allocation71_spill] sm:$0xff]  ;;  %v9083_v20 = vld [vmem:[#allocation2 + $0x198] sm:$0xe] }
 0x340   :  { %v8444_v25 = vsel %vm12789_vm13, %v8439_v37, %v8443_v53  ;;  %v8459_v11 = vshll.u32 %v7729_v1, 16  ;;  %v8449_v23 = vrot.slane %v8448_v52, 4  ;;  %v8458_v39 = vrot.slane %v8456_v12, 4  ;;  %v11943_v37 = vpop.f32.mrf.mxu1 }
 0x341   :  { %18712 = vst [vmem:[#allocation57_spill] sm:$0xff] %v17070_v62  ;;  %v9390_v29 = vsel %vm13565_vm2, %v9388_v63, %v9389_v7  ;;  %v8465_v36 = vshll.u32 %v7730_v55, 16  ;;  %v17080_v54 = vadd.f32 %v17024_v60, %v6922_v14  ;;  %v6920_v51 = vadd.f32 %v6737_v42, %v18714_v27  ;;  %v17083_v53 = vpop.f32.mrf.mxu0  ;;  %v252_v14 = vld [vmem:[#allocation2 + $0x1ac] sm:$0x1] }
 0x342   :  { %v11187_v5 = vcombine.low %v9387_v59, %v9390_v29  ;;  %v8461_v40 = vrot.slane %v8459_v11, 5  ;;  %v8454_v1 = vsel %vm12789_vm13, %v8449_v23, %v8453_v58  ;;  %v8469_v62 = vshrl.u32 %v7730_v55, 16  ;;  %v6740_v29 = vpop.f32.mrf.mxu1 }
 0x343   :  { %v8467_v52 = vrot.slane %v8465_v36, 5  ;;  %v8475_v7 = vshll.u32 %v7731_v4, 16  ;;  %v11090_v63 = vcombine.low %v8444_v25, %v8454_v1  ;;  %v17089_v60 = vadd.f32 %v17030_v47, %v6920_v51  ;;  %v17092_v11 = vpop.f32.mrf.mxu0  ;;  %v7732_v36 = vld [vmem:[#allocation2 + $0x1a4] sm:$0xf] }
 0x344   :  { %12171 = vmatmul.mubr.msk.bf16.gmra.mxu0 %vm2154_vm12, %v11187_v5  ;;  %v6923_v59 = vadd.f32 %v11943_v37, %v16342_v50  ;;  %v8462_v12 = vor.u32 %v8461_v40, %v8458_v39  ;;  %v8471_v42 = vrot.slane %v8469_v62, 4  ;;  %v11155_v58 = vrot.slane %v9083_v20, 9  ;;  %v7733_v50 = vld [vmem:[#allocation2 + $0x1a8] sm:$0xf]  ;;  %v11946_v20 = vpop.f32.mrf.mxu1 }
 0x345   :  { %v8477_v27 = vrot.slane %v8475_v7, 5  ;;  %v9393_v23 = vrot.slane %v7730_v55, 5  ;;  %12105 = vmatmul.mubr.msk.bf16.gmra.mxu1 %vm2154_vm12, %v11090_v63  ;;  %v6921_v47 = vadd.f32 %v6740_v29, %v16360_v33  ;;  %v9396_v51 = vrot.slane %v7731_v4, 5  ;;  %v17099_v39 = vpop.f32.mrf.mxu0  ;;  %v9084_v63 = vld [vmem:[#allocation2 + $0x1a4] sm:$0xe] }
 0x346   :  { %v17096_v25 = vadd.f32 %v17041_v8, %v6923_v59  ;;  %v8463_v5 = vrot.slane %v8462_v12, 4  ;;  %v8472_v40 = vor.u32 %v8471_v42, %v8467_v52  ;;  %v253_v37 = vsel %vm12694_vm6, 0, %v252_v14 }
 0x347   :  { %v9394_v62 = vsel %vm13565_vm2, %v11155_v58, %v9393_v23  ;;  %v9395_v1 = vrot.slane %v9393_v23, 4  ;;  %v17106_v7 = vadd.f32 %v17049_v56, %v6921_v47  ;;  %v6926_v8 = vadd.f32 %v11946_v20, %v16372_v48  ;;  %254 = vst [vmem:[#allocation2 + $0x1ac] sm:$0x1] %v253_v37  ;;  %v12017_v59 = vpop.f32.mrf.mxu0  ;;  %v6753_v23 = vpop.f32.mrf.mxu1 }
 0x348   :  { %v8468_v33 = vsel %vm12789_vm13, %v8463_v5, %v8467_v52  ;;  %v8480_v4 = vshrl.u32 %v7732_v36, 16  ;;  %v8473_v12 = vrot.slane %v8472_v40, 4  ;;  %v8483_v42 = vshll.u32 %v7732_v36, 16 }
 0x349   :  { %18716 = vst [vmem:[#allocation59_spill] sm:$0xff] %v17106_v7  ;;  %v9397_v29 = vsel %vm13565_vm2, %v9395_v1, %v9396_v51  ;;  %v8489_v58 = vshll.u32 %v7733_v50, 16  ;;  %v17114_v56 = vadd.f32 %v17058_v57, %v6926_v8  ;;  %v8493_v55 = vshrl.u32 %v7733_v50, 16  ;;  %v7451_v52 = vpop.f32.mrf.mxu0  ;;  %v11947_v40 = vpop.f32.mrf.mxu1  ;;  %v18718_v8 = vld [vmem:[#allocation72_spill] sm:$0xff] }
 0x34a   :  { %v11188_v14 = vcombine.low %v9394_v62, %v9397_v29  ;;  %v8482_v47 = vrot.slane %v8480_v4, 4  ;;  %v8478_v48 = vsel %vm12789_vm13, %v8473_v12, %v8477_v27  ;;  %v8485_v5 = vrot.slane %v8483_v42, 5 }
 0x34b   :  { %18717 = vst [vmem:[#allocation14_spill] sm:$0xff] %v17114_v56  ;;  %v8491_v20 = vrot.slane %v8489_v58, 5  ;;  %v11156_v37 = vrot.slane %v9084_v63, 9  ;;  %v11091_v7 = vcombine.low %v8468_v33, %v8478_v48  ;;  %v8495_v36 = vrot.slane %v8493_v55, 4  ;;  %v12020_v1 = vpop.f32.mrf.mxu0  ;;  %v6756_v29 = vpop.f32.mrf.mxu1  ;;  %v18719_v58 = vld [vmem:[#allocation73_spill] sm:$0xff] }
 0x34c   :  { %12174 = vmatprep.mubr.msk.bf16.mxu0 %vm2154_vm12, %v11188_v14  ;;  %v9400_v51 = vrot.slane %v7733_v50, 5  ;;  %v6924_v62 = vadd.f32 %v6753_v23, %v16386_v61  ;;  %v8486_v57 = vor.u32 %v8485_v5, %v8482_v47  ;;  %v6927_v4 = vadd.f32 %v11947_v40, %v18718_v8 }
 0x34d   :  { %12108 = vmatprep.mubr.msk.bf16.mxu1 %vm2154_vm12, %v11091_v7  ;;  %v8496_v56 = vor.u32 %v8495_v36, %v8491_v20  ;;  %v7464_v63 = vpop.f32.mrf.mxu0  ;;  %v6925_v23 = vadd.f32 %v6756_v29, %v18719_v58  ;;  %v11950_v14 = vpop.f32.mrf.mxu1 }
 0x34e   :  { %v9402_v27 = vrot.slane %v9400_v51, 4  ;;  %v17123_v12 = vadd.f32 %v17065_v43, %v6924_v62  ;;  %v7734_v33 = vld [vmem:[#allocation2 + $0x1ac] sm:$0x1]  ;;  %v8487_v42 = vrot.slane %v8486_v57, 4  ;;  %v9401_v50 = vsel %vm13565_vm2, %v11156_v37, %v9400_v51 }
 0x34f   :  { %v17128_v61 = vadd.f32 %v17075_v10, %v6927_v4  ;;  %v8497_v47 = vrot.slane %v8496_v56, 4  ;;  %v8499_v55 = vshll.u32 %v7734_v33, 16  ;;  %v9403_v7 = vrot.slane %v7734_v33, 5  ;;  %v12021_v5 = vpop.f32.mrf.mxu0  ;;  %v6769_v36 = vpop.f32.mrf.mxu1  ;;  %v18720_v56 = vld [vmem:[#allocation74_spill] sm:$0xff] }
 0x350   :  { %v6930_v48 = vadd.f32 %v11950_v14, %v16425_v34  ;;  %v8492_v43 = vsel %vm12789_vm13, %v8487_v42, %v8491_v20  ;;  %v17135_v40 = vadd.f32 %v17083_v53, %v6925_v23  ;;  %v6928_v62 = vadd.f32 %v6769_v36, %v18720_v56  ;;  %v18721_v53 = vld [vmem:[#allocation77_spill] sm:$0xff]  ;;  %v18723_v14 = vld [vmem:[#allocation12_spill] sm:$0xff] }
 0x351   :  { %v8501_v37 = vrot.slane %v8499_v55, 5  ;;  %v9404_v10 = vsel %vm13565_vm2, %v9402_v27, %v9403_v7  ;;  %v7467_v57 = vpop.f32.mrf.mxu0  ;;  %v11951_v34 = vpop.f32.mrf.mxu1  ;;  %v18722_v27 = vld [vmem:[#allocation78_spill] sm:$0xff] }
 0x352   :  { %v17140_v51 = vadd.f32 %v17092_v11, %v6930_v48  ;;  %v11189_v8 = vcombine.low %v9401_v50, %v9404_v10  ;;  %v17146_v20 = vadd.f32 %v17099_v39, %v6928_v62  ;;  %v6931_v29 = vadd.f32 %v11951_v34, %v18721_v53  ;;  %v18724_v48 = vld [vmem:[#allocation80_spill] sm:$0xff] }
 0x353   :  { %v8502_v4 = vsel %vm12789_vm13, %v8497_v47, %v8501_v37  ;;  %v12024_v33 = vpop.f32.mrf.mxu0  ;;  %v6772_v19 = vpop.f32.mrf.mxu1  ;;  %v18725_v10 = vld [vmem:[#allocation92_spill] sm:$0xff] }
 0x354   :  { %v11092_v42 = vcombine.low %v8492_v43, %v8502_v4  ;;  %12175 = vmatmul.mubr.msk.bf16.gmra.mxu0 %vm2154_vm12, %v11189_v8  ;;  %v17150_v11 = vadd.f32 %v12017_v59, %v6931_v29  ;;  %v6929_v58 = vadd.f32 %v6772_v19, %v18722_v27 }
 0x355   :  { %v7480_v23 = vpop.f32.mrf.mxu0  ;;  %v11954_v50 = vpop.f32.mrf.mxu1 }
 0x356   :  { %12109 = vmatmul.mubr.msk.bf16.gmra.mxu1 %vm2154_vm12, %v11092_v42  ;;  %v17154_v32 = vadd.f32 %v7451_v52, %v6929_v58  ;;  %v6934_v39 = vadd.f32 %v11954_v50, %v18723_v14  ;;  %v18726_v52 = vld [vmem:[#allocation83_spill] sm:$0xff] }
 0x357   :  { %v12025_v47 = vpop.f32.mrf.mxu0  ;;  %v6785_v55 = vpop.f32.mrf.mxu1 }
 0x358   :  { %v17157_v7 = vadd.f32 %v12020_v1, %v6934_v39  ;;  %v6932_v43 = vadd.f32 %v6785_v55, %v18724_v48  ;;  %v18727_v1 = vld [vmem:[#allocation84_spill] sm:$0xff] }
 0x359   :  { %v7483_v36 = vpop.f32.mrf.mxu0  ;;  %v11955_v37 = vpop.f32.mrf.mxu1 }
 0x35a   :  { %v17160_v59 = vadd.f32 %v7464_v63, %v6932_v43  ;;  %v6935_v56 = vadd.f32 %v11955_v37, %v18725_v10  ;;  %v18728_v63 = vld [vmem:[#allocation3_spill] sm:$0xff] }
 0x35b   :  { %v12028_v62 = vpop.f32.mrf.mxu0  ;;  %v6788_v8 = vpop.f32.mrf.mxu1 }
 0x35c   :  { %v17163_v34 = vadd.f32 %v12021_v5, %v6935_v56  ;;  %v6933_v4 = vadd.f32 %v6788_v8, %v18726_v52 }
 0x35d   :  { %v7496_v53 = vpop.f32.mrf.mxu0  ;;  %v11958_v29 = vpop.f32.mrf.mxu1 }
 0x35e   :  { %v17166_v42 = vadd.f32 %v7467_v57, %v6933_v4  ;;  %v6938_v19 = vadd.f32 %v11958_v29, %v18727_v1 }
 0x35f   :  { %v12029_v27 = vpop.f32.mrf.mxu0  ;;  %v6801_v58 = vpop.f32.mrf.mxu1 }
 0x360   :  { %v17169_v50 = vadd.f32 %v12024_v33, %v6938_v19  ;;  %v6936_v14 = vadd.f32 %v6801_v58, %v18728_v63  ;;  %v18729_v33 = vld [vmem:[#allocation94_spill] sm:$0xff] }
 0x361   :  { %v7499_v39 = vpop.f32.mrf.mxu0  ;;  %v11959_v55 = vpop.f32.mrf.mxu1 }
 0x362   :  { %v17172_v48 = vadd.f32 %v7480_v23, %v6936_v14  ;;  %v6939_v5 = vadd.f32 %v11959_v55, %v16563_v9  ;;  %v18731_v23 = vld [vmem:[#allocation86_spill] sm:$0xff] }
 0x363   :  { %v12032_v43 = vpop.f32.mrf.mxu0  ;;  %v6804_v37 = vpop.f32.mrf.mxu1 }
 0x364   :  { %v17175_v10 = vadd.f32 %v12025_v47, %v6939_v5  ;;  %v6937_v57 = vadd.f32 %v6804_v37, %v16575_v26 }
 0x365   :  { %v7512_v56 = vpop.f32.mrf.mxu0  ;;  %v11962_v8 = vpop.f32.mrf.mxu1 }
 0x366   :  { %v17178_v52 = vadd.f32 %v7483_v36, %v6937_v57  ;;  %v6942_v4 = vadd.f32 %v11962_v8, %v18729_v33 }
 0x367   :  { %v12033_v29 = vpop.f32.mrf.mxu0  ;;  %v6817_v1 = vpop.f32.mrf.mxu1 }
 0x368   :  { %v17181_v19 = vadd.f32 %v12028_v62, %v6942_v4  ;;  %v6940_v58 = vadd.f32 %v6817_v1, %v18731_v23  ;;  %v18735_v62 = vld [vmem:[#allocation95_spill] sm:$0xff] }
 0x369   :  { %v7515_v63 = vpop.f32.mrf.mxu0  ;;  %v11963_v9 = vpop.f32.mrf.mxu1 }
 0x36a   :  { %18730 = vst [vmem:[#allocation37_spill] sm:$0xff] %v17181_v19  ;;  %v17184_v14 = vadd.f32 %v7496_v53, %v6940_v58  ;;  %v6943_v47 = vadd.f32 %v11963_v9, %v16615_v46  ;;  %v18737_v53 = vld [vmem:[#allocation48_spill] sm:$0xff] }
 0x36b   :  { %v12036_v55 = vpop.f32.mrf.mxu0  ;;  %v6820_v26 = vpop.f32.mrf.mxu1 }
 0x36c   :  { %18732 = vst [vmem:[#allocation15_spill] sm:$0xff] %v17184_v14  ;;  %v17187_v5 = vadd.f32 %v12029_v27, %v6943_v47  ;;  %v6941_v36 = vadd.f32 %v6820_v26, %v16627_v24 }
 0x36d   :  { %v7528_v37 = vpop.f32.mrf.mxu0  ;;  %v11966_v57 = vpop.f32.mrf.mxu1 }
 0x36e   :  { %18733 = vst [vmem:[#allocation34_spill] sm:$0xff] %v17187_v5  ;;  %v17190_v8 = vadd.f32 %v7499_v39, %v6941_v36  ;;  %v6946_v33 = vadd.f32 %v11966_v57, %v18735_v62 }
 0x36f   :  { %v12037_v4 = vpop.f32.mrf.mxu0  ;;  %v6833_v1 = vpop.f32.mrf.mxu1 }
 0x370   :  { %18734 = vst [vmem:[#allocation24_spill] sm:$0xff] %v17190_v8  ;;  %v17193_v23 = vadd.f32 %v12032_v43, %v6946_v33  ;;  %v6944_v58 = vadd.f32 %v6833_v1, %v18737_v53  ;;  %v18741_v43 = vld [vmem:[#allocation87_spill] sm:$0xff] }
 0x371   :  { %v7531_v14 = vpop.f32.mrf.mxu0  ;;  %v11967_v46 = vpop.f32.mrf.mxu1 }
 0x372   :  { %18736 = vst [vmem:[#allocation60_spill] sm:$0xff] %v17193_v23  ;;  %v17196_v9 = vadd.f32 %v7512_v56, %v6944_v58  ;;  %v6947_v27 = vadd.f32 %v11967_v46, %v16667_v21 }
 0x373   :  { %v12040_v47 = vpop.f32.mrf.mxu0  ;;  %v6836_v24 = vpop.f32.mrf.mxu1 }
 0x374   :  { %18738 = vst [vmem:[#allocation47_spill] sm:$0xff] %v17196_v9  ;;  %v17199_v26 = vadd.f32 %v12033_v29, %v6947_v27  ;;  %v6945_v39 = vadd.f32 %v6836_v24, %v16679_v35 }
 0x375   :  { %v7544_v36 = vpop.f32.mrf.mxu0  ;;  %v11970_v57 = vpop.f32.mrf.mxu1 }
 0x376   :  { %18739 = vst [vmem:[#allocation51_spill] sm:$0xff] %v17199_v26  ;;  %v17202_v62 = vadd.f32 %v7515_v63, %v6945_v39  ;;  %v6950_v33 = vadd.f32 %v11970_v57, %v18741_v43 }
 0x377   :  { %v12041_v23 = vpop.f32.mrf.mxu0  ;;  %v6849_v1 = vpop.f32.mrf.mxu1 }
 0x378   :  { %18740 = vst [vmem:[#allocation61_spill] sm:$0xff] %v17202_v62  ;;  %v17205_v53 = vadd.f32 %v12036_v55, %v6950_v33  ;;  %v6948_v56 = vadd.f32 %v6849_v1, %v16703_v44  ;;  %v18746_v55 = vld [vmem:[#allocation88_spill] sm:$0xff] }
 0x379   :  { %v7547_v58 = vpop.f32.mrf.mxu0  ;;  %v11971_v21 = vpop.f32.mrf.mxu1 }
 0x37a   :  { %18742 = vst [vmem:[#allocation44_spill] sm:$0xff] %v17205_v53  ;;  %v17208_v46 = vadd.f32 %v7528_v37, %v6948_v56  ;;  %v6951_v29 = vadd.f32 %v11971_v21, %v16719_v16 }
 0x37b   :  { %v12044_v27 = vpop.f32.mrf.mxu0  ;;  %v6852_v35 = vpop.f32.mrf.mxu1 }
 0x37c   :  { %18743 = vst [vmem:[#allocation17_spill] sm:$0xff] %v17208_v46  ;;  %v17211_v24 = vadd.f32 %v12037_v4, %v6951_v29  ;;  %v6949_v63 = vadd.f32 %v6852_v35, %v16731_v17 }
 0x37d   :  { %v7560_v39 = vpop.f32.mrf.mxu0  ;;  %v11974_v57 = vpop.f32.mrf.mxu1 }
 0x37e   :  { %18744 = vst [vmem:[#allocation46_spill] sm:$0xff] %v17211_v24  ;;  %v17214_v43 = vadd.f32 %v7531_v14, %v6949_v63  ;;  %v6954_v33 = vadd.f32 %v11974_v57, %v18746_v55 }
 0x37f   :  { %v12045_v53 = vpop.f32.mrf.mxu0  ;;  %v6865_v44 = vpop.f32.mrf.mxu1 }
 0x380   :  { %18745 = vst [vmem:[#allocation62_spill] sm:$0xff] %v17214_v43  ;;  %v17217_v1 = vadd.f32 %v12040_v47, %v6954_v33  ;;  %v6952_v37 = vadd.f32 %v6865_v44, %v16755_v22  ;;  %v18751_v47 = vld [vmem:[#allocation43_spill] sm:$0xff] }
 0x381   :  { %v7563_v56 = vpop.f32.mrf.mxu0  ;;  %v11975_v16 = vpop.f32.mrf.mxu1 }
 0x382   :  { %18747 = vst [vmem:[#allocation64_spill] sm:$0xff] %v17217_v1  ;;  %v17220_v21 = vadd.f32 %v7544_v36, %v6952_v37  ;;  %v6955_v4 = vadd.f32 %v11975_v16, %v16771_v13 }
 0x383   :  { %v12116_v29 = vpop.f32.mrf.mxu0  ;;  %v6868_v17 = vpop.f32.mrf.mxu1 }
 0x384   :  { %18748 = vst [vmem:[#allocation18_spill] sm:$0xff] %v17220_v21  ;;  %v17223_v35 = vadd.f32 %v12041_v23, %v6955_v4  ;;  %v6953_v14 = vadd.f32 %v6868_v17, %v16783_v0 }
 0x385   :  { %v9636_v63 = vpop.f32.mrf.mxu0  ;;  %v11978_v57 = vpop.f32.mrf.mxu1 }
 0x386   :  { %18749 = vst [vmem:[#allocation54_spill] sm:$0xff] %v17223_v35  ;;  %v17226_v55 = vadd.f32 %v7547_v58, %v6953_v14  ;;  %v6958_v33 = vadd.f32 %v11978_v57, %v18751_v47 }
 0x387   :  { %v12117_v1 = vpop.f32.mrf.mxu0  ;;  %v6881_v22 = vpop.f32.mrf.mxu1 }
 0x388   :  { %18750 = vst [vmem:[#allocation22_spill] sm:$0xff] %v17226_v55  ;;  %v17229_v44 = vadd.f32 %v12044_v27, %v6958_v33  ;;  %v6956_v36 = vadd.f32 %v6881_v22, %v16807_v31  ;;  %v17244_v31 = vld [vmem:[%s17989_s2] ss:$0 sm:$0xff] }
 0x389   :  { %v9639_v37 = vpop.f32.mrf.mxu0  ;;  %v11979_v13 = vpop.f32.mrf.mxu1 }
 0x38a   :  { %18752 = vst [vmem:[#allocation32_spill] sm:$0xff] %v17229_v44  ;;  %v17232_v16 = vadd.f32 %v7560_v39, %v6956_v36  ;;  %v6959_v23 = vadd.f32 %v11979_v13, %v16823_v6 }
 0x38b   :  { %v12120_v4 = vpop.f32.mrf.mxu0  ;;  %v6884_v0 = vpop.f32.mrf.mxu1 }
 0x38c   :  { %18753 = vst [vmem:[#allocation19_spill] sm:$0xff] %v17232_v16  ;;  %v17235_v17 = vadd.f32 %v12045_v53, %v6959_v23  ;;  %v6957_v58 = vadd.f32 %v6884_v0, %v16835_v45 }
 0x38d   :  { %v9652_v14 = vpop.f32.mrf.mxu0  ;;  %v12050_v57 = vpop.f32.mrf.mxu1 }
 0x38e   :  { %18754 = vst [vmem:[#allocation25_spill] sm:$0xff] %v17235_v17  ;;  %v17238_v47 = vadd.f32 %v7563_v56, %v6957_v58  ;;  %v8991_v27 = vadd.f32 %v12050_v57, %v16849_v30  ;;  %v18756_v56 = vld [vmem:[#allocation97_spill] sm:$0xff]  ;;  %v18757_v17 = vld [vmem:[#allocation99_spill] sm:$0xff] }
 0x38f   :  { %v12121_v33 = vpop.f32.mrf.mxu0  ;;  %v8734_v39 = vpop.f32.mrf.mxu1 }
 0x390   :  { %18755 = vst [vmem:[#allocation27_spill] sm:$0xff] %v17238_v47  ;;  %v9893_v6 = vadd.f32 %v12116_v29, %v8991_v27  ;;  %v8989_v22 = vadd.f32 %v8734_v39, %v16859_v18 }
 0x391   :  { %v9655_v53 = vpop.f32.mrf.mxu0  ;;  %v12051_v36 = vpop.f32.mrf.mxu1 }
 0x392   :  { %v17248_v45 = vadd.f32 %v17244_v31, %v9893_v6  ;;  %v9891_v13 = vadd.f32 %v9636_v63, %v8989_v22  ;;  %v8992_v23 = vadd.f32 %v12051_v36, %v18756_v56 }
 0x393   :  { %v12124_v0 = vpop.f32.mrf.mxu0  ;;  %v8737_v30 = vpop.f32.mrf.mxu1 }
 0x394   :  { %v11225_v58 = vmul.f32 -1.442695, %v17248_v45  ;;  %v17253_v57 = vadd.f32 %v17244_v31, %v9891_v13  ;;  %v9894_v47 = vadd.f32 %v12117_v1, %v8992_v23  ;;  %v8990_v29 = vadd.f32 %v8737_v30, %v18757_v17 }
 0x395   :  { %v9668_v27 = vpop.f32.mrf.mxu0  ;;  %v12054_v18 = vpop.f32.mrf.mxu1 }
 0x396   :  { %12256 = vpow2.f32 %v11225_v58  ;;  %v11223_v39 = vmul.f32 -1.442695, %v17253_v57  ;;  %v17258_v6 = vadd.f32 %v17244_v31, %v9894_v47  ;;  %v9892_v63 = vadd.f32 %v9639_v37, %v8990_v29  ;;  %v18758_v37 = vld [vmem:[#allocation89_spill] sm:$0xff] }
 0x397   :  { %v12125_v22 = vpop.f32.mrf.mxu0  ;;  %v8995_v36 = vadd.f32 %v12054_v18, %v16897_v15  ;;  %v8750_v56 = vpop.f32.mrf.mxu1 }
 0x398   :  { %12258 = vpow2.f32 %v11223_v39  ;;  %v11226_v13 = vmul.f32 -1.442695, %v17258_v6  ;;  %v17263_v1 = vadd.f32 %v17244_v31, %v9892_v63  ;;  %v8993_v17 = vadd.f32 %v8750_v56, %v16905_v49  ;;  %v18759_v49 = vld [vmem:[#allocation53_spill] sm:$0xff] }
 0x399   :  { %v9671_v23 = vpop.f32.mrf.mxu0  ;;  %v9897_v30 = vadd.f32 %v12120_v4, %v8995_v36  ;;  %v12055_v58 = vpop.f32.mrf.mxu1 }
 0x39a   :  { %12260 = vpow2.f32 %v11226_v13  ;;  %v11224_v47 = vmul.f32 -1.442695, %v17263_v1  ;;  %v9895_v16 = vadd.f32 %v9652_v14, %v8993_v17  ;;  %v8996_v29 = vadd.f32 %v12055_v58, %v18758_v37 }
 0x39b   :  { %v17269_v15 = vadd.f32 %v17244_v31, %v9897_v30  ;;  %v8753_v18 = vpop.f32.mrf.mxu1 }
 0x39c   :  { %v12128_v44 = vpop.f32.mrf.mxu0  ;;  %12262 = vpow2.f32 %v11224_v47  ;;  %v17272_v39 = vadd.f32 %v17244_v31, %v9895_v16  ;;  %v9898_v63 = vadd.f32 %v12121_v33, %v8996_v29  ;;  %v8994_v56 = vadd.f32 %v8753_v18, %v18759_v49  ;;  %v18760_v49 = vld [vmem:[#allocation90_spill] sm:$0xff] }
 0x39d   :  { %v11229_v36 = vmul.f32 -1.442695, %v17269_v15  ;;  %v12058_v13 = vpop.f32.mrf.mxu1 }
 0x39e   :  { %v9684_v4 = vpop.f32.mrf.mxu0  ;;  %v11227_v14 = vmul.f32 -1.442695, %v17272_v39  ;;  %v17278_v17 = vadd.f32 %v17244_v31, %v9898_v63  ;;  %v9896_v58 = vadd.f32 %v9655_v53, %v8994_v56  ;;  %v8999_v30 = vadd.f32 %v12058_v13, %v16937_v28  ;;  %v18761_v63 = vld [vmem:[#allocation91_spill] sm:$0xff] }
 0x39f   :  { %12264 = vpow2.f32 %v11229_v36  ;;  %v8766_v47 = vpop.f32.mrf.mxu1 }
 0x3a0   :  { %v12129_v37 = vpop.f32.mrf.mxu0  ;;  %12266 = vpow2.f32 %v11227_v14  ;;  %v11230_v16 = vmul.f32 -1.442695, %v17278_v17  ;;  %v17283_v33 = vadd.f32 %v17244_v31, %v9896_v58  ;;  %v9901_v29 = vadd.f32 %v12124_v0, %v8999_v30 }
 0x3a1   :  { %v8997_v55 = vadd.f32 %v8766_v47, %v18760_v49  ;;  %v12059_v35 = vpop.f32.mrf.mxu1 }
 0x3a2   :  { %v17285_v18 = vpop.f32.mrf.mxu0  ;;  %12268 = vpow2.f32 %v11230_v16  ;;  %v11228_v53 = vmul.f32 -1.442695, %v17283_v33  ;;  %v17290_v28 = vadd.f32 %v17244_v31, %v9901_v29  ;;  %v9000_v56 = vadd.f32 %v12059_v35, %v18761_v63  ;;  %v18762_v29 = vld [vmem:[#allocation93_spill] sm:$0xff] }
 0x3a3   :  { %v12257_v13 = vpop.eup %12256  ;;  %v9899_v14 = vadd.f32 %v9668_v27, %v8997_v55  ;;  %v8769_v58 = vpop.f32.mrf.mxu1  ;;  %v18763_v55 = vld [vmem:[#allocation50_spill] sm:$0xff] }
 0x3a4   :  { %v17293_v36 = vpop.f32.mrf.mxu0  ;;  %v10220_v21 = vadd.f32 1.0, %v12257_v13  ;;  %12270 = vpow2.f32 %v11228_v53  ;;  %v11233_v0 = vmul.f32 -1.442695, %v17290_v28  ;;  %v9902_v30 = vadd.f32 %v12125_v22, %v9000_v56 }
 0x3a5   :  { %v12259_v16 = vpop.eup %12258  ;;  %v17299_v49 = vadd.f32 %v17244_v31, %v9899_v14  ;;  %v8998_v43 = vadd.f32 %v8769_v58, %v18762_v29  ;;  %v12062_v24 = vpop.f32.mrf.mxu1 }
 0x3a6   :  { %v17296_v47 = vpop.f32.mrf.mxu0  ;;  %12272 = vrcp.f32 %v10220_v21  ;;  %v10218_v35 = vadd.f32 1.0, %v12259_v16  ;;  %v17303_v63 = vadd.f32 %v17244_v31, %v9902_v30  ;;  %v9003_v27 = vadd.f32 %v12062_v24, %v18763_v55  ;;  %v18764_v24 = vld [vmem:[#allocation13_spill] sm:$0xff] }
 0x3a7   :  { %v12261_v13 = vpop.eup %12260  ;;  %12274 = vpow2.f32 %v11233_v0  ;;  %v11231_v22 = vmul.f32 -1.442695, %v17299_v49  ;;  %v9900_v56 = vadd.f32 %v9671_v23, %v8998_v43  ;;  %v8782_v46 = vpop.f32.mrf.mxu1 }
 0x3a8   :  { %v17306_v53 = vpop.f32.mrf.mxu0  ;;  %12276 = vrcp.f32 %v10218_v35  ;;  %v10221_v14 = vadd.f32 1.0, %v12261_v13  ;;  %v11234_v58 = vmul.f32 -1.442695, %v17303_v63  ;;  %v9905_v29 = vadd.f32 %v12128_v44, %v9003_v27 }
 0x3a9   :  { %v12263_v16 = vpop.eup %12262  ;;  %12278 = vpow2.f32 %v11231_v22  ;;  %v17313_v30 = vadd.f32 %v17244_v31, %v9900_v56  ;;  %v9001_v55 = vadd.f32 %v8782_v46, %v18764_v24  ;;  %v12063_v62 = vpop.f32.mrf.mxu1  ;;  %v18765_v24 = vld [vmem:[#allocation96_spill] sm:$0xff] }
 0x3aa   :  { %v17310_v21 = vpop.f32.mrf.mxu0  ;;  %12280 = vrcp.f32 %v10221_v14  ;;  %v10219_v0 = vadd.f32 1.0, %v12263_v16  ;;  %v17317_v43 = vadd.f32 %v17244_v31, %v9905_v29  ;;  %v9004_v23 = vadd.f32 %v12063_v62, %v16991_v38 }
 0x3ab   :  { %12282 = vpow2.f32 %v11234_v58  ;;  %v11232_v44 = vmul.f32 -1.442695, %v17313_v30  ;;  %v9903_v27 = vadd.f32 %v9684_v4, %v9001_v55  ;;  %v8785_v13 = vpop.f32.mrf.mxu1 }
 0x3ac   :  { %v17320_v35 = vpop.f32.mrf.mxu0  ;;  %v12265_v22 = vpop.eup %12264  ;;  %12284 = vrcp.f32 %v10219_v0  ;;  %v11237_v56 = vmul.f32 -1.442695, %v17317_v43  ;;  %v9906_v46 = vadd.f32 %v12129_v37, %v9004_v23  ;;  %v9002_v14 = vadd.f32 %v8785_v13, %v18765_v24  ;;  %v18766_v13 = vld [vmem:[#allocation98_spill] sm:$0xff] }
 0x3ad   :  { %v12267_v29 = vpop.eup %12266  ;;  %v10224_v26 = vadd.f32 1.0, %v12265_v22  ;;  %12286 = vpow2.f32 %v11232_v44  ;;  %v17328_v38 = vadd.f32 %v17244_v31, %v9903_v27  ;;  %v12066_v62 = vpop.f32.mrf.mxu1 }
 0x3ae   :  { %v17325_v16 = vpop.f32.mrf.mxu0  ;;  %v10222_v58 = vadd.f32 1.0, %v12267_v29  ;;  %12288 = vpow2.f32 %v11237_v56  ;;  %v17331_v4 = vadd.f32 %v17244_v31, %v9906_v46  ;;  %v9904_v55 = vadd.f32 %v17285_v18, %v9002_v14  ;;  %v18767_v14 = vld [vmem:[#allocation100_spill] sm:$0xff] }
 0x3af   :  { %v12269_v37 = vpop.eup %12268  ;;  %12290 = vrcp.f32 %v10224_v26  ;;  %v11235_v23 = vmul.f32 -1.442695, %v17328_v38  ;;  %v9007_v22 = vadd.f32 %v12066_v62, %v18766_v13  ;;  %v8798_v44 = vpop.f32.mrf.mxu1 }
 0x3b0   :  { %v17334_v0 = vpop.f32.mrf.mxu0  ;;  %12292 = vrcp.f32 %v10222_v58  ;;  %v10225_v27 = vadd.f32 1.0, %v12269_v37  ;;  %v11238_v24 = vmul.f32 -1.442695, %v17331_v4  ;;  %v17340_v56 = vadd.f32 %v17244_v31, %v9904_v55  ;;  %v18768_v58 = vld [vmem:[#allocation52_spill] sm:$0xff] }
 0x3b1   :  { %v12271_v29 = vpop.eup %12270  ;;  %12294 = vpow2.f32 %v11235_v23  ;;  %v9909_v18 = vadd.f32 %v17293_v36, %v9007_v22  ;;  %v9005_v26 = vadd.f32 %v8798_v44, %v18767_v14  ;;  %v12067_v9 = vpop.f32.mrf.mxu1 }
 0x3b2   :  { %v17342_v46 = vpop.f32.mrf.mxu0  ;;  %12296 = vrcp.f32 %v10225_v27  ;;  %v10223_v8 = vadd.f32 1.0, %v12271_v29  ;;  %v11236_v62 = vmul.f32 -1.442695, %v17340_v56  ;;  %v9008_v37 = vadd.f32 %v12067_v9, %v18768_v58  ;;  %v18769_v27 = vld [vmem:[#allocation55_spill] sm:$0xff] }
 0x3b3   :  { %v12273_v5 = vpop.eup %12272  ;;  %12298 = vpow2.f32 %v11238_v24  ;;  %v17351_v55 = vadd.f32 %v17244_v31, %v9909_v18  ;;  %v9907_v23 = vadd.f32 %v17296_v47, %v9005_v26  ;;  %v8801_v19 = vpop.f32.mrf.mxu1 }
 0x3b4   :  { %v17348_v13 = vpop.f32.mrf.mxu0  ;;  %v12275_v36 = vpop.eup %12274  ;;  %v10412_v22 = vmul.f32 %v12273_v5, %v17248_v45  ;;  %12300 = vrcp.f32 %v10223_v8  ;;  %v9910_v44 = vadd.f32 %v17306_v53, %v9008_v37  ;;  %v9006_v29 = vadd.f32 %v8801_v19, %v18769_v27 }
 0x3b5   :  { %v12277_v9 = vpop.eup %12276  ;;  %v10228_v58 = vadd.f32 1.0, %v12275_v36  ;;  %12302 = vpow2.f32 %v11236_v62  ;;  %v11241_v24 = vmul.f32 -1.442695, %v17351_v55  ;;  %v17361_v18 = vadd.f32 %v17244_v31, %v9907_v23  ;;  %v12070_v47 = vpop.f32.mrf.mxu1 }
 0x3b6   :  { %v17357_v14 = vpop.f32.mrf.mxu0  ;;  %v12279_v26 = vpop.eup %12278  ;;  %10476 = vst.msk [vmem:[%s17990_s3 + $0x10] sm:$0xff] %vm2154_vm12, %v10412_v22  ;;  %v10410_v5 = vmul.f32 %v12277_v9, %v17253_v57  ;;  %v17369_v19 = vadd.f32 %v17244_v31, %v9910_v44  ;;  %v9908_v8 = vadd.f32 %v17310_v21, %v9006_v29  ;;  %v9011_v45 = vadd.f32 %v12070_v47, %v17046_v41 }
 0x3b7   :  { %v12281_v62 = vpop.eup %12280  ;;  %12304 = vrcp.f32 %v10228_v58  ;;  %v10226_v37 = vadd.f32 1.0, %v12279_v26  ;;  %v11239_v23 = vmul.f32 -1.442695, %v17361_v18  ;;  %v8814_v36 = vpop.f32.mrf.mxu1 }
 0x3b8   :  { %v17373_v53 = vpop.f32.mrf.mxu0  ;;  %v12283_v27 = vpop.eup %12282  ;;  %10474 = vst.msk [vmem:[%s17990_s3] sm:$0xff] %vm2154_vm12, %v10410_v5  ;;  %v10413_v57 = vmul.f32 %v12281_v62, %v17258_v6  ;;  %12306 = vpow2.f32 %v11241_v24  ;;  %v11242_v21 = vmul.f32 -1.442695, %v17369_v19  ;;  %v17383_v41 = vadd.f32 %v17244_v31, %v9908_v8 }
 0x3b9   :  { %v12285_v44 = vpop.eup %12284  ;;  %12308 = vrcp.f32 %v10226_v37  ;;  %v10229_v29 = vadd.f32 1.0, %v12283_v27  ;;  %v9913_v9 = vadd.f32 %v17320_v35, %v9011_v45  ;;  %v9009_v58 = vadd.f32 %v8814_v36, %v17054_v3  ;;  %v12071_v47 = vpop.f32.mrf.mxu1 }
 0x3ba   :  { %v17385_v22 = vpop.f32.mrf.mxu0  ;;  %v12287_v26 = vpop.eup %12286  ;;  %10477 = vst.msk [vmem:[%s17990_s3 + $0x18] sm:$0xff] %vm2154_vm12, %v10413_v57  ;;  %v10411_v6 = vmul.f32 %v12285_v44, %v17263_v1  ;;  %12310 = vpow2.f32 %v11239_v23  ;;  %v11240_v24 = vmul.f32 -1.442695, %v17383_v41  ;;  %v9012_v5 = vadd.f32 %v12071_v47, %v17061_v2  ;;  %v18770_v23 = vld [vmem:[#allocation57_spill] sm:$0xff] }
 0x3bb   :  { %v12289_v62 = vpop.eup %12288  ;;  %12312 = vrcp.f32 %v10229_v29  ;;  %v10227_v35 = vadd.f32 1.0, %v12287_v26  ;;  %v17399_v3 = vadd.f32 %v17244_v31, %v9913_v9  ;;  %v9911_v45 = vadd.f32 %v17325_v16, %v9009_v58  ;;  %v8817_v37 = vpop.f32.mrf.mxu1 }
 0x3bc   :  { %v17396_v8 = vpop.f32.mrf.mxu0  ;;  %v12291_v36 = vpop.eup %12290  ;;  %10475 = vst.msk [vmem:[%s17990_s3 + $0x8] sm:$0xff] %vm2154_vm12, %v10411_v6  ;;  %v10232_v1 = vadd.f32 1.0, %v12289_v62  ;;  %12314 = vpow2.f32 %v11242_v21  ;;  %v9914_v2 = vadd.f32 %v17334_v0, %v9012_v5  ;;  %v9010_v27 = vadd.f32 %v8817_v37, %v18770_v23 }
 0x3bd   :  { %v12293_v44 = vpop.eup %12292  ;;  %v10416_v29 = vmul.f32 %v12291_v36, %v17269_v15  ;;  %12316 = vrcp.f32 %v10227_v35  ;;  %v11245_v16 = vmul.f32 -1.442695, %v17399_v3  ;;  %v17413_v9 = vadd.f32 %v17244_v31, %v9911_v45  ;;  %v12074_v58 = vpop.f32.mrf.mxu1 }
 0x3be   :  { %v17408_v57 = vpop.f32.mrf.mxu0  ;;  %v12295_v47 = vpop.eup %12294  ;;  %v10414_v26 = vmul.f32 %v12293_v44, %v17272_v39  ;;  %12318 = vrcp.f32 %v10232_v1  ;;  %v17417_v0 = vadd.f32 %v17244_v31, %v9914_v2  ;;  %v9912_v21 = vadd.f32 %v17342_v46, %v9010_v27 }
 0x3bf   :  { %v12297_v5 = vpop.eup %12296  ;;  %10480 = vst.msk [vmem:[%s17990_s3 + $0x30] sm:$0xff] %vm2154_vm12, %v10416_v29  ;;  %v10230_v15 = vadd.f32 1.0, %v12295_v47  ;;  %12320 = vpow2.f32 %v11240_v24  ;;  %v11243_v62 = vmul.f32 -1.442695, %v17413_v9  ;;  %v9015_v39 = vadd.f32 %v12074_v58, %v17080_v54  ;;  %v8830_v35 = vpop.f32.mrf.mxu1 }
 0x3c0   :  { %v17420_v6 = vpop.f32.mrf.mxu0  ;;  %v12299_v45 = vpop.eup %12298  ;;  %10478 = vst.msk [vmem:[%s17990_s3 + $0x20] sm:$0xff] %vm2154_vm12, %v10414_v26  ;;  %v10417_v46 = vmul.f32 %v12297_v5, %v17278_v17  ;;  %12322 = vpow2.f32 %v11245_v16  ;;  %v11246_v37 = vmul.f32 -1.442695, %v17417_v0  ;;  %v17435_v36 = vadd.f32 %v17244_v31, %v9912_v21 }
 0x3c1   :  { %v12301_v1 = vpop.eup %12300  ;;  %12324 = vrcp.f32 %v10230_v15  ;;  %v10233_v54 = vadd.f32 1.0, %v12299_v45  ;;  %v9917_v2 = vadd.f32 %v17348_v13, %v9015_v39  ;;  %v9013_v23 = vadd.f32 %v8830_v35, %v17089_v60  ;;  %v12075_v27 = vpop.f32.mrf.mxu1 }
 0x3c2   :  { %v17437_v24 = vpop.f32.mrf.mxu0  ;;  %v12303_v44 = vpop.eup %12302  ;;  %10481 = vst.msk [vmem:[%s17990_s3 + $0x38] sm:$0xff] %vm2154_vm12, %v10417_v46  ;;  %v10415_v17 = vmul.f32 %v12301_v1, %v17283_v33  ;;  %12326 = vpow2.f32 %v11243_v62  ;;  %v11244_v29 = vmul.f32 -1.442695, %v17435_v36  ;;  %v9016_v16 = vadd.f32 %v12075_v27, %v17096_v25  ;;  %v18771_v25 = vld [vmem:[#allocation59_spill] sm:$0xff]  ;;  %v18772_v27 = vld [vmem:[#allocation14_spill] sm:$0xff] }
 0x3c3   :  { %12328 = vrcp.f32 %v10233_v54  ;;  %v10231_v13 = vadd.f32 1.0, %v12303_v44  ;;  %v17451_v60 = vadd.f32 %v17244_v31, %v9917_v2  ;;  %v9915_v47 = vadd.f32 %v17357_v14, %v9013_v23  ;;  %v8833_v26 = vpop.f32.mrf.mxu1 }
 0x3c4   :  { %v17448_v58 = vpop.f32.mrf.mxu0  ;;  %v12305_v21 = vpop.eup %12304  ;;  %10479 = vst.msk [vmem:[%s17990_s3 + $0x28] sm:$0xff] %vm2154_vm12, %v10415_v17  ;;  %12330 = vpow2.f32 %v11246_v37  ;;  %v9918_v33 = vadd.f32 %v17373_v53, %v9016_v16  ;;  %v9014_v5 = vadd.f32 %v8833_v26, %v18771_v25 }
 0x3c5   :  { %v12307_v62 = vpop.eup %12306  ;;  %v10420_v39 = vmul.f32 %v12305_v21, %v17290_v28  ;;  %12332 = vrcp.f32 %v10231_v13  ;;  %v11249_v14 = vmul.f32 -1.442695, %v17451_v60  ;;  %v17465_v35 = vadd.f32 %v17244_v31, %v9915_v47  ;;  %v12078_v45 = vpop.f32.mrf.mxu1 }
 0x3c6   :  { %v17460_v15 = vpop.f32.mrf.mxu0  ;;  %v12309_v46 = vpop.eup %12308  ;;  %v10236_v1 = vadd.f32 1.0, %v12307_v62  ;;  %12334 = vpow2.f32 %v11244_v29  ;;  %v17468_v37 = vadd.f32 %v17244_v31, %v9918_v33  ;;  %v9916_v53 = vadd.f32 %v17385_v22, %v9014_v5 }
 0x3c7   :  { %v12311_v2 = vpop.eup %12310  ;;  %10484 = vst.msk [vmem:[%s17990_s3 + $0x50] sm:$0xff] %vm2154_vm12, %v10420_v39  ;;  %v10418_v28 = vmul.f32 %v12309_v46, %v17299_v49  ;;  %12336 = vpow2.f32 %v11249_v14  ;;  %v11247_v23 = vmul.f32 -1.442695, %v17465_v35  ;;  %v9019_v44 = vadd.f32 %v12078_v45, %v18772_v27  ;;  %v8846_v17 = vpop.f32.mrf.mxu1 }
 0x3c8   :  { %v17471_v54 = vpop.f32.mrf.mxu0  ;;  %v12313_v29 = vpop.eup %12312  ;;  %12338 = vrcp.f32 %v10236_v1  ;;  %v10234_v16 = vadd.f32 1.0, %v12311_v2  ;;  %v11250_v22 = vmul.f32 -1.442695, %v17468_v37  ;;  %v17482_v13 = vadd.f32 %v17244_v31, %v9916_v53 }
 0x3c9   :  { %v12315_v26 = vpop.eup %12314  ;;  %10482 = vst.msk [vmem:[%s17990_s3 + $0x40] sm:$0xff] %vm2154_vm12, %v10418_v28  ;;  %v10421_v49 = vmul.f32 %v12313_v29, %v17303_v63  ;;  %12340 = vpow2.f32 %v11247_v23  ;;  %v9921_v21 = vadd.f32 %v17396_v8, %v9019_v44  ;;  %v9017_v33 = vadd.f32 %v8846_v17, %v17123_v12  ;;  %v12079_v25 = vpop.f32.mrf.mxu1 }
 0x3ca   :  { %v17484_v47 = vpop.f32.mrf.mxu0  ;;  %v12317_v5 = vpop.eup %12316  ;;  %12342 = vrcp.f32 %v10234_v16  ;;  %v10237_v62 = vadd.f32 1.0, %v12315_v26  ;;  %v11248_v39 = vmul.f32 -1.442695, %v17482_v13  ;;  %v9020_v14 = vadd.f32 %v12079_v25, %v17128_v61 }
 0x3cb   :  { %v12319_v46 = vpop.eup %12318  ;;  %10485 = vst.msk [vmem:[%s17990_s3 + $0x58] sm:$0xff] %vm2154_vm12, %v10421_v49  ;;  %v10419_v63 = vmul.f32 %v12317_v5, %v17313_v30  ;;  %12344 = vpow2.f32 %v11250_v22  ;;  %v17503_v12 = vadd.f32 %v17244_v31, %v9921_v21  ;;  %v9919_v8 = vadd.f32 %v17408_v57, %v9017_v33  ;;  %v8849_v1 = vpop.f32.mrf.mxu1 }
 0x3cc   :  { %v17495_v45 = vpop.f32.mrf.mxu0  ;;  %v12321_v53 = vpop.eup %12320  ;;  %v10424_v61 = vmul.f32 %v12319_v46, %v17317_v43  ;;  %12346 = vrcp.f32 %v10237_v62  ;;  %v9922_v2 = vadd.f32 %v17420_v6, %v9020_v14  ;;  %v9018_v28 = vadd.f32 %v8849_v1, %v17135_v40 }
 0x3cd   :  { %v12323_v27 = vpop.eup %12322  ;;  %10483 = vst.msk [vmem:[%s17990_s3 + $0x48] sm:$0xff] %vm2154_vm12, %v10419_v63  ;;  %v10235_v30 = vadd.f32 1.0, %v12321_v53  ;;  %12348 = vpow2.f32 %v11248_v39  ;;  %v11253_v57 = vmul.f32 -1.442695, %v17503_v12  ;;  %v17517_v44 = vadd.f32 %v17244_v31, %v9919_v8  ;;  %v12082_v43 = vpop.f32.mrf.mxu1 }
 0x3ce   :  { %v17509_v23 = vpop.f32.mrf.mxu0  ;;  %v12325_v17 = vpop.eup %12324  ;;  %10488 = vst.msk [vmem:[%s17990_s3 + $0x70] sm:$0xff] %vm2154_vm12, %v10424_v61  ;;  %v10240_v40 = vadd.f32 1.0, %v12323_v27  ;;  %v17524_v6 = vadd.f32 %v17244_v31, %v9922_v2  ;;  %v9920_v29 = vadd.f32 %v17437_v24, %v9018_v28  ;;  %v9023_v16 = vadd.f32 %v12082_v43, %v17140_v51 }
 0x3cf   :  { %v12327_v26 = vpop.eup %12326  ;;  %v10422_v49 = vmul.f32 %v12325_v17, %v17328_v38  ;;  %12350 = vrcp.f32 %v10235_v30  ;;  %v11251_v21 = vmul.f32 -1.442695, %v17517_v44  ;;  %v8862_v33 = vpop.f32.mrf.mxu1 }
 0x3d0   :  { %v17528_v22 = vpop.f32.mrf.mxu0  ;;  %v12329_v25 = vpop.eup %12328  ;;  %12352 = vrcp.f32 %v10240_v40  ;;  %v10238_v5 = vadd.f32 1.0, %v12327_v26  ;;  %v11254_v62 = vmul.f32 -1.442695, %v17524_v6  ;;  %v17534_v39 = vadd.f32 %v17244_v31, %v9920_v29 }
 0x3d1   :  { %v12331_v51 = vpop.eup %12330  ;;  %10486 = vst.msk [vmem:[%s17990_s3 + $0x60] sm:$0xff] %vm2154_vm12, %v10422_v49  ;;  %v10425_v38 = vmul.f32 %v12329_v25, %v17331_v4  ;;  %12354 = vpow2.f32 %v11253_v57  ;;  %v9925_v14 = vadd.f32 %v17448_v58, %v9023_v16  ;;  %v9021_v46 = vadd.f32 %v8862_v33, %v17146_v20  ;;  %v12083_v63 = vpop.f32.mrf.mxu1 }
 0x3d2   :  { %v17536_v24 = vpop.f32.mrf.mxu0  ;;  %v12333_v8 = vpop.eup %12332  ;;  %12356 = vrcp.f32 %v10238_v5  ;;  %v10241_v1 = vadd.f32 1.0, %v12331_v51  ;;  %v11252_v53 = vmul.f32 -1.442695, %v17534_v39  ;;  %v9024_v61 = vadd.f32 %v12083_v63, %v17150_v11 }
 0x3d3   :  { %v12335_v28 = vpop.eup %12334  ;;  %10489 = vst.msk [vmem:[%s17990_s3 + $0x78] sm:$0xff] %vm2154_vm12, %v10425_v38  ;;  %v10423_v4 = vmul.f32 %v12333_v8, %v17340_v56  ;;  %12358 = vpow2.f32 %v11251_v21  ;;  %v17555_v20 = vadd.f32 %v17244_v31, %v9925_v14  ;;  %v9923_v58 = vadd.f32 %v17460_v15, %v9021_v46  ;;  %v8865_v27 = vpop.f32.mrf.mxu1 }
 0x3d4   :  { %v12337_v30 = vpop.eup %12336  ;;  %12360 = vrcp.f32 %v10241_v1  ;;  %v10239_v11 = vadd.f32 1.0, %v12335_v28  ;;  %v9926_v57 = vadd.f32 %v17471_v54, %v9024_v61  ;;  %v9022_v43 = vadd.f32 %v8865_v27, %v17154_v32 }
 0x3d5   :  { %v17547_v2 = vpop.f32.mrf.mxu0  ;;  %v12339_v40 = vpop.eup %12338  ;;  %10487 = vst.msk [vmem:[%s17990_s3 + $0x68] sm:$0xff] %vm2154_vm12, %v10423_v4  ;;  %v10244_v56 = vadd.f32 1.0, %v12337_v30  ;;  %12362 = vpow2.f32 %v11254_v62  ;;  %v11257_v15 = vmul.f32 -1.442695, %v17555_v20  ;;  %v17568_v29 = vadd.f32 %v17244_v31, %v9923_v58 }
 0x3d6   :  { %v12086_v16 = vpop.f32.mrf.mxu1  ;;  %v12341_v26 = vpop.eup %12340  ;;  %v10428_v54 = vmul.f32 %v12339_v40, %v17351_v55  ;;  %12364 = vrcp.f32 %v10239_v11  ;;  %v17572_v32 = vadd.f32 %v17244_v31, %v9926_v57  ;;  %v9924_v49 = vadd.f32 %v17484_v47, %v9022_v43 }
 0x3d7   :  { %v17560_v17 = vpop.f32.mrf.mxu0  ;;  %v12343_v33 = vpop.eup %12342  ;;  %12366 = vrcp.f32 %v10244_v56  ;;  %v10242_v25 = vadd.f32 1.0, %v12341_v26  ;;  %v11255_v5 = vmul.f32 -1.442695, %v17568_v29  ;;  %v9027_v62 = vadd.f32 %v12086_v16, %v17157_v7 }
 0x3d8   :  { %v8878_v51 = vpop.f32.mrf.mxu1  ;;  %v12345_v38 = vpop.eup %12344  ;;  %10492 = vst.msk [vmem:[%s17990_s3 + $0x90] sm:$0xff] %vm2154_vm12, %v10428_v54  ;;  %v10426_v55 = vmul.f32 %v12343_v33, %v17361_v18  ;;  %12368 = vpow2.f32 %v11252_v53  ;;  %v11258_v47 = vmul.f32 -1.442695, %v17572_v32  ;;  %v17586_v14 = vadd.f32 %v17244_v31, %v9924_v49 }
 0x3d9   :  { %v17575_v21 = vpop.f32.mrf.mxu0  ;;  %v12347_v63 = vpop.eup %12346  ;;  %12370 = vrcp.f32 %v10242_v25  ;;  %v10245_v7 = vadd.f32 1.0, %v12345_v38  ;;  %v9929_v8 = vadd.f32 %v17495_v45, %v9027_v62  ;;  %v9025_v1 = vadd.f32 %v8878_v51, %v17160_v59 }
 0x3da   :  { %v12087_v61 = vpop.f32.mrf.mxu1  ;;  %v12349_v28 = vpop.eup %12348  ;;  %10490 = vst.msk [vmem:[%s17990_s3 + $0x80] sm:$0xff] %vm2154_vm12, %v10426_v55  ;;  %v10429_v18 = vmul.f32 %v12347_v63, %v17369_v19  ;;  %12372 = vpow2.f32 %v11257_v15  ;;  %v11256_v53 = vmul.f32 -1.442695, %v17586_v14 }
 0x3db   :  { %v17588_v46 = vpop.f32.mrf.mxu0  ;;  %v9028_v4 = vadd.f32 %v12087_v61, %v17163_v34  ;;  %12374 = vrcp.f32 %v10245_v7  ;;  %v10243_v45 = vadd.f32 1.0, %v12349_v28  ;;  %v17602_v59 = vadd.f32 %v17244_v31, %v9929_v8 }
 0x3dc   :  { %v9927_v27 = vadd.f32 %v17509_v23, %v9025_v1  ;;  %v8881_v30 = vpop.f32.mrf.mxu1  ;;  %v12351_v11 = vpop.eup %12350  ;;  %10493 = vst.msk [vmem:[%s17990_s3 + $0x98] sm:$0xff] %vm2154_vm12, %v10429_v18  ;;  %12376 = vpow2.f32 %v11255_v5 }
 0x3dd   :  { %v17599_v58 = vpop.f32.mrf.mxu0  ;;  %v9930_v19 = vadd.f32 %v17528_v22, %v9028_v4  ;;  %v9026_v34 = vadd.f32 %v8881_v30, %v17166_v42  ;;  %v12353_v43 = vpop.eup %12352  ;;  %v10427_v40 = vmul.f32 %v12351_v11, %v17383_v41  ;;  %12378 = vrcp.f32 %v10243_v45 }
 0x3de   :  { %v11261_v23 = vmul.f32 -1.442695, %v17602_v59  ;;  %v17616_v56 = vadd.f32 %v17244_v31, %v9927_v27  ;;  %v12090_v15 = vpop.f32.mrf.mxu1  ;;  %v12355_v16 = vpop.eup %12354  ;;  %v10432_v26 = vmul.f32 %v12353_v43, %v17399_v3  ;;  %12380 = vpow2.f32 %v11258_v47 }
 0x3df   :  { %v17611_v57 = vpop.f32.mrf.mxu0  ;;  %v17620_v22 = vadd.f32 %v17244_v31, %v9930_v19  ;;  %v9928_v42 = vadd.f32 %v17536_v24, %v9026_v34  ;;  %v12357_v49 = vpop.eup %12356  ;;  %10491 = vst.msk [vmem:[%s17990_s3 + $0x88] sm:$0xff] %vm2154_vm12, %v10427_v40  ;;  %v10248_v41 = vadd.f32 1.0, %v12355_v16  ;;  %12382 = vpow2.f32 %v11256_v53  ;;  %v18773_v16 = vld [vmem:[#allocation37_spill] sm:$0xff] }
 0x3e0   :  { %v11259_v33 = vmul.f32 -1.442695, %v17616_v56  ;;  %v9031_v3 = vadd.f32 %v12090_v15, %v17169_v50  ;;  %v8894_v25 = vpop.f32.mrf.mxu1  ;;  %v12359_v5 = vpop.eup %12358  ;;  %10496 = vst.msk [vmem:[%s17990_s3 + $0xb0] sm:$0xff] %vm2154_vm12, %v10432_v26  ;;  %v10430_v24 = vmul.f32 %v12357_v49, %v17413_v9  ;;  %12384 = vpow2.f32 %v11261_v23 }
 0x3e1   :  { %v17623_v54 = vpop.f32.mrf.mxu0  ;;  %v11262_v62 = vmul.f32 -1.442695, %v17620_v22  ;;  %v17638_v51 = vadd.f32 %v17244_v31, %v9928_v42  ;;  %v12361_v55 = vpop.eup %12360  ;;  %12386 = vrcp.f32 %v10248_v41  ;;  %v10246_v50 = vadd.f32 1.0, %v12359_v5  ;;  %v18774_v5 = vld [vmem:[#allocation15_spill] sm:$0xff] }
 0x3e2   :  { %v9933_v47 = vadd.f32 %v17547_v2, %v9031_v3  ;;  %v9029_v63 = vadd.f32 %v8894_v25, %v17172_v48  ;;  %v12091_v7 = vpop.f32.mrf.mxu1  ;;  %v12363_v8 = vpop.eup %12362  ;;  %10494 = vst.msk [vmem:[%s17990_s3 + $0xa0] sm:$0xff] %vm2154_vm12, %v10430_v24  ;;  %v10433_v9 = vmul.f32 %v12361_v55, %v17417_v0  ;;  %12388 = vpow2.f32 %v11259_v33 }
 0x3e3   :  { %v17640_v38 = vpop.f32.mrf.mxu0  ;;  %v11260_v1 = vmul.f32 -1.442695, %v17638_v51  ;;  %v9032_v61 = vadd.f32 %v12091_v7, %v17175_v10  ;;  %v12365_v18 = vpop.eup %12364  ;;  %12390 = vrcp.f32 %v10246_v50  ;;  %v10249_v2 = vadd.f32 1.0, %v12363_v8 }
 0x3e4   :  { %v17654_v48 = vadd.f32 %v17244_v31, %v9933_v47  ;;  %v9931_v53 = vadd.f32 %v17560_v17, %v9029_v63  ;;  %v8897_v4 = vpop.f32.mrf.mxu1  ;;  %v12367_v45 = vpop.eup %12366  ;;  %10497 = vst.msk [vmem:[%s17990_s3 + $0xb8] sm:$0xff] %vm2154_vm12, %v10433_v9  ;;  %v10431_v0 = vmul.f32 %v12365_v18, %v17435_v36  ;;  %12392 = vpow2.f32 %v11262_v62  ;;  %v18775_v63 = vld [vmem:[#allocation34_spill] sm:$0xff] }
 0x3e5   :  { %v17651_v28 = vpop.f32.mrf.mxu0  ;;  %v9934_v10 = vadd.f32 %v17575_v21, %v9032_v61  ;;  %v9030_v27 = vadd.f32 %v8897_v4, %v17178_v52  ;;  %v12369_v30 = vpop.eup %12368  ;;  %v10436_v11 = vmul.f32 %v12367_v45, %v17451_v60  ;;  %12394 = vrcp.f32 %v10249_v2  ;;  %v18776_v4 = vld [vmem:[#allocation24_spill] sm:$0xff] }
 0x3e6   :  { %v11265_v17 = vmul.f32 -1.442695, %v17654_v48  ;;  %v17667_v19 = vadd.f32 %v17244_v31, %v9931_v53  ;;  %v12094_v34 = vpop.f32.mrf.mxu1  ;;  %v12371_v43 = vpop.eup %12370  ;;  %10495 = vst.msk [vmem:[%s17990_s3 + $0xa8] sm:$0xff] %vm2154_vm12, %v10431_v0  ;;  %v10247_v36 = vadd.f32 1.0, %v12369_v30  ;;  %12396 = vpow2.f32 %v11260_v1 }
 0x3e7   :  { %v17674_v52 = vadd.f32 %v17244_v31, %v9934_v10  ;;  %v9932_v60 = vadd.f32 %v17588_v46, %v9030_v27  ;;  %v17677_v21 = vpop.f32.mrf.mxu0  ;;  %v12373_v40 = vpop.eup %12372  ;;  %10500 = vst.msk [vmem:[%s17990_s3 + $0xd0] sm:$0xff] %vm2154_vm12, %v10436_v11  ;;  %v10434_v23 = vmul.f32 %v12371_v43, %v17465_v35  ;;  %v9035_v26 = vadd.f32 %v12094_v34, %v18773_v16 }
 0x3e8   :  { %12398 = vpow2.f32 %v11265_v17  ;;  %v11263_v15 = vmul.f32 -1.442695, %v17667_v19  ;;  %v8910_v42 = vpop.f32.mrf.mxu1  ;;  %v12375_v49 = vpop.eup %12374  ;;  %v10252_v41 = vadd.f32 1.0, %v12373_v40  ;;  %v18777_v40 = vld [vmem:[#allocation60_spill] sm:$0xff] }
 0x3e9   :  { %12400 = vrcp.f32 %v10247_v36  ;;  %v11266_v46 = vmul.f32 -1.442695, %v17674_v52  ;;  %v17688_v33 = vadd.f32 %v17244_v31, %v9932_v60  ;;  %v12377_v3 = vpop.eup %12376  ;;  %10498 = vst.msk [vmem:[%s17990_s3 + $0xc0] sm:$0xff] %vm2154_vm12, %v10434_v23  ;;  %v10437_v35 = vmul.f32 %v12375_v49, %v17468_v37  ;;  %v12165_v8 = vpop.f32.mrf.mxu0 }
 0x3ea   :  { %12402 = vpow2.f32 %v11263_v15  ;;  %v9937_v25 = vadd.f32 %v17599_v58, %v9035_v26  ;;  %v9033_v24 = vadd.f32 %v8910_v42, %v18774_v5  ;;  %v12095_v62 = vpop.f32.mrf.mxu1  ;;  %v12379_v55 = vpop.eup %12378  ;;  %v10250_v50 = vadd.f32 1.0, %v12377_v3 }
 0x3eb   :  { %12404 = vrcp.f32 %v10252_v41  ;;  %v11264_v47 = vmul.f32 -1.442695, %v17688_v33  ;;  %v9036_v7 = vadd.f32 %v12095_v62, %v18775_v63  ;;  %v12381_v9 = vpop.eup %12380  ;;  %10501 = vst.msk [vmem:[%s17990_s3 + $0xd8] sm:$0xff] %vm2154_vm12, %v10437_v35  ;;  %v10435_v37 = vmul.f32 %v12379_v55, %v17482_v13  ;;  %v9831_v34 = vpop.f32.mrf.mxu0  ;;  %v18779_v62 = vld [vmem:[#allocation51_spill] sm:$0xff] }
 0x3ec   :  { %12406 = vpow2.f32 %v11266_v46  ;;  %v17705_v58 = vadd.f32 %v17244_v31, %v9937_v25  ;;  %v9935_v1 = vadd.f32 %v17611_v57, %v9033_v24  ;;  %v8913_v61 = vpop.f32.mrf.mxu1  ;;  %v12383_v18 = vpop.eup %12382  ;;  %v10253_v2 = vadd.f32 1.0, %v12381_v9  ;;  %v17718_v57 = vld [vmem:[%s17989_s2] ss:$0 sm:$0xff]  ;;  %v18778_v46 = vld [vmem:[#allocation47_spill] sm:$0xff] }
 0x3ed   :  { %12408 = vrcp.f32 %v10250_v50  ;;  %v9938_v53 = vadd.f32 %v17623_v54, %v9036_v7  ;;  %v9034_v45 = vadd.f32 %v8913_v61, %v18776_v4  ;;  %v12385_v0 = vpop.eup %12384  ;;  %10499 = vst.msk [vmem:[%s17990_s3 + $0xc8] sm:$0xff] %vm2154_vm12, %v10435_v37  ;;  %v10251_v13 = vadd.f32 1.0, %v12383_v18  ;;  %v18780_v61 = vld [vmem:[#allocation61_spill] sm:$0xff] }
 0x3ee   :  { %12410 = vpow2.f32 %v11264_v47  ;;  %v11269_v31 = vmul.f32 -1.442695, %v17705_v58  ;;  %v17721_v10 = vadd.f32 %v17718_v57, %v9935_v1  ;;  %v12098_v54 = vpop.f32.mrf.mxu1  ;;  %v12387_v27 = vpop.eup %12386  ;;  %v10256_v30 = vadd.f32 1.0, %v12385_v0 }
 0x3ef   :  { %12412 = vrcp.f32 %v10253_v2  ;;  %v17724_v11 = vadd.f32 %v17718_v57, %v9938_v53  ;;  %v9936_v17 = vadd.f32 %v17640_v38, %v9034_v45  ;;  %v12389_v43 = vpop.eup %12388  ;;  %v10440_v36 = vmul.f32 %v12387_v27, %v17503_v12 }
 0x3f0   :  { %12414 = vrcp.f32 %v10251_v13  ;;  %v11267_v60 = vmul.f32 -1.442695, %v17721_v10  ;;  %v9039_v23 = vadd.f32 %v12098_v54, %v18777_v40  ;;  %v8926_v15 = vpop.f32.mrf.mxu1  ;;  %v12391_v16 = vpop.eup %12390  ;;  %v10254_v26 = vadd.f32 1.0, %v12389_v43 }
 0x3f1   :  { %12416 = vrcp.f32 %v10256_v30  ;;  %v11270_v42 = vmul.f32 -1.442695, %v17724_v11  ;;  %v17732_v49 = vadd.f32 %v17718_v57, %v9936_v17  ;;  %v12393_v41 = vpop.eup %12392  ;;  %10504 = vst.msk [vmem:[%s17990_s3 + $0xf0] sm:$0xff] %vm2154_vm12, %v10440_v36  ;;  %v10438_v12 = vmul.f32 %v12391_v16, %v17517_v44  ;;  %v18781_v17 = vld [vmem:[#allocation44_spill] sm:$0xff] }
 0x3f2   :  { %12418 = vpow2.f32 %v11269_v31  ;;  %v9941_v38 = vadd.f32 %v17651_v28, %v9039_v23  ;;  %v9037_v3 = vadd.f32 %v8926_v15, %v18778_v46  ;;  %v12099_v35 = vpop.f32.mrf.mxu1  ;;  %v12395_v25 = vpop.eup %12394  ;;  %v10257_v5 = vadd.f32 1.0, %v12393_v41 }
 0x3f3   :  { %12420 = vrcp.f32 %v10254_v26  ;;  %v11268_v24 = vmul.f32 -1.442695, %v17732_v49  ;;  %v9040_v55 = vadd.f32 %v12099_v35, %v18779_v62  ;;  %v12397_v47 = vpop.eup %12396  ;;  %10502 = vst.msk [vmem:[%s17990_s3 + $0xe0] sm:$0xff] %vm2154_vm12, %v10438_v12  ;;  %v10441_v44 = vmul.f32 %v12395_v25, %v17524_v6  ;;  %v18782_v26 = vld [vmem:[#allocation17_spill] sm:$0xff] }
 0x3f4   :  { %v12168_v50 = vpop.f32.mrf.mxu0  ;;  %12422 = vpow2.f32 %v11267_v60  ;;  %v17749_v28 = vadd.f32 %v17718_v57, %v9941_v38  ;;  %v9939_v63 = vadd.f32 %v17677_v21, %v9037_v3  ;;  %v8929_v7 = vpop.f32.mrf.mxu1  ;;  %v10255_v37 = vadd.f32 1.0, %v12397_v47  ;;  %v18783_v3 = vld [vmem:[#allocation46_spill] sm:$0xff] }
 0x3f5   :  { %v12399_v9 = vpop.eup %12398  ;;  %12424 = vrcp.f32 %v10257_v5  ;;  %v9942_v1 = vadd.f32 %v12165_v8, %v9040_v55  ;;  %v9038_v18 = vadd.f32 %v8929_v7, %v18780_v61  ;;  %10505 = vst.msk [vmem:[%s17990_s3 + $0xf8] sm:$0xff] %vm2154_vm12, %v10441_v44  ;;  %v18784_v44 = vld [vmem:[#allocation62_spill] sm:$0xff] }
 0x3f6   :  { %v12401_v2 = vpop.eup %12400  ;;  %v10260_v6 = vadd.f32 1.0, %v12399_v9  ;;  %12426 = vpow2.f32 %v11270_v42  ;;  %v11273_v53 = vmul.f32 -1.442695, %v17749_v28  ;;  %v17759_v4 = vadd.f32 %v17718_v57, %v9939_v63  ;;  %v12102_v21 = vpop.f32.mrf.mxu1 }
 0x3f7   :  { %v9844_v45 = vpop.f32.mrf.mxu0  ;;  %v12403_v0 = vpop.eup %12402  ;;  %v10439_v8 = vmul.f32 %v12401_v2, %v17534_v39  ;;  %12428 = vrcp.f32 %v10255_v37  ;;  %v17763_v13 = vadd.f32 %v17718_v57, %v9942_v1  ;;  %v9940_v31 = vadd.f32 %v9831_v34, %v9038_v18 }
 0x3f8   :  { %v12405_v54 = vpop.eup %12404  ;;  %12430 = vrcp.f32 %v10260_v6  ;;  %v10258_v27 = vadd.f32 1.0, %v12403_v0  ;;  %v11271_v30 = vmul.f32 -1.442695, %v17759_v4  ;;  %v9043_v43 = vadd.f32 %v12102_v21, %v18781_v17  ;;  %v8942_v36 = vpop.f32.mrf.mxu1 }
 0x3f9   :  { %v12407_v60 = vpop.eup %12406  ;;  %10503 = vst.msk [vmem:[%s17990_s3 + $0xe8] sm:$0xff] %vm2154_vm12, %v10439_v8  ;;  %v10444_v39 = vmul.f32 %v12405_v54, %v17555_v20  ;;  %12432 = vpow2.f32 %v11268_v24  ;;  %v11274_v40 = vmul.f32 -1.442695, %v17763_v13  ;;  %v17774_v34 = vadd.f32 %v17718_v57, %v9940_v31  ;;  %v12169_v12 = vpop.f32.mrf.mxu0 }
 0x3fa   :  { %v12409_v23 = vpop.eup %12408  ;;  %12434 = vrcp.f32 %v10258_v27  ;;  %v10261_v15 = vadd.f32 1.0, %v12407_v60  ;;  %v9945_v16 = vadd.f32 %v12168_v50, %v9043_v43  ;;  %v9041_v42 = vadd.f32 %v8942_v36, %v18782_v26  ;;  %v12103_v41 = vpop.f32.mrf.mxu1 }
 0x3fb   :  { %v12411_v38 = vpop.eup %12410  ;;  %10508 = vst.msk [vmem:[%s17990_s3 + $0x110] sm:$0xff] %vm2154_vm12, %v10444_v39  ;;  %v10442_v20 = vmul.f32 %v12409_v23, %v17568_v29  ;;  %12436 = vpow2.f32 %v11273_v53  ;;  %v11272_v46 = vmul.f32 -1.442695, %v17774_v34  ;;  %v9044_v35 = vadd.f32 %v12103_v41, %v18783_v3  ;;  %v9847_v61 = vpop.f32.mrf.mxu0 }
 0x3fc   :  { %v12413_v25 = vpop.eup %12412  ;;  %12438 = vrcp.f32 %v10261_v15  ;;  %v10259_v5 = vadd.f32 1.0, %v12411_v38  ;;  %v17785_v24 = vadd.f32 %v17718_v57, %v9945_v16  ;;  %v9943_v62 = vadd.f32 %v9844_v45, %v9041_v42  ;;  %v8945_v55 = vpop.f32.mrf.mxu1  ;;  %v18785_v15 = vld [vmem:[#allocation64_spill] sm:$0xff] }
 0x3fd   :  { %v12415_v50 = vpop.eup %12414  ;;  %10506 = vst.msk [vmem:[%s17990_s3 + $0x100] sm:$0xff] %vm2154_vm12, %v10442_v20  ;;  %v10445_v29 = vmul.f32 %v12413_v25, %v17572_v32  ;;  %12440 = vpow2.f32 %v11271_v30  ;;  %v9946_v47 = vadd.f32 %v12169_v12, %v9044_v35  ;;  %v9042_v63 = vadd.f32 %v8945_v55, %v18784_v44  ;;  %v18786_v20 = vld [vmem:[#allocation18_spill] sm:$0xff] }
 0x3fe   :  { %v12417_v7 = vpop.eup %12416  ;;  %v10443_v9 = vmul.f32 %v12415_v50, %v17586_v14  ;;  %12442 = vrcp.f32 %v10259_v5  ;;  %v11277_v37 = vmul.f32 -1.442695, %v17785_v24  ;;  %v17796_v1 = vadd.f32 %v17718_v57, %v9943_v62 }
 0x3ff   :  { %v12419_v18 = vpop.eup %12418  ;;  %10509 = vst.msk [vmem:[%s17990_s3 + $0x118] sm:$0xff] %vm2154_vm12, %v10445_v29  ;;  %v10448_v32 = vmul.f32 %v12417_v7, %v17602_v59  ;;  %12444 = vpow2.f32 %v11274_v40  ;;  %v17804_v2 = vadd.f32 %v17718_v57, %v9946_v47  ;;  %v9944_v14 = vadd.f32 %v9847_v61, %v9042_v63 }
 0x400   :  { %v12421_v6 = vpop.eup %12420  ;;  %10507 = vst.msk [vmem:[%s17990_s3 + $0x108] sm:$0xff] %vm2154_vm12, %v10443_v9  ;;  %v10264_v53 = vadd.f32 1.0, %v12419_v18  ;;  %12446 = vpow2.f32 %v11272_v46  ;;  %v11275_v21 = vmul.f32 -1.442695, %v17796_v1 }
 0x401   :  { %v12423_v45 = vpop.eup %12422  ;;  %10512 = vst.msk [vmem:[%s17990_s3 + $0x130] sm:$0xff] %vm2154_vm12, %v10448_v32  ;;  %v10446_v59 = vmul.f32 %v12421_v6, %v17616_v56  ;;  %12448 = vpow2.f32 %v11277_v37  ;;  %v11278_v0 = vmul.f32 -1.442695, %v17804_v2  ;;  %v17818_v8 = vadd.f32 %v17718_v57, %v9944_v14  ;;  %v18788_v6 = vld [vmem:[#allocation22_spill] sm:$0xff] }
 0x402   :  { %v12425_v31 = vpop.eup %12424  ;;  %12450 = vrcp.f32 %v10264_v53  ;;  %v10262_v54 = vadd.f32 1.0, %v12423_v45 }
 0x403   :  { %v12427_v27 = vpop.eup %12426  ;;  %10510 = vst.msk [vmem:[%s17990_s3 + $0x120] sm:$0xff] %vm2154_vm12, %v10446_v59  ;;  %v10449_v30 = vmul.f32 %v12425_v31, %v17620_v22  ;;  %12452 = vpow2.f32 %v11275_v21  ;;  %v11276_v56 = vmul.f32 -1.442695, %v17818_v8 }
 0x404   :  { %v12172_v17 = vpop.f32.mrf.mxu0  ;;  %v12429_v43 = vpop.eup %12428  ;;  %12454 = vrcp.f32 %v10262_v54  ;;  %v10265_v36 = vadd.f32 1.0, %v12427_v27 }
 0x405   :  { %v12431_v60 = vpop.eup %12430  ;;  %10513 = vst.msk [vmem:[%s17990_s3 + $0x138] sm:$0xff] %vm2154_vm12, %v10449_v30  ;;  %v10447_v39 = vmul.f32 %v12429_v43, %v17638_v51  ;;  %12456 = vpow2.f32 %v11278_v0  ;;  %v12106_v40 = vpop.f32.mrf.mxu1 }
 0x406   :  { %v12433_v23 = vpop.eup %12432  ;;  %v10452_v22 = vmul.f32 %v12431_v60, %v17654_v48  ;;  %12458 = vrcp.f32 %v10265_v36  ;;  %v9047_v16 = vadd.f32 %v12106_v40, %v18785_v15  ;;  %v9860_v26 = vpop.f32.mrf.mxu0 }
 0x407   :  { %v12435_v42 = vpop.eup %12434  ;;  %10511 = vst.msk [vmem:[%s17990_s3 + $0x128] sm:$0xff] %vm2154_vm12, %v10447_v39  ;;  %v10263_v41 = vadd.f32 1.0, %v12433_v23  ;;  %12460 = vpow2.f32 %v11276_v56  ;;  %v8958_v12 = vpop.f32.mrf.mxu1 }
 0x408   :  { %v12437_v38 = vpop.eup %12436  ;;  %10516 = vst.msk [vmem:[%s17990_s3 + $0x150] sm:$0xff] %vm2154_vm12, %v10452_v22  ;;  %v10450_v51 = vmul.f32 %v12435_v42, %v17667_v19  ;;  %v9949_v48 = vadd.f32 %v12172_v17, %v9047_v16  ;;  %v9045_v46 = vadd.f32 %v8958_v12, %v18786_v20  ;;  %v18787_v19 = vld [vmem:[#allocation54_spill] sm:$0xff]  ;;  %v12173_v47 = vpop.f32.mrf.mxu0 }
 0x409   :  { %v12439_v3 = vpop.eup %12438  ;;  %12462 = vrcp.f32 %v10263_v41  ;;  %v10268_v35 = vadd.f32 1.0, %v12437_v38  ;;  %v12107_v25 = vpop.f32.mrf.mxu1  ;;  %v18789_v38 = vld [vmem:[#allocation32_spill] sm:$0xff] }
 0x40a   :  { %v12441_v5 = vpop.eup %12440  ;;  %10514 = vst.msk [vmem:[%s17990_s3 + $0x140] sm:$0xff] %vm2154_vm12, %v10450_v51  ;;  %v10453_v62 = vmul.f32 %v12439_v3, %v17674_v52  ;;  %v17849_v55 = vadd.f32 %v17718_v57, %v9949_v48  ;;  %v9947_v50 = vadd.f32 %v9860_v26, %v9045_v46  ;;  %v9048_v29 = vadd.f32 %v12107_v25, %v18787_v19  ;;  %v9863_v0 = vpop.f32.mrf.mxu0 }
 0x40b   :  { %v12443_v44 = vpop.eup %12442  ;;  %12464 = vrcp.f32 %v10268_v35  ;;  %v10266_v63 = vadd.f32 1.0, %v12441_v5  ;;  %v8961_v7 = vpop.f32.mrf.mxu1  ;;  %v18790_v35 = vld [vmem:[#allocation19_spill] sm:$0xff] }
 0x40c   :  { %v12445_v9 = vpop.eup %12444  ;;  %10517 = vst.msk [vmem:[%s17990_s3 + $0x158] sm:$0xff] %vm2154_vm12, %v10453_v62  ;;  %v10451_v37 = vmul.f32 %v12443_v44, %v17688_v33  ;;  %v11281_v52 = vmul.f32 -1.442695, %v17849_v55  ;;  %v17859_v61 = vadd.f32 %v17718_v57, %v9947_v50  ;;  %v9950_v18 = vadd.f32 %v12173_v47, %v9048_v29  ;;  %v18791_v47 = vld [vmem:[#allocation25_spill] sm:$0xff] }
 0x40d   :  { %v12447_v32 = vpop.eup %12446  ;;  %12466 = vrcp.f32 %v10266_v63  ;;  %v10269_v14 = vadd.f32 1.0, %v12445_v9  ;;  %v9046_v53 = vadd.f32 %v8961_v7, %v18788_v6 }
 0x40e   :  { %v12449_v21 = vpop.eup %12448  ;;  %10515 = vst.msk [vmem:[%s17990_s3 + $0x148] sm:$0xff] %vm2154_vm12, %v10451_v37  ;;  %v10267_v45 = vadd.f32 1.0, %v12447_v32  ;;  %12468 = vpow2.f32 %v11281_v52  ;;  %v11279_v33 = vmul.f32 -1.442695, %v17859_v61  ;;  %v17868_v59 = vadd.f32 %v17718_v57, %v9950_v18 }
 0x40f   :  { %v12451_v31 = vpop.eup %12450  ;;  %12470 = vrcp.f32 %v10269_v14  ;;  %v10272_v54 = vadd.f32 1.0, %v12449_v21  ;;  %v9948_v27 = vadd.f32 %v9863_v0, %v9046_v53  ;;  %v18792_v53 = vld [vmem:[#allocation27_spill] sm:$0xff] }
 0x410   :  { %v12453_v30 = vpop.eup %12452  ;;  %v10456_v56 = vmul.f32 %v12451_v31, %v17705_v58  ;;  %12472 = vrcp.f32 %v10267_v45  ;;  %v11282_v17 = vmul.f32 -1.442695, %v17868_v59 }
 0x411   :  { %v12455_v43 = vpop.eup %12454  ;;  %12474 = vrcp.f32 %v10272_v54  ;;  %v10270_v36 = vadd.f32 1.0, %v12453_v30  ;;  %v17873_v60 = vadd.f32 %v17718_v57, %v9948_v27 }
 0x412   :  { %v12457_v39 = vpop.eup %12456  ;;  %10520 = vst.msk [vmem:[%s17990_s3 + $0x170] sm:$0xff] %vm2154_vm12, %v10456_v56  ;;  %v10454_v40 = vmul.f32 %v12455_v43, %v17721_v10  ;;  %12476 = vpow2.f32 %v11279_v33 }
 0x413   :  { %v12459_v23 = vpop.eup %12458  ;;  %12478 = vrcp.f32 %v10270_v36  ;;  %v10273_v58 = vadd.f32 1.0, %v12457_v39  ;;  %v11280_v22 = vmul.f32 -1.442695, %v17873_v60 }
 0x414   :  { %v12461_v15 = vpop.eup %12460  ;;  %10518 = vst.msk [vmem:[%s17990_s3 + $0x160] sm:$0xff] %vm2154_vm12, %v10454_v40  ;;  %v10457_v16 = vmul.f32 %v12459_v23, %v17724_v11  ;;  %12480 = vpow2.f32 %v11282_v17  ;;  %v12176_v26 = vpop.f32.mrf.mxu0 }
 0x415   :  { %12482 = vrcp.f32 %v10273_v58  ;;  %v10271_v42 = vadd.f32 1.0, %v12461_v15 }
 0x416   :  { %v12463_v41 = vpop.eup %12462  ;;  %10521 = vst.msk [vmem:[%s17990_s3 + $0x178] sm:$0xff] %vm2154_vm12, %v10457_v16  ;;  %12484 = vpow2.f32 %v11280_v22  ;;  %v12110_v10 = vpop.f32.mrf.mxu1 }
 0x417   :  { %v10455_v12 = vmul.f32 %v12463_v41, %v17732_v49  ;;  %12486 = vrcp.f32 %v10271_v42  ;;  %v9051_v51 = vadd.f32 %v12110_v10, %v18789_v38  ;;  %v9876_v48 = vpop.f32.mrf.mxu0 }
 0x418   :  { %v12465_v20 = vpop.eup %12464  ;;  %v8974_v11 = vpop.f32.mrf.mxu1 }
 0x419   :  { %10519 = vst.msk [vmem:[%s17990_s3 + $0x168] sm:$0xff] %vm2154_vm12, %v10455_v12  ;;  %v10460_v46 = vmul.f32 %v12465_v20, %v17749_v28  ;;  %v9953_v3 = vadd.f32 %v12176_v26, %v9051_v51  ;;  %v9049_v25 = vadd.f32 %v8974_v11, %v18790_v35  ;;  %v12177_v28 = vpop.f32.mrf.mxu0 }
 0x41a   :  { %v12467_v5 = vpop.eup %12466  ;;  %v12111_v62 = vpop.f32.mrf.mxu1 }
 0x41b   :  { %v12469_v50 = vpop.eup %12468  ;;  %10524 = vst.msk [vmem:[%s17990_s3 + $0x190] sm:$0xff] %vm2154_vm12, %v10460_v46  ;;  %v10458_v49 = vmul.f32 %v12467_v5, %v17759_v4  ;;  %v17904_v19 = vadd.f32 %v17718_v57, %v9953_v3  ;;  %v9951_v29 = vadd.f32 %v9876_v48, %v9049_v25  ;;  %v9052_v44 = vadd.f32 %v12111_v62, %v18791_v47  ;;  %v9879_v31 = vpop.f32.mrf.mxu0 }
 0x41c   :  { %v12471_v63 = vpop.eup %12470  ;;  %v10276_v7 = vadd.f32 1.0, %v12469_v50  ;;  %v8977_v9 = vpop.f32.mrf.mxu1 }
 0x41d   :  { %v12473_v37 = vpop.eup %12472  ;;  %10522 = vst.msk [vmem:[%s17990_s3 + $0x180] sm:$0xff] %vm2154_vm12, %v10458_v49  ;;  %v10461_v52 = vmul.f32 %v12471_v63, %v17763_v13  ;;  %v11285_v4 = vmul.f32 -1.442695, %v17904_v19  ;;  %v17914_v18 = vadd.f32 %v17718_v57, %v9951_v29  ;;  %v9954_v32 = vadd.f32 %v12177_v28, %v9052_v44 }
 0x41e   :  { %v12475_v14 = vpop.eup %12474  ;;  %v10459_v6 = vmul.f32 %v12473_v37, %v17774_v34  ;;  %12488 = vrcp.f32 %v10276_v7  ;;  %v9050_v21 = vadd.f32 %v8977_v9, %v18792_v53 }
 0x41f   :  { %v12477_v45 = vpop.eup %12476  ;;  %10525 = vst.msk [vmem:[%s17990_s3 + $0x198] sm:$0xff] %vm2154_vm12, %v10461_v52  ;;  %v10464_v13 = vmul.f32 %v12475_v14, %v17785_v24  ;;  %12490 = vpow2.f32 %v11285_v4  ;;  %v11283_v33 = vmul.f32 -1.442695, %v17914_v18  ;;  %v10025_v0 = vadd.f32 %v17718_v57, %v9954_v32 }
 0x420   :  { %v12479_v54 = vpop.eup %12478  ;;  %10523 = vst.msk [vmem:[%s17990_s3 + $0x188] sm:$0xff] %vm2154_vm12, %v10459_v6  ;;  %v10274_v34 = vadd.f32 1.0, %v12477_v45  ;;  %v9952_v27 = vadd.f32 %v9879_v31, %v9050_v21 }
 0x421   :  { %v12481_v30 = vpop.eup %12480  ;;  %10528 = vst.msk [vmem:[%s17990_s3 + $0x1b0] sm:$0xff] %vm2154_vm12, %v10464_v13  ;;  %v10462_v24 = vmul.f32 %v12479_v54, %v17796_v1  ;;  %12492 = vpow2.f32 %v11283_v33  ;;  %v11286_v56 = vmul.f32 -1.442695, %v10025_v0 }
 0x422   :  { %v12483_v17 = vpop.eup %12482  ;;  %12494 = vrcp.f32 %v10274_v34  ;;  %v10277_v43 = vadd.f32 1.0, %v12481_v30  ;;  %v10023_v36 = vadd.f32 %v17718_v57, %v9952_v27 }
 0x423   :  { %v12485_v39 = vpop.eup %12484  ;;  %10526 = vst.msk [vmem:[%s17990_s3 + $0x1a0] sm:$0xff] %vm2154_vm12, %v10462_v24  ;;  %v10465_v40 = vmul.f32 %v12483_v17, %v17804_v2  ;;  %12496 = vpow2.f32 %v11286_v56 }
 0x424   :  { %v12487_v23 = vpop.eup %12486  ;;  %12498 = vrcp.f32 %v10277_v43  ;;  %v10275_v58 = vadd.f32 1.0, %v12485_v39  ;;  %v11284_v1 = vmul.f32 -1.442695, %v10023_v36 }
 0x425   :  { %10529 = vst.msk [vmem:[%s17990_s3 + $0x1b8] sm:$0xff] %vm2154_vm12, %v10465_v40  ;;  %v10463_v57 = vmul.f32 %v12487_v23, %v17818_v8 }
 0x426   :  { %12500 = vrcp.f32 %v10275_v58 }
 0x427   :  { %10527 = vst.msk [vmem:[%s17990_s3 + $0x1a8] sm:$0xff] %vm2154_vm12, %v10463_v57  ;;  %12502 = vpow2.f32 %v11284_v1 }
 0x42b   :  { %v12489_v2 = vpop.eup %12488 }
 0x42c   :  { %v12491_v22 = vpop.eup %12490  ;;  %v10468_v15 = vmul.f32 %v12489_v2, %v17849_v55 }
 0x42d   :  { %v10280_v16 = vadd.f32 1.0, %v12491_v22 }
 0x42e   :  { %v12493_v26 = vpop.eup %12492  ;;  %10532 = vst.msk [vmem:[%s17990_s3 + $0x1d0] sm:$0xff] %vm2154_vm12, %v10468_v15 }
 0x42f   :  { %v12495_v42 = vpop.eup %12494  ;;  %12504 = vrcp.f32 %v10280_v16  ;;  %v10278_v8 = vadd.f32 1.0, %v12493_v26 }
 0x430   :  { %v12497_v41 = vpop.eup %12496  ;;  %v10466_v10 = vmul.f32 %v12495_v42, %v17859_v61 }
 0x431   :  { %v12499_v12 = vpop.eup %12498  ;;  %12506 = vrcp.f32 %v10278_v8  ;;  %v10281_v38 = vadd.f32 1.0, %v12497_v41 }
 0x432   :  { %10530 = vst.msk [vmem:[%s17990_s3 + $0x1c0] sm:$0xff] %vm2154_vm12, %v10466_v10  ;;  %v10469_v55 = vmul.f32 %v12499_v12, %v17868_v59 }
 0x433   :  { %v12501_v51 = vpop.eup %12500  ;;  %12508 = vrcp.f32 %v10281_v38 }
 0x434   :  { %v12503_v48 = vpop.eup %12502  ;;  %10533 = vst.msk [vmem:[%s17990_s3 + $0x1d8] sm:$0xff] %vm2154_vm12, %v10469_v55  ;;  %v10467_v61 = vmul.f32 %v12501_v51, %v17873_v60 }
 0x435   :  { %v10279_v20 = vadd.f32 1.0, %v12503_v48 }
 0x436   :  { %10531 = vst.msk [vmem:[%s17990_s3 + $0x1c8] sm:$0xff] %vm2154_vm12, %v10467_v61 }
 0x437   :  { %12510 = vrcp.f32 %v10279_v20 }
 0x43c   :  { %v12505_v11 = vpop.eup %12504 }
 0x43d   :  { %v10472_v59 = vmul.f32 %v12505_v11, %v17904_v19 }
 0x43e   :  { %v12507_v46 = vpop.eup %12506 }
 0x43f   :  { %10536 = vst.msk [vmem:[%s17990_s3 + $0x1f0] sm:$0xff] %vm2154_vm12, %v10472_v59  ;;  %v10470_v3 = vmul.f32 %v12507_v46, %v17914_v18 }
 0x440   :  { %v12509_v35 = vpop.eup %12508 }
 0x441   :  { %10534 = vst.msk [vmem:[%s17990_s3 + $0x1e0] sm:$0xff] %vm2154_vm12, %v10470_v3  ;;  %v10473_v60 = vmul.f32 %v12509_v35, %v10025_v0 }
 0x443   :  { %10537 = vst.msk [vmem:[%s17990_s3 + $0x1f8] sm:$0xff] %vm2154_vm12, %v10473_v60 }
 0x444   :  { %v12511_v25 = vpop.eup %12510 }
 0x445   :  { %v10471_v5 = vmul.f32 %v12511_v25, %v10023_v36 }
 0x447   :  { %10535 = vst.msk [vmem:[%s17990_s3 + $0x1e8] sm:$0xff] %vm2154_vm12, %v10471_v5 }

</bundles_post_ra>
